<compile_context>
chip_gen: v6e
topology: v6e:2x2x1
jax: 0.10.0
libtpu: 0.0.40
codegen_flags: <defaults>
</compile_context>

<pallas_src>
import functools

import jax
import jax.numpy as jnp
from jax.experimental import pallas as pl
from jax.experimental.pallas import tpu as pltpu

LANE = 128


def _round_up(x, m):
    return ((x + m - 1) // m) * m


# ----------------------------------------------------------------------------
# Pallas kernels
# ----------------------------------------------------------------------------
def _matmul_bias_relu_kernel(a_ref, b_ref, bias_ref, o_ref, *, relu):
    """One output tile: o = [relu](a @ b + bias); K is un-tiled (fits VMEM)."""
    out = jnp.dot(a_ref[...], b_ref[...], preferred_element_type=jnp.float32)
    out = out + bias_ref[...]
    if relu:
        out = jnp.maximum(out, 0.0)
    o_ref[...] = out.astype(o_ref.dtype)


def pallas_conv_matmul(a, b, bias, *, relu, out_dtype, tm=128, tn=128):
    """a: (M, K) unpadded.  b: (Kp, Np) and bias: (Np,) already padded to
    multiples of 128.  Returns the M-padded (Mp, Np) result (caller slices)."""
    M, K = a.shape
    Kp, Np = b.shape
    assert Kp % LANE == 0 and Np % LANE == 0 and K <= Kp
    Mp = _round_up(max(M, tm), tm)
    a_p = jnp.pad(a.astype(jnp.bfloat16), ((0, Mp - M), (0, Kp - K)))
    bias2d = bias.astype(jnp.float32).reshape(1, Np)

    cost = pl.CostEstimate(
        flops=2 * M * Np * K,
        transcendentals=0,
        bytes_accessed=Mp * Kp * 2 + Kp * Np * 2 + Np * 4
        + Mp * Np * jnp.dtype(out_dtype).itemsize,
    )
    return pl.pallas_call(
        functools.partial(_matmul_bias_relu_kernel, relu=relu),
        out_shape=jax.ShapeDtypeStruct((Mp, Np), out_dtype),
        grid=(Mp // tm, Np // tn),
        in_specs=[
            pl.BlockSpec((tm, Kp), lambda i, j: (i, 0)),
            pl.BlockSpec((Kp, tn), lambda i, j: (0, j)),
            pl.BlockSpec((1, tn), lambda i, j: (0, j)),
        ],
        out_specs=pl.BlockSpec((tm, tn), lambda i, j: (i, j)),
        compiler_params=pltpu.CompilerParams(
            dimension_semantics=("parallel", "parallel")),
        cost_estimate=cost,
    )(a_p, b.astype(jnp.bfloat16), bias2d)


def _classifier_kernel(x_ref, w1_ref, b1_ref, w2_ref, b2_ref, w3_ref, b3_ref,
                       o_ref):
    """Fused Linear->ReLU->Linear->ReLU->Linear, all weights resident in VMEM.
    Intermediates are cast to bf16 between layers (f32 accumulation per dot)."""
    h = jnp.dot(x_ref[...], w1_ref[...], preferred_element_type=jnp.float32)
    h = jnp.maximum(h + b1_ref[...], 0.0).astype(jnp.bfloat16)
    h = jnp.dot(h, w2_ref[...], preferred_element_type=jnp.float32)
    h = jnp.maximum(h + b2_ref[...], 0.0).astype(jnp.bfloat16)
    out = jnp.dot(h, w3_ref[...], preferred_element_type=jnp.float32)
    o_ref[...] = (out + b3_ref[...]).astype(o_ref.dtype)


def pallas_classifier(x, w1, b1, w2, b2, w3, b3):
    # TODO(synk): the ~6 MB of classifier weight DMA could be hidden behind the
    # conv/pool stages with a cross-call DMA future (P10 pattern); not done here.
    M, K1 = x.shape
    Kp = w1.shape[0]
    Mp = _round_up(max(M, 8), 8)
    x_p = jnp.pad(x.astype(jnp.bfloat16), ((0, Mp - M), (0, Kp - K1)))
    N1, N2, N3 = w1.shape[1], w2.shape[1], w3.shape[1]

    def full(shape):
        return pl.BlockSpec(shape, lambda i, _s=shape: (0,) * len(_s))

    cost = pl.CostEstimate(
        flops=2 * Mp * (Kp * N1 + N1 * N2 + N2 * N3),
        transcendentals=0,
        bytes_accessed=(x_p.size + w1.size + w2.size + w3.size) * 2
        + (b1.size + b2.size + b3.size) * 4 + Mp * N3 * 4,
    )
    out = pl.pallas_call(
        _classifier_kernel,
        out_shape=jax.ShapeDtypeStruct((Mp, N3), jnp.float32),
        grid=(1,),
        in_specs=[
            full((Mp, Kp)), full((Kp, N1)), full((1, N1)),
            full((N1, N2)), full((1, N2)),
            full((N2, N3)), full((1, N3)),
        ],
        out_specs=full((Mp, N3)),
        compiler_params=pltpu.CompilerParams(
            dimension_semantics=("arbitrary",),
            vmem_limit_bytes=32 * 1024 * 1024),
        cost_estimate=cost,
    )(x_p, w1.astype(jnp.bfloat16), b1.reshape(1, -1).astype(jnp.float32),
      w2.astype(jnp.bfloat16), b2.reshape(1, -1).astype(jnp.float32),
      w3.astype(jnp.bfloat16), b3.reshape(1, -1).astype(jnp.float32))
    return out[:M]


# ----------------------------------------------------------------------------
# JAX glue (XLA-fused under jit): im2col, pooling, parameter init / prep
# ----------------------------------------------------------------------------
def _im2col(x, kh, kw, stride, pad):
    """x: (N,H,W,C) NHWC -> ((N*OH*OW, kh*kw*C) windows, OH, OW).
    Row order inside a window is (kh, kw, C) major->minor."""
    if pad > 0:
        x = jnp.pad(x, ((0, 0), (pad, pad), (pad, pad), (0, 0)))
    n, h, w, c = x.shape
    oh = (h - kh) // stride + 1
    ow = (w - kw) // stride + 1
    cols = []
    for i in range(kh):
        for j in range(kw):
            cols.append(x[:, i:i + (oh - 1) * stride + 1:stride,
                            j:j + (ow - 1) * stride + 1:stride, :])
    win = jnp.stack(cols, axis=3)                       # (n, oh, ow, kh*kw, c)
    return win.reshape(n * oh * ow, kh * kw * c), oh, ow


def _max_pool_nhwc(x, k, s):
    n, h, w, c = x.shape
    oh = (h - k) // s + 1
    ow = (w - k) // s + 1
    out = None
    for i in range(k):
        for j in range(k):
            v = x[:, i:i + (oh - 1) * s + 1:s, j:j + (ow - 1) * s + 1:s, :]
            out = v if out is None else jnp.maximum(out, v)
    return out


def init_params(key, num_classes):
    """Torch-equivalent layouts: conv weights (KH,KW,IC,OC), fc = torch_w.T
    (fc1 rows in torch's NCHW-flatten order c*9 + h*3 + w)."""
    ks = jax.random.split(key, 10)

    def w(k, shape, fan_in):
        return jax.random.normal(k, shape, jnp.float32) / jnp.sqrt(float(fan_in))

    return {
        "w1": w(ks[0], (3, 3, 3, 64), 3 * 3 * 3),
        "b1": 0.01 * jax.random.normal(ks[1], (64,), jnp.float32),
        "w2": w(ks[2], (3, 3, 64, 192), 3 * 3 * 64),
        "b2": 0.01 * jax.random.normal(ks[3], (192,), jnp.float32),
        "fc1_w": w(ks[4], (1728, 1024), 1728),
        "fc1_b": 0.01 * jax.random.normal(ks[5], (1024,), jnp.float32),
        "fc2_w": w(ks[6], (1024, 1024), 1024),
        "fc2_b": 0.01 * jax.random.normal(ks[7], (1024,), jnp.float32),
        "fc3_w": w(ks[8], (1024, num_classes), 1024),
        "fc3_b": 0.01 * jax.random.normal(ks[9], (num_classes,), jnp.float32),
    }


def prepare_params(p):
    """One-time conversion to kernel-friendly layouts: bf16 weights, K/N dims
    zero-padded to multiples of 128, NHWC flatten order folded into fc1 rows."""
    c1 = _round_up(64, LANE)     # 128 conv1 out channels (padded)
    c2 = _round_up(192, LANE)    # 256 conv2 out channels (padded)
    nc = p["fc3_w"].shape[1]
    nc_p = _round_up(nc, LANE)

    # conv1 (3,3,3,64) -> (K=27 padded to 128, N=128)
    w1 = jnp.pad(p["w1"].reshape(27, 64),
                 ((0, LANE - 27), (0, c1 - 64))).astype(jnp.bfloat16)
    b1 = jnp.pad(p["b1"], (0, c1 - 64))

    # conv2 (3,3,64,192) with UNPADDED input channels -> (K=576 padded to 640, N=256)
    w2 = jnp.pad(p["w2"].reshape(576, 192),
                 ((0, 640 - 576), (0, c2 - 192))).astype(jnp.bfloat16)
    b2 = jnp.pad(p["b2"], (0, c2 - 192))

    # fc1: torch rows are NCHW-flatten order (c*9 + h*3 + w).  Re-order them to
    # the NHWC (3,3,192)-flatten order (h*576 + w*192 + c); pad K 1728 -> 1792.
    fw1 = p["fc1_w"].reshape(192, 3, 3, 1024)
    fw1 = jnp.transpose(fw1, (1, 2, 0, 3)).reshape(1728, 1024)
    fw1 = jnp.pad(fw1, ((0, 1792 - 1728), (0, 0))).astype(jnp.bfloat16)

    fw3 = jnp.pad(p["fc3_w"], ((0, 0), (0, nc_p - nc))).astype(jnp.bfloat16)
    fb3 = jnp.pad(p["fc3_b"], (0, nc_p - nc))

    return {
        "w1": w1, "b1": b1, "w2": w2, "b2": b2,
        "fc1_w": fw1, "fc1_b": p["fc1_b"],
        "fc2_w": p["fc2_w"].astype(jnp.bfloat16), "fc2_b": p["fc2_b"],
        "fc3_w": fw3, "fc3_b": fb3,
    }


@functools.partial(jax.jit, static_argnames=("num_classes",))
def alexnet_forward(x, kp, *, num_classes):
    # x: (N, 3, H, W) NCHW like PyTorch -> NHWC bf16 internally.
    x = jnp.transpose(x, (0, 2, 3, 1)).astype(jnp.bfloat16)
    n = x.shape[0]

    # features[0-1]: Conv2d(3,64,(3,3),(4,4),(2,2)) + ReLU  (im2col + matmul)
    a, oh, ow = _im2col(x, 3, 3, stride=4, pad=2)          # (n*81, 27)
    y = pallas_conv_matmul(a, kp["w1"], kp["b1"], relu=True,
                           out_dtype=jnp.bfloat16)
    y = y[:n * oh * ow].reshape(n, oh, ow, -1)             # (n, 9, 9, 128)

    # features[2]: MaxPool2d((3,3),(2,2))  (XLA-fused elementwise max)
    y = _max_pool_nhwc(y, 3, 2)                            # (n, 4, 4, 128)

    # features[3-4]: Conv2d(64,192,(3,3),(1,1),(2,2)) + ReLU
    # im2col from the UNPADDED 64 channels -> K = 576 (no structural zeros).
    a, oh, ow = _im2col(y[..., :64], 3, 3, stride=1, pad=2)  # (n*36, 576)
    y = pallas_conv_matmul(a, kp["w2"], kp["b2"], relu=True,
                           out_dtype=jnp.float32)
    y = y[:n * oh * ow].reshape(n, oh, ow, -1)[..., :192]  # (n, 6, 6, 192)

    # AdaptiveAvgPool2d((3,3)): 6x6 -> 3x3 is exactly a 2x2 avg pool, stride 2.
    # TODO(synk): adaptive-pool path specialized to 32x32 inputs (6x6 -> 3x3).
    assert oh == 6 and ow == 6, "adaptive pool path specialized for 32x32 input"
    y = (y[:, 0::2, 0::2] + y[:, 0::2, 1::2]
         + y[:, 1::2, 0::2] + y[:, 1::2, 1::2]) * 0.25     # (n, 3, 3, 192)

    # torch.flatten(x,1): the NHWC->NCHW reorder is folded into fc1_w rows.
    y = y.reshape(n, 3 * 3 * 192)                          # (n, 1728)

    # classifier: fused FC1+ReLU+FC2+ReLU+FC3.
    # TODO(synk): Dropout(0.5) layers treated as identity (eval semantics).
    out = pallas_classifier(y, kp["fc1_w"], kp["fc1_b"],
                            kp["fc2_w"], kp["fc2_b"],
                            kp["fc3_w"], kp["fc3_b"])
    return out[:, :num_classes]


if __name__ == "__main__":
    num_classes = 16  # small head; the module default is 1000
    key = jax.random.PRNGKey(0)
    pkey, xkey = jax.random.split(key)
    params = prepare_params(init_params(pkey, num_classes))
    # 32x32 input: conv1 -> 9x9, maxpool -> 4x4, conv2 -> 6x6, avgpool -> 3x3,
    # flatten -> 1728 features, exactly what the classifier expects.
    x = jax.random.normal(xkey, (2, 3, 32, 32), jnp.float32)
    out = jax.block_until_ready(
        alexnet_forward(x, params, num_classes=num_classes))
    assert out.shape == (2, num_classes)
    assert bool(jnp.all(jnp.isfinite(out.astype(jnp.float32))))
    print("KERNEL_OK")
</pallas_src>

<mosaic_0001>
module attributes {stable_mosaic.version = 11 : i64} {
  func.func @_matmul_bias_relu_kernel(%arg0: i32, %arg1: i32, %arg2: memref<128x128xbf16, #tpu.memory_space<vmem>>, %arg3: memref<128x128xbf16, #tpu.memory_space<vmem>>, %arg4: memref<1x128xf32, #tpu.memory_space<vmem>>, %arg5: memref<128x128xbf16, #tpu.memory_space<vmem>>) attributes {dimension_semantics = [#tpu.dimension_semantics<parallel>, #tpu.dimension_semantics<parallel>], iteration_bounds = array<i64: 2, 1>, scalar_prefetch = 0 : i64, scratch_operands = 0 : i64, tpu.core_type = #tpu.core_type<tc>, window_params = [{transform_indices = @transform_0, window_bounds = array<i64: 128, 128>}, {transform_indices = @transform_1, window_bounds = array<i64: 128, 128>}, {transform_indices = @transform_2, window_bounds = array<i64: 1, 128>}, {transform_indices = @transform_3, window_bounds = array<i64: 128, 128>}]} {
    %c0 = arith.constant 0 : index
    %c0_0 = arith.constant 0 : index
    %0 = vector.load %arg2[%c0, %c0_0] : memref<128x128xbf16, #tpu.memory_space<vmem>>, vector<128x128xbf16>
    %c0_1 = arith.constant 0 : index
    %c0_2 = arith.constant 0 : index
    %1 = vector.load %arg3[%c0_1, %c0_2] : memref<128x128xbf16, #tpu.memory_space<vmem>>, vector<128x128xbf16>
    %cst = arith.constant dense<0.000000e+00> : vector<128x128xf32>
    %2 = tpu.matmul %0, %1, %cst {dimension_numbers = #tpu.dot_dimension_numbers<[1], [0], [0], [1], [0, 0, 1, 1], [], []>} : vector<128x128xbf16>, vector<128x128xbf16>, vector<128x128xf32> -> vector<128x128xf32>
    %c0_3 = arith.constant 0 : index
    %c0_4 = arith.constant 0 : index
    %3 = vector.load %arg4[%c0_3, %c0_4] : memref<1x128xf32, #tpu.memory_space<vmem>>, vector<1x128xf32>
    %4 = vector.broadcast %3 : vector<1x128xf32> to vector<128x128xf32>
    %5 = arith.addf %2, %4 : vector<128x128xf32>
    %cst_5 = arith.constant 0.000000e+00 : f32
    %6 = vector.broadcast %cst_5 : f32 to vector<128x128xf32>
    %7 = arith.maximumf %5, %6 : vector<128x128xf32>
    %8 = arith.truncf %7 : vector<128x128xf32> to vector<128x128xbf16>
    %c0_6 = arith.constant 0 : index
    %c0_7 = arith.constant 0 : index
    %9 = vector.load %arg5[%c0_6, %c0_7] : memref<128x128xbf16, #tpu.memory_space<vmem>>, vector<128x128xbf16>
    tpu.vector_store %arg5[%c0_6, %c0_7], %8 {strides = array<i32>} : memref<128x128xbf16, #tpu.memory_space<vmem>>, vector<128x128xbf16>,
    return
  }
  func.func @transform_0(%arg0: i32, %arg1: i32) -> (i32, i32) {
    %c0_i32 = arith.constant 0 : i32
    %c0_i32_0 = arith.constant 0 : i32
    return %arg0, %c0_i32 : i32, i32
  }
  func.func @transform_1(%arg0: i32, %arg1: i32) -> (i32, i32) {
    %c0_i32 = arith.constant 0 : i32
    %c0_i32_0 = arith.constant 0 : i32
    return %c0_i32, %arg1 : i32, i32
  }
  func.func @transform_2(%arg0: i32, %arg1: i32) -> (i32, i32) {
    %c0_i32 = arith.constant 0 : i32
    %c0_i32_0 = arith.constant 0 : i32
    return %c0_i32, %arg1 : i32, i32
  }
  func.func @transform_3(%arg0: i32, %arg1: i32) -> (i32, i32) {
    %c0_i32 = arith.constant 0 : i32
    return %arg0, %arg1 : i32, i32
  }
}

module attributes {stable_mosaic.version = 11 : i64} {
  func.func @_matmul_bias_relu_kernel(%arg0: i32, %arg1: i32, %arg2: memref<128x640xbf16, #tpu.memory_space<vmem>>, %arg3: memref<640x128xbf16, #tpu.memory_space<vmem>>, %arg4: memref<1x128xf32, #tpu.memory_space<vmem>>, %arg5: memref<128x128xf32, #tpu.memory_space<vmem>>) attributes {dimension_semantics = [#tpu.dimension_semantics<parallel>, #tpu.dimension_semantics<parallel>], iteration_bounds = array<i64: 1, 2>, scalar_prefetch = 0 : i64, scratch_operands = 0 : i64, tpu.core_type = #tpu.core_type<tc>, window_params = [{transform_indices = @transform_0, window_bounds = array<i64: 128, 640>}, {transform_indices = @transform_1, window_bounds = array<i64: 640, 128>}, {transform_indices = @transform_2, window_bounds = array<i64: 1, 128>}, {transform_indices = @transform_3, window_bounds = array<i64: 128, 128>}]} {
    %c0 = arith.constant 0 : index
    %c0_0 = arith.constant 0 : index
    %0 = vector.load %arg2[%c0, %c0_0] : memref<128x640xbf16, #tpu.memory_space<vmem>>, vector<128x640xbf16>
    %c0_1 = arith.constant 0 : index
    %c0_2 = arith.constant 0 : index
    %1 = vector.load %arg3[%c0_1, %c0_2] : memref<640x128xbf16, #tpu.memory_space<vmem>>, vector<640x128xbf16>
    %cst = arith.constant dense<0.000000e+00> : vector<128x128xf32>
    %2 = tpu.matmul %0, %1, %cst {dimension_numbers = #tpu.dot_dimension_numbers<[1], [0], [0], [1], [0, 0, 1, 1], [], []>} : vector<128x640xbf16>, vector<640x128xbf16>, vector<128x128xf32> -> vector<128x128xf32>
    %c0_3 = arith.constant 0 : index
    %c0_4 = arith.constant 0 : index
    %3 = vector.load %arg4[%c0_3, %c0_4] : memref<1x128xf32, #tpu.memory_space<vmem>>, vector<1x128xf32>
    %4 = vector.broadcast %3 : vector<1x128xf32> to vector<128x128xf32>
    %5 = arith.addf %2, %4 : vector<128x128xf32>
    %cst_5 = arith.constant 0.000000e+00 : f32
    %6 = vector.broadcast %cst_5 : f32 to vector<128x128xf32>
    %7 = arith.maximumf %5, %6 : vector<128x128xf32>
    %c0_6 = arith.constant 0 : index
    %c0_7 = arith.constant 0 : index
    %8 = vector.load %arg5[%c0_6, %c0_7] : memref<128x128xf32, #tpu.memory_space<vmem>>, vector<128x128xf32>
    tpu.vector_store %arg5[%c0_6, %c0_7], %7 {strides = array<i32>} : memref<128x128xf32, #tpu.memory_space<vmem>>, vector<128x128xf32>,
    return
  }
  func.func @transform_0(%arg0: i32, %arg1: i32) -> (i32, i32) {
    %c0_i32 = arith.constant 0 : i32
    %c0_i32_0 = arith.constant 0 : i32
    return %arg0, %c0_i32 : i32, i32
  }
  func.func @transform_1(%arg0: i32, %arg1: i32) -> (i32, i32) {
    %c0_i32 = arith.constant 0 : i32
    %c0_i32_0 = arith.constant 0 : i32
    return %c0_i32, %arg1 : i32, i32
  }
  func.func @transform_2(%arg0: i32, %arg1: i32) -> (i32, i32) {
    %c0_i32 = arith.constant 0 : i32
    %c0_i32_0 = arith.constant 0 : i32
    return %c0_i32, %arg1 : i32, i32
  }
  func.func @transform_3(%arg0: i32, %arg1: i32) -> (i32, i32) {
    %c0_i32 = arith.constant 0 : i32
    return %arg0, %arg1 : i32, i32
  }
}

module attributes {stable_mosaic.version = 11 : i64} {
  func.func @_classifier_kernel(%arg0: i32, %arg1: memref<8x1792xbf16, #tpu.memory_space<vmem>>, %arg2: memref<1792x1024xbf16, #tpu.memory_space<vmem>>, %arg3: memref<1x1024xf32, #tpu.memory_space<vmem>>, %arg4: memref<1024x1024xbf16, #tpu.memory_space<vmem>>, %arg5: memref<1x1024xf32, #tpu.memory_space<vmem>>, %arg6: memref<1024x128xbf16, #tpu.memory_space<vmem>>, %arg7: memref<1x128xf32, #tpu.memory_space<vmem>>, %arg8: memref<8x128xf32, #tpu.memory_space<vmem>>) attributes {dimension_semantics = [#tpu.dimension_semantics<arbitrary>], iteration_bounds = array<i64: 1>, scalar_prefetch = 0 : i64, scratch_operands = 0 : i64, tpu.core_type = #tpu.core_type<tc>, window_params = [{pipeline_mode = #tpu.pipeline_mode<synchronous>, transform_indices = @transform_0, window_bounds = array<i64: 8, 1792>}, {pipeline_mode = #tpu.pipeline_mode<synchronous>, transform_indices = @transform_1, window_bounds = array<i64: 1792, 1024>}, {pipeline_mode = #tpu.pipeline_mode<synchronous>, transform_indices = @transform_2, window_bounds = array<i64: 1, 1024>}, {pipeline_mode = #tpu.pipeline_mode<synchronous>, transform_indices = @transform_3, window_bounds = array<i64: 1024, 1024>}, {pipeline_mode = #tpu.pipeline_mode<synchronous>, transform_indices = @transform_4, window_bounds = array<i64: 1, 1024>}, {pipeline_mode = #tpu.pipeline_mode<synchronous>, transform_indices = @transform_5, window_bounds = array<i64: 1024, 128>}, {pipeline_mode = #tpu.pipeline_mode<synchronous>, transform_indices = @transform_6, window_bounds = array<i64: 1, 128>}, {pipeline_mode = #tpu.pipeline_mode<synchronous>, transform_indices = @transform_7, window_bounds = array<i64: 8, 128>}]} {
    %c0 = arith.constant 0 : index
    %c0_0 = arith.constant 0 : index
    %0 = vector.load %arg1[%c0, %c0_0] : memref<8x1792xbf16, #tpu.memory_space<vmem>>, vector<8x1792xbf16>
    %c0_1 = arith.constant 0 : index
    %c0_2 = arith.constant 0 : index
    %1 = vector.load %arg2[%c0_1, %c0_2] : memref<1792x1024xbf16, #tpu.memory_space<vmem>>, vector<1792x1024xbf16>
    %cst = arith.constant dense<0.000000e+00> : vector<8x1024xf32>
    %2 = tpu.matmul %0, %1, %cst {dimension_numbers = #tpu.dot_dimension_numbers<[1], [0], [0], [1], [0, 0, 1, 1], [], []>} : vector<8x1792xbf16>, vector<1792x1024xbf16>, vector<8x1024xf32> -> vector<8x1024xf32>
    %c0_3 = arith.constant 0 : index
    %c0_4 = arith.constant 0 : index
    %3 = vector.load %arg3[%c0_3, %c0_4] : memref<1x1024xf32, #tpu.memory_space<vmem>>, vector<1x1024xf32>
    %4 = vector.broadcast %3 : vector<1x1024xf32> to vector<8x1024xf32>
    %5 = arith.addf %2, %4 : vector<8x1024xf32>
    %cst_5 = arith.constant 0.000000e+00 : f32
    %6 = vector.broadcast %cst_5 : f32 to vector<8x1024xf32>
    %7 = arith.maximumf %5, %6 : vector<8x1024xf32>
    %8 = arith.truncf %7 : vector<8x1024xf32> to vector<8x1024xbf16>
    %c0_6 = arith.constant 0 : index
    %c0_7 = arith.constant 0 : index
    %9 = vector.load %arg4[%c0_6, %c0_7] : memref<1024x1024xbf16, #tpu.memory_space<vmem>>, vector<1024x1024xbf16>
    %cst_8 = arith.constant dense<0.000000e+00> : vector<8x1024xf32>
    %10 = tpu.matmul %8, %9, %cst_8 {dimension_numbers = #tpu.dot_dimension_numbers<[1], [0], [0], [1], [0, 0, 1, 1], [], []>} : vector<8x1024xbf16>, vector<1024x1024xbf16>, vector<8x1024xf32> -> vector<8x1024xf32>
    %c0_9 = arith.constant 0 : index
    %c0_10 = arith.constant 0 : index
    %11 = vector.load %arg5[%c0_9, %c0_10] : memref<1x1024xf32, #tpu.memory_space<vmem>>, vector<1x1024xf32>
    %12 = vector.broadcast %11 : vector<1x1024xf32> to vector<8x1024xf32>
    %13 = arith.addf %10, %12 : vector<8x1024xf32>
    %cst_11 = arith.constant 0.000000e+00 : f32
    %14 = vector.broadcast %cst_11 : f32 to vector<8x1024xf32>
    %15 = arith.maximumf %13, %14 : vector<8x1024xf32>
    %16 = arith.truncf %15 : vector<8x1024xf32> to vector<8x1024xbf16>
    %c0_12 = arith.constant 0 : index
    %c0_13 = arith.constant 0 : index
    %17 = vector.load %arg6[%c0_12, %c0_13] : memref<1024x128xbf16, #tpu.memory_space<vmem>>, vector<1024x128xbf16>
    %cst_14 = arith.constant dense<0.000000e+00> : vector<8x128xf32>
    %18 = tpu.matmul %16, %17, %cst_14 {dimension_numbers = #tpu.dot_dimension_numbers<[1], [0], [0], [1], [0, 0, 1, 1], [], []>} : vector<8x1024xbf16>, vector<1024x128xbf16>, vector<8x128xf32> -> vector<8x128xf32>
    %c0_15 = arith.constant 0 : index
    %c0_16 = arith.constant 0 : index
    %19 = vector.load %arg7[%c0_15, %c0_16] : memref<1x128xf32, #tpu.memory_space<vmem>>, vector<1x128xf32>
    %20 = vector.broadcast %19 : vector<1x128xf32> to vector<8x128xf32>
    %21 = arith.addf %18, %20 : vector<8x128xf32>
    %c0_17 = arith.constant 0 : index
    %c0_18 = arith.constant 0 : index
    %22 = vector.load %arg8[%c0_17, %c0_18] : memref<8x128xf32, #tpu.memory_space<vmem>>, vector<8x128xf32>
    tpu.vector_store %arg8[%c0_17, %c0_18], %21 {strides = array<i32>} : memref<8x128xf32, #tpu.memory_space<vmem>>, vector<8x128xf32>,
    return
  }
  func.func @transform_0(%arg0: i32) -> (i32, i32) {
    %c0_i32 = arith.constant 0 : i32
    %c0_i32_0 = arith.constant 0 : i32
    %c0_i32_1 = arith.constant 0 : i32
    return %c0_i32, %c0_i32_0 : i32, i32
  }
  func.func @transform_1(%arg0: i32) -> (i32, i32) {
    %c0_i32 = arith.constant 0 : i32
    %c0_i32_0 = arith.constant 0 : i32
    %c0_i32_1 = arith.constant 0 : i32
    return %c0_i32, %c0_i32_0 : i32, i32
  }
  func.func @transform_2(%arg0: i32) -> (i32, i32) {
    %c0_i32 = arith.constant 0 : i32
    %c0_i32_0 = arith.constant 0 : i32
    %c0_i32_1 = arith.constant 0 : i32
    return %c0_i32, %c0_i32_0 : i32, i32
  }
  func.func @transform_3(%arg0: i32) -> (i32, i32) {
    %c0_i32 = arith.constant 0 : i32
    %c0_i32_0 = arith.constant 0 : i32
    %c0_i32_1 = arith.constant 0 : i32
    return %c0_i32, %c0_i32_0 : i32, i32
  }
  func.func @transform_4(%arg0: i32) -> (i32, i32) {
    %c0_i32 = arith.constant 0 : i32
    %c0_i32_0 = arith.constant 0 : i32
    %c0_i32_1 = arith.constant 0 : i32
    return %c0_i32, %c0_i32_0 : i32, i32
  }
  func.func @transform_5(%arg0: i32) -> (i32, i32) {
    %c0_i32 = arith.constant 0 : i32
    %c0_i32_0 = arith.constant 0 : i32
    %c0_i32_1 = arith.constant 0 : i32
    return %c0_i32, %c0_i32_0 : i32, i32
  }
  func.func @transform_6(%arg0: i32) -> (i32, i32) {
    %c0_i32 = arith.constant 0 : i32
    %c0_i32_0 = arith.constant 0 : i32
    %c0_i32_1 = arith.constant 0 : i32
    return %c0_i32, %c0_i32_0 : i32, i32
  }
  func.func @transform_7(%arg0: i32) -> (i32, i32) {
    %c0_i32 = arith.constant 0 : i32
    %c0_i32_0 = arith.constant 0 : i32
    %c0_i32_1 = arith.constant 0 : i32
    return %c0_i32, %c0_i32_0 : i32, i32
  }
}

</mosaic_0001>

<bundles_post_ra>
// kernel: alexnet_forward.3
= control target key start
LH: loop header
LB: loop body
LE: loop exit
PB: predicated region body
PF: predicated region fallthrough
CT: control target
= control target key end

     0   :  { %8 = vsyncpa [#allocation3], 0  ;;  %s1120_s0 = inlined_call_operand.vmem [shape: bf16[256,128], index: 0, kind: input, shape index: {}]   ;;  %s1121_s1 = inlined_call_operand.hbm [shape: bf16[128,128], index: 1, kind: input, shape index: {}]   ;;  %s1122_s2 = inlined_call_operand.hbm [shape: f32[1,128], index: 2, kind: input, shape index: {}]   ;;  %s1123_s3 = inlined_call_operand.vmem [shape: bf16[256,128], index: 3, kind: output, shape index: {}]  }
   0x1   :  { %9 = vsyncpa [#allocation5], 0  ;;  %s1012_s12 = smov 0   ;;  %s1014_s13 = smov 0  }
   0x2   :  { %s1016_s14 = smov 0  }
   0x3 LB: > { %s666_s15 = sadd.s32 4294967295, %s986_s14   ;;  %s27_s16 = sadd.s32 1, %s982_s13  ;;  %s986_s14 = sphi %s1016_s14, %s15_s14   ;;  %s982_s13 = sphi %s1014_s13, %s1128_s13   ;;  %s978_s12 = sphi %s1012_s12, %s1127_s12  }
   0x4   : > { %p29_p0 = scmp.ge.s32.totalorder %s27_s16, 2  ;;  %p668_p1 = scmp.ge.s32.totalorder %s986_s14, 1 }
   0x5   : > { %p138_p2 = scmp.lt.s32.totalorder %s986_s14, 3  ;;  %p1037_p4 = scmp.eq.s32.totalorder %s666_s15, 0 }
   0x6   : > { %s1130_s16 = smov (%p29_p0, %s27_s16), 0  ;;  %s988_s19 = smov [#allocation2]  }
   0x7   : > { %p1033_p3 = pnand %p668_p1, %p138_p2  ;;  %s152_s20 = sshll.u32 %s988_s19, 4  ;;  %s153_s20 = int_to_ptr.vmem [resolvable:$true] %s152_s20 }
   0x8   : > { %s989_s22 = smov [#allocation4]   ;;  %s915_s24 = scalar_lea.vmem %s153_s20, 1024 }
   0x9   : > { %p849_p5 = pneg %p1033_p3  ;;  %s168_s23 = sshll.u32 %s989_s22, 4  ;;  %s169_s23 = int_to_ptr.vmem [resolvable:$true] %s168_s23 }
   0xa   : > { %p916_p8 = scmp.ne.s32.totalorder %s153_s20, %s915_s24  ;;  %p923_p11 = scmp.lt.s32.totalorder %s153_s20, %s153_s20 }
   0xb   : > { %p1045_p6 = pnand %p1037_p4, %p849_p5  ;;  %p924_p12 = scmp.lt.s32.totalorder %s915_s24, %s915_s24 }
   0xd   : > { %p906_p7 = pneg %p1045_p6  ;;  %p925_p13 = por %p924_p12, %p923_p11 }
   0xf   : > { %p918_p9 = pnand %p916_p8, %p906_p7 }
  0x11   : > { %p919_p10 = pneg %p918_p9 }
  0x13   : > { %p926_p0 = pnand %p925_p13, %p919_p10 }
  0x15   : > { %929 = shalt.err (!%p926_p0)
}
  0x16   : > { %s990_s25 = smov 64   ;;  %s991_s26 = smov 4  }
  0x17   : > { %852 = dma.hbm_to_vmem [thread:$0]  (!%p1045_p6), %s1121_s1, 1024, %s153_s20, [#allocation3], %s990_s25, %s990_s25, %s991_s26  }
  0x18   : > { %s941_s29 = scalar_lea.vmem %s169_s23, 16  ;;  %s948_s30 = scalar_lea.vmem %s169_s23, 32 }
  0x19   : > { %p942_p1 = scmp.ne.s32.totalorder %s169_s23, %s941_s29  ;;  %p949_p8 = scmp.lt.s32.totalorder %s169_s23, %s169_s23 }
  0x1a   : > { %p950_p9 = scmp.lt.s32.totalorder %s948_s30, %s941_s29 }
  0x1b   : > { %p944_p2 = pnand %p942_p1, %p906_p7 }
  0x1c   : > { %p951_p10 = por %p950_p9, %p949_p8 }
  0x1d   : > { %p945_p5 = pneg %p944_p2 }
  0x1f   : > { %p952_p11 = pnand %p951_p10, %p945_p5 }
  0x21   : > { %955 = shalt.err (!%p952_p11)
}
  0x22   : > { %855 = dma.hbm_to_vmem [thread:$0]  (!%p1045_p6), %s1122_s2, 16, %s169_s23, [#allocation5]  }
  0x23   : > { %190 = sbr.rel (%p1033_p3) target bundleno = 290 (0x122), region = 32 }
  0x28   : > { %969 = dma.done.wait (%p1037_p4), [#allocation3], 1024  }
  0x29   : > { %971 = vsyncadd (%p1037_p4), [#allocation3], 4294966272 }
  0x2a   : > { %973 = dma.done.wait (%p1037_p4), [#allocation5], 16  }
  0x2b   : > { %975 = vsyncadd (%p1037_p4), [#allocation5], 4294967280  ;;  %s675_s6 = sshll.u32 %s978_s12, 4  ;;  %v888_v0 = vld [vmem:[#allocation2 + $0x38] sm:$0xff]   ;;  %v889_v1 = vld [vmem:[#allocation2 + $0x30] sm:$0xff]  }
  0x2c   : > { %p222_p7 = scmp.lt.s32.totalorder %s675_s6, 31  ;;  %793 = vmatprep.subr.bf16.mxu0 %v888_v0  ;;  %825 = vmatprep.subr.bf16.mxu1 %v888_v0  ;;  %v890_v2 = vld [vmem:[#allocation2 + $0x28] sm:$0xff]   ;;  %v891_v3 = vld [vmem:[#allocation2 + $0x20] sm:$0xff]   ;;  %v892_v6 = vld [vmem:[#allocation2 + $0x18] sm:$0xff]  }
  0x2d   : > { %794 = vmatpush3.bf16.msra.mxu0 %v888_v0  ;;  %833 = vmatpush3.bf16.msra.mxu1 %v888_v0  ;;  %v893_v7 = vld [vmem:[#allocation2 + $0x10] sm:$0xff]   ;;  %v894_v8 = vld [vmem:[#allocation2 + $0x8] sm:$0xff]   ;;  %v895_v9 = vld [vmem:[#allocation2] sm:$0xff]  }
  0x2e   : > { %s1132_s6 = smov (!%p222_p7, %s675_s6), 31  ;;  %795 = vmatprep.subr.bf16.mxu0 %v889_v1  ;;  %826 = vmatprep.subr.bf16.mxu1 %v889_v1  ;;  %v679_v16 = vld [vmem:[#allocation4] ss:$0 sm:$0xff] }
  0x2f   : > { %s676_s7 = sshll.u32 %s1132_s6, 2 }
  0x30   : > { %s1086_s10 = scalar_lea.vmem %s1120_s0, %s676_s7  ;;  %s1101_s15 = scalar_lea.vmem %s1123_s3, %s676_s7 }
  0x31   : > { %796 = vmatpush3.bf16.msra.mxu0 %v889_v1  ;;  %834 = vmatpush3.bf16.msra.mxu1 %v889_v1  ;;  %v896_v4 = vld [vmem:[%s1086_s10] sm:$0xff]   ;;  %v898_v10 = vld [vmem:[%s1086_s10 + $0x8] sm:$0xff]   ;;  %v900_v12 = vld [vmem:[%s1086_s10 + $0x10] sm:$0xff]  }
  0x32   : > { %797 = vmatprep.subr.bf16.mxu0 %v890_v2  ;;  %827 = vmatprep.subr.bf16.mxu1 %v890_v2  ;;  %v897_v5 = vld [vmem:[%s1086_s10 + $0x20] sm:$0xff]   ;;  %v899_v11 = vld [vmem:[%s1086_s10 + $0x28] sm:$0xff]   ;;  %v901_v13 = vld [vmem:[%s1086_s10 + $0x30] sm:$0xff]  }
  0x33   : > { %809 = vmatprep.mubr.bf16.mxu0 %v896_v4  ;;  %817 = vmatprep.mubr.bf16.mxu1 %v897_v5  ;;  %v902_v14 = vld [vmem:[%s1086_s10 + $0x18] sm:$0xff]  }
  0x34   : > { %v903_v15 = vld [vmem:[%s1086_s10 + $0x38] sm:$0xff]  }
  0x35   : > { %798 = vmatpush3.bf16.msra.mxu0 %v890_v2  ;;  %835 = vmatpush3.bf16.msra.mxu1 %v890_v2 }
  0x36   : > { %799 = vmatprep.subr.bf16.mxu0 %v891_v3  ;;  %828 = vmatprep.subr.bf16.mxu1 %v891_v3 }
  0x39   : > { %800 = vmatpush3.bf16.msra.mxu0 %v891_v3  ;;  %836 = vmatpush3.bf16.msra.mxu1 %v891_v3 }
  0x3a   : > { %801 = vmatprep.subr.bf16.mxu0 %v892_v6  ;;  %829 = vmatprep.subr.bf16.mxu1 %v892_v6 }
  0x3d   : > { %802 = vmatpush3.bf16.msra.mxu0 %v892_v6  ;;  %837 = vmatpush3.bf16.msra.mxu1 %v892_v6 }
  0x3e   : > { %803 = vmatprep.subr.bf16.mxu0 %v893_v7  ;;  %830 = vmatprep.subr.bf16.mxu1 %v893_v7 }
  0x41   : > { %804 = vmatpush3.bf16.msra.mxu0 %v893_v7  ;;  %838 = vmatpush3.bf16.msra.mxu1 %v893_v7 }
  0x42   : > { %805 = vmatprep.subr.bf16.mxu0 %v894_v8  ;;  %831 = vmatprep.subr.bf16.mxu1 %v894_v8 }
  0x45   : > { %806 = vmatpush3.bf16.msra.mxu0 %v894_v8  ;;  %839 = vmatpush3.bf16.msra.mxu1 %v894_v8 }
  0x46   : > { %807 = vmatprep.subr.bf16.mxu0 %v895_v9  ;;  %832 = vmatprep.subr.bf16.mxu1 %v895_v9 }
  0x49   : > { %808 = vmatpush3.bf16.msra.mxu0 %v895_v9  ;;  %840 = vmatpush3.bf16.msra.mxu1 %v895_v9 }
  0x4c   : > { %810 = vmatmul.mubr.bf16.vlgmr.msra.gmra.mxu0 %v898_v10  ;;  %818 = vmatmul.mubr.bf16.vlgmr.msra.gmra.mxu1 %v899_v11 }
  0x4d   : > { %813 = vmatprep.mubr.bf16.mxu0 %v900_v12  ;;  %821 = vmatprep.mubr.bf16.mxu1 %v901_v13 }
  0x54   : > { %814 = vmatmul.mubr.bf16.gmra.mxu0 %v902_v14  ;;  %822 = vmatmul.mubr.bf16.gmra.mxu1 %v903_v15 }
 0x10c   : > { %v811_v17 = vpop.f32.mrf.mxu0  ;;  %v819_v18 = vpop.f32.mrf.mxu1 }
 0x10d   : > { %v415_v19 = vadd.f32 %v811_v17, %v679_v16  ;;  %v447_v20 = vadd.f32 %v819_v18, %v679_v16 }
 0x10e   : > { %v406_v21 = vpop.f32.mrf.mxu0  ;;  %v438_v22 = vpop.f32.mrf.mxu1 }
 0x10f   : > { %v407_v23 = vadd.f32 %v679_v16, %v406_v21  ;;  %v439_v24 = vadd.f32 %v679_v16, %v438_v22  ;;  %v471_v29 = vmax.f32 %v415_v19, 0.0  ;;  %v479_v30 = vmax.f32 %v447_v20, 0.0 }
 0x110   : > { %v812_v25 = vpop.f32.mrf.mxu0  ;;  %v820_v26 = vpop.f32.mrf.mxu1 }
 0x111   : > { %v418_v27 = vadd.f32 %v812_v25, %v679_v16  ;;  %v450_v28 = vadd.f32 %v820_v26, %v679_v16  ;;  %v469_v37 = vmax.f32 %v407_v23, 0.0  ;;  %v477_v38 = vmax.f32 %v439_v24, 0.0 }
 0x112   : > { %v409_v31 = vpop.f32.mrf.mxu0  ;;  %v441_v32 = vpop.f32.mrf.mxu1 }
 0x113   : > { %v472_v33 = vmax.f32 %v418_v27, 0.0  ;;  %v480_v34 = vmax.f32 %v450_v28, 0.0  ;;  %v410_v35 = vadd.f32 %v679_v16, %v409_v31  ;;  %v442_v36 = vadd.f32 %v679_v16, %v441_v32 }
 0x114   : > { %v815_v39 = vpop.f32.mrf.mxu0  ;;  %v823_v40 = vpop.f32.mrf.mxu1 }
 0x115   : > { %v738_v41 = vpack.c.bf16 %v472_v33, %v471_v29  ;;  %v758_v42 = vpack.c.bf16 %v480_v34, %v479_v30  ;;  %v470_v43 = vmax.f32 %v410_v35, 0.0  ;;  %v478_v44 = vmax.f32 %v442_v36, 0.0 }
 0x116   : > { %v431_v45 = vadd.f32 %v815_v39, %v679_v16  ;;  %v463_v46 = vadd.f32 %v823_v40, %v679_v16  ;;  %v422_v47 = vpop.f32.mrf.mxu0  ;;  %v454_v48 = vpop.f32.mrf.mxu1 }
 0x117   : > { %770 = vst [vmem:[%s1101_s15 + $0x8] sm:$0xff] %v738_v41   ;;  %774 = vst [vmem:[%s1101_s15 + $0x28] sm:$0xff] %v758_v42   ;;  %v733_v49 = vpack.c.bf16 %v470_v43, %v469_v37  ;;  %v753_v50 = vpack.c.bf16 %v478_v44, %v477_v38  ;;  %v423_v51 = vadd.f32 %v679_v16, %v422_v47 }
 0x118   : > { %v455_v52 = vadd.f32 %v679_v16, %v454_v48  ;;  %v816_v53 = vpop.f32.mrf.mxu0  ;;  %v824_v54 = vpop.f32.mrf.mxu1  ;;  %v475_v57 = vmax.f32 %v431_v45, 0.0  ;;  %v483_v58 = vmax.f32 %v463_v46, 0.0 }
 0x119   : > { %734 = vst [vmem:[%s1101_s15] sm:$0xff] %v733_v49   ;;  %773 = vst [vmem:[%s1101_s15 + $0x20] sm:$0xff] %v753_v50   ;;  %v434_v55 = vadd.f32 %v816_v53, %v679_v16  ;;  %v466_v56 = vadd.f32 %v824_v54, %v679_v16  ;;  %v473_v1 = vmax.f32 %v423_v51, 0.0 }
 0x11a   : > { %v425_v59 = vpop.f32.mrf.mxu0  ;;  %v457_v60 = vpop.f32.mrf.mxu1  ;;  %v481_v2 = vmax.f32 %v455_v52, 0.0 }
 0x11b   : > { %v476_v61 = vmax.f32 %v434_v55, 0.0  ;;  %v484_v62 = vmax.f32 %v466_v56, 0.0  ;;  %v426_v63 = vadd.f32 %v679_v16, %v425_v59  ;;  %v458_v0 = vadd.f32 %v679_v16, %v457_v60 }
 0x11d   : > { %v748_v3 = vpack.c.bf16 %v476_v61, %v475_v57  ;;  %v768_v4 = vpack.c.bf16 %v484_v62, %v483_v58  ;;  %v474_v5 = vmax.f32 %v426_v63, 0.0  ;;  %v482_v6 = vmax.f32 %v458_v0, 0.0 }
 0x11f   : > { %772 = vst [vmem:[%s1101_s15 + $0x18] sm:$0xff] %v748_v3   ;;  %776 = vst [vmem:[%s1101_s15 + $0x38] sm:$0xff] %v768_v4   ;;  %v743_v7 = vpack.c.bf16 %v474_v5, %v473_v1  ;;  %v763_v8 = vpack.c.bf16 %v482_v6, %v481_v2 }
 0x121   : > { %771 = vst [vmem:[%s1101_s15 + $0x10] sm:$0xff] %v743_v7   ;;  %775 = vst [vmem:[%s1101_s15 + $0x30] sm:$0xff] %v763_v8  }
 0x122 PF: > { %s15_s14 = sadd.s32 1, %s986_s14   ;;  %s1127_s12 = smov %s982_s13 }
 0x123   : > { %p12_p3 = scmp.ge.s32.totalorder %s15_s14, 4   ;;  %s1128_s13 = smov %s1130_s16 }
 0x125   :  { %14 = sbr.rel (!%p12_p3) target bundleno = 3 (0x3), region = 73 }
 0x12a   :  { %593 = vsyncpa [#allocation3], 1 }
 0x12b   :  { %595 = vsyncpa [#allocation3 + $0x1], 1 }
 0x12c   :  { %596 = vsyncpa [#allocation5], 1 }

// kernel: alexnet_forward.4
= control target key start
LH: loop header
LB: loop body
LE: loop exit
PB: predicated region body
PF: predicated region fallthrough
CT: control target
= control target key end

     0   :  { %s2164_s12 = smov 0   ;;  %s2166_s13 = smov 0   ;;  %s2719_s0 = inlined_call_operand.vmem [shape: bf16[128,640], index: 0, kind: input, shape index: {}]   ;;  %s2720_s1 = inlined_call_operand.vmem [shape: bf16[640,256], index: 1, kind: input, shape index: {}]   ;;  %s2721_s2 = inlined_call_operand.vmem [shape: f32[1,256], index: 2, kind: input, shape index: {}]   ;;  %s2722_s3 = inlined_call_operand.vmem [shape: f32[128,256], index: 3, kind: output, shape index: {}]  }
   0x1   :  { %s2168_s14 = smov 0   ;;  %s2170_s15 = smov 0  }
   0x2   :  { %s2172_s16 = smov 0  }
   0x3 LB: > { %s22_s17 = sadd.s32 1, %s2138_s15  ;;  %s1681_s18 = sadd.s32 4294967295, %s2142_s16   ;;  %s2142_s16 = sphi %s2172_s16, %s13_s16   ;;  %s2138_s15 = sphi %s2170_s15, %s2731_s15   ;;  %s2134_s14 = sphi %s2168_s14, %s2730_s14   ;;  %s2130_s13 = sphi %s2166_s13, %s2729_s13   ;;  %s2126_s12 = sphi %s2164_s12, %s2728_s12  }
   0x4   : > { %p23_p0 = scmp.ge.s32.totalorder %s22_s17, 2  ;;  %p65_p1 = scmp.ne.s32.totalorder %s2130_s13, %s2126_s12 }
   0x5   : > { %p66_p2 = scmp.eq.s32.totalorder %s2142_s16, 0  ;;  %p123_p4 = scmp.eq.s32.totalorder %s1681_s18, 1 }
   0x6   : > { %s2733_s17 = smov (%p23_p0, %s22_s17), 0  ;;  %s58_s20 = sadd.s32 1, %s2130_s13 }
   0x7   : > { %p67_p3 = por %p66_p2, %p65_p1  ;;  %s55_s19 = ssub.s32 %s2138_s15, %s2733_s17 }
   0x8   : > { %p56_p5 = scmp.eq.s32.totalorder %s55_s19, 0  ;;  %p2199_p6 = por %p123_p4, %p65_p1 }
   0x9   : > { %p1685_p7 = scmp.ge.s32.totalorder %s2142_s16, 2 }
   0xa   : > { %s2204_s22 = scalar_select %p56_p5, %s2130_s13, %s58_s20  }
   0xb   : > { %155 = sbr.rel (%p1685_p7) target bundleno = 73 (0x49), region = 20 }
  0x10   : > { %158 = sbr.rel (!%p67_p3) target bundleno = 73 (0x49), region = 24  ;;  %s160_s23 = sand.u32 (%p67_p3), 1, %s2130_s13  }
  0x11   : > { %s1686_s24 = sshll.u32 (%p67_p3), %s2138_s15, 2  ;;  %s1966_s25 = smul.u32 (%p67_p3), 320, %s160_s23 }
  0x12   : > { %s2212_s28 = scalar_lea.vmem (%p67_p3), %s2720_s1, %s1686_s24 }
  0x13   : > { %v181_v0 = vld [vmem:[%s2212_s28] sm:$0xf] (%p67_p3)  ;;  %v183_v1 = vld [vmem:[%s2212_s28 + $0x8] sm:$0xf] (%p67_p3)  ;;  %v185_v2 = vld [vmem:[%s2212_s28 + $0x10] sm:$0xf] (%p67_p3) }
  0x14   : > { %v187_v3 = vld [vmem:[%s2212_s28 + $0x18] sm:$0xf] (%p67_p3)  ;;  %v189_v4 = vld [vmem:[%s2212_s28 + $0x20] sm:$0xf] (%p67_p3)  ;;  %s2219_s29 = scalar_lea.vmem (%p67_p3), [#allocation2], %s1966_s25 }
  0x15   : > { %182 = vst [vmem:[%s2219_s29] sm:$0xf] %v181_v0  ;;  %184 = vst [vmem:[%s2219_s29 + $0x4] sm:$0xf] %v183_v1  ;;  %v191_v5 = vld [vmem:[%s2212_s28 + $0x28] sm:$0xf] }
  0x16   : > { %186 = vst [vmem:[%s2219_s29 + $0x8] sm:$0xf] %v185_v2  ;;  %188 = vst [vmem:[%s2219_s29 + $0xc] sm:$0xf] %v187_v3  ;;  %v193_v6 = vld [vmem:[%s2212_s28 + $0x30] sm:$0xf] }
  0x17   : > { %190 = vst [vmem:[%s2219_s29 + $0x10] sm:$0xf] %v189_v4  ;;  %v195_v7 = vld [vmem:[%s2212_s28 + $0x38] sm:$0xf]  ;;  %192 = vst [vmem:[%s2219_s29 + $0x14] sm:$0xf] %v191_v5 }
  0x18   : > { %194 = vst [vmem:[%s2219_s29 + $0x18] sm:$0xf] %v193_v6  ;;  %196 = vst [vmem:[%s2219_s29 + $0x1c] sm:$0xf] %v195_v7  ;;  %v197_v8 = vld [vmem:[%s2212_s28 + $0x40] sm:$0xf] }
  0x19   : > { %v199_v9 = vld [vmem:[%s2212_s28 + $0x48] sm:$0xf]  ;;  %v201_v10 = vld [vmem:[%s2212_s28 + $0x50] sm:$0xf]  ;;  %198 = vst [vmem:[%s2219_s29 + $0x20] sm:$0xf] %v197_v8 }
  0x1a   : > { %200 = vst [vmem:[%s2219_s29 + $0x24] sm:$0xf] %v199_v9  ;;  %202 = vst [vmem:[%s2219_s29 + $0x28] sm:$0xf] %v201_v10  ;;  %v203_v11 = vld [vmem:[%s2212_s28 + $0x58] sm:$0xf] }
  0x1b   : > { %v205_v12 = vld [vmem:[%s2212_s28 + $0x60] sm:$0xf]  ;;  %v207_v13 = vld [vmem:[%s2212_s28 + $0x68] sm:$0xf]  ;;  %204 = vst [vmem:[%s2219_s29 + $0x2c] sm:$0xf] %v203_v11 }
  0x1c   : > { %206 = vst [vmem:[%s2219_s29 + $0x30] sm:$0xf] %v205_v12  ;;  %208 = vst [vmem:[%s2219_s29 + $0x34] sm:$0xf] %v207_v13  ;;  %v209_v14 = vld [vmem:[%s2212_s28 + $0x70] sm:$0xf] }
  0x1d   : > { %v211_v15 = vld [vmem:[%s2212_s28 + $0x78] sm:$0xf]  ;;  %v213_v16 = vld [vmem:[%s2212_s28 + $0x80] sm:$0xf]  ;;  %210 = vst [vmem:[%s2219_s29 + $0x38] sm:$0xf] %v209_v14 }
  0x1e   : > { %212 = vst [vmem:[%s2219_s29 + $0x3c] sm:$0xf] %v211_v15  ;;  %214 = vst [vmem:[%s2219_s29 + $0x40] sm:$0xf] %v213_v16  ;;  %v215_v17 = vld [vmem:[%s2212_s28 + $0x88] sm:$0xf] }
  0x1f   : > { %v217_v18 = vld [vmem:[%s2212_s28 + $0x90] sm:$0xf]  ;;  %v219_v19 = vld [vmem:[%s2212_s28 + $0x98] sm:$0xf]  ;;  %216 = vst [vmem:[%s2219_s29 + $0x44] sm:$0xf] %v215_v17 }
  0x20   : > { %218 = vst [vmem:[%s2219_s29 + $0x48] sm:$0xf] %v217_v18  ;;  %220 = vst [vmem:[%s2219_s29 + $0x4c] sm:$0xf] %v219_v19  ;;  %v221_v20 = vld [vmem:[%s2212_s28 + $0xa0] sm:$0xf] }
  0x21   : > { %v223_v21 = vld [vmem:[%s2212_s28 + $0xa8] sm:$0xf]  ;;  %v225_v22 = vld [vmem:[%s2212_s28 + $0xb0] sm:$0xf]  ;;  %222 = vst [vmem:[%s2219_s29 + $0x50] sm:$0xf] %v221_v20 }
  0x22   : > { %224 = vst [vmem:[%s2219_s29 + $0x54] sm:$0xf] %v223_v21  ;;  %226 = vst [vmem:[%s2219_s29 + $0x58] sm:$0xf] %v225_v22  ;;  %v227_v23 = vld [vmem:[%s2212_s28 + $0xb8] sm:$0xf] }
  0x23   : > { %v229_v24 = vld [vmem:[%s2212_s28 + $0xc0] sm:$0xf]  ;;  %v231_v25 = vld [vmem:[%s2212_s28 + $0xc8] sm:$0xf]  ;;  %228 = vst [vmem:[%s2219_s29 + $0x5c] sm:$0xf] %v227_v23 }
  0x24   : > { %230 = vst [vmem:[%s2219_s29 + $0x60] sm:$0xf] %v229_v24  ;;  %232 = vst [vmem:[%s2219_s29 + $0x64] sm:$0xf] %v231_v25  ;;  %v233_v26 = vld [vmem:[%s2212_s28 + $0xd0] sm:$0xf] }
  0x25   : > { %v235_v27 = vld [vmem:[%s2212_s28 + $0xd8] sm:$0xf]  ;;  %v237_v28 = vld [vmem:[%s2212_s28 + $0xe0] sm:$0xf]  ;;  %234 = vst [vmem:[%s2219_s29 + $0x68] sm:$0xf] %v233_v26 }
  0x26   : > { %236 = vst [vmem:[%s2219_s29 + $0x6c] sm:$0xf] %v235_v27  ;;  %238 = vst [vmem:[%s2219_s29 + $0x70] sm:$0xf] %v237_v28  ;;  %v239_v29 = vld [vmem:[%s2212_s28 + $0xe8] sm:$0xf] }
  0x27   : > { %v241_v30 = vld [vmem:[%s2212_s28 + $0xf0] sm:$0xf]  ;;  %v243_v31 = vld [vmem:[%s2212_s28 + $0xf8] sm:$0xf]  ;;  %240 = vst [vmem:[%s2219_s29 + $0x74] sm:$0xf] %v239_v29 }
  0x28   : > { %242 = vst [vmem:[%s2219_s29 + $0x78] sm:$0xf] %v241_v30  ;;  %244 = vst [vmem:[%s2219_s29 + $0x7c] sm:$0xf] %v243_v31  ;;  %v245_v32 = vld [vmem:[%s2212_s28 + $0x100] sm:$0xf] }
  0x29   : > { %v247_v33 = vld [vmem:[%s2212_s28 + $0x108] sm:$0xf]  ;;  %v249_v34 = vld [vmem:[%s2212_s28 + $0x110] sm:$0xf]  ;;  %246 = vst [vmem:[%s2219_s29 + $0x80] sm:$0xf] %v245_v32 }
  0x2a   : > { %248 = vst [vmem:[%s2219_s29 + $0x84] sm:$0xf] %v247_v33  ;;  %250 = vst [vmem:[%s2219_s29 + $0x88] sm:$0xf] %v249_v34  ;;  %v251_v35 = vld [vmem:[%s2212_s28 + $0x118] sm:$0xf] }
  0x2b   : > { %v253_v36 = vld [vmem:[%s2212_s28 + $0x120] sm:$0xf]  ;;  %v255_v37 = vld [vmem:[%s2212_s28 + $0x128] sm:$0xf]  ;;  %252 = vst [vmem:[%s2219_s29 + $0x8c] sm:$0xf] %v251_v35 }
  0x2c   : > { %254 = vst [vmem:[%s2219_s29 + $0x90] sm:$0xf] %v253_v36  ;;  %256 = vst [vmem:[%s2219_s29 + $0x94] sm:$0xf] %v255_v37  ;;  %v257_v38 = vld [vmem:[%s2212_s28 + $0x130] sm:$0xf] }
  0x2d   : > { %v259_v39 = vld [vmem:[%s2212_s28 + $0x138] sm:$0xf]  ;;  %v261_v40 = vld [vmem:[%s2212_s28 + $0x140] sm:$0xf]  ;;  %258 = vst [vmem:[%s2219_s29 + $0x98] sm:$0xf] %v257_v38 }
  0x2e   : > { %260 = vst [vmem:[%s2219_s29 + $0x9c] sm:$0xf] %v259_v39  ;;  %262 = vst [vmem:[%s2219_s29 + $0xa0] sm:$0xf] %v261_v40  ;;  %v263_v41 = vld [vmem:[%s2212_s28 + $0x148] sm:$0xf] }
  0x2f   : > { %v265_v42 = vld [vmem:[%s2212_s28 + $0x150] sm:$0xf]  ;;  %v267_v43 = vld [vmem:[%s2212_s28 + $0x158] sm:$0xf]  ;;  %264 = vst [vmem:[%s2219_s29 + $0xa4] sm:$0xf] %v263_v41 }
  0x30   : > { %266 = vst [vmem:[%s2219_s29 + $0xa8] sm:$0xf] %v265_v42  ;;  %268 = vst [vmem:[%s2219_s29 + $0xac] sm:$0xf] %v267_v43  ;;  %v269_v44 = vld [vmem:[%s2212_s28 + $0x160] sm:$0xf] }
  0x31   : > { %v271_v45 = vld [vmem:[%s2212_s28 + $0x168] sm:$0xf]  ;;  %v273_v46 = vld [vmem:[%s2212_s28 + $0x170] sm:$0xf]  ;;  %270 = vst [vmem:[%s2219_s29 + $0xb0] sm:$0xf] %v269_v44 }
  0x32   : > { %272 = vst [vmem:[%s2219_s29 + $0xb4] sm:$0xf] %v271_v45  ;;  %274 = vst [vmem:[%s2219_s29 + $0xb8] sm:$0xf] %v273_v46  ;;  %v275_v47 = vld [vmem:[%s2212_s28 + $0x178] sm:$0xf] }
  0x33   : > { %v277_v48 = vld [vmem:[%s2212_s28 + $0x180] sm:$0xf]  ;;  %v279_v49 = vld [vmem:[%s2212_s28 + $0x188] sm:$0xf]  ;;  %276 = vst [vmem:[%s2219_s29 + $0xbc] sm:$0xf] %v275_v47 }
  0x34   : > { %278 = vst [vmem:[%s2219_s29 + $0xc0] sm:$0xf] %v277_v48  ;;  %280 = vst [vmem:[%s2219_s29 + $0xc4] sm:$0xf] %v279_v49  ;;  %v281_v50 = vld [vmem:[%s2212_s28 + $0x190] sm:$0xf] }
  0x35   : > { %v283_v51 = vld [vmem:[%s2212_s28 + $0x198] sm:$0xf]  ;;  %v285_v52 = vld [vmem:[%s2212_s28 + $0x1a0] sm:$0xf]  ;;  %282 = vst [vmem:[%s2219_s29 + $0xc8] sm:$0xf] %v281_v50 }
  0x36   : > { %284 = vst [vmem:[%s2219_s29 + $0xcc] sm:$0xf] %v283_v51  ;;  %286 = vst [vmem:[%s2219_s29 + $0xd0] sm:$0xf] %v285_v52  ;;  %v287_v53 = vld [vmem:[%s2212_s28 + $0x1a8] sm:$0xf] }
  0x37   : > { %v289_v54 = vld [vmem:[%s2212_s28 + $0x1b0] sm:$0xf]  ;;  %v291_v55 = vld [vmem:[%s2212_s28 + $0x1b8] sm:$0xf]  ;;  %288 = vst [vmem:[%s2219_s29 + $0xd4] sm:$0xf] %v287_v53 }
  0x38   : > { %290 = vst [vmem:[%s2219_s29 + $0xd8] sm:$0xf] %v289_v54  ;;  %292 = vst [vmem:[%s2219_s29 + $0xdc] sm:$0xf] %v291_v55  ;;  %v293_v56 = vld [vmem:[%s2212_s28 + $0x1c0] sm:$0xf] }
  0x39   : > { %v295_v57 = vld [vmem:[%s2212_s28 + $0x1c8] sm:$0xf]  ;;  %v297_v58 = vld [vmem:[%s2212_s28 + $0x1d0] sm:$0xf]  ;;  %294 = vst [vmem:[%s2219_s29 + $0xe0] sm:$0xf] %v293_v56 }
  0x3a   : > { %296 = vst [vmem:[%s2219_s29 + $0xe4] sm:$0xf] %v295_v57  ;;  %298 = vst [vmem:[%s2219_s29 + $0xe8] sm:$0xf] %v297_v58  ;;  %v299_v59 = vld [vmem:[%s2212_s28 + $0x1d8] sm:$0xf] }
  0x3b   : > { %v301_v60 = vld [vmem:[%s2212_s28 + $0x1e0] sm:$0xf]  ;;  %v303_v61 = vld [vmem:[%s2212_s28 + $0x1e8] sm:$0xf]  ;;  %300 = vst [vmem:[%s2219_s29 + $0xec] sm:$0xf] %v299_v59 }
  0x3c   : > { %302 = vst [vmem:[%s2219_s29 + $0xf0] sm:$0xf] %v301_v60  ;;  %304 = vst [vmem:[%s2219_s29 + $0xf4] sm:$0xf] %v303_v61  ;;  %v305_v62 = vld [vmem:[%s2212_s28 + $0x1f0] sm:$0xf] }
  0x3d   : > { %v307_v63 = vld [vmem:[%s2212_s28 + $0x1f8] sm:$0xf]  ;;  %v309_v0 = vld [vmem:[%s2212_s28 + $0x200] sm:$0xf]  ;;  %306 = vst [vmem:[%s2219_s29 + $0xf8] sm:$0xf] %v305_v62 }
  0x3e   : > { %308 = vst [vmem:[%s2219_s29 + $0xfc] sm:$0xf] %v307_v63  ;;  %310 = vst [vmem:[%s2219_s29 + $0x100] sm:$0xf] %v309_v0  ;;  %v311_v1 = vld [vmem:[%s2212_s28 + $0x208] sm:$0xf] }
  0x3f   : > { %v313_v2 = vld [vmem:[%s2212_s28 + $0x210] sm:$0xf]  ;;  %v315_v3 = vld [vmem:[%s2212_s28 + $0x218] sm:$0xf]  ;;  %312 = vst [vmem:[%s2219_s29 + $0x104] sm:$0xf] %v311_v1 }
  0x40   : > { %314 = vst [vmem:[%s2219_s29 + $0x108] sm:$0xf] %v313_v2  ;;  %316 = vst [vmem:[%s2219_s29 + $0x10c] sm:$0xf] %v315_v3  ;;  %v317_v4 = vld [vmem:[%s2212_s28 + $0x220] sm:$0xf] }
  0x41   : > { %v319_v5 = vld [vmem:[%s2212_s28 + $0x228] sm:$0xf]  ;;  %v321_v6 = vld [vmem:[%s2212_s28 + $0x230] sm:$0xf]  ;;  %318 = vst [vmem:[%s2219_s29 + $0x110] sm:$0xf] %v317_v4 }
  0x42   : > { %320 = vst [vmem:[%s2219_s29 + $0x114] sm:$0xf] %v319_v5  ;;  %322 = vst [vmem:[%s2219_s29 + $0x118] sm:$0xf] %v321_v6  ;;  %v323_v7 = vld [vmem:[%s2212_s28 + $0x238] sm:$0xf] }
  0x43   : > { %v325_v8 = vld [vmem:[%s2212_s28 + $0x240] sm:$0xf]  ;;  %v327_v9 = vld [vmem:[%s2212_s28 + $0x248] sm:$0xf]  ;;  %324 = vst [vmem:[%s2219_s29 + $0x11c] sm:$0xf] %v323_v7 }
  0x44   : > { %326 = vst [vmem:[%s2219_s29 + $0x120] sm:$0xf] %v325_v8  ;;  %328 = vst [vmem:[%s2219_s29 + $0x124] sm:$0xf] %v327_v9  ;;  %v329_v10 = vld [vmem:[%s2212_s28 + $0x250] sm:$0xf] }
  0x45   : > { %v331_v11 = vld [vmem:[%s2212_s28 + $0x258] sm:$0xf]  ;;  %v333_v12 = vld [vmem:[%s2212_s28 + $0x260] sm:$0xf]  ;;  %330 = vst [vmem:[%s2219_s29 + $0x128] sm:$0xf] %v329_v10 }
  0x46   : > { %332 = vst [vmem:[%s2219_s29 + $0x12c] sm:$0xf] %v331_v11  ;;  %334 = vst [vmem:[%s2219_s29 + $0x130] sm:$0xf] %v333_v12  ;;  %v335_v13 = vld [vmem:[%s2212_s28 + $0x268] sm:$0xf] }
  0x47   : > { %v337_v14 = vld [vmem:[%s2212_s28 + $0x270] sm:$0xf]  ;;  %v339_v15 = vld [vmem:[%s2212_s28 + $0x278] sm:$0xf]  ;;  %336 = vst [vmem:[%s2219_s29 + $0x134] sm:$0xf] %v335_v13 }
  0x48   : > { %338 = vst [vmem:[%s2219_s29 + $0x138] sm:$0xf] %v337_v14  ;;  %340 = vst [vmem:[%s2219_s29 + $0x13c] sm:$0xf] %v339_v15 }
  0x49 PF: > { %p1687_p8 = scmp.ge.s32.totalorder %s2142_s16, 1  ;;  %p529_p9 = scmp.lt.s32.totalorder %s2142_s16, 3 }
  0x4b   : > { %p530_p10 = pnand %p1687_p8, %p529_p9 }
  0x4d   : > { %533 = sbr.rel (%p530_p10) target bundleno = 405 (0x195), region = 69 }
  0x52   : > { %s536_s30 = sand.u32 1, %s2126_s12   ;;  %v2042_v16 = vld [vmem:[%s2719_s0 + $0x4] ss:$20 sps:$4 sm:$0xff]   ;;  %v2045_v17 = vld [vmem:[%s2719_s0 + $0xc] ss:$20 sps:$4 sm:$0xff]   ;;  %p574_p11 = scmp.lt.s32.totalorder %s2134_s14, 1 }
  0x53   : > { %s1967_s4 = smul.u32 320, %s536_s30  ;;  %1194 = vmatprep.mubr.bf16.mxu0 %v2042_v16  ;;  %1291 = vmatprep.mubr.bf16.mxu1 %v2045_v17  ;;  %v2040_v48 = vld [vmem:[%s2719_s0] ss:$20 sps:$4 sm:$0xff]   ;;  %v2043_v50 = vld [vmem:[%s2719_s0 + $0x8] ss:$20 sps:$4 sm:$0xff]   ;;  %s1688_s27 = sshll.u32 %s536_s30, 7 }
  0x54   : > { %v2047_v53 = vld [vmem:[%s2719_s0 + $0x2c] ss:$20 sps:$4 sm:$0xff]   ;;  %v2049_v54 = vld [vmem:[%s2719_s0 + $0x34] ss:$20 sps:$4 sm:$0xff]   ;;  %v2052_v58 = vld [vmem:[%s2719_s0 + $0x30] ss:$20 sps:$4 sm:$0xff]  }
  0x55   : > { %s2387_s9 = scalar_lea.vmem [#allocation2], %s1967_s4  ;;  %v2051_v56 = vld [vmem:[%s2719_s0 + $0x28] ss:$20 sps:$4 sm:$0xff]   ;;  %v2058_v63 = vld [vmem:[%s2719_s0 + $0x50] ss:$20 sps:$4 sm:$0xff]   ;;  %s2647_s12 = scalar_lea.vmem [#allocation3], %s1688_s27 }
  0x56   : > { %v2008_v18 = vld [vmem:[%s2387_s9 + $0x78] sm:$0xff]   ;;  %v2012_v22 = vld [vmem:[%s2387_s9 + $0x70] sm:$0xff]   ;;  %v2016_v26 = vld [vmem:[%s2387_s9 + $0x68] sm:$0xff]   ;;  %s575_s23 = scalar_select %p574_p11, %s2134_s14, 1 }
  0x57   : > { %v2009_v19 = vld [vmem:[%s2387_s9 + $0xf8] sm:$0xff]   ;;  %1774 = vmatprep.subr.bf16.mxu0 %v2008_v18  ;;  %v2013_v23 = vld [vmem:[%s2387_s9 + $0xf0] sm:$0xff]   ;;  %v2017_v27 = vld [vmem:[%s2387_s9 + $0xe8] sm:$0xff]   ;;  %s1771_s30 = sshll.u32 (%p2199_p6), %s2134_s14, 3 }
  0x58   : > { %v2010_v20 = vld [vmem:[%s2387_s9 + $0x38] sm:$0xff]   ;;  %1838 = vmatprep.subr.bf16.mxu1 %v2009_v19  ;;  %v2014_v24 = vld [vmem:[%s2387_s9 + $0x30] sm:$0xff]   ;;  %v2018_v28 = vld [vmem:[%s2387_s9 + $0x28] sm:$0xff]   ;;  %s576_s26 = scalar_lea.vmem %s2721_s2, %s575_s23  ;;  %s1496_s4 = scalar_lea.vmem (%p2199_p6), %s2722_s3, %s1771_s30 }
  0x59   : > { %v2011_v21 = vld [vmem:[%s2387_s9 + $0xb8] sm:$0xff]   ;;  %1775 = vmatpush3.bf16.msra.mxu0 %v2010_v20  ;;  %v2015_v25 = vld [vmem:[%s2387_s9 + $0xb0] sm:$0xff]   ;;  %v2019_v29 = vld [vmem:[%s2387_s9 + $0xa8] sm:$0xff]  }
  0x5a   : > { %1839 = vmatpush3.bf16.msra.mxu1 %v2011_v21  ;;  %1776 = vmatprep.subr.bf16.mxu0 %v2012_v22  ;;  %v2020_v30 = vld [vmem:[%s2387_s9 + $0x60] sm:$0xff]   ;;  %v2024_v34 = vld [vmem:[%s2387_s9 + $0x58] sm:$0xff]   ;;  %v2028_v38 = vld [vmem:[%s2387_s9 + $0x50] sm:$0xff]  }
  0x5b   : > { %1840 = vmatprep.subr.bf16.mxu1 %v2013_v23  ;;  %v2021_v31 = vld [vmem:[%s2387_s9 + $0xe0] sm:$0xff]   ;;  %v2025_v35 = vld [vmem:[%s2387_s9 + $0xd8] sm:$0xff]   ;;  %v2029_v39 = vld [vmem:[%s2387_s9 + $0xd0] sm:$0xff]  }
  0x5c   : > { %v2022_v32 = vld [vmem:[%s2387_s9 + $0x20] sm:$0xff]   ;;  %v2026_v36 = vld [vmem:[%s2387_s9 + $0x18] sm:$0xff]   ;;  %v2030_v40 = vld [vmem:[%s2387_s9 + $0x10] sm:$0xff]  }
  0x5d   : > { %1777 = vmatpush3.bf16.msra.mxu0 %v2014_v24  ;;  %v2023_v33 = vld [vmem:[%s2387_s9 + $0xa0] sm:$0xff]   ;;  %v2027_v37 = vld [vmem:[%s2387_s9 + $0x98] sm:$0xff]   ;;  %v2031_v41 = vld [vmem:[%s2387_s9 + $0x90] sm:$0xff]  }
  0x5e   : > { %1841 = vmatpush3.bf16.msra.mxu1 %v2015_v25  ;;  %1778 = vmatprep.subr.bf16.mxu0 %v2016_v26  ;;  %v2032_v42 = vld [vmem:[%s2387_s9 + $0x48] sm:$0xff]   ;;  %v2036_v46 = vld [vmem:[%s2387_s9 + $0x40] sm:$0xff]   ;;  %v2046_v52 = vld [vmem:[%s2387_s9 + $0x138] sm:$0xff]  }
  0x5f   : > { %1842 = vmatprep.subr.bf16.mxu1 %v2017_v27  ;;  %v2033_v43 = vld [vmem:[%s2387_s9 + $0xc8] sm:$0xff]   ;;  %v2037_v47 = vld [vmem:[%s2387_s9 + $0xc0] sm:$0xff]   ;;  %v2053_v55 = vld [vmem:[%s2387_s9 + $0x130] sm:$0xff]  }
  0x60   : > { %v2034_v44 = vld [vmem:[%s2387_s9 + $0x8] sm:$0xff]   ;;  %v2038_v49 = vld [vmem:[%s2387_s9] sm:$0xff]   ;;  %v2056_v60 = vld [vmem:[%s2719_s0 + $0x5c] ss:$20 sps:$4 sm:$0xff]  }
  0x61   : > { %1779 = vmatpush3.bf16.msra.mxu0 %v2018_v28  ;;  %v2035_v45 = vld [vmem:[%s2387_s9 + $0x88] sm:$0xff]   ;;  %v2039_v51 = vld [vmem:[%s2387_s9 + $0x80] sm:$0xff]   ;;  %v2074_v62 = vld [vmem:[%s2387_s9 + $0x118] sm:$0xff]  }
  0x62   : > { %1843 = vmatpush3.bf16.msra.mxu1 %v2019_v29  ;;  %1780 = vmatprep.subr.bf16.mxu0 %v2020_v30  ;;  %v2060_v57 = vld [vmem:[%s2387_s9 + $0x128] sm:$0xff]   ;;  %v2067_v61 = vld [vmem:[%s2387_s9 + $0x120] sm:$0xff]   ;;  %v2061_v1 = vld [vmem:[%s2719_s0 + $0x7c] ss:$20 sps:$4 sm:$0xff]  }
  0x63   : > { %1844 = vmatprep.subr.bf16.mxu1 %v2021_v31  ;;  %v2054_v59 = vld [vmem:[%s2719_s0 + $0x54] ss:$20 sps:$4 sm:$0xff]   ;;  %v2059_v0 = vld [vmem:[%s2719_s0 + $0x58] ss:$20 sps:$4 sm:$0xff]   ;;  %v2095_v9 = vld [vmem:[%s2387_s9 + $0x100] sm:$0xff]  }
  0x64   : > { %v2063_v2 = vld [vmem:[%s2719_s0 + $0x84] ss:$20 sps:$4 sm:$0xff]   ;;  %v2081_v3 = vld [vmem:[%s2387_s9 + $0x110] sm:$0xff]   ;;  %v2088_v4 = vld [vmem:[%s2387_s9 + $0x108] sm:$0xff]  }
  0x65   : > { %1781 = vmatpush3.bf16.msra.mxu0 %v2022_v32  ;;  %v2065_v5 = vld [vmem:[%s2719_s0 + $0x78] ss:$20 sps:$4 sm:$0xff]   ;;  %v2066_v6 = vld [vmem:[%s2719_s0 + $0x80] ss:$20 sps:$4 sm:$0xff]   ;;  %v2073_v11 = vld [vmem:[%s2719_s0 + $0xa8] ss:$20 sps:$4 sm:$0xff]  }
  0x66   : > { %1845 = vmatpush3.bf16.msra.mxu1 %v2023_v33  ;;  %1782 = vmatprep.subr.bf16.mxu0 %v2024_v34  ;;  %v2068_v7 = vld [vmem:[%s2719_s0 + $0xa4] ss:$20 sps:$4 sm:$0xff]   ;;  %v2070_v8 = vld [vmem:[%s2719_s0 + $0xac] ss:$20 sps:$4 sm:$0xff]   ;;  %v2077_v13 = vld [vmem:[%s2719_s0 + $0xd4] ss:$20 sps:$4 sm:$0xff]  }
  0x67   : > { %1846 = vmatprep.subr.bf16.mxu1 %v2025_v35  ;;  %v2072_v10 = vld [vmem:[%s2719_s0 + $0xa0] ss:$20 sps:$4 sm:$0xff]   ;;  %v2079_v14 = vld [vmem:[%s2719_s0 + $0xc8] ss:$20 sps:$4 sm:$0xff]   ;;  %v2080_v15 = vld [vmem:[%s2719_s0 + $0xd0] ss:$20 sps:$4 sm:$0xff]  }
  0x68   : > { %v2075_v12 = vld [vmem:[%s2719_s0 + $0xcc] ss:$20 sps:$4 sm:$0xff]   ;;  %v2082_v16 = vld [vmem:[%s2719_s0 + $0xf4] ss:$20 sps:$4 sm:$0xff]   ;;  %v2084_v17 = vld [vmem:[%s2719_s0 + $0xfc] ss:$20 sps:$4 sm:$0xff]  }
  0x69   : > { %1783 = vmatpush3.bf16.msra.mxu0 %v2026_v36  ;;  %v2086_v18 = vld [vmem:[%s2719_s0 + $0xf0] ss:$20 sps:$4 sm:$0xff]   ;;  %v2087_v19 = vld [vmem:[%s2719_s0 + $0xf8] ss:$20 sps:$4 sm:$0xff]   ;;  %v2094_v23 = vld [vmem:[%s2719_s0 + $0x120] ss:$20 sps:$4 sm:$0xff]  }
  0x6a   : > { %1847 = vmatpush3.bf16.msra.mxu1 %v2027_v37  ;;  %1784 = vmatprep.subr.bf16.mxu0 %v2028_v38  ;;  %v2089_v20 = vld [vmem:[%s2719_s0 + $0x11c] ss:$20 sps:$4 sm:$0xff]   ;;  %v2091_v21 = vld [vmem:[%s2719_s0 + $0x124] ss:$20 sps:$4 sm:$0xff]   ;;  %v2100_v28 = vld [vmem:[%s2719_s0 + $0x60] ss:$20 sps:$4 sm:$0xff]  }
  0x6b   : > { %1848 = vmatprep.subr.bf16.mxu1 %v2029_v39  ;;  %v2093_v22 = vld [vmem:[%s2719_s0 + $0x118] ss:$20 sps:$4 sm:$0xff]   ;;  %v2096_v24 = vld [vmem:[%s2719_s0 + $0x10] ss:$20 sps:$4 sm:$0xff]   ;;  %v2101_v29 = vld [vmem:[%s2719_s0 + $0x100] ss:$20 sps:$4 sm:$0xff]  }
  0x6c   : > { %v2097_v25 = vld [vmem:[%s2719_s0 + $0xb0] ss:$20 sps:$4 sm:$0xff]   ;;  %v2098_v26 = vld [vmem:[%s2719_s0 + $0x38] ss:$20 sps:$4 sm:$0xff]   ;;  %v2102_v30 = vld [vmem:[%s2719_s0 + $0x88] ss:$20 sps:$4 sm:$0xff]  }
  0x6d   : > { %1785 = vmatpush3.bf16.msra.mxu0 %v2030_v40  ;;  %v2099_v27 = vld [vmem:[%s2719_s0 + $0xd8] ss:$20 sps:$4 sm:$0xff]   ;;  %v2103_v31 = vld [vmem:[%s2719_s0 + $0x128] ss:$20 sps:$4 sm:$0xff]  }
  0x6e   : > { %1849 = vmatpush3.bf16.msra.mxu1 %v2031_v41  ;;  %1786 = vmatprep.subr.bf16.mxu0 %v2032_v42 }
  0x6f   : > { %1850 = vmatprep.subr.bf16.mxu1 %v2033_v43 }
  0x71   : > { %1787 = vmatpush3.bf16.msra.mxu0 %v2034_v44 }
  0x72   : > { %1851 = vmatpush3.bf16.msra.mxu1 %v2035_v45  ;;  %1788 = vmatprep.subr.bf16.mxu0 %v2036_v46 }
  0x73   : > { %1852 = vmatprep.subr.bf16.mxu1 %v2037_v47 }
  0x75   : > { %1789 = vmatpush3.bf16.msra.mxu0 %v2038_v49 }
  0x76   : > { %1853 = vmatpush3.bf16.msra.mxu1 %v2039_v51  ;;  %1918 = vmatprep.subr.bf16.mxu0 %v2046_v52 }
  0x77   : > { %1950 = vmatprep.subr.bf16.mxu1 %v2046_v52 }
  0x78   : > { %1195 = vmatmul.mubr.bf16.vlgmr.msra.gmra.mxu0 %v2040_v48 }
  0x79   : > { %1292 = vmatmul.mubr.bf16.vlgmr.msra.gmra.mxu1 %v2043_v50  ;;  %1919 = vmatpush3.bf16.msra.mxu0 %v2046_v52 }
  0x7a   : > { %1958 = vmatpush3.bf16.msra.mxu1 %v2046_v52  ;;  %1202 = vmatprep.mubr.bf16.mxu0 %v2047_v53 }
  0x7b   : > { %1299 = vmatprep.mubr.bf16.mxu1 %v2049_v54  ;;  %1920 = vmatprep.subr.bf16.mxu0 %v2053_v55 }
  0x7c   : > { %1951 = vmatprep.subr.bf16.mxu1 %v2053_v55 }
  0x7d   : > { %1921 = vmatpush3.bf16.msra.mxu0 %v2053_v55 }
  0x7e   : > { %1959 = vmatpush3.bf16.msra.mxu1 %v2053_v55  ;;  %1922 = vmatprep.subr.bf16.mxu0 %v2060_v57 }
  0x7f   : > { %1952 = vmatprep.subr.bf16.mxu1 %v2060_v57 }
  0x80   : > { %1203 = vmatmul.mubr.bf16.gmra.mxu0 %v2051_v56 }
  0x81   : > { %1300 = vmatmul.mubr.bf16.gmra.mxu1 %v2052_v58  ;;  %1210 = vmatprep.mubr.bf16.mxu0 %v2054_v59 }
  0x82   : > { %1307 = vmatprep.mubr.bf16.mxu1 %v2056_v60  ;;  %1923 = vmatpush3.bf16.msra.mxu0 %v2060_v57 }
  0x83   : > { %1960 = vmatpush3.bf16.msra.mxu1 %v2060_v57  ;;  %1924 = vmatprep.subr.bf16.mxu0 %v2067_v61 }
  0x84   : > { %1953 = vmatprep.subr.bf16.mxu1 %v2067_v61 }
  0x86   : > { %1925 = vmatpush3.bf16.msra.mxu0 %v2067_v61 }
  0x87   : > { %1961 = vmatpush3.bf16.msra.mxu1 %v2067_v61  ;;  %1926 = vmatprep.subr.bf16.mxu0 %v2074_v62 }
  0x88   : > { %1211 = vmatmul.mubr.bf16.gmra.mxu0 %v2058_v63  ;;  %1954 = vmatprep.subr.bf16.mxu1 %v2074_v62 }
  0x89   : > { %1308 = vmatmul.mubr.bf16.gmra.mxu1 %v2059_v0  ;;  %1218 = vmatprep.mubr.bf16.mxu0 %v2061_v1 }
  0x8a   : > { %1315 = vmatprep.mubr.bf16.mxu1 %v2063_v2  ;;  %1927 = vmatpush3.bf16.msra.mxu0 %v2074_v62 }
  0x8b   : > { %1962 = vmatpush3.bf16.msra.mxu1 %v2074_v62  ;;  %1928 = vmatprep.subr.bf16.mxu0 %v2081_v3 }
  0x8c   : > { %1955 = vmatprep.subr.bf16.mxu1 %v2081_v3 }
  0x8e   : > { %1929 = vmatpush3.bf16.msra.mxu0 %v2081_v3 }
  0x8f   : > { %1963 = vmatpush3.bf16.msra.mxu1 %v2081_v3  ;;  %1930 = vmatprep.subr.bf16.mxu0 %v2088_v4 }
  0x90   : > { %1219 = vmatmul.mubr.bf16.gmra.mxu0 %v2065_v5  ;;  %1956 = vmatprep.subr.bf16.mxu1 %v2088_v4 }
  0x91   : > { %1316 = vmatmul.mubr.bf16.gmra.mxu1 %v2066_v6  ;;  %1226 = vmatprep.mubr.bf16.mxu0 %v2068_v7 }
  0x92   : > { %1323 = vmatprep.mubr.bf16.mxu1 %v2070_v8  ;;  %1931 = vmatpush3.bf16.msra.mxu0 %v2088_v4 }
  0x93   : > { %1964 = vmatpush3.bf16.msra.mxu1 %v2088_v4  ;;  %1932 = vmatprep.subr.bf16.mxu0 %v2095_v9 }
  0x94   : > { %1957 = vmatprep.subr.bf16.mxu1 %v2095_v9 }
  0x96   : > { %1933 = vmatpush3.bf16.msra.mxu0 %v2095_v9 }
  0x97   : > { %1965 = vmatpush3.bf16.msra.mxu1 %v2095_v9 }
  0x98   : > { %1227 = vmatmul.mubr.bf16.gmra.mxu0 %v2072_v10 }
  0x99   : > { %1324 = vmatmul.mubr.bf16.gmra.mxu1 %v2073_v11  ;;  %1234 = vmatprep.mubr.bf16.mxu0 %v2075_v12 }
  0x9a   : > { %1331 = vmatprep.mubr.bf16.mxu1 %v2077_v13 }
  0xa0   : > { %1235 = vmatmul.mubr.bf16.gmra.mxu0 %v2079_v14 }
  0xa1   : > { %1332 = vmatmul.mubr.bf16.gmra.mxu1 %v2080_v15  ;;  %1242 = vmatprep.mubr.bf16.mxu0 %v2082_v16 }
  0xa2   : > { %1339 = vmatprep.mubr.bf16.mxu1 %v2084_v17 }
  0xa8   : > { %1243 = vmatmul.mubr.bf16.gmra.mxu0 %v2086_v18 }
  0xa9   : > { %1340 = vmatmul.mubr.bf16.gmra.mxu1 %v2087_v19  ;;  %1250 = vmatprep.mubr.bf16.mxu0 %v2089_v20 }
  0xaa   : > { %1347 = vmatprep.mubr.bf16.mxu1 %v2091_v21 }
  0xb0   : > { %1251 = vmatmul.mubr.bf16.gmra.mxu0 %v2093_v22  ;;  %v2598_v22 = vld [vmem:[%s576_s26] ss:$0 sm:$0xff] }
  0xb1   : > { %1348 = vmatmul.mubr.bf16.gmra.mxu1 %v2094_v23  ;;  %1934 = vmatprep.mubr.bf16.mxu0 %v2096_v24 }
  0xb2   : > { %1942 = vmatprep.mubr.bf16.mxu1 %v2097_v25 }
  0xb8   : > { %1935 = vmatmul.mubr.bf16.vlgmr.msra.gmra.mxu0 %v2098_v26 }
  0xb9   : > { %1943 = vmatmul.mubr.bf16.vlgmr.msra.gmra.mxu1 %v2099_v27  ;;  %1938 = vmatprep.mubr.bf16.mxu0 %v2100_v28 }
  0xba   : > { %1946 = vmatprep.mubr.bf16.mxu1 %v2101_v29 }
  0xc0   : > { %1939 = vmatmul.mubr.bf16.gmra.mxu0 %v2102_v30 }
  0xc1   : > { %1947 = vmatmul.mubr.bf16.gmra.mxu1 %v2103_v31 }
 0x138   : > { %v1790_v32 = vpop.f32.mrf.mxu0 }
 0x139   : > { %v2543_v33 = vpop.f32.mrf.mxu1 }
 0x13a   : > { %v1791_v34 = vpop.f32.mrf.mxu0 }
 0x13b   : > { %v2545_v35 = vpop.f32.mrf.mxu1  ;;  %v1792_v20 = vadd.f32 %v1791_v34, %v1790_v32 }
 0x13c   : > { %v1793_v36 = vpop.f32.mrf.mxu0  ;;  %v1856_v32 = vadd.f32 %v2545_v35, %v2543_v33 }
 0x13d   : > { %v2547_v37 = vpop.f32.mrf.mxu1  ;;  %v1197_v30 = vadd.f32 %v1792_v20, %v2598_v22 }
 0x13e   : > { %v1794_v38 = vpop.f32.mrf.mxu0 }
 0x13f   : > { %v2549_v39 = vpop.f32.mrf.mxu1  ;;  %v1795_v23 = vadd.f32 %v1794_v38, %v1793_v36 }
 0x140   : > { %v1796_v40 = vpop.f32.mrf.mxu0  ;;  %v1859_v36 = vadd.f32 %v2549_v39, %v2547_v37  ;;  %v1294_v37 = vadd.f32 %v1856_v32, %v1197_v30 }
 0x141   : > { %v2551_v41 = vpop.f32.mrf.mxu1  ;;  %v1200_v34 = vadd.f32 %v1795_v23, %v2598_v22 }
 0x142   : > { %v1797_v42 = vpop.f32.mrf.mxu0 }
 0x143   : > { %v2553_v43 = vpop.f32.mrf.mxu1  ;;  %v1798_v25 = vadd.f32 %v1797_v42, %v1796_v40 }
 0x144   : > { %v1799_v44 = vpop.f32.mrf.mxu0  ;;  %v1862_v33 = vadd.f32 %v2553_v43, %v2551_v41 }
 0x145   : > { %v2555_v45 = vpop.f32.mrf.mxu1  ;;  %v1205_v38 = vadd.f32 %v1798_v25, %v2598_v22 }
 0x146   : > { %v1800_v46 = vpop.f32.mrf.mxu0 }
 0x147   : > { %v2557_v47 = vpop.f32.mrf.mxu1  ;;  %v1801_v27 = vadd.f32 %v1800_v46, %v1799_v44 }
 0x148   : > { %v1802_v48 = vpop.f32.mrf.mxu0  ;;  %v1865_v39 = vadd.f32 %v2557_v47, %v2555_v45 }
 0x149   : > { %v2559_v49 = vpop.f32.mrf.mxu1  ;;  %v1208_v46 = vadd.f32 %v1801_v27, %v2598_v22 }
 0x14a   : > { %v1803_v50 = vpop.f32.mrf.mxu0 }
 0x14b   : > { %v2561_v51 = vpop.f32.mrf.mxu1  ;;  %v1804_v28 = vadd.f32 %v1803_v50, %v1802_v48  ;;  %v1305_v47 = vadd.f32 %v1865_v39, %v1208_v46 }
 0x14c   : > { %v1805_v52 = vpop.f32.mrf.mxu0 }
 0x14d   : > { %v2563_v53 = vpop.f32.mrf.mxu1  ;;  %v1213_v48 = vadd.f32 %v1804_v28, %v2598_v22 }
 0x14e   : > { %2724 = vst [vmem:[#allocation4_spill] sm:$0xff] %v2563_v53  ;;  %v1806_v54 = vpop.f32.mrf.mxu0 }
 0x14f   : > { %v2565_v55 = vpop.f32.mrf.mxu1  ;;  %v1807_v50 = vadd.f32 %v1806_v54, %v1805_v52  ;;  %v1297_v52 = vadd.f32 %v1859_v36, %v1200_v34 }
 0x150   : > { %2725 = vst [vmem:[#allocation5_spill] sm:$0xff] %v2565_v55  ;;  %v1808_v56 = vpop.f32.mrf.mxu0 }
 0x151   : > { %v2567_v57 = vpop.f32.mrf.mxu1 }
 0x152   : > { %v1809_v58 = vpop.f32.mrf.mxu0 }
 0x153   : > { %v2569_v59 = vpop.f32.mrf.mxu1  ;;  %v1810_v40 = vadd.f32 %v1809_v58, %v1808_v56  ;;  %v1868_v56 = vadd.f32 %v2561_v51, %v2559_v49 }
 0x154   : > { %v2571_v60 = vpop.f32.mrf.mxu0  ;;  %v1874_v51 = vadd.f32 %v2569_v59, %v2567_v57 }
 0x155   : > { %v2573_v61 = vpop.f32.mrf.mxu1  ;;  %v1221_v54 = vadd.f32 %v1810_v40, %v2598_v22  ;;  %v2634_v49 = vadd.f32 %v1868_v56, %v1213_v48 }
 0x156   : > { %v2575_v62 = vpop.f32.mrf.mxu0 }
 0x157   : > { %v2577_v63 = vpop.f32.mrf.mxu1  ;;  %v1813_v32 = vadd.f32 %v2575_v62, %v2571_v60  ;;  %v1318_v40 = vadd.f32 %v1874_v51, %v1221_v54  ;;  %v2726_v51 = vld [vmem:[#allocation4_spill] sm:$0xff] }
 0x158   : > { %v1814_v0 = vpop.f32.mrf.mxu0  ;;  %v1877_v54 = vadd.f32 %v2577_v63, %v2573_v61 }
 0x159   : > { %v2579_v1 = vpop.f32.mrf.mxu1 }
 0x15a   : > { %v1815_v2 = vpop.f32.mrf.mxu0 }
 0x15b   : > { %v2581_v3 = vpop.f32.mrf.mxu1  ;;  %v1816_v42 = vadd.f32 %v1815_v2, %v1814_v0 }
 0x15c   : > { %v1817_v4 = vpop.f32.mrf.mxu0 }
 0x15d   : > { %v2583_v5 = vpop.f32.mrf.mxu1  ;;  %v1229_v2 = vadd.f32 %v1816_v42, %v2598_v22 }
 0x15e   : > { %v1818_v6 = vpop.f32.mrf.mxu0 }
 0x15f   : > { %v2585_v7 = vpop.f32.mrf.mxu1  ;;  %v1819_v58 = vadd.f32 %v1818_v6, %v1817_v4  ;;  %v1880_v4 = vadd.f32 %v2581_v3, %v2579_v1 }
 0x160   : > { %v1820_v8 = vpop.f32.mrf.mxu0  ;;  %v1883_v57 = vadd.f32 %v2585_v7, %v2583_v5 }
 0x161   : > { %v1884_v9 = vpop.f32.mrf.mxu1  ;;  %v1232_v25 = vadd.f32 %v1819_v58, %v2598_v22 }
 0x162   : > { %v1821_v10 = vpop.f32.mrf.mxu0 }
 0x163   : > { %v1885_v11 = vpop.f32.mrf.mxu1  ;;  %v1822_v31 = vadd.f32 %v1821_v10, %v1820_v8  ;;  %v1329_v7 = vadd.f32 %v1883_v57, %v1232_v25 }
 0x164   : > { %v1823_v12 = vpop.f32.mrf.mxu0  ;;  %v1886_v41 = vadd.f32 %v1885_v11, %v1884_v9 }
 0x165   : > { %v1887_v13 = vpop.f32.mrf.mxu1  ;;  %v1237_v35 = vadd.f32 %v1822_v31, %v2598_v22 }
 0x166   : > { %v1824_v14 = vpop.f32.mrf.mxu0 }
 0x167   : > { %v1888_v15 = vpop.f32.mrf.mxu1  ;;  %v1825_v8 = vadd.f32 %v1824_v14, %v1823_v12  ;;  %v1302_v12 = vadd.f32 %v1862_v33, %v1205_v38  ;;  %v2629_v14 = vadd.f32 %v1807_v50, %v2598_v22  ;;  %v1334_v11 = vadd.f32 %v1886_v41, %v1237_v35 }
 0x168   : > { %v1826_v16 = vpop.f32.mrf.mxu0  ;;  %v1889_v27 = vadd.f32 %v1888_v15, %v1887_v13  ;;  %v1326_v38 = vadd.f32 %v1880_v4, %v1229_v2  ;;  %v1224_v35 = vadd.f32 %v1813_v32, %v2598_v22  ;;  %v2727_v4 = vld [vmem:[#allocation5_spill] sm:$0xff] }
 0x169   : > { %v2589_v17 = vpop.f32.mrf.mxu1  ;;  %v1240_v23 = vadd.f32 %v1825_v8, %v2598_v22 }
 0x16a   : > { %v1827_v18 = vpop.f32.mrf.mxu0 }
 0x16b   : > { %v2594_v19 = vpop.f32.mrf.mxu1  ;;  %v1828_v28 = vadd.f32 %v1827_v18, %v1826_v16  ;;  %v1337_v3 = vadd.f32 %v1889_v27, %v1240_v23 }
 0x16c   : > { %v2596_v21 = vpop.f32.mrf.mxu0 }
 0x16d   : > { %v2600_v24 = vpop.f32.mrf.mxu1 }
 0x16e   : > { %v2602_v26 = vpop.f32.mrf.mxu0 }
 0x16f   : > { %v2604_v29 = vpop.f32.mrf.mxu1  ;;  %v1831_v46 = vadd.f32 %v2602_v26, %v2596_v21 }
 0x170   : > { %v1832_v55 = vpop.f32.mrf.mxu0 }
 0x171   : > { %v2610_v53 = vpop.f32.mrf.mxu1 }
 0x172   : > { %v1833_v44 = vpop.f32.mrf.mxu0 }
 0x173   : > { %v1897_v10 = vpop.f32.mrf.mxu1  ;;  %v1834_v6 = vadd.f32 %v1833_v44, %v1832_v55  ;;  %v1245_v44 = vadd.f32 %v1828_v28, %v2598_v22 }
 0x174   : > { %v1835_v20 = vpop.f32.mrf.mxu0  ;;  %v1898_v48 = vadd.f32 %v1897_v10, %v2610_v53 }
 0x175   : > { %v2624_v0 = vpop.f32.mrf.mxu1  ;;  %v1253_v42 = vadd.f32 %v1834_v6, %v2598_v22  ;;  %v1871_v6 = vadd.f32 %v2727_v4, %v2726_v51 }
 0x176   : > { %v1836_v43 = vpop.f32.mrf.mxu0 }
 0x177   : > { %v1900_v45 = vpop.f32.mrf.mxu1  ;;  %v1837_v13 = vadd.f32 %v1836_v43, %v1835_v20  ;;  %v1892_v20 = vadd.f32 %v2594_v19, %v2589_v17  ;;  %v1350_v10 = vadd.f32 %v1898_v48, %v1253_v42 }
 0x178   : > { %v1936_v9 = vpop.f32.mrf.mxu0  ;;  %v1901_v43 = vadd.f32 %v1900_v45, %v2624_v0 }
 0x179   : > { %v1399_v30 = vadd.f32 %v1936_v9, %v1302_v12  ;;  %v1944_v31 = vpop.f32.mrf.mxu1  ;;  %v1256_v58 = vadd.f32 %v1837_v13, %v2598_v22  ;;  %v1342_v19 = vadd.f32 %v1892_v20, %v1245_v44 }
 0x17a   : > { %v1431_v34 = vadd.f32 %v1944_v31, %v1334_v11  ;;  %v1390_v36 = vpop.f32.mrf.mxu0  ;;  %v1321_v11 = vadd.f32 %v1877_v54, %v1224_v35 }
 0x17b   : > { %v1455_v59 = vmax.f32 %v1399_v30, 0.0  ;;  %v1391_v55 = vadd.f32 %v1390_v36, %v1294_v37  ;;  %v1422_v1 = vpop.f32.mrf.mxu1  ;;  %v1353_v27 = vadd.f32 %v1901_v43, %v1256_v58 }
 0x17c   : > { %v1463_v15 = vmax.f32 %v1431_v34, 0.0  ;;  %v1423_v16 = vadd.f32 %v1422_v1, %v1326_v38  ;;  %v1937_v18 = vpop.f32.mrf.mxu0 }
 0x17d   : > { %1471 = vst [vmem:[%s2647_s12 + $0x10] sm:$0xff] %v1455_v59  ;;  %v1453_v60 = vmax.f32 %v1391_v55, 0.0  ;;  %v1402_v62 = vadd.f32 %v1937_v18, %v1305_v47  ;;  %v1945_v5 = vpop.f32.mrf.mxu1 }
 0x17e   : > { %1479 = vst [vmem:[%s2647_s12 + $0x50] sm:$0xff] %v1463_v15  ;;  %v1461_v50 = vmax.f32 %v1423_v16, 0.0  ;;  %v1434_v8 = vadd.f32 %v1945_v5, %v1337_v3  ;;  %v1393_v33 = vpop.f32.mrf.mxu0 }
 0x17f   : > { %1469 = vst [vmem:[%s2647_s12] sm:$0xff] %v1453_v60  ;;  %v1456_v37 = vmax.f32 %v1402_v62, 0.0  ;;  %v1394_v39 = vadd.f32 %v1393_v33, %v1297_v52  ;;  %v1425_v56 = vpop.f32.mrf.mxu1  ;;  %v1248_v52 = vadd.f32 %v1831_v46, %v2598_v22  ;;  %v1895_v22 = vadd.f32 %v2604_v29, %v2600_v24 }
 0x180   : > { %1477 = vst [vmem:[%s2647_s12 + $0x40] sm:$0xff] %v1461_v50  ;;  %v1464_v21 = vmax.f32 %v1434_v8, 0.0  ;;  %v1426_v53 = vadd.f32 %v1425_v56, %v1329_v7  ;;  %v1940_v26 = vpop.f32.mrf.mxu0 }
 0x181   : > { %1472 = vst [vmem:[%s2647_s12 + $0x18] sm:$0xff] %v1456_v37  ;;  %v1454_v2 = vmax.f32 %v1394_v39, 0.0  ;;  %v1415_v41 = vadd.f32 %v1940_v26, %v1318_v40  ;;  %v1948_v17 = vpop.f32.mrf.mxu1  ;;  %v1345_v34 = vadd.f32 %v1895_v22, %v1248_v52 }
 0x182   : > { %1480 = vst [vmem:[%s2647_s12 + $0x58] sm:$0xff] %v1464_v21  ;;  %v1462_v12 = vmax.f32 %v1426_v53, 0.0  ;;  %v1447_v23 = vadd.f32 %v1948_v17, %v1350_v10  ;;  %v1406_v47 = vpop.f32.mrf.mxu0 }
 0x183   : > { %1470 = vst [vmem:[%s2647_s12 + $0x8] sm:$0xff] %v1454_v2  ;;  %v1459_v61 = vmax.f32 %v1415_v41, 0.0  ;;  %v1407_v63 = vadd.f32 %v1406_v47, %v2634_v49  ;;  %v1438_v9 = vpop.f32.mrf.mxu1  ;;  %v1313_v49 = vadd.f32 %v1871_v6, %v2629_v14 }
 0x184   : > { %1478 = vst [vmem:[%s2647_s12 + $0x48] sm:$0xff] %v1462_v12  ;;  %v1467_v0 = vmax.f32 %v1447_v23, 0.0  ;;  %v1439_v45 = vadd.f32 %v1438_v9, %v1342_v19  ;;  %v1941_v25 = vpop.f32.mrf.mxu0  ;;  %v1559_v42 = vld [vmem:[%s2647_s12 + $0x10] sm:$0xff] (%p2199_p6) }
 0x185   : > { %1475 = vst [vmem:[%s2647_s12 + $0x30] sm:$0xff] %v1459_v61  ;;  %v1457_v28 = vmax.f32 %v1407_v63, 0.0  ;;  %v1418_v30 = vadd.f32 %v1941_v25, %v1321_v11  ;;  %v1949_v31 = vpop.f32.mrf.mxu1  ;;  %1560 = vst [vmem:[%s1496_s4 + $0x20] sm:$0xff] (%p2199_p6), %v1559_v42  ;;  %v1575_v5 = vld [vmem:[%s2647_s12 + $0x50] sm:$0xff] (%p2199_p6) }
 0x186   : > { %1483 = vst [vmem:[%s2647_s12 + $0x70] sm:$0xff] %v1467_v0  ;;  %v1465_v32 = vmax.f32 %v1439_v45, 0.0  ;;  %v1450_v24 = vadd.f32 %v1949_v31, %v1353_v27  ;;  %v1409_v29 = vpop.f32.mrf.mxu0  ;;  %v1555_v14 = vld [vmem:[%s2647_s12] sm:$0xff] (%p2199_p6)  ;;  %1576 = vst [vmem:[%s1496_s4 + $0xa0] sm:$0xff] (%p2199_p6), %v1575_v5 }
 0x187   : > { %1473 = vst [vmem:[%s2647_s12 + $0x20] sm:$0xff] %v1457_v28  ;;  %v1460_v36 = vmax.f32 %v1418_v30, 0.0  ;;  %v1410_v38 = vadd.f32 %v1409_v29, %v1313_v49  ;;  %v1441_v40 = vpop.f32.mrf.mxu1  ;;  %1556 = vst [vmem:[%s1496_s4] sm:$0xff] (%p2199_p6), %v1555_v14  ;;  %v1571_v60 = vld [vmem:[%s2647_s12 + $0x40] sm:$0xff] (%p2199_p6) }
 0x188   : > { %1481 = vst [vmem:[%s2647_s12 + $0x60] sm:$0xff] %v1465_v32  ;;  %v1468_v57 = vmax.f32 %v1450_v24, 0.0  ;;  %v1442_v59 = vadd.f32 %v1441_v40, %v1345_v34  ;;  %1491 = sbr.rel (!%p2199_p6) target bundleno = 405 (0x195), region = 77  ;;  %v1561_v13 = vld [vmem:[%s2647_s12 + $0x18] sm:$0xff] (%p2199_p6)  ;;  %1572 = vst [vmem:[%s1496_s4 + $0x80] sm:$0xff] (%p2199_p6), %v1571_v60 }
 0x189   : > { %1476 = vst [vmem:[%s2647_s12 + $0x38] sm:$0xff] %v1460_v36  ;;  %v1458_v55 = vmax.f32 %v1410_v38, 0.0  ;;  %1562 = vst [vmem:[%s1496_s4 + $0x30] sm:$0xff] (%p2199_p6), %v1561_v13  ;;  %v1577_v7 = vld [vmem:[%s2647_s12 + $0x58] sm:$0xff] (%p2199_p6) }
 0x18a   : > { %1484 = vst [vmem:[%s2647_s12 + $0x78] sm:$0xff] %v1468_v57  ;;  %v1466_v1 = vmax.f32 %v1442_v59, 0.0  ;;  %v1557_v3 = vld [vmem:[%s2647_s12 + $0x8] sm:$0xff] (%p2199_p6)  ;;  %1578 = vst [vmem:[%s1496_s4 + $0xb0] sm:$0xff] (%p2199_p6), %v1577_v7 }
 0x18b   : > { %1474 = vst [vmem:[%s2647_s12 + $0x28] sm:$0xff] %v1458_v55  ;;  %1558 = vst [vmem:[%s1496_s4 + $0x10] sm:$0xff] (%p2199_p6), %v1557_v3  ;;  %v1573_v62 = vld [vmem:[%s2647_s12 + $0x48] sm:$0xff] (%p2199_p6) }
 0x18c   : > { %1482 = vst [vmem:[%s2647_s12 + $0x68] sm:$0xff] %v1466_v1  ;;  %v1567_v18 = vld [vmem:[%s2647_s12 + $0x30] sm:$0xff] (%p2199_p6)  ;;  %1574 = vst [vmem:[%s1496_s4 + $0x90] sm:$0xff] (%p2199_p6), %v1573_v62 }
 0x18d   : > { %1568 = vst [vmem:[%s1496_s4 + $0x60] sm:$0xff] %v1567_v18  ;;  %v1583_v50 = vld [vmem:[%s2647_s12 + $0x70] sm:$0xff] }
 0x18e   : > { %v1563_v15 = vld [vmem:[%s2647_s12 + $0x20] sm:$0xff]  ;;  %1584 = vst [vmem:[%s1496_s4 + $0xe0] sm:$0xff] %v1583_v50 }
 0x18f   : > { %1564 = vst [vmem:[%s1496_s4 + $0x40] sm:$0xff] %v1563_v15  ;;  %v1579_v46 = vld [vmem:[%s2647_s12 + $0x60] sm:$0xff] }
 0x190   : > { %v1569_v44 = vld [vmem:[%s2647_s12 + $0x38] sm:$0xff]  ;;  %1580 = vst [vmem:[%s1496_s4 + $0xc0] sm:$0xff] %v1579_v46 }
 0x191   : > { %1570 = vst [vmem:[%s1496_s4 + $0x70] sm:$0xff] %v1569_v44  ;;  %v1585_v8 = vld [vmem:[%s2647_s12 + $0x78] sm:$0xff] }
 0x192   : > { %v1565_v16 = vld [vmem:[%s2647_s12 + $0x28] sm:$0xff]  ;;  %1586 = vst [vmem:[%s1496_s4 + $0xf0] sm:$0xff] %v1585_v8 }
 0x193   : > { %1566 = vst [vmem:[%s1496_s4 + $0x50] sm:$0xff] %v1565_v16  ;;  %v1581_v48 = vld [vmem:[%s2647_s12 + $0x68] sm:$0xff] }
 0x194   : > { %1582 = vst [vmem:[%s1496_s4 + $0xd0] sm:$0xff] %v1581_v48 }
 0x195 PF: > { %s13_s16 = sadd.s32 1, %s2142_s16   ;;  %s2728_s12 = smov %s2130_s13 }
 0x196   : > { %p10_p12 = scmp.ge.s32.totalorder %s13_s16, 4   ;;  %s2729_s13 = smov %s2204_s22 }
 0x197   : > { %s2730_s14 = smov %s2138_s15  ;;  %s2731_s15 = smov %s2733_s17 }
 0x198   :  { %12 = sbr.rel (!%p10_p12) target bundleno = 3 (0x3), region = 152 }

// kernel: alexnet_forward.5
= control target key start
LH: loop header
LB: loop body
LE: loop exit
PB: predicated region body
PF: predicated region fallthrough
CT: control target
= control target key end

     0   :  { %12 = vsyncpa [#allocation3], 0  ;;  %s12832_s24 = smov [#allocation2]   ;;  %s16176_s0 = inlined_call_operand.vmem [shape: bf16[8,1792], index: 0, kind: input, shape index: {}]   ;;  %s16177_s1 = inlined_call_operand.vmem [shape: bf16[1792,1024], index: 1, kind: input, shape index: {}]   ;;  %s16178_s2 = inlined_call_operand.vmem [shape: f32[1,1024], index: 2, kind: input, shape index: {}]   ;;  %s16179_s3 = inlined_call_operand.hbm [shape: bf16[1024,1024], index: 3, kind: input, shape index: {}]   ;;  %s16180_s4 = inlined_call_operand.vmem [shape: f32[1,1024], index: 4, kind: input, shape index: {}]   ;;  %s16181_s5 = inlined_call_operand.vmem [shape: bf16[1024,128], index: 5, kind: input, shape index: {}]   ;;  %s16182_s6 = inlined_call_operand.vmem [shape: f32[1,128], index: 6, kind: input, shape index: {}]   ;;  %s16183_s7 = inlined_call_operand.vmem [shape: f32[8,128], index: 7, kind: output, shape index: {}]  }
   0x1   :  { %s24_s25 = sshll.u32 %s12832_s24, 4  ;;  %s25_s25 = int_to_ptr.vmem [resolvable:$true] %s24_s25 }
   0x2   :  { %s12818_s26 = scalar_lea.vmem %s25_s25, 65536  ;;  %p12823_p1 = scmp.lt.s32.totalorder %s25_s25, %s25_s25 }
   0x3   :  { %p12819_p0 = scmp.ne.s32.totalorder %s25_s25, %s12818_s26  ;;  %p12824_p2 = scmp.lt.s32.totalorder %s12818_s26, %s12818_s26 }
   0x5   :  { %p12825_p3 = por %p12824_p2, %p12823_p1 }
   0x7   :  { %p12826_p4 = pnand %p12825_p3, %p12819_p0 }
   0x9   :  { %12829 = shalt.err (!%p12826_p4)
}
   0xa   :  { %s12833_s27 = smov 512   ;;  %s12834_s28 = smov 32  }
   0xb   :  { %30 = dma.hbm_to_vmem [thread:$0]  %s16179_s3, 65536, %s25_s25, [#allocation3], %s12833_s27, %s12833_s27, %s12834_s28  }
   0xc   :  { %12830 = dma.done.wait [#allocation3], 65536  }
   0xd   :  { %12831 = vsyncadd [#allocation3], 4294901760  ;;  %v104_v0 = vld [vmem:[%s16177_s1 + $0x1c0] sm:$0xff]  ;;  %v12970_v54 = vld [vmem:[%s16176_s0 + $0x8] sm:$0xff] }
   0xe   :  { %v108_v1 = vld [vmem:[%s16177_s1 + $0x1e0] sm:$0xff]  ;;  %v12984_v59 = vcombine.high %v12970_v54, %v12970_v54 }
   0xf   :  { %v232_v2 = vld [vmem:[%s16177_s1 + $0x5c0] sm:$0xff]  ;;  %v11221_v3 = vcombine.high %v104_v0, %v108_v1  ;;  %v11220_v5 = vcombine.low %v104_v0, %v108_v1 }
  0x10   :  { %v236_v4 = vld [vmem:[%s16177_s1 + $0x5e0] sm:$0xff]  ;;  %5588 = vmatprep.mubr.bf16.mxu1 %v12984_v59 }
  0x11   :  { %v96_v6 = vld [vmem:[%s16177_s1 + $0x180] sm:$0xff]  ;;  %v11349_v8 = vcombine.high %v232_v2, %v236_v4  ;;  %v11348_v9 = vcombine.low %v232_v2, %v236_v4  ;;  %5515 = vmatprep.subr.bf16.mxu0 %v11221_v3 }
  0x12   :  { %v100_v7 = vld [vmem:[%s16177_s1 + $0x1a0] sm:$0xff]  ;;  %5516 = vmatpush1.bf16.msra.mxu0 %v11220_v5 }
  0x13   :  { %v11213_v10 = vcombine.high %v96_v6, %v100_v7  ;;  %v224_v11 = vld [vmem:[%s16177_s1 + $0x580] sm:$0xff]  ;;  %5556 = vmatprep.subr.bf16.mxu1 %v11349_v8  ;;  %v11212_v18 = vcombine.low %v96_v6, %v100_v7 }
  0x14   :  { %v228_v12 = vld [vmem:[%s16177_s1 + $0x5a0] sm:$0xff]  ;;  %5557 = vmatpush1.bf16.msra.mxu1 %v11348_v9 }
  0x15   :  { %v88_v13 = vld [vmem:[%s16177_s1 + $0x140] sm:$0xff]  ;;  %v11341_v14 = vcombine.high %v224_v11, %v228_v12  ;;  %5517 = vmatprep.subr.bf16.mxu0 %v11213_v10  ;;  %v11340_v19 = vcombine.low %v224_v11, %v228_v12 }
  0x16   :  { %v92_v15 = vld [vmem:[%s16177_s1 + $0x160] sm:$0xff]  ;;  %5518 = vmatpush1.bf16.msra.mxu0 %v11212_v18 }
  0x17   :  { %v216_v16 = vld [vmem:[%s16177_s1 + $0x540] sm:$0xff]  ;;  %v11205_v20 = vcombine.high %v88_v13, %v92_v15  ;;  %5558 = vmatprep.subr.bf16.mxu1 %v11341_v14  ;;  %v11204_v26 = vcombine.low %v88_v13, %v92_v15 }
  0x18   :  { %v220_v17 = vld [vmem:[%s16177_s1 + $0x560] sm:$0xff]  ;;  %5559 = vmatpush1.bf16.msra.mxu1 %v11340_v19 }
  0x19   :  { %v11333_v21 = vcombine.high %v216_v16, %v220_v17  ;;  %v80_v22 = vld [vmem:[%s16177_s1 + $0x100] sm:$0xff]  ;;  %5519 = vmatprep.subr.bf16.mxu0 %v11205_v20  ;;  %v11332_v27 = vcombine.low %v216_v16, %v220_v17 }
  0x1a   :  { %v84_v23 = vld [vmem:[%s16177_s1 + $0x120] sm:$0xff]  ;;  %5520 = vmatpush1.bf16.msra.mxu0 %v11204_v26 }
  0x1b   :  { %v208_v24 = vld [vmem:[%s16177_s1 + $0x500] sm:$0xff]  ;;  %v11197_v28 = vcombine.high %v80_v22, %v84_v23  ;;  %5560 = vmatprep.subr.bf16.mxu1 %v11333_v21  ;;  %v11196_v34 = vcombine.low %v80_v22, %v84_v23 }
  0x1c   :  { %v212_v25 = vld [vmem:[%s16177_s1 + $0x520] sm:$0xff]  ;;  %5561 = vmatpush1.bf16.msra.mxu1 %v11332_v27 }
  0x1d   :  { %v11325_v29 = vcombine.high %v208_v24, %v212_v25  ;;  %v72_v30 = vld [vmem:[%s16177_s1 + $0xc0] sm:$0xff]  ;;  %5521 = vmatprep.subr.bf16.mxu0 %v11197_v28  ;;  %v11324_v35 = vcombine.low %v208_v24, %v212_v25 }
  0x1e   :  { %v76_v31 = vld [vmem:[%s16177_s1 + $0xe0] sm:$0xff]  ;;  %5522 = vmatpush1.bf16.msra.mxu0 %v11196_v34 }
  0x1f   :  { %v200_v32 = vld [vmem:[%s16177_s1 + $0x4c0] sm:$0xff]  ;;  %v11189_v36 = vcombine.high %v72_v30, %v76_v31  ;;  %5562 = vmatprep.subr.bf16.mxu1 %v11325_v29  ;;  %v11188_v42 = vcombine.low %v72_v30, %v76_v31 }
  0x20   :  { %v204_v33 = vld [vmem:[%s16177_s1 + $0x4e0] sm:$0xff]  ;;  %5563 = vmatpush1.bf16.msra.mxu1 %v11324_v35 }
  0x21   :  { %v11317_v37 = vcombine.high %v200_v32, %v204_v33  ;;  %v64_v38 = vld [vmem:[%s16177_s1 + $0x80] sm:$0xff]  ;;  %5523 = vmatprep.subr.bf16.mxu0 %v11189_v36  ;;  %v11316_v43 = vcombine.low %v200_v32, %v204_v33 }
  0x22   :  { %v68_v39 = vld [vmem:[%s16177_s1 + $0xa0] sm:$0xff]  ;;  %5524 = vmatpush1.bf16.msra.mxu0 %v11188_v42 }
  0x23   :  { %v192_v40 = vld [vmem:[%s16177_s1 + $0x480] sm:$0xff]  ;;  %v11181_v44 = vcombine.high %v64_v38, %v68_v39  ;;  %5564 = vmatprep.subr.bf16.mxu1 %v11317_v37  ;;  %v11180_v50 = vcombine.low %v64_v38, %v68_v39 }
  0x24   :  { %v196_v41 = vld [vmem:[%s16177_s1 + $0x4a0] sm:$0xff]  ;;  %5565 = vmatpush1.bf16.msra.mxu1 %v11316_v43 }
  0x25   :  { %v11309_v45 = vcombine.high %v192_v40, %v196_v41  ;;  %v56_v46 = vld [vmem:[%s16177_s1 + $0x40] sm:$0xff]  ;;  %5525 = vmatprep.subr.bf16.mxu0 %v11181_v44  ;;  %v11308_v51 = vcombine.low %v192_v40, %v196_v41 }
  0x26   :  { %v60_v47 = vld [vmem:[%s16177_s1 + $0x60] sm:$0xff]  ;;  %5526 = vmatpush1.bf16.msra.mxu0 %v11180_v50 }
  0x27   :  { %v184_v48 = vld [vmem:[%s16177_s1 + $0x440] sm:$0xff]  ;;  %v11173_v52 = vcombine.high %v56_v46, %v60_v47  ;;  %5566 = vmatprep.subr.bf16.mxu1 %v11309_v45  ;;  %v11172_v62 = vcombine.low %v56_v46, %v60_v47 }
  0x28   :  { %v188_v49 = vld [vmem:[%s16177_s1 + $0x460] sm:$0xff]  ;;  %5567 = vmatpush1.bf16.msra.mxu1 %v11308_v51 }
  0x29   :  { %v12965_v53 = vld [vmem:[%s16176_s0] sm:$0xff]  ;;  %v11301_v55 = vcombine.high %v184_v48, %v188_v49  ;;  %5527 = vmatprep.subr.bf16.mxu0 %v11173_v52  ;;  %v11300_v63 = vcombine.low %v184_v48, %v188_v49 }
  0x2a   :  { %v48_v56 = vld [vmem:[%s16177_s1] sm:$0xff]  ;;  %v12980_v58 = vcombine.high %v12965_v53, %v12965_v53  ;;  %5528 = vmatpush1.bf16.msra.mxu0 %v11172_v62 }
  0x2b   :  { %v52_v57 = vld [vmem:[%s16177_s1 + $0x20] sm:$0xff]  ;;  %5568 = vmatprep.subr.bf16.mxu1 %v11301_v55 }
  0x2c   :  { %v176_v60 = vld [vmem:[%s16177_s1 + $0x400] sm:$0xff]  ;;  %5547 = vmatprep.mubr.bf16.mxu0 %v12980_v58  ;;  %v11165_v0 = vcombine.high %v48_v56, %v52_v57  ;;  %v11164_v6 = vcombine.low %v48_v56, %v52_v57  ;;  %5569 = vmatpush1.bf16.msra.mxu1 %v11300_v63 }
  0x2d   :  { %v180_v61 = vld [vmem:[%s16177_s1 + $0x420] sm:$0xff] }
  0x2e   :  { %v11293_v1 = vcombine.high %v176_v60, %v180_v61  ;;  %v168_v2 = vld [vmem:[%s16177_s1 + $0x3c0] sm:$0xff]  ;;  %5529 = vmatprep.subr.bf16.mxu0 %v11165_v0  ;;  %v11292_v7 = vcombine.low %v176_v60, %v180_v61 }
  0x2f   :  { %v172_v3 = vld [vmem:[%s16177_s1 + $0x3e0] sm:$0xff]  ;;  %5530 = vmatpush1.bf16.msra.mxu0 %v11164_v6 }
  0x30   :  { %v296_v4 = vld [vmem:[%s16177_s1 + $0x7c0] sm:$0xff]  ;;  %v11285_v8 = vcombine.high %v168_v2, %v172_v3  ;;  %5570 = vmatprep.subr.bf16.mxu1 %v11293_v1  ;;  %v11284_v14 = vcombine.low %v168_v2, %v172_v3 }
  0x31   :  { %v300_v5 = vld [vmem:[%s16177_s1 + $0x7e0] sm:$0xff]  ;;  %5571 = vmatpush1.bf16.msra.mxu1 %v11292_v7 }
  0x32   :  { %v11413_v9 = vcombine.high %v296_v4, %v300_v5  ;;  %v160_v10 = vld [vmem:[%s16177_s1 + $0x380] sm:$0xff]  ;;  %5531 = vmatprep.subr.bf16.mxu0 %v11285_v8  ;;  %v11412_v15 = vcombine.low %v296_v4, %v300_v5 }
  0x33   :  { %v164_v11 = vld [vmem:[%s16177_s1 + $0x3a0] sm:$0xff]  ;;  %5532 = vmatpush2.bf16.msra.mxu0 %v11284_v14 }
  0x34   :  { %v288_v12 = vld [vmem:[%s16177_s1 + $0x780] sm:$0xff]  ;;  %v11277_v16 = vcombine.high %v160_v10, %v164_v11  ;;  %5572 = vmatprep.subr.bf16.mxu1 %v11413_v9  ;;  %v11276_v22 = vcombine.low %v160_v10, %v164_v11 }
  0x35   :  { %v292_v13 = vld [vmem:[%s16177_s1 + $0x7a0] sm:$0xff]  ;;  %5573 = vmatpush2.bf16.msra.mxu1 %v11412_v15 }
  0x36   :  { %v11405_v17 = vcombine.high %v288_v12, %v292_v13  ;;  %v152_v18 = vld [vmem:[%s16177_s1 + $0x340] sm:$0xff]  ;;  %5533 = vmatprep.subr.bf16.mxu0 %v11277_v16  ;;  %v11404_v23 = vcombine.low %v288_v12, %v292_v13  ;;  %v13110_v16 = vcombine.low %v12965_v53, %v12965_v53 }
  0x37   :  { %v156_v19 = vld [vmem:[%s16177_s1 + $0x360] sm:$0xff]  ;;  %5534 = vmatpush2.bf16.msra.mxu0 %v11276_v22 }
  0x38   :  { %v280_v20 = vld [vmem:[%s16177_s1 + $0x740] sm:$0xff]  ;;  %v11269_v24 = vcombine.high %v152_v18, %v156_v19  ;;  %5574 = vmatprep.subr.bf16.mxu1 %v11405_v17  ;;  %v11268_v30 = vcombine.low %v152_v18, %v156_v19  ;;  %v13121_v19 = vld [vmem:[%s16176_s0 + $0x10] sm:$0xff] }
  0x39   :  { %v284_v21 = vld [vmem:[%s16177_s1 + $0x760] sm:$0xff]  ;;  %5575 = vmatpush2.bf16.msra.mxu1 %v11404_v23 }
  0x3a   :  { %v11397_v25 = vcombine.high %v280_v20, %v284_v21  ;;  %v144_v26 = vld [vmem:[%s16177_s1 + $0x300] sm:$0xff]  ;;  %5535 = vmatprep.subr.bf16.mxu0 %v11269_v24  ;;  %v11396_v31 = vcombine.low %v280_v20, %v284_v21  ;;  %v13125_v20 = vcombine.low %v12970_v54, %v12970_v54  ;;  %v13130_v21 = vld [vmem:[%s16176_s0 + $0x18] sm:$0xff] }
  0x3b   :  { %v148_v27 = vld [vmem:[%s16177_s1 + $0x320] sm:$0xff]  ;;  %5536 = vmatpush2.bf16.msra.mxu0 %v11268_v30 }
  0x3c   :  { %v272_v28 = vld [vmem:[%s16177_s1 + $0x700] sm:$0xff]  ;;  %v11261_v32 = vcombine.high %v144_v26, %v148_v27  ;;  %5576 = vmatprep.subr.bf16.mxu1 %v11397_v25  ;;  %v11260_v38 = vcombine.low %v144_v26, %v148_v27  ;;  %v13143_v27 = vcombine.high %v13121_v19, %v13121_v19 }
  0x3d   :  { %v276_v29 = vld [vmem:[%s16177_s1 + $0x720] sm:$0xff]  ;;  %5577 = vmatpush2.bf16.msra.mxu1 %v11396_v31 }
  0x3e   :  { %v11389_v33 = vcombine.high %v272_v28, %v276_v29  ;;  %v136_v34 = vld [vmem:[%s16177_s1 + $0x2c0] sm:$0xff]  ;;  %5537 = vmatprep.subr.bf16.mxu0 %v11261_v32  ;;  %v11388_v39 = vcombine.low %v272_v28, %v276_v29  ;;  %v13151_v29 = vcombine.high %v13130_v21, %v13130_v21 }
  0x3f   :  { %v140_v35 = vld [vmem:[%s16177_s1 + $0x2e0] sm:$0xff]  ;;  %5538 = vmatpush2.bf16.msra.mxu0 %v11260_v38 }
  0x40   :  { %v264_v36 = vld [vmem:[%s16177_s1 + $0x6c0] sm:$0xff]  ;;  %v11253_v40 = vcombine.high %v136_v34, %v140_v35  ;;  %5578 = vmatprep.subr.bf16.mxu1 %v11389_v33  ;;  %v11252_v46 = vcombine.low %v136_v34, %v140_v35 }
  0x41   :  { %v268_v37 = vld [vmem:[%s16177_s1 + $0x6e0] sm:$0xff]  ;;  %5579 = vmatpush2.bf16.msra.mxu1 %v11388_v39 }
  0x42   :  { %v11381_v41 = vcombine.high %v264_v36, %v268_v37  ;;  %v128_v42 = vld [vmem:[%s16177_s1 + $0x280] sm:$0xff]  ;;  %5539 = vmatprep.subr.bf16.mxu0 %v11253_v40  ;;  %v11380_v47 = vcombine.low %v264_v36, %v268_v37 }
  0x43   :  { %v132_v43 = vld [vmem:[%s16177_s1 + $0x2a0] sm:$0xff]  ;;  %5540 = vmatpush2.bf16.msra.mxu0 %v11252_v46 }
  0x44   :  { %v256_v44 = vld [vmem:[%s16177_s1 + $0x680] sm:$0xff]  ;;  %v11245_v48 = vcombine.high %v128_v42, %v132_v43  ;;  %5580 = vmatprep.subr.bf16.mxu1 %v11381_v41  ;;  %v11244_v56 = vcombine.low %v128_v42, %v132_v43 }
  0x45   :  { %v260_v45 = vld [vmem:[%s16177_s1 + $0x6a0] sm:$0xff]  ;;  %5581 = vmatpush2.bf16.msra.mxu1 %v11380_v47 }
  0x46   :  { %v11373_v49 = vcombine.high %v256_v44, %v260_v45  ;;  %v120_v50 = vld [vmem:[%s16177_s1 + $0x240] sm:$0xff]  ;;  %5541 = vmatprep.subr.bf16.mxu0 %v11245_v48  ;;  %v11372_v57 = vcombine.low %v256_v44, %v260_v45 }
  0x47   :  { %v124_v51 = vld [vmem:[%s16177_s1 + $0x260] sm:$0xff]  ;;  %5542 = vmatpush2.bf16.msra.mxu0 %v11244_v56 }
  0x48   :  { %v248_v52 = vld [vmem:[%s16177_s1 + $0x640] sm:$0xff]  ;;  %v11237_v60 = vcombine.high %v120_v50, %v124_v51  ;;  %5582 = vmatprep.subr.bf16.mxu1 %v11373_v49  ;;  %v11236_v2 = vcombine.low %v120_v50, %v124_v51 }
  0x49   :  { %v252_v55 = vld [vmem:[%s16177_s1 + $0x660] sm:$0xff]  ;;  %5583 = vmatpush2.bf16.msra.mxu1 %v11372_v57 }
  0x4a   :  { %v11365_v61 = vcombine.high %v248_v52, %v252_v55  ;;  %v112_v62 = vld [vmem:[%s16177_s1 + $0x200] sm:$0xff]  ;;  %5543 = vmatprep.subr.bf16.mxu0 %v11237_v60  ;;  %v11364_v3 = vcombine.low %v248_v52, %v252_v55 }
  0x4b   :  { %v116_v63 = vld [vmem:[%s16177_s1 + $0x220] sm:$0xff]  ;;  %5544 = vmatpush2.bf16.msra.mxu0 %v11236_v2 }
  0x4c   :  { %v240_v0 = vld [vmem:[%s16177_s1 + $0x600] sm:$0xff]  ;;  %v11229_v4 = vcombine.high %v112_v62, %v116_v63  ;;  %5584 = vmatprep.subr.bf16.mxu1 %v11365_v61  ;;  %v11228_v10 = vcombine.low %v112_v62, %v116_v63 }
  0x4d   :  { %v244_v1 = vld [vmem:[%s16177_s1 + $0x620] sm:$0xff]  ;;  %5585 = vmatpush2.bf16.msra.mxu1 %v11364_v3 }
  0x4e   :  { %v11357_v5 = vcombine.high %v240_v0, %v244_v1  ;;  %v360_v6 = vld [vmem:[%s16177_s1 + $0x9c0] sm:$0xff]  ;;  %5545 = vmatprep.subr.bf16.mxu0 %v11229_v4  ;;  %v11356_v11 = vcombine.low %v240_v0, %v244_v1 }
  0x4f   :  { %v364_v7 = vld [vmem:[%s16177_s1 + $0x9e0] sm:$0xff]  ;;  %5546 = vmatpush2.bf16.msra.mxu0 %v11228_v10 }
  0x50   :  { %v488_v8 = vld [vmem:[%s16177_s1 + $0xdc0] sm:$0xff]  ;;  %v11477_v12 = vcombine.high %v360_v6, %v364_v7  ;;  %5586 = vmatprep.subr.bf16.mxu1 %v11357_v5  ;;  %v11476_v53 = vcombine.low %v360_v6, %v364_v7 }
  0x51   :  { %v492_v9 = vld [vmem:[%s16177_s1 + $0xde0] sm:$0xff]  ;;  %5587 = vmatpush2.bf16.msra.mxu1 %v11356_v11 }
  0x52   :  { %v11605_v13 = vcombine.high %v488_v8, %v492_v9  ;;  %v352_v14 = vld [vmem:[%s16177_s1 + $0x980] sm:$0xff]  ;;  %5597 = vmatprep.subr.bf16.mxu0 %v11477_v12  ;;  %v11604_v22 = vcombine.low %v488_v8, %v492_v9  ;;  %5548 = vmatmul.mubr.bf16.vlgmr.msra.gmra.mxu0 %v13110_v16 }
  0x53   :  { %v356_v15 = vld [vmem:[%s16177_s1 + $0x9a0] sm:$0xff]  ;;  %5598 = vmatpush1.bf16.msra.mxu0 %v11476_v53  ;;  %5629 = vmatprep.mubr.bf16.mxu0 %v13143_v27 }
  0x54   :  { %v480_v17 = vld [vmem:[%s16177_s1 + $0xd80] sm:$0xff]  ;;  %v11469_v23 = vcombine.high %v352_v14, %v356_v15  ;;  %5638 = vmatprep.subr.bf16.mxu1 %v11605_v13  ;;  %5589 = vmatmul.mubr.bf16.vlgmr.msra.gmra.mxu1 %v13125_v20  ;;  %v11468_v30 = vcombine.low %v352_v14, %v356_v15 }
  0x55   :  { %v484_v18 = vld [vmem:[%s16177_s1 + $0xda0] sm:$0xff]  ;;  %5639 = vmatpush1.bf16.msra.mxu1 %v11604_v22  ;;  %5670 = vmatprep.mubr.bf16.mxu1 %v13151_v29 }
  0x56   :  { %v11597_v24 = vcombine.high %v480_v17, %v484_v18  ;;  %v344_v25 = vld [vmem:[%s16177_s1 + $0x940] sm:$0xff]  ;;  %5599 = vmatprep.subr.bf16.mxu0 %v11469_v23  ;;  %v11596_v31 = vcombine.low %v480_v17, %v484_v18 }
  0x57   :  { %v348_v54 = vld [vmem:[%s16177_s1 + $0x960] sm:$0xff]  ;;  %5600 = vmatpush1.bf16.msra.mxu0 %v11468_v30 }
  0x58   :  { %v472_v26 = vld [vmem:[%s16177_s1 + $0xd40] sm:$0xff]  ;;  %v11461_v32 = vcombine.high %v344_v25, %v348_v54  ;;  %5640 = vmatprep.subr.bf16.mxu1 %v11597_v24  ;;  %v11460_v38 = vcombine.low %v344_v25, %v348_v54 }
  0x59   :  { %v476_v28 = vld [vmem:[%s16177_s1 + $0xd60] sm:$0xff]  ;;  %5641 = vmatpush1.bf16.msra.mxu1 %v11596_v31 }
  0x5a   :  { %v336_v33 = vld [vmem:[%s16177_s1 + $0x900] sm:$0xff]  ;;  %v11589_v36 = vcombine.high %v472_v26, %v476_v28  ;;  %5601 = vmatprep.subr.bf16.mxu0 %v11461_v32  ;;  %v11588_v39 = vcombine.low %v472_v26, %v476_v28 }
  0x5b   :  { %v340_v34 = vld [vmem:[%s16177_s1 + $0x920] sm:$0xff]  ;;  %5602 = vmatpush1.bf16.msra.mxu0 %v11460_v38 }
  0x5c   :  { %v464_v35 = vld [vmem:[%s16177_s1 + $0xd00] sm:$0xff]  ;;  %v11453_v40 = vcombine.high %v336_v33, %v340_v34  ;;  %5642 = vmatprep.subr.bf16.mxu1 %v11589_v36  ;;  %v11452_v46 = vcombine.low %v336_v33, %v340_v34 }
  0x5d   :  { %v468_v37 = vld [vmem:[%s16177_s1 + $0xd20] sm:$0xff]  ;;  %5643 = vmatpush1.bf16.msra.mxu1 %v11588_v39 }
  0x5e   :  { %v328_v41 = vld [vmem:[%s16177_s1 + $0x8c0] sm:$0xff]  ;;  %v11581_v44 = vcombine.high %v464_v35, %v468_v37  ;;  %5603 = vmatprep.subr.bf16.mxu0 %v11453_v40  ;;  %v11580_v47 = vcombine.low %v464_v35, %v468_v37 }
  0x5f   :  { %v332_v42 = vld [vmem:[%s16177_s1 + $0x8e0] sm:$0xff]  ;;  %5604 = vmatpush1.bf16.msra.mxu0 %v11452_v46 }
  0x60   :  { %v456_v43 = vld [vmem:[%s16177_s1 + $0xcc0] sm:$0xff]  ;;  %v11445_v48 = vcombine.high %v328_v41, %v332_v42  ;;  %5644 = vmatprep.subr.bf16.mxu1 %v11581_v44  ;;  %v11444_v56 = vcombine.low %v328_v41, %v332_v42 }
  0x61   :  { %v460_v45 = vld [vmem:[%s16177_s1 + $0xce0] sm:$0xff]  ;;  %5645 = vmatpush1.bf16.msra.mxu1 %v11580_v47 }
  0x62   :  { %v320_v49 = vld [vmem:[%s16177_s1 + $0x880] sm:$0xff]  ;;  %v11573_v52 = vcombine.high %v456_v43, %v460_v45  ;;  %5605 = vmatprep.subr.bf16.mxu0 %v11445_v48  ;;  %v11572_v57 = vcombine.low %v456_v43, %v460_v45 }
  0x63   :  { %v324_v50 = vld [vmem:[%s16177_s1 + $0x8a0] sm:$0xff]  ;;  %5606 = vmatpush1.bf16.msra.mxu0 %v11444_v56 }
  0x64   :  { %v448_v51 = vld [vmem:[%s16177_s1 + $0xc80] sm:$0xff]  ;;  %v11437_v60 = vcombine.high %v320_v49, %v324_v50  ;;  %5646 = vmatprep.subr.bf16.mxu1 %v11573_v52  ;;  %v11436_v2 = vcombine.low %v320_v49, %v324_v50 }
  0x65   :  { %v452_v55 = vld [vmem:[%s16177_s1 + $0xca0] sm:$0xff]  ;;  %5647 = vmatpush1.bf16.msra.mxu1 %v11572_v57 }
  0x66   :  { %v312_v61 = vld [vmem:[%s16177_s1 + $0x840] sm:$0xff]  ;;  %v11565_v0 = vcombine.high %v448_v51, %v452_v55  ;;  %5607 = vmatprep.subr.bf16.mxu0 %v11437_v60  ;;  %v11564_v3 = vcombine.low %v448_v51, %v452_v55 }
  0x67   :  { %v316_v62 = vld [vmem:[%s16177_s1 + $0x860] sm:$0xff]  ;;  %5608 = vmatpush1.bf16.msra.mxu0 %v11436_v2 }
  0x68   :  { %v440_v63 = vld [vmem:[%s16177_s1 + $0xc40] sm:$0xff]  ;;  %v11429_v4 = vcombine.high %v312_v61, %v316_v62  ;;  %5648 = vmatprep.subr.bf16.mxu1 %v11565_v0  ;;  %v11428_v10 = vcombine.low %v312_v61, %v316_v62 }
  0x69   :  { %v444_v1 = vld [vmem:[%s16177_s1 + $0xc60] sm:$0xff]  ;;  %5649 = vmatpush1.bf16.msra.mxu1 %v11564_v3 }
  0x6a   :  { %v304_v5 = vld [vmem:[%s16177_s1 + $0x800] sm:$0xff]  ;;  %v11557_v8 = vcombine.high %v440_v63, %v444_v1  ;;  %5609 = vmatprep.subr.bf16.mxu0 %v11429_v4  ;;  %v11556_v11 = vcombine.low %v440_v63, %v444_v1 }
  0x6b   :  { %v308_v6 = vld [vmem:[%s16177_s1 + $0x820] sm:$0xff]  ;;  %5610 = vmatpush1.bf16.msra.mxu0 %v11428_v10 }
  0x6c   :  { %v432_v7 = vld [vmem:[%s16177_s1 + $0xc00] sm:$0xff]  ;;  %v11421_v12 = vcombine.high %v304_v5, %v308_v6  ;;  %5650 = vmatprep.subr.bf16.mxu1 %v11557_v8  ;;  %v11420_v53 = vcombine.low %v304_v5, %v308_v6 }
  0x6d   :  { %v436_v9 = vld [vmem:[%s16177_s1 + $0xc20] sm:$0xff]  ;;  %5651 = vmatpush1.bf16.msra.mxu1 %v11556_v11 }
  0x6e   :  { %v424_v13 = vld [vmem:[%s16177_s1 + $0xbc0] sm:$0xff]  ;;  %v11549_v17 = vcombine.high %v432_v7, %v436_v9  ;;  %5611 = vmatprep.subr.bf16.mxu0 %v11421_v12  ;;  %v11548_v22 = vcombine.low %v432_v7, %v436_v9 }
  0x6f   :  { %v428_v14 = vld [vmem:[%s16177_s1 + $0xbe0] sm:$0xff]  ;;  %5612 = vmatpush1.bf16.msra.mxu0 %v11420_v53 }
  0x70   :  { %v552_v15 = vld [vmem:[%s16177_s1 + $0xfc0] sm:$0xff]  ;;  %v11541_v23 = vcombine.high %v424_v13, %v428_v14  ;;  %5652 = vmatprep.subr.bf16.mxu1 %v11549_v17  ;;  %v11540_v30 = vcombine.low %v424_v13, %v428_v14 }
  0x71   :  { %v556_v18 = vld [vmem:[%s16177_s1 + $0xfe0] sm:$0xff]  ;;  %5653 = vmatpush1.bf16.msra.mxu1 %v11548_v22 }
  0x72   :  { %v416_v24 = vld [vmem:[%s16177_s1 + $0xb80] sm:$0xff]  ;;  %v11669_v26 = vcombine.high %v552_v15, %v556_v18  ;;  %5613 = vmatprep.subr.bf16.mxu0 %v11541_v23  ;;  %v11668_v31 = vcombine.low %v552_v15, %v556_v18 }
  0x73   :  { %v420_v25 = vld [vmem:[%s16177_s1 + $0xba0] sm:$0xff]  ;;  %5614 = vmatpush2.bf16.msra.mxu0 %v11540_v30 }
  0x74   :  { %v544_v54 = vld [vmem:[%s16177_s1 + $0xf80] sm:$0xff]  ;;  %v11533_v32 = vcombine.high %v416_v24, %v420_v25  ;;  %5654 = vmatprep.subr.bf16.mxu1 %v11669_v26  ;;  %v11532_v38 = vcombine.low %v416_v24, %v420_v25 }
  0x75   :  { %v548_v28 = vld [vmem:[%s16177_s1 + $0xfa0] sm:$0xff]  ;;  %5655 = vmatpush2.bf16.msra.mxu1 %v11668_v31 }
  0x76   :  { %v408_v33 = vld [vmem:[%s16177_s1 + $0xb40] sm:$0xff]  ;;  %v11661_v36 = vcombine.high %v544_v54, %v548_v28  ;;  %5615 = vmatprep.subr.bf16.mxu0 %v11533_v32  ;;  %v11660_v39 = vcombine.low %v544_v54, %v548_v28 }
  0x77   :  { %v412_v34 = vld [vmem:[%s16177_s1 + $0xb60] sm:$0xff]  ;;  %5616 = vmatpush2.bf16.msra.mxu0 %v11532_v38 }
  0x78   :  { %v536_v35 = vld [vmem:[%s16177_s1 + $0xf40] sm:$0xff]  ;;  %v11525_v40 = vcombine.high %v408_v33, %v412_v34  ;;  %5656 = vmatprep.subr.bf16.mxu1 %v11661_v36  ;;  %v11524_v46 = vcombine.low %v408_v33, %v412_v34 }
  0x79   :  { %v540_v37 = vld [vmem:[%s16177_s1 + $0xf60] sm:$0xff]  ;;  %5657 = vmatpush2.bf16.msra.mxu1 %v11660_v39  ;;  %v13343_v39 = vcombine.low %v13121_v19, %v13121_v19 }
  0x7a   :  { %v400_v41 = vld [vmem:[%s16177_s1 + $0xb00] sm:$0xff]  ;;  %v11653_v44 = vcombine.high %v536_v35, %v540_v37  ;;  %5617 = vmatprep.subr.bf16.mxu0 %v11525_v40  ;;  %v11652_v47 = vcombine.low %v536_v35, %v540_v37  ;;  %v13347_v40 = vcombine.low %v13130_v21, %v13130_v21 }
  0x7b   :  { %v404_v42 = vld [vmem:[%s16177_s1 + $0xb20] sm:$0xff]  ;;  %5618 = vmatpush2.bf16.msra.mxu0 %v11524_v46 }
  0x7c   :  { %v528_v43 = vld [vmem:[%s16177_s1 + $0xf00] sm:$0xff]  ;;  %v11517_v48 = vcombine.high %v400_v41, %v404_v42  ;;  %5658 = vmatprep.subr.bf16.mxu1 %v11653_v44  ;;  %v11516_v56 = vcombine.low %v400_v41, %v404_v42  ;;  %v13352_v42 = vld [vmem:[%s16176_s0 + $0x28] sm:$0xff] }
  0x7d   :  { %v532_v45 = vld [vmem:[%s16177_s1 + $0xf20] sm:$0xff]  ;;  %5659 = vmatpush2.bf16.msra.mxu1 %v11652_v47 }
  0x7e   :  { %v392_v49 = vld [vmem:[%s16177_s1 + $0xac0] sm:$0xff]  ;;  %v11645_v52 = vcombine.high %v528_v43, %v532_v45  ;;  %5619 = vmatprep.subr.bf16.mxu0 %v11517_v48  ;;  %v11644_v57 = vcombine.low %v528_v43, %v532_v45 }
  0x7f   :  { %v396_v50 = vld [vmem:[%s16177_s1 + $0xae0] sm:$0xff]  ;;  %5620 = vmatpush2.bf16.msra.mxu0 %v11516_v56 }
  0x80   :  { %v520_v51 = vld [vmem:[%s16177_s1 + $0xec0] sm:$0xff]  ;;  %v11509_v60 = vcombine.high %v392_v49, %v396_v50  ;;  %5660 = vmatprep.subr.bf16.mxu1 %v11645_v52  ;;  %v11508_v2 = vcombine.low %v392_v49, %v396_v50  ;;  %v13373_v49 = vcombine.high %v13352_v42, %v13352_v42 }
  0x81   :  { %v524_v55 = vld [vmem:[%s16177_s1 + $0xee0] sm:$0xff]  ;;  %5661 = vmatpush2.bf16.msra.mxu1 %v11644_v57 }
  0x82   :  { %v384_v61 = vld [vmem:[%s16177_s1 + $0xa80] sm:$0xff]  ;;  %v11637_v0 = vcombine.high %v520_v51, %v524_v55  ;;  %5621 = vmatprep.subr.bf16.mxu0 %v11509_v60  ;;  %v11636_v3 = vcombine.low %v520_v51, %v524_v55 }
  0x83   :  { %v388_v62 = vld [vmem:[%s16177_s1 + $0xaa0] sm:$0xff]  ;;  %5622 = vmatpush2.bf16.msra.mxu0 %v11508_v2 }
  0x84   :  { %v512_v63 = vld [vmem:[%s16177_s1 + $0xe80] sm:$0xff]  ;;  %v11501_v4 = vcombine.high %v384_v61, %v388_v62  ;;  %5662 = vmatprep.subr.bf16.mxu1 %v11637_v0  ;;  %v11500_v10 = vcombine.low %v384_v61, %v388_v62 }
  0x85   :  { %v516_v1 = vld [vmem:[%s16177_s1 + $0xea0] sm:$0xff]  ;;  %5663 = vmatpush2.bf16.msra.mxu1 %v11636_v3 }
  0x86   :  { %v376_v5 = vld [vmem:[%s16177_s1 + $0xa40] sm:$0xff]  ;;  %v11629_v8 = vcombine.high %v512_v63, %v516_v1  ;;  %5623 = vmatprep.subr.bf16.mxu0 %v11501_v4  ;;  %v11628_v11 = vcombine.low %v512_v63, %v516_v1 }
  0x87   :  { %v380_v6 = vld [vmem:[%s16177_s1 + $0xa60] sm:$0xff]  ;;  %5624 = vmatpush2.bf16.msra.mxu0 %v11500_v10 }
  0x88   :  { %v504_v7 = vld [vmem:[%s16177_s1 + $0xe40] sm:$0xff]  ;;  %v11493_v12 = vcombine.high %v376_v5, %v380_v6  ;;  %5664 = vmatprep.subr.bf16.mxu1 %v11629_v8  ;;  %v11492_v53 = vcombine.low %v376_v5, %v380_v6 }
  0x89   :  { %v508_v9 = vld [vmem:[%s16177_s1 + $0xe60] sm:$0xff]  ;;  %5665 = vmatpush2.bf16.msra.mxu1 %v11628_v11 }
  0x8a   :  { %v368_v13 = vld [vmem:[%s16177_s1 + $0xa00] sm:$0xff]  ;;  %v11621_v17 = vcombine.high %v504_v7, %v508_v9  ;;  %5625 = vmatprep.subr.bf16.mxu0 %v11493_v12  ;;  %v11620_v22 = vcombine.low %v504_v7, %v508_v9 }
  0x8b   :  { %v372_v14 = vld [vmem:[%s16177_s1 + $0xa20] sm:$0xff]  ;;  %5626 = vmatpush2.bf16.msra.mxu0 %v11492_v53 }
  0x8c   :  { %v496_v15 = vld [vmem:[%s16177_s1 + $0xe00] sm:$0xff]  ;;  %v11485_v23 = vcombine.high %v368_v13, %v372_v14  ;;  %5666 = vmatprep.subr.bf16.mxu1 %v11621_v17  ;;  %v11484_v30 = vcombine.low %v368_v13, %v372_v14 }
  0x8d   :  { %v500_v18 = vld [vmem:[%s16177_s1 + $0xe20] sm:$0xff]  ;;  %5667 = vmatpush2.bf16.msra.mxu1 %v11620_v22 }
  0x8e   :  { %v616_v24 = vld [vmem:[%s16177_s1 + $0x11c0] sm:$0xff]  ;;  %v11613_v26 = vcombine.high %v496_v15, %v500_v18  ;;  %5627 = vmatprep.subr.bf16.mxu0 %v11485_v23  ;;  %v11612_v32 = vcombine.low %v496_v15, %v500_v18 }
  0x8f   :  { %v620_v25 = vld [vmem:[%s16177_s1 + $0x11e0] sm:$0xff]  ;;  %5628 = vmatpush2.bf16.msra.mxu0 %v11484_v30 }
  0x90   :  { %v744_v54 = vld [vmem:[%s16177_s1 + $0x15c0] sm:$0xff]  ;;  %v11733_v33 = vcombine.high %v616_v24, %v620_v25  ;;  %5668 = vmatprep.subr.bf16.mxu1 %v11613_v26  ;;  %v11732_v41 = vcombine.low %v616_v24, %v620_v25 }
  0x91   :  { %v748_v28 = vld [vmem:[%s16177_s1 + $0x15e0] sm:$0xff]  ;;  %5669 = vmatpush2.bf16.msra.mxu1 %v11612_v32 }
  0x92   :  { %v608_v31 = vld [vmem:[%s16177_s1 + $0x1180] sm:$0xff]  ;;  %v11861_v37 = vcombine.high %v744_v54, %v748_v28  ;;  %5679 = vmatprep.subr.bf16.mxu0 %v11733_v33  ;;  %v11860_v43 = vcombine.low %v744_v54, %v748_v28  ;;  %5630 = vmatmul.mubr.bf16.vlgmr.msra.gmra.mxu0 %v13343_v39 }
  0x93   :  { %v612_v34 = vld [vmem:[%s16177_s1 + $0x11a0] sm:$0xff]  ;;  %5680 = vmatpush1.bf16.msra.mxu0 %v11732_v41 }
  0x94   :  { %v736_v35 = vld [vmem:[%s16177_s1 + $0x1580] sm:$0xff]  ;;  %v11725_v44 = vcombine.high %v608_v31, %v612_v34  ;;  %5720 = vmatprep.subr.bf16.mxu1 %v11861_v37  ;;  %5671 = vmatmul.mubr.bf16.vlgmr.msra.gmra.mxu1 %v13347_v40  ;;  %v11724_v50 = vcombine.low %v608_v31, %v612_v34 }
  0x95   :  { %v740_v36 = vld [vmem:[%s16177_s1 + $0x15a0] sm:$0xff]  ;;  %5721 = vmatpush1.bf16.msra.mxu1 %v11860_v43  ;;  %5752 = vmatprep.mubr.bf16.mxu1 %v13373_v49 }
  0x96   :  { %v13339_v38 = vld [vmem:[%s16176_s0 + $0x20] sm:$0xff]  ;;  %v11853_v45 = vcombine.high %v736_v35, %v740_v36  ;;  %5681 = vmatprep.subr.bf16.mxu0 %v11725_v44  ;;  %v11852_v51 = vcombine.low %v736_v35, %v740_v36 }
  0x97   :  { %v600_v19 = vld [vmem:[%s16177_s1 + $0x1140] sm:$0xff]  ;;  %v13365_v47 = vcombine.high %v13339_v38, %v13339_v38  ;;  %5682 = vmatpush1.bf16.msra.mxu0 %v11724_v50 }
  0x98   :  { %v604_v21 = vld [vmem:[%s16177_s1 + $0x1160] sm:$0xff]  ;;  %5722 = vmatprep.subr.bf16.mxu1 %v11853_v45 }
  0x99   :  { %v728_v46 = vld [vmem:[%s16177_s1 + $0x1540] sm:$0xff]  ;;  %v11717_v52 = vcombine.high %v600_v19, %v604_v21  ;;  %5711 = vmatprep.mubr.bf16.mxu0 %v13365_v47  ;;  %v11716_v62 = vcombine.low %v600_v19, %v604_v21  ;;  %5723 = vmatpush1.bf16.msra.mxu1 %v11852_v51 }
  0x9a   :  { %v732_v48 = vld [vmem:[%s16177_s1 + $0x1560] sm:$0xff] }
  0x9b   :  { %v11845_v55 = vcombine.high %v728_v46, %v732_v48  ;;  %v592_v56 = vld [vmem:[%s16177_s1 + $0x1100] sm:$0xff]  ;;  %5683 = vmatprep.subr.bf16.mxu0 %v11717_v52  ;;  %v11844_v63 = vcombine.low %v728_v46, %v732_v48 }
  0x9c   :  { %v596_v57 = vld [vmem:[%s16177_s1 + $0x1120] sm:$0xff]  ;;  %5684 = vmatpush1.bf16.msra.mxu0 %v11716_v62 }
  0x9d   :  { %v720_v60 = vld [vmem:[%s16177_s1 + $0x1500] sm:$0xff]  ;;  %v11709_v0 = vcombine.high %v592_v56, %v596_v57  ;;  %5724 = vmatprep.subr.bf16.mxu1 %v11845_v55  ;;  %v11708_v6 = vcombine.low %v592_v56, %v596_v57 }
  0x9e   :  { %v724_v61 = vld [vmem:[%s16177_s1 + $0x1520] sm:$0xff]  ;;  %5725 = vmatpush1.bf16.msra.mxu1 %v11844_v63 }
  0x9f   :  { %v11837_v1 = vcombine.high %v720_v60, %v724_v61  ;;  %v584_v2 = vld [vmem:[%s16177_s1 + $0x10c0] sm:$0xff]  ;;  %5685 = vmatprep.subr.bf16.mxu0 %v11709_v0  ;;  %v11836_v7 = vcombine.low %v720_v60, %v724_v61 }
  0xa0   :  { %v588_v3 = vld [vmem:[%s16177_s1 + $0x10e0] sm:$0xff]  ;;  %5686 = vmatpush1.bf16.msra.mxu0 %v11708_v6 }
  0xa1   :  { %v712_v4 = vld [vmem:[%s16177_s1 + $0x14c0] sm:$0xff]  ;;  %v11701_v8 = vcombine.high %v584_v2, %v588_v3  ;;  %5726 = vmatprep.subr.bf16.mxu1 %v11837_v1  ;;  %v11700_v14 = vcombine.low %v584_v2, %v588_v3 }
  0xa2   :  { %v716_v5 = vld [vmem:[%s16177_s1 + $0x14e0] sm:$0xff]  ;;  %5727 = vmatpush1.bf16.msra.mxu1 %v11836_v7 }
  0xa3   :  { %v11829_v9 = vcombine.high %v712_v4, %v716_v5  ;;  %v576_v10 = vld [vmem:[%s16177_s1 + $0x1080] sm:$0xff]  ;;  %5687 = vmatprep.subr.bf16.mxu0 %v11701_v8  ;;  %v11828_v15 = vcombine.low %v712_v4, %v716_v5 }
  0xa4   :  { %v580_v11 = vld [vmem:[%s16177_s1 + $0x10a0] sm:$0xff]  ;;  %5688 = vmatpush1.bf16.msra.mxu0 %v11700_v14 }
  0xa5   :  { %v704_v12 = vld [vmem:[%s16177_s1 + $0x1480] sm:$0xff]  ;;  %v11693_v17 = vcombine.high %v576_v10, %v580_v11  ;;  %5728 = vmatprep.subr.bf16.mxu1 %v11829_v9  ;;  %v11692_v25 = vcombine.low %v576_v10, %v580_v11 }
  0xa6   :  { %v708_v13 = vld [vmem:[%s16177_s1 + $0x14a0] sm:$0xff]  ;;  %5729 = vmatpush1.bf16.msra.mxu1 %v11828_v15 }
  0xa7   :  { %v11821_v18 = vcombine.high %v704_v12, %v708_v13  ;;  %v568_v53 = vld [vmem:[%s16177_s1 + $0x1040] sm:$0xff]  ;;  %5689 = vmatprep.subr.bf16.mxu0 %v11693_v17  ;;  %v11820_v54 = vcombine.low %v704_v12, %v708_v13 }
  0xa8   :  { %v572_v22 = vld [vmem:[%s16177_s1 + $0x1060] sm:$0xff]  ;;  %5690 = vmatpush1.bf16.msra.mxu0 %v11692_v25 }
  0xa9   :  { %v696_v23 = vld [vmem:[%s16177_s1 + $0x1440] sm:$0xff]  ;;  %v11685_v26 = vcombine.high %v568_v53, %v572_v22  ;;  %5730 = vmatprep.subr.bf16.mxu1 %v11821_v18  ;;  %v11684_v34 = vcombine.low %v568_v53, %v572_v22 }
  0xaa   :  { %v700_v24 = vld [vmem:[%s16177_s1 + $0x1460] sm:$0xff]  ;;  %5731 = vmatpush1.bf16.msra.mxu1 %v11820_v54 }
  0xab   :  { %v11813_v28 = vcombine.high %v696_v23, %v700_v24  ;;  %v560_v30 = vld [vmem:[%s16177_s1 + $0x1000] sm:$0xff]  ;;  %5691 = vmatprep.subr.bf16.mxu0 %v11685_v26  ;;  %v11812_v35 = vcombine.low %v696_v23, %v700_v24 }
  0xac   :  { %v564_v31 = vld [vmem:[%s16177_s1 + $0x1020] sm:$0xff]  ;;  %5692 = vmatpush1.bf16.msra.mxu0 %v11684_v34 }
  0xad   :  { %v688_v32 = vld [vmem:[%s16177_s1 + $0x1400] sm:$0xff]  ;;  %v11677_v36 = vcombine.high %v560_v30, %v564_v31  ;;  %5732 = vmatprep.subr.bf16.mxu1 %v11813_v28  ;;  %v11676_v45 = vcombine.low %v560_v30, %v564_v31 }
  0xae   :  { %v692_v33 = vld [vmem:[%s16177_s1 + $0x1420] sm:$0xff]  ;;  %5733 = vmatpush1.bf16.msra.mxu1 %v11812_v35 }
  0xaf   :  { %v11805_v37 = vcombine.high %v688_v32, %v692_v33  ;;  %v680_v41 = vld [vmem:[%s16177_s1 + $0x13c0] sm:$0xff]  ;;  %5693 = vmatprep.subr.bf16.mxu0 %v11677_v36  ;;  %v11804_v21 = vcombine.low %v688_v32, %v692_v33 }
  0xb0   :  { %v684_v43 = vld [vmem:[%s16177_s1 + $0x13e0] sm:$0xff]  ;;  %5694 = vmatpush1.bf16.msra.mxu0 %v11676_v45 }
  0xb1   :  { %v808_v44 = vld [vmem:[%s16177_s1 + $0x17c0] sm:$0xff]  ;;  %v11797_v46 = vcombine.high %v680_v41, %v684_v43  ;;  %5734 = vmatprep.subr.bf16.mxu1 %v11805_v37  ;;  %v11796_v56 = vcombine.low %v680_v41, %v684_v43 }
  0xb2   :  { %v812_v19 = vld [vmem:[%s16177_s1 + $0x17e0] sm:$0xff]  ;;  %5735 = vmatpush1.bf16.msra.mxu1 %v11804_v21 }
  0xb3   :  { %v11925_v48 = vcombine.high %v808_v44, %v812_v19  ;;  %v672_v50 = vld [vmem:[%s16177_s1 + $0x1380] sm:$0xff]  ;;  %5695 = vmatprep.subr.bf16.mxu0 %v11797_v46  ;;  %v11924_v57 = vcombine.low %v808_v44, %v812_v19 }
  0xb4   :  { %v676_v51 = vld [vmem:[%s16177_s1 + $0x13a0] sm:$0xff]  ;;  %5696 = vmatpush2.bf16.msra.mxu0 %v11796_v56 }
  0xb5   :  { %v800_v52 = vld [vmem:[%s16177_s1 + $0x1780] sm:$0xff]  ;;  %v11789_v60 = vcombine.high %v672_v50, %v676_v51  ;;  %5736 = vmatprep.subr.bf16.mxu1 %v11925_v48  ;;  %v11788_v2 = vcombine.low %v672_v50, %v676_v51 }
  0xb6   :  { %v804_v55 = vld [vmem:[%s16177_s1 + $0x17a0] sm:$0xff]  ;;  %5737 = vmatpush2.bf16.msra.mxu1 %v11924_v57 }
  0xb7   :  { %v11917_v61 = vcombine.high %v800_v52, %v804_v55  ;;  %v664_v62 = vld [vmem:[%s16177_s1 + $0x1340] sm:$0xff]  ;;  %5697 = vmatprep.subr.bf16.mxu0 %v11789_v60  ;;  %v11916_v3 = vcombine.low %v800_v52, %v804_v55  ;;  %v105_v60 = vld [vmem:[%s16177_s1 + $0x1c8] sm:$0xff] }
  0xb8   :  { %v668_v63 = vld [vmem:[%s16177_s1 + $0x1360] sm:$0xff]  ;;  %5698 = vmatpush2.bf16.msra.mxu0 %v11788_v2 }
  0xb9   :  { %v792_v0 = vld [vmem:[%s16177_s1 + $0x1740] sm:$0xff]  ;;  %v11781_v4 = vcombine.high %v664_v62, %v668_v63  ;;  %5738 = vmatprep.subr.bf16.mxu1 %v11917_v61  ;;  %v11780_v10 = vcombine.low %v664_v62, %v668_v63  ;;  %v109_v61 = vld [vmem:[%s16177_s1 + $0x1e8] sm:$0xff] }
  0xba   :  { %v796_v1 = vld [vmem:[%s16177_s1 + $0x1760] sm:$0xff]  ;;  %5739 = vmatpush2.bf16.msra.mxu1 %v11916_v3 }
  0xbb   :  { %v11909_v5 = vcombine.high %v792_v0, %v796_v1  ;;  %v656_v6 = vld [vmem:[%s16177_s1 + $0x1300] sm:$0xff]  ;;  %5699 = vmatprep.subr.bf16.mxu0 %v11781_v4  ;;  %v11908_v11 = vcombine.low %v792_v0, %v796_v1  ;;  %v11223_v1 = vcombine.high %v105_v60, %v109_v61  ;;  %v13554_v4 = vcombine.low %v13339_v38, %v13339_v38 }
  0xbc   :  { %v660_v7 = vld [vmem:[%s16177_s1 + $0x1320] sm:$0xff]  ;;  %5700 = vmatpush2.bf16.msra.mxu0 %v11780_v10 }
  0xbd   :  { %v784_v8 = vld [vmem:[%s16177_s1 + $0x1700] sm:$0xff]  ;;  %v11773_v12 = vcombine.high %v656_v6, %v660_v7  ;;  %5740 = vmatprep.subr.bf16.mxu1 %v11909_v5  ;;  %v11772_v53 = vcombine.low %v656_v6, %v660_v7  ;;  %v97_v5 = vld [vmem:[%s16177_s1 + $0x188] sm:$0xff]  ;;  %v13565_v7 = vld [vmem:[%s16176_s0 + $0x30] sm:$0xff] }
  0xbe   :  { %v788_v9 = vld [vmem:[%s16177_s1 + $0x1720] sm:$0xff]  ;;  %5741 = vmatpush2.bf16.msra.mxu1 %v11908_v11  ;;  %v101_v6 = vld [vmem:[%s16177_s1 + $0x1a8] sm:$0xff] }
  0xbf   :  { %v11901_v13 = vcombine.high %v784_v8, %v788_v9  ;;  %v648_v14 = vld [vmem:[%s16177_s1 + $0x12c0] sm:$0xff]  ;;  %5701 = vmatprep.subr.bf16.mxu0 %v11773_v12  ;;  %v11900_v22 = vcombine.low %v784_v8, %v788_v9  ;;  %v13569_v8 = vcombine.low %v13352_v42, %v13352_v42  ;;  %v11222_v9 = vcombine.low %v105_v60, %v109_v61  ;;  %v89_v42 = vld [vmem:[%s16177_s1 + $0x148] sm:$0xff] }
  0xc0   :  { %v652_v15 = vld [vmem:[%s16177_s1 + $0x12e0] sm:$0xff]  ;;  %5702 = vmatpush2.bf16.msra.mxu0 %v11772_v53  ;;  %v11215_v11 = vcombine.high %v97_v5, %v101_v6 }
  0xc1   :  { %v776_v17 = vld [vmem:[%s16177_s1 + $0x16c0] sm:$0xff]  ;;  %v11765_v23 = vcombine.high %v648_v14, %v652_v15  ;;  %5742 = vmatprep.subr.bf16.mxu1 %v11901_v13  ;;  %v11764_v30 = vcombine.low %v648_v14, %v652_v15  ;;  %v13579_v14 = vcombine.high %v13565_v7, %v13565_v7  ;;  %v93_v15 = vld [vmem:[%s16177_s1 + $0x168] sm:$0xff] }
  0xc2   :  { %v780_v18 = vld [vmem:[%s16177_s1 + $0x16e0] sm:$0xff]  ;;  %5743 = vmatpush2.bf16.msra.mxu1 %v11900_v22  ;;  %v11207_v22 = vcombine.high %v89_v42, %v93_v15 }
  0xc3   :  { %v11893_v24 = vcombine.high %v776_v17, %v780_v18  ;;  %v640_v25 = vld [vmem:[%s16177_s1 + $0x1280] sm:$0xff]  ;;  %5703 = vmatprep.subr.bf16.mxu0 %v11765_v23  ;;  %v11892_v31 = vcombine.low %v776_v17, %v780_v18  ;;  %v11214_v18 = vcombine.low %v97_v5, %v101_v6 }
  0xc4   :  { %v644_v54 = vld [vmem:[%s16177_s1 + $0x12a0] sm:$0xff]  ;;  %5704 = vmatpush2.bf16.msra.mxu0 %v11764_v30 }
  0xc5   :  { %v768_v26 = vld [vmem:[%s16177_s1 + $0x1680] sm:$0xff]  ;;  %v11757_v32 = vcombine.high %v640_v25, %v644_v54  ;;  %5744 = vmatprep.subr.bf16.mxu1 %v11893_v24  ;;  %v11756_v41 = vcombine.low %v640_v25, %v644_v54  ;;  %v81_v25 = vld [vmem:[%s16177_s1 + $0x108] sm:$0xff] }
  0xc6   :  { %v772_v28 = vld [vmem:[%s16177_s1 + $0x16a0] sm:$0xff]  ;;  %5745 = vmatpush2.bf16.msra.mxu1 %v11892_v31  ;;  %v85_v54 = vld [vmem:[%s16177_s1 + $0x128] sm:$0xff] }
  0xc7   :  { %v11885_v33 = vcombine.high %v768_v26, %v772_v28  ;;  %v632_v34 = vld [vmem:[%s16177_s1 + $0x1240] sm:$0xff]  ;;  %5705 = vmatprep.subr.bf16.mxu0 %v11757_v32  ;;  %v11884_v43 = vcombine.low %v768_v26, %v772_v28  ;;  %v11206_v28 = vcombine.low %v89_v42, %v93_v15  ;;  %v11199_v31 = vcombine.high %v81_v25, %v85_v54 }
  0xc8   :  { %v636_v35 = vld [vmem:[%s16177_s1 + $0x1260] sm:$0xff]  ;;  %5706 = vmatpush2.bf16.msra.mxu0 %v11756_v41 }
  0xc9   :  { %v760_v36 = vld [vmem:[%s16177_s1 + $0x1640] sm:$0xff]  ;;  %v11749_v44 = vcombine.high %v632_v34, %v636_v35  ;;  %5746 = vmatprep.subr.bf16.mxu1 %v11885_v33  ;;  %v11748_v50 = vcombine.low %v632_v34, %v636_v35  ;;  %v73_v34 = vld [vmem:[%s16177_s1 + $0xc8] sm:$0xff] }
  0xca   :  { %v764_v37 = vld [vmem:[%s16177_s1 + $0x1660] sm:$0xff]  ;;  %5747 = vmatpush2.bf16.msra.mxu1 %v11884_v43  ;;  %v77_v35 = vld [vmem:[%s16177_s1 + $0xe8] sm:$0xff] }
  0xcb   :  { %v11877_v19 = vcombine.high %v760_v36, %v764_v37  ;;  %v624_v45 = vld [vmem:[%s16177_s1 + $0x1200] sm:$0xff]  ;;  %5707 = vmatprep.subr.bf16.mxu0 %v11749_v44  ;;  %v11876_v51 = vcombine.low %v760_v36, %v764_v37  ;;  %v11198_v37 = vcombine.low %v81_v25, %v85_v54  ;;  %v11191_v43 = vcombine.high %v73_v34, %v77_v35 }
  0xcc   :  { %v628_v21 = vld [vmem:[%s16177_s1 + $0x1220] sm:$0xff]  ;;  %5708 = vmatpush2.bf16.msra.mxu0 %v11748_v50 }
  0xcd   :  { %v752_v46 = vld [vmem:[%s16177_s1 + $0x1600] sm:$0xff]  ;;  %v11741_v52 = vcombine.high %v624_v45, %v628_v21  ;;  %5748 = vmatprep.subr.bf16.mxu1 %v11877_v19  ;;  %v11740_v62 = vcombine.low %v624_v45, %v628_v21  ;;  %v65_v45 = vld [vmem:[%s16177_s1 + $0x88] sm:$0xff] }
  0xce   :  { %v756_v48 = vld [vmem:[%s16177_s1 + $0x1620] sm:$0xff]  ;;  %5749 = vmatpush2.bf16.msra.mxu1 %v11876_v51  ;;  %v69_v21 = vld [vmem:[%s16177_s1 + $0xa8] sm:$0xff] }
  0xcf   :  { %v11869_v55 = vcombine.high %v752_v46, %v756_v48  ;;  %v872_v56 = vld [vmem:[%s16177_s1 + $0x19c0] sm:$0xff]  ;;  %5709 = vmatprep.subr.bf16.mxu0 %v11741_v52  ;;  %v11868_v63 = vcombine.low %v752_v46, %v756_v48  ;;  %v11190_v48 = vcombine.low %v73_v34, %v77_v35  ;;  %v11183_v51 = vcombine.high %v65_v45, %v69_v21 }
  0xd0   :  { %v876_v57 = vld [vmem:[%s16177_s1 + $0x19e0] sm:$0xff]  ;;  %5710 = vmatpush2.bf16.msra.mxu0 %v11740_v62  ;;  %v11182_v61 = vcombine.low %v65_v45, %v69_v21 }
  0xd1   :  { %v11989_v0 = vcombine.high %v872_v56, %v876_v57  ;;  %5750 = vmatprep.subr.bf16.mxu1 %v11869_v55  ;;  %v864_v2 = vld [vmem:[%s16177_s1 + $0x1980] sm:$0xff]  ;;  %v11988_v38 = vcombine.low %v872_v56, %v876_v57  ;;  %v57_v56 = vld [vmem:[%s16177_s1 + $0x48] sm:$0xff] }
  0xd2   :  { %v868_v3 = vld [vmem:[%s16177_s1 + $0x19a0] sm:$0xff]  ;;  %5751 = vmatpush2.bf16.msra.mxu1 %v11868_v63  ;;  %v61_v57 = vld [vmem:[%s16177_s1 + $0x68] sm:$0xff] }
  0xd3   :  { %5761 = vmatprep.subr.bf16.mxu0 %v11989_v0  ;;  %v11981_v10 = vcombine.high %v864_v2, %v868_v3  ;;  %5802 = vmatprep.subr.bf16.mxu1 %v11223_v1  ;;  %v856_v12 = vld [vmem:[%s16177_s1 + $0x1940] sm:$0xff]  ;;  %v11980_v17 = vcombine.low %v864_v2, %v868_v3  ;;  %v11175_v63 = vcombine.high %v57_v56, %v61_v57  ;;  %v49_v2 = vld [vmem:[%s16177_s1 + $0x8] sm:$0xff] }
  0xd4   :  { %v860_v13 = vld [vmem:[%s16177_s1 + $0x1960] sm:$0xff]  ;;  %5712 = vmatmul.mubr.bf16.vlgmr.msra.gmra.mxu0 %v13554_v4  ;;  %v53_v3 = vld [vmem:[%s16177_s1 + $0x28] sm:$0xff]  ;;  %v11174_v6 = vcombine.low %v57_v56, %v61_v57 }
  0xd5   :  { %5753 = vmatmul.mubr.bf16.vlgmr.msra.gmra.mxu1 %v13569_v8  ;;  %5762 = vmatpush1.bf16.msra.mxu0 %v11988_v38  ;;  %v11973_v53 = vcombine.high %v856_v12, %v860_v13  ;;  %v848_v23 = vld [vmem:[%s16177_s1 + $0x1900] sm:$0xff]  ;;  %v11972_v26 = vcombine.low %v856_v12, %v860_v13  ;;  %v169_v12 = vld [vmem:[%s16177_s1 + $0x3c8] sm:$0xff]  ;;  %v11166_v15 = vcombine.low %v49_v2, %v53_v3 }
  0xd6   :  { %5803 = vmatpush1.bf16.msra.mxu1 %v11222_v9  ;;  %5763 = vmatprep.subr.bf16.mxu0 %v11981_v10  ;;  %v852_v24 = vld [vmem:[%s16177_s1 + $0x1920] sm:$0xff]  ;;  %v11167_v9 = vcombine.high %v49_v2, %v53_v3  ;;  %v173_v13 = vld [vmem:[%s16177_s1 + $0x3e8] sm:$0xff] }
  0xd7   :  { %5804 = vmatprep.subr.bf16.mxu1 %v11215_v11  ;;  %5793 = vmatprep.mubr.bf16.mxu0 %v13579_v14  ;;  %v11965_v30 = vcombine.high %v848_v23, %v852_v24  ;;  %v840_v32 = vld [vmem:[%s16177_s1 + $0x18c0] sm:$0xff]  ;;  %v11964_v36 = vcombine.low %v848_v23, %v852_v24  ;;  %v161_v23 = vld [vmem:[%s16177_s1 + $0x388] sm:$0xff]  ;;  %v11286_v54 = vcombine.low %v169_v12, %v173_v13 }
  0xd8   :  { %5834 = vmatprep.mubr.bf16.mxu1 %v12980_v58  ;;  %v844_v33 = vld [vmem:[%s16177_s1 + $0x18e0] sm:$0xff]  ;;  %v165_v24 = vld [vmem:[%s16177_s1 + $0x3a8] sm:$0xff] }
  0xd9   :  { %5764 = vmatpush1.bf16.msra.mxu0 %v11980_v17  ;;  %v11957_v41 = vcombine.high %v840_v32, %v844_v33  ;;  %v832_v44 = vld [vmem:[%s16177_s1 + $0x1880] sm:$0xff]  ;;  %v11956_v46 = vcombine.low %v840_v32, %v844_v33  ;;  %v153_v32 = vld [vmem:[%s16177_s1 + $0x348] sm:$0xff]  ;;  %v11278_v35 = vcombine.low %v161_v23, %v165_v24 }
  0xda   :  { %5805 = vmatpush1.bf16.msra.mxu1 %v11214_v18  ;;  %5765 = vmatprep.subr.bf16.mxu0 %v11973_v53  ;;  %v836_v19 = vld [vmem:[%s16177_s1 + $0x18a0] sm:$0xff]  ;;  %v11287_v18 = vcombine.high %v169_v12, %v173_v13  ;;  %v157_v33 = vld [vmem:[%s16177_s1 + $0x368] sm:$0xff]  ;;  %v946_v13 = vlaneseq }
  0xdb   :  { %5806 = vmatprep.subr.bf16.mxu1 %v11207_v22  ;;  %v11949_v50 = vcombine.high %v832_v44, %v836_v19  ;;  %v824_v52 = vld [vmem:[%s16177_s1 + $0x1840] sm:$0xff]  ;;  %v11948_v60 = vcombine.low %v832_v44, %v836_v19  ;;  %v145_v44 = vld [vmem:[%s16177_s1 + $0x308] sm:$0xff]  ;;  %v11270_v21 = vcombine.low %v153_v32, %v157_v33 }
  0xdc   :  { %v828_v55 = vld [vmem:[%s16177_s1 + $0x1860] sm:$0xff]  ;;  %v149_v19 = vld [vmem:[%s16177_s1 + $0x328] sm:$0xff] }
  0xdd   :  { %5766 = vmatpush1.bf16.msra.mxu0 %v11972_v26  ;;  %v11941_v62 = vcombine.high %v824_v52, %v828_v55  ;;  %v816_v0 = vld [vmem:[%s16177_s1 + $0x1800] sm:$0xff]  ;;  %v11940_v5 = vcombine.low %v824_v52, %v828_v55  ;;  %v137_v52 = vld [vmem:[%s16177_s1 + $0x2c8] sm:$0xff]  ;;  %v11262_v57 = vcombine.low %v145_v44, %v149_v19 }
  0xde   :  { %5807 = vmatpush1.bf16.msra.mxu1 %v11206_v28  ;;  %5767 = vmatprep.subr.bf16.mxu0 %v11965_v30  ;;  %v820_v1 = vld [vmem:[%s16177_s1 + $0x1820] sm:$0xff]  ;;  %v11279_v28 = vcombine.high %v161_v23, %v165_v24  ;;  %v141_v55 = vld [vmem:[%s16177_s1 + $0x2e8] sm:$0xff] }
  0xdf   :  { %5808 = vmatprep.subr.bf16.mxu1 %v11199_v31  ;;  %v11933_v38 = vcombine.high %v816_v0, %v820_v1  ;;  %v936_v10 = vld [vmem:[%s16177_s1 + $0x1bc0] sm:$0xff]  ;;  %v11932_v42 = vcombine.low %v816_v0, %v820_v1  ;;  %v129_v0 = vld [vmem:[%s16177_s1 + $0x288] sm:$0xff]  ;;  %v11254_v3 = vcombine.low %v137_v52, %v141_v55 }
  0xe0   :  { %v940_v11 = vld [vmem:[%s16177_s1 + $0x1be0] sm:$0xff]  ;;  %v133_v1 = vld [vmem:[%s16177_s1 + $0x2a8] sm:$0xff] }
  0xe1   :  { %5768 = vmatpush1.bf16.msra.mxu0 %v11964_v36  ;;  %v12053_v17 = vcombine.high %v936_v10, %v940_v11  ;;  %v928_v53 = vld [vmem:[%s16177_s1 + $0x1b80] sm:$0xff]  ;;  %v12052_v25 = vcombine.low %v936_v10, %v940_v11  ;;  %v121_v10 = vld [vmem:[%s16177_s1 + $0x248] sm:$0xff] }
  0xe2   :  { %5809 = vmatpush1.bf16.msra.mxu1 %v11198_v37  ;;  %5769 = vmatprep.subr.bf16.mxu0 %v11957_v41  ;;  %v932_v22 = vld [vmem:[%s16177_s1 + $0x1ba0] sm:$0xff]  ;;  %v11271_v37 = vcombine.high %v153_v32, %v157_v33  ;;  %v125_v11 = vld [vmem:[%s16177_s1 + $0x268] sm:$0xff] }
  0xe3   :  { %5810 = vmatprep.subr.bf16.mxu1 %v11191_v43  ;;  %v12045_v26 = vcombine.high %v928_v53, %v932_v22  ;;  %v920_v30 = vld [vmem:[%s16177_s1 + $0x1b40] sm:$0xff]  ;;  %v12044_v34 = vcombine.low %v928_v53, %v932_v22  ;;  %v113_v22 = vld [vmem:[%s16177_s1 + $0x208] sm:$0xff] }
  0xe4   :  { %v924_v31 = vld [vmem:[%s16177_s1 + $0x1b60] sm:$0xff]  ;;  %v117_v23 = vld [vmem:[%s16177_s1 + $0x228] sm:$0xff] }
  0xe5   :  { %5770 = vmatpush1.bf16.msra.mxu0 %v11956_v46  ;;  %v12037_v36 = vcombine.high %v920_v30, %v924_v31  ;;  %v912_v41 = vld [vmem:[%s16177_s1 + $0x1b00] sm:$0xff]  ;;  %v12036_v45 = vcombine.low %v920_v30, %v924_v31  ;;  %v233_v30 = vld [vmem:[%s16177_s1 + $0x5c8] sm:$0xff] }
  0xe6   :  { %5811 = vmatpush1.bf16.msra.mxu1 %v11190_v48  ;;  %5771 = vmatprep.subr.bf16.mxu0 %v11949_v50  ;;  %v916_v43 = vld [vmem:[%s16177_s1 + $0x1b20] sm:$0xff]  ;;  %v11263_v48 = vcombine.high %v145_v44, %v149_v19  ;;  %v237_v31 = vld [vmem:[%s16177_s1 + $0x5e8] sm:$0xff] }
  0xe7   :  { %5812 = vmatprep.subr.bf16.mxu1 %v11183_v51  ;;  %v12029_v46 = vcombine.high %v912_v41, %v916_v43  ;;  %v904_v50 = vld [vmem:[%s16177_s1 + $0x1ac0] sm:$0xff]  ;;  %v12028_v56 = vcombine.low %v912_v41, %v916_v43  ;;  %v361_v32 = vld [vmem:[%s16177_s1 + $0x9c8] sm:$0xff]  ;;  %v11351_v41 = vcombine.high %v233_v30, %v237_v31 }
  0xe8   :  { %v908_v51 = vld [vmem:[%s16177_s1 + $0x1ae0] sm:$0xff]  ;;  %v365_v33 = vld [vmem:[%s16177_s1 + $0x9e8] sm:$0xff] }
  0xe9   :  { %5772 = vmatpush1.bf16.msra.mxu0 %v11948_v60  ;;  %v12021_v60 = vcombine.high %v904_v50, %v908_v51  ;;  %v12020_v2 = vcombine.low %v904_v50, %v908_v51  ;;  %v884_v53 = vld [vmem:[%s16177_s1 + $0x1a20] sm:$0xff]  ;;  %v11479_v43 = vcombine.high %v361_v32, %v365_v33  ;;  %v225_v19 = vld [vmem:[%s16177_s1 + $0x588] sm:$0xff]  ;;  %v11350_v51 = vcombine.low %v233_v30, %v237_v31 }
  0xea   :  { %5813 = vmatpush1.bf16.msra.mxu1 %v11182_v61  ;;  %5773 = vmatprep.subr.bf16.mxu0 %v11941_v62  ;;  %v11255_v61 = vcombine.high %v137_v52, %v141_v55  ;;  %v896_v62 = vld [vmem:[%s16177_s1 + $0x1a80] sm:$0xff]  ;;  %v11478_v52 = vcombine.low %v361_v32, %v365_v33  ;;  %v201_v30 = vld [vmem:[%s16177_s1 + $0x4c8] sm:$0xff] }
  0xeb   :  { %5814 = vmatprep.subr.bf16.mxu1 %v11175_v63  ;;  %v900_v63 = vld [vmem:[%s16177_s1 + $0x1aa0] sm:$0xff]  ;;  %v205_v31 = vld [vmem:[%s16177_s1 + $0x4e8] sm:$0xff] }
  0xec   :  { %v12012_v12 = vcombine.low %v896_v62, %v900_v63  ;;  %v329_v32 = vld [vmem:[%s16177_s1 + $0x8c8] sm:$0xff] }
  0xed   :  { %5774 = vmatpush1.bf16.msra.mxu0 %v11940_v5  ;;  %v12013_v5 = vcombine.high %v896_v62, %v900_v63  ;;  %v345_v62 = vld [vmem:[%s16177_s1 + $0x948] sm:$0xff] }
  0xee   :  { %5815 = vmatpush1.bf16.msra.mxu1 %v11174_v6  ;;  %5775 = vmatprep.subr.bf16.mxu0 %v11933_v38  ;;  %v11247_v6 = vcombine.high %v129_v0, %v133_v1  ;;  %v888_v38 = vld [vmem:[%s16177_s1 + $0x1a40] sm:$0xff]  ;;  %v349_v63 = vld [vmem:[%s16177_s1 + $0x968] sm:$0xff] }
  0xef   :  { %5816 = vmatprep.subr.bf16.mxu1 %v11167_v9  ;;  %v892_v9 = vld [vmem:[%s16177_s1 + $0x1a60] sm:$0xff]  ;;  %v333_v33 = vld [vmem:[%s16177_s1 + $0x8e8] sm:$0xff] }
  0xf0   :  { %v12004_v24 = vcombine.low %v888_v38, %v892_v9 }
  0xf1   :  { %5776 = vmatpush1.bf16.msra.mxu0 %v11932_v42  ;;  %v11246_v42 = vcombine.low %v129_v0, %v133_v1 }
  0xf2   :  { %5817 = vmatpush1.bf16.msra.mxu1 %v11166_v15  ;;  %5777 = vmatprep.subr.bf16.mxu0 %v12053_v17  ;;  %v12005_v15 = vcombine.high %v888_v38, %v892_v9  ;;  %v11239_v17 = vcombine.high %v121_v10, %v125_v11 }
  0xf3   :  { %5818 = vmatprep.subr.bf16.mxu1 %v11287_v18  ;;  %v880_v18 = vld [vmem:[%s16177_s1 + $0x1a00] sm:$0xff] }
  0xf5   :  { %5778 = vmatpush2.bf16.msra.mxu0 %v12052_v25  ;;  %v13747_v25 = vshrl.u32 %v946_v13, 7  ;;  %v213_v13 = vld [vmem:[%s16177_s1 + $0x528] sm:$0xff] }
  0xf6   :  { %5819 = vmatpush2.bf16.msra.mxu1 %v11286_v54  ;;  %5779 = vmatprep.subr.bf16.mxu0 %v12045_v26  ;;  %v11238_v54 = vcombine.low %v121_v10, %v125_v11  ;;  %v11997_v26 = vcombine.high %v880_v18, %v884_v53  ;;  %v11463_v11 = vcombine.high %v345_v62, %v349_v63 }
  0xf7   :  { %5820 = vmatprep.subr.bf16.mxu1 %v11279_v28  ;;  %v11231_v28 = vcombine.high %v113_v22, %v117_v23  ;;  %v952_v44 = vsub.s32 1, %v13747_v25 }
  0xf9   :  { %5780 = vmatpush2.bf16.msra.mxu0 %v12044_v34  ;;  %v11996_v34 = vcombine.low %v880_v18, %v884_v53 }
  0xfa   :  { %5821 = vmatpush2.bf16.msra.mxu1 %v11278_v35  ;;  %5781 = vmatprep.subr.bf16.mxu0 %v12037_v36  ;;  %v948_v35 = vsub.s32 0, %v13747_v25  ;;  %v11230_v36 = vcombine.low %v113_v22, %v117_v23 }
  0xfb   :  { %5822 = vmatprep.subr.bf16.mxu1 %v11271_v37  ;;  %v944_v37 = vld [vmem:[%s16178_s2] sm:$0xff] }
  0xfc   :  { %v949_v50 = vrot.slane %v944_v37, %v948_v35 }
  0xfd   :  { %5782 = vmatpush2.bf16.msra.mxu0 %v12036_v45  ;;  %v229_v45 = vld [vmem:[%s16177_s1 + $0x5a8] sm:$0xff] }
  0xfe   :  { %5823 = vmatpush2.bf16.msra.mxu1 %v11270_v21  ;;  %5783 = vmatprep.subr.bf16.mxu0 %v12029_v46  ;;  %v13774_v21 = vcombine.low %v13565_v7, %v13565_v7  ;;  %v353_v46 = vld [vmem:[%s16177_s1 + $0x988] sm:$0xff]  ;;  %v11343_v55 = vcombine.high %v225_v19, %v229_v45  ;;  %v953_v7 = vrot.slane %v944_v37, %v952_v44 }
  0xff   :  { %5824 = vmatprep.subr.bf16.mxu1 %v11263_v48  ;;  %v357_v48 = vld [vmem:[%s16177_s1 + $0x9a8] sm:$0xff]  ;;  %v11319_v37 = vcombine.high %v201_v30, %v205_v31 }
 0x101   :  { %5784 = vmatpush2.bf16.msra.mxu0 %v12028_v56  ;;  %v11471_v56 = vcombine.high %v353_v46, %v357_v48 }
 0x102   :  { %5825 = vmatpush2.bf16.msra.mxu1 %v11262_v57  ;;  %5785 = vmatprep.subr.bf16.mxu0 %v12021_v60  ;;  %v217_v57 = vld [vmem:[%s16177_s1 + $0x548] sm:$0xff] }
 0x103   :  { %5826 = vmatprep.subr.bf16.mxu1 %v11255_v61  ;;  %v221_v60 = vld [vmem:[%s16177_s1 + $0x568] sm:$0xff] }
 0x104   :  { %v11334_v22 = vcombine.low %v217_v57, %v221_v60 }
 0x105   :  { %5786 = vmatpush2.bf16.msra.mxu0 %v12020_v2  ;;  %v11342_v2 = vcombine.low %v225_v19, %v229_v45  ;;  %v197_v19 = vld [vmem:[%s16177_s1 + $0x4a8] sm:$0xff] }
 0x106   :  { %5827 = vmatpush2.bf16.msra.mxu1 %v11254_v3  ;;  %5787 = vmatprep.subr.bf16.mxu0 %v12013_v5  ;;  %v11470_v5 = vcombine.low %v353_v46, %v357_v48  ;;  %v321_v45 = vld [vmem:[%s16177_s1 + $0x888] sm:$0xff]  ;;  %v11318_v48 = vcombine.low %v201_v30, %v205_v31 }
 0x107   :  { %5828 = vmatprep.subr.bf16.mxu1 %v11247_v6  ;;  %v11335_v6 = vcombine.high %v217_v57, %v221_v60  ;;  %v325_v46 = vld [vmem:[%s16177_s1 + $0x8a8] sm:$0xff] }
 0x108   :  { %v317_v57 = vld [vmem:[%s16177_s1 + $0x868] sm:$0xff] }
 0x109   :  { %5788 = vmatpush2.bf16.msra.mxu0 %v12012_v12  ;;  %v209_v12 = vld [vmem:[%s16177_s1 + $0x508] sm:$0xff] }
 0x10a   :  { %5829 = vmatpush2.bf16.msra.mxu1 %v11246_v42  ;;  %5789 = vmatprep.subr.bf16.mxu0 %v12005_v15  ;;  %v337_v15 = vld [vmem:[%s16177_s1 + $0x908] sm:$0xff] }
 0x10b   :  { %5830 = vmatprep.subr.bf16.mxu1 %v11239_v17  ;;  %v341_v17 = vld [vmem:[%s16177_s1 + $0x928] sm:$0xff] }
 0x10d   :  { %5790 = vmatpush2.bf16.msra.mxu0 %v12004_v24  ;;  %v11462_v24 = vcombine.low %v345_v62, %v349_v63 }
 0x10e   :  { %5831 = vmatpush2.bf16.msra.mxu1 %v11238_v54  ;;  %5791 = vmatprep.subr.bf16.mxu0 %v11997_v26  ;;  %v11327_v54 = vcombine.high %v209_v12, %v213_v13 }
 0x10f   :  { %5832 = vmatprep.subr.bf16.mxu1 %v11231_v28  ;;  %v11455_v28 = vcombine.high %v337_v15, %v341_v17 }
 0x111   :  { %5792 = vmatpush2.bf16.msra.mxu0 %v11996_v34  ;;  %v11326_v34 = vcombine.low %v209_v12, %v213_v13  ;;  %v301_v12 = vld [vmem:[%s16177_s1 + $0x7e8] sm:$0xff] }
 0x112   :  { %5833 = vmatpush2.bf16.msra.mxu1 %v11230_v36  ;;  %5843 = vmatprep.subr.bf16.mxu0 %v11351_v41  ;;  %v5549_v61 = vpop.f32.mrf.mxu0  ;;  %v11454_v36 = vcombine.low %v337_v15, %v341_v17  ;;  %v11447_v41 = vcombine.high %v329_v32, %v333_v33  ;;  %v425_v13 = vld [vmem:[%s16177_s1 + $0xbc8] sm:$0xff] }
 0x113   :  { %5884 = vmatprep.subr.bf16.mxu1 %v11479_v43  ;;  %v5550_v0 = vadd.f32 %v5549_v61, %v949_v50  ;;  %v193_v43 = vld [vmem:[%s16177_s1 + $0x488] sm:$0xff]  ;;  %v11446_v50 = vcombine.low %v329_v32, %v333_v33  ;;  %v11438_v61 = vcombine.low %v321_v45, %v325_v46 }
 0x114   :  { %5794 = vmatmul.mubr.bf16.vlgmr.msra.gmra.mxu0 %v13774_v21  ;;  %v5590_v1 = vpop.f32.mrf.mxu1  ;;  %v5551_v3 = vpop.f32.mrf.mxu0  ;;  %v11310_v60 = vcombine.low %v193_v43, %v197_v19  ;;  %v281_v33 = vld [vmem:[%s16177_s1 + $0x748] sm:$0xff] }
 0x115   :  { %5835 = vmatmul.mubr.bf16.vlgmr.msra.gmra.mxu1 %v13110_v16  ;;  %5844 = vmatpush1.bf16.msra.mxu0 %v11350_v51  ;;  %v13800_v38 = vadd.f32 %v5590_v1, %v5550_v0  ;;  %v5552_v9 = vadd.f32 %v5551_v3, %v953_v7  ;;  %v11311_v51 = vcombine.high %v193_v43, %v197_v19  ;;  %v189_v7 = vld [vmem:[%s16177_s1 + $0x468] sm:$0xff] }
 0x116   :  { %5885 = vmatpush1.bf16.msra.mxu1 %v11478_v52  ;;  %5845 = vmatprep.subr.bf16.mxu0 %v11343_v55  ;;  %v5592_v10 = vpop.f32.mrf.mxu1  ;;  %v5553_v42 = vpop.f32.mrf.mxu0  ;;  %v11439_v52 = vcombine.high %v321_v45, %v325_v46  ;;  %v185_v55 = vld [vmem:[%s16177_s1 + $0x448] sm:$0xff] }
 0x117   :  { %5886 = vmatprep.subr.bf16.mxu1 %v11471_v56  ;;  %5875 = vmatprep.mubr.bf16.mxu0 %v12984_v59  ;;  %v13816_v18 = vadd.f32 %v5592_v10, %v5552_v9  ;;  %v313_v56 = vld [vmem:[%s16177_s1 + $0x848] sm:$0xff]  ;;  %v11303_v62 = vcombine.high %v185_v55, %v189_v7 }
 0x118   :  { %5916 = vmatprep.mubr.bf16.mxu1 %v13143_v27  ;;  %v5594_v53 = vpop.f32.mrf.mxu1  ;;  %v5554_v23 = vpop.f32.mrf.mxu0  ;;  %v11431_v63 = vcombine.high %v313_v56, %v317_v57  ;;  %v177_v0 = vld [vmem:[%s16177_s1 + $0x408] sm:$0xff] }
 0x119   :  { %5846 = vmatpush1.bf16.msra.mxu0 %v11342_v2  ;;  %v181_v1 = vld [vmem:[%s16177_s1 + $0x428] sm:$0xff] }
 0x11a   :  { %5887 = vmatpush1.bf16.msra.mxu1 %v11470_v5  ;;  %5847 = vmatprep.subr.bf16.mxu0 %v11335_v6  ;;  %v5595_v26 = vpop.f32.mrf.mxu1  ;;  %v305_v2 = vld [vmem:[%s16177_s1 + $0x808] sm:$0xff]  ;;  %v11302_v5 = vcombine.low %v185_v55, %v189_v7  ;;  %v11430_v6 = vcombine.low %v313_v56, %v317_v57  ;;  %v11295_v9 = vcombine.high %v177_v0, %v181_v1 }
 0x11b   :  { %5888 = vmatprep.subr.bf16.mxu1 %v11463_v11  ;;  %v309_v3 = vld [vmem:[%s16177_s1 + $0x828] sm:$0xff]  ;;  %v11294_v15 = vcombine.low %v177_v0, %v181_v1 }
 0x11c   :  { %v11423_v10 = vcombine.high %v305_v2, %v309_v3  ;;  %v297_v11 = vld [vmem:[%s16177_s1 + $0x7c8] sm:$0xff]  ;;  %v11422_v17 = vcombine.low %v305_v2, %v309_v3 }
 0x11d   :  { %5848 = vmatpush1.bf16.msra.mxu0 %v11334_v22  ;;  %v429_v42 = vld [vmem:[%s16177_s1 + $0xbe8] sm:$0xff]  ;;  %v11415_v53 = vcombine.high %v297_v11, %v301_v12 }
 0x11e   :  { %5889 = vmatpush1.bf16.msra.mxu1 %v11462_v24  ;;  %5849 = vmatprep.subr.bf16.mxu0 %v11327_v54  ;;  %v11543_v22 = vcombine.high %v425_v13, %v429_v42  ;;  %v289_v23 = vld [vmem:[%s16177_s1 + $0x788] sm:$0xff]  ;;  %v11542_v30 = vcombine.low %v425_v13, %v429_v42 }
 0x11f   :  { %5890 = vmatprep.subr.bf16.mxu1 %v11455_v28  ;;  %v293_v24 = vld [vmem:[%s16177_s1 + $0x7a8] sm:$0xff]  ;;  %v11414_v28 = vcombine.low %v297_v11, %v301_v12 }
 0x120   :  { %v417_v54 = vld [vmem:[%s16177_s1 + $0xb88] sm:$0xff]  ;;  %v11407_v31 = vcombine.high %v289_v23, %v293_v24 }
 0x121   :  { %5850 = vmatpush1.bf16.msra.mxu0 %v11326_v34  ;;  %v421_v26 = vld [vmem:[%s16177_s1 + $0xba8] sm:$0xff] }
 0x122   :  { %5891 = vmatpush1.bf16.msra.mxu1 %v11454_v36  ;;  %5851 = vmatprep.subr.bf16.mxu0 %v11319_v37  ;;  %v11535_v32 = vcombine.high %v417_v54, %v421_v26  ;;  %v285_v34 = vld [vmem:[%s16177_s1 + $0x768] sm:$0xff]  ;;  %v11534_v43 = vcombine.low %v417_v54, %v421_v26 }
 0x123   :  { %5892 = vmatprep.subr.bf16.mxu1 %v11447_v41  ;;  %v409_v36 = vld [vmem:[%s16177_s1 + $0xb48] sm:$0xff]  ;;  %v11406_v41 = vcombine.low %v289_v23, %v293_v24  ;;  %v11399_v19 = vcombine.high %v281_v33, %v285_v34 }
 0x124   :  { %v413_v37 = vld [vmem:[%s16177_s1 + $0xb68] sm:$0xff] }
 0x125   :  { %5852 = vmatpush1.bf16.msra.mxu0 %v11318_v48  ;;  %v11527_v45 = vcombine.high %v409_v36, %v413_v37  ;;  %v273_v46 = vld [vmem:[%s16177_s1 + $0x708] sm:$0xff]  ;;  %v11526_v55 = vcombine.low %v409_v36, %v413_v37 }
 0x126   :  { %5893 = vmatpush1.bf16.msra.mxu1 %v11446_v50  ;;  %5853 = vmatprep.subr.bf16.mxu0 %v11311_v51  ;;  %v277_v48 = vld [vmem:[%s16177_s1 + $0x728] sm:$0xff] }
 0x127   :  { %5894 = vmatprep.subr.bf16.mxu1 %v11439_v52  ;;  %v401_v50 = vld [vmem:[%s16177_s1 + $0xb08] sm:$0xff]  ;;  %v11398_v52 = vcombine.low %v281_v33, %v285_v34  ;;  %v11391_v7 = vcombine.high %v273_v46, %v277_v48 }
 0x128   :  { %v405_v51 = vld [vmem:[%s16177_s1 + $0xb28] sm:$0xff] }
 0x129   :  { %5854 = vmatpush1.bf16.msra.mxu0 %v11310_v60  ;;  %v11519_v56 = vcombine.high %v401_v50, %v405_v51  ;;  %v265_v57 = vld [vmem:[%s16177_s1 + $0x6c8] sm:$0xff]  ;;  %v11518_v0 = vcombine.low %v401_v50, %v405_v51 }
 0x12a   :  { %5895 = vmatpush1.bf16.msra.mxu1 %v11438_v61  ;;  %5855 = vmatprep.subr.bf16.mxu0 %v11303_v62  ;;  %v269_v60 = vld [vmem:[%s16177_s1 + $0x6e8] sm:$0xff] }
 0x12b   :  { %5896 = vmatprep.subr.bf16.mxu1 %v11431_v63  ;;  %v393_v61 = vld [vmem:[%s16177_s1 + $0xac8] sm:$0xff]  ;;  %v11390_v63 = vcombine.low %v273_v46, %v277_v48  ;;  %v11383_v1 = vcombine.high %v265_v57, %v269_v60 }
 0x12c   :  { %v397_v62 = vld [vmem:[%s16177_s1 + $0xae8] sm:$0xff] }
 0x12d   :  { %5856 = vmatpush1.bf16.msra.mxu0 %v11302_v5  ;;  %v11511_v2 = vcombine.high %v393_v61, %v397_v62  ;;  %v257_v3 = vld [vmem:[%s16177_s1 + $0x688] sm:$0xff]  ;;  %v11510_v11 = vcombine.low %v393_v61, %v397_v62 }
 0x12e   :  { %5897 = vmatpush1.bf16.msra.mxu1 %v11430_v6  ;;  %5857 = vmatprep.subr.bf16.mxu0 %v11295_v9  ;;  %v261_v5 = vld [vmem:[%s16177_s1 + $0x6a8] sm:$0xff] }
 0x12f   :  { %5898 = vmatprep.subr.bf16.mxu1 %v11423_v10  ;;  %v385_v6 = vld [vmem:[%s16177_s1 + $0xa88] sm:$0xff]  ;;  %v11382_v10 = vcombine.low %v265_v57, %v269_v60  ;;  %v11375_v12 = vcombine.high %v257_v3, %v261_v5 }
 0x130   :  { %v389_v9 = vld [vmem:[%s16177_s1 + $0xaa8] sm:$0xff] }
 0x131   :  { %5858 = vmatpush1.bf16.msra.mxu0 %v11294_v15  ;;  %v11503_v13 = vcombine.high %v385_v6, %v389_v9  ;;  %v249_v42 = vld [vmem:[%s16177_s1 + $0x648] sm:$0xff]  ;;  %v11502_v23 = vcombine.low %v385_v6, %v389_v9 }
 0x132   :  { %5899 = vmatpush1.bf16.msra.mxu1 %v11422_v17  ;;  %5859 = vmatprep.subr.bf16.mxu0 %v11415_v53  ;;  %v253_v15 = vld [vmem:[%s16177_s1 + $0x668] sm:$0xff] }
 0x133   :  { %5900 = vmatprep.subr.bf16.mxu1 %v11543_v22  ;;  %v377_v17 = vld [vmem:[%s16177_s1 + $0xa48] sm:$0xff]  ;;  %v11374_v22 = vcombine.low %v257_v3, %v261_v5  ;;  %v11367_v24 = vcombine.high %v249_v42, %v253_v15 }
 0x134   :  { %v381_v53 = vld [vmem:[%s16177_s1 + $0xa68] sm:$0xff] }
 0x135   :  { %5860 = vmatpush2.bf16.msra.mxu0 %v11414_v28  ;;  %v11495_v54 = vcombine.high %v377_v17, %v381_v53  ;;  %v241_v26 = vld [vmem:[%s16177_s1 + $0x608] sm:$0xff]  ;;  %v11494_v33 = vcombine.low %v377_v17, %v381_v53 }
 0x136   :  { %5901 = vmatpush2.bf16.msra.mxu1 %v11542_v30  ;;  %5861 = vmatprep.subr.bf16.mxu0 %v11407_v31  ;;  %v245_v28 = vld [vmem:[%s16177_s1 + $0x628] sm:$0xff] }
 0x137   :  { %5902 = vmatprep.subr.bf16.mxu1 %v11535_v32  ;;  %v369_v30 = vld [vmem:[%s16177_s1 + $0xa08] sm:$0xff]  ;;  %v11366_v32 = vcombine.low %v249_v42, %v253_v15  ;;  %v11359_v34 = vcombine.high %v241_v26, %v245_v28 }
 0x138   :  { %v373_v31 = vld [vmem:[%s16177_s1 + $0xa28] sm:$0xff] }
 0x139   :  { %5862 = vmatpush2.bf16.msra.mxu0 %v11406_v41  ;;  %v11487_v36 = vcombine.high %v369_v30, %v373_v31  ;;  %v489_v37 = vld [vmem:[%s16177_s1 + $0xdc8] sm:$0xff]  ;;  %v11486_v46 = vcombine.low %v369_v30, %v373_v31 }
 0x13a   :  { %5903 = vmatpush2.bf16.msra.mxu1 %v11534_v43  ;;  %5863 = vmatprep.subr.bf16.mxu0 %v11399_v19  ;;  %v493_v41 = vld [vmem:[%s16177_s1 + $0xde8] sm:$0xff] }
 0x13b   :  { %5904 = vmatprep.subr.bf16.mxu1 %v11527_v45  ;;  %v617_v43 = vld [vmem:[%s16177_s1 + $0x11c8] sm:$0xff]  ;;  %v11358_v45 = vcombine.low %v241_v26, %v245_v28  ;;  %v11607_v48 = vcombine.high %v489_v37, %v493_v41 }
 0x13c   :  { %v621_v19 = vld [vmem:[%s16177_s1 + $0x11e8] sm:$0xff] }
 0x13d   :  { %5864 = vmatpush2.bf16.msra.mxu0 %v11398_v52  ;;  %v11735_v50 = vcombine.high %v617_v43, %v621_v19  ;;  %v481_v51 = vld [vmem:[%s16177_s1 + $0xd88] sm:$0xff]  ;;  %v11734_v57 = vcombine.low %v617_v43, %v621_v19 }
 0x13e   :  { %5905 = vmatpush2.bf16.msra.mxu1 %v11526_v55  ;;  %5865 = vmatprep.subr.bf16.mxu0 %v11391_v7  ;;  %v485_v52 = vld [vmem:[%s16177_s1 + $0xda8] sm:$0xff] }
 0x13f   :  { %5906 = vmatprep.subr.bf16.mxu1 %v11519_v56  ;;  %v609_v55 = vld [vmem:[%s16177_s1 + $0x1188] sm:$0xff]  ;;  %v11606_v56 = vcombine.low %v489_v37, %v493_v41  ;;  %v11599_v60 = vcombine.high %v481_v51, %v485_v52  ;;  %v11598_v6 = vcombine.low %v481_v51, %v485_v52 }
 0x140   :  { %v613_v7 = vld [vmem:[%s16177_s1 + $0x11a8] sm:$0xff] }
 0x141   :  { %5866 = vmatpush2.bf16.msra.mxu0 %v11390_v63  ;;  %v11727_v61 = vcombine.high %v609_v55, %v613_v7  ;;  %v473_v62 = vld [vmem:[%s16177_s1 + $0xd48] sm:$0xff] }
 0x142   :  { %5907 = vmatpush2.bf16.msra.mxu1 %v11518_v0  ;;  %5867 = vmatprep.subr.bf16.mxu0 %v11383_v1  ;;  %v477_v63 = vld [vmem:[%s16177_s1 + $0xd68] sm:$0xff] }
 0x143   :  { %5908 = vmatprep.subr.bf16.mxu1 %v11511_v2  ;;  %v601_v1 = vld [vmem:[%s16177_s1 + $0x1148] sm:$0xff] }
 0x144   :  { %v605_v2 = vld [vmem:[%s16177_s1 + $0x1168] sm:$0xff] }
 0x145   :  { %5868 = vmatpush2.bf16.msra.mxu0 %v11382_v10  ;;  %v11726_v10 = vcombine.low %v609_v55, %v613_v7  ;;  %v11719_v15 = vcombine.high %v601_v1, %v605_v2  ;;  %v469_v17 = vld [vmem:[%s16177_s1 + $0xd28] sm:$0xff]  ;;  %v11718_v28 = vcombine.low %v601_v1, %v605_v2 }
 0x146   :  { %5909 = vmatpush2.bf16.msra.mxu1 %v11510_v11  ;;  %5869 = vmatprep.subr.bf16.mxu0 %v11375_v12  ;;  %v11591_v11 = vcombine.high %v473_v62, %v477_v63  ;;  %v589_v37 = vld [vmem:[%s16177_s1 + $0x10e8] sm:$0xff] }
 0x147   :  { %5910 = vmatprep.subr.bf16.mxu1 %v11503_v13  ;;  %v581_v51 = vld [vmem:[%s16177_s1 + $0x10a8] sm:$0xff] }
 0x149   :  { %5870 = vmatpush2.bf16.msra.mxu0 %v11374_v22  ;;  %v593_v22 = vld [vmem:[%s16177_s1 + $0x1108] sm:$0xff] }
 0x14a   :  { %5911 = vmatpush2.bf16.msra.mxu1 %v11502_v23  ;;  %5871 = vmatprep.subr.bf16.mxu0 %v11367_v24 }
 0x14b   :  { %5912 = vmatprep.subr.bf16.mxu1 %v11495_v54  ;;  %v11590_v54 = vcombine.low %v473_v62, %v477_v63  ;;  %v573_v62 = vld [vmem:[%s16177_s1 + $0x1068] sm:$0xff] }
 0x14d   :  { %5872 = vmatpush2.bf16.msra.mxu0 %v11366_v32 }
 0x14e   :  { %5913 = vmatpush2.bf16.msra.mxu1 %v11494_v33  ;;  %5873 = vmatprep.subr.bf16.mxu0 %v11359_v34  ;;  %v457_v33 = vld [vmem:[%s16177_s1 + $0xcc8] sm:$0xff] }
 0x14f   :  { %5914 = vmatprep.subr.bf16.mxu1 %v11487_v36  ;;  %v461_v34 = vld [vmem:[%s16177_s1 + $0xce8] sm:$0xff] }
 0x150   :  { %v585_v36 = vld [vmem:[%s16177_s1 + $0x10c8] sm:$0xff]  ;;  %v11575_v19 = vcombine.high %v457_v33, %v461_v34  ;;  %v11574_v52 = vcombine.low %v457_v33, %v461_v34 }
 0x151   :  { %5874 = vmatpush2.bf16.msra.mxu0 %v11358_v45  ;;  %v11703_v45 = vcombine.high %v585_v36, %v589_v37  ;;  %v11702_v55 = vcombine.low %v585_v36, %v589_v37  ;;  %v537_v37 = vld [vmem:[%s16177_s1 + $0xf48] sm:$0xff] }
 0x152   :  { %5915 = vmatpush2.bf16.msra.mxu1 %v11486_v46  ;;  %5925 = vmatprep.subr.bf16.mxu0 %v11607_v48  ;;  %v5631_v0 = vpop.f32.mrf.mxu0  ;;  %v449_v46 = vld [vmem:[%s16177_s1 + $0xc88] sm:$0xff] }
 0x153   :  { %5966 = vmatprep.subr.bf16.mxu1 %v11735_v50  ;;  %v5632_v3 = vadd.f32 %v5631_v0, %v13800_v38  ;;  %v465_v38 = vld [vmem:[%s16177_s1 + $0xd08] sm:$0xff] }
 0x154   :  { %5876 = vmatmul.mubr.bf16.vlgmr.msra.gmra.mxu0 %v13125_v20  ;;  %v5672_v5 = vpop.f32.mrf.mxu1  ;;  %v5633_v9 = vpop.f32.mrf.mxu0  ;;  %v11583_v30 = vcombine.high %v465_v38, %v469_v17  ;;  %v11582_v41 = vcombine.low %v465_v38, %v469_v17  ;;  %v453_v48 = vld [vmem:[%s16177_s1 + $0xca8] sm:$0xff] }
 0x155   :  { %5917 = vmatmul.mubr.bf16.vlgmr.msra.gmra.mxu1 %v13343_v39  ;;  %5926 = vmatpush1.bf16.msra.mxu0 %v11606_v56  ;;  %v14001_v12 = vadd.f32 %v5672_v5, %v5632_v3  ;;  %v5634_v13 = vadd.f32 %v5633_v9, %v13816_v18  ;;  %v597_v18 = vld [vmem:[%s16177_s1 + $0x1128] sm:$0xff]  ;;  %v11567_v7 = vcombine.high %v449_v46, %v453_v48 }
 0x156   :  { %5967 = vmatpush1.bf16.msra.mxu1 %v11734_v57  ;;  %5927 = vmatprep.subr.bf16.mxu0 %v11599_v60  ;;  %v5674_v42 = vpop.f32.mrf.mxu1  ;;  %v5635_v53 = vpop.f32.mrf.mxu0  ;;  %v11711_v32 = vcombine.high %v593_v22, %v597_v18  ;;  %v11710_v43 = vcombine.low %v593_v22, %v597_v18  ;;  %v577_v50 = vld [vmem:[%s16177_s1 + $0x1088] sm:$0xff]  ;;  %v11566_v63 = vcombine.low %v449_v46, %v453_v48 }
 0x157   :  { %5968 = vmatprep.subr.bf16.mxu1 %v11727_v61  ;;  %5957 = vmatprep.mubr.bf16.mxu0 %v13151_v29  ;;  %v14018_v23 = vadd.f32 %v5674_v42, %v5634_v13  ;;  %v11695_v56 = vcombine.high %v577_v50, %v581_v51  ;;  %v441_v57 = vld [vmem:[%s16177_s1 + $0xc48] sm:$0xff]  ;;  %v11694_v0 = vcombine.low %v577_v50, %v581_v51 }
 0x158   :  { %5998 = vmatprep.mubr.bf16.mxu1 %v13365_v47  ;;  %v5676_v24 = vpop.f32.mrf.mxu1  ;;  %v5636_v26 = vpop.f32.mrf.mxu0  ;;  %v445_v60 = vld [vmem:[%s16177_s1 + $0xc68] sm:$0xff] }
 0x159   :  { %5928 = vmatpush1.bf16.msra.mxu0 %v11598_v6  ;;  %v569_v61 = vld [vmem:[%s16177_s1 + $0x1048] sm:$0xff]  ;;  %v11559_v1 = vcombine.high %v441_v57, %v445_v60 }
 0x15a   :  { %5969 = vmatpush1.bf16.msra.mxu1 %v11726_v10  ;;  %5929 = vmatprep.subr.bf16.mxu0 %v11591_v11  ;;  %v5677_v31 = vpop.f32.mrf.mxu1  ;;  %v11687_v2 = vcombine.high %v569_v61, %v573_v62  ;;  %v433_v3 = vld [vmem:[%s16177_s1 + $0xc08] sm:$0xff]  ;;  %v11558_v10 = vcombine.low %v441_v57, %v445_v60  ;;  %v11686_v11 = vcombine.low %v569_v61, %v573_v62 }
 0x15b   :  { %5970 = vmatprep.subr.bf16.mxu1 %v11719_v15  ;;  %v437_v5 = vld [vmem:[%s16177_s1 + $0xc28] sm:$0xff] }
 0x15c   :  { %v561_v6 = vld [vmem:[%s16177_s1 + $0x1008] sm:$0xff]  ;;  %v11551_v13 = vcombine.high %v433_v3, %v437_v5  ;;  %v11550_v22 = vcombine.low %v433_v3, %v437_v5 }
 0x15d   :  { %5930 = vmatpush1.bf16.msra.mxu0 %v11590_v54  ;;  %v565_v9 = vld [vmem:[%s16177_s1 + $0x1028] sm:$0xff] }
 0x15e   :  { %5971 = vmatpush1.bf16.msra.mxu1 %v11718_v28  ;;  %5931 = vmatprep.subr.bf16.mxu0 %v11583_v30  ;;  %v11679_v42 = vcombine.high %v561_v6, %v565_v9  ;;  %v553_v15 = vld [vmem:[%s16177_s1 + $0xfc8] sm:$0xff]  ;;  %v11678_v18 = vcombine.low %v561_v6, %v565_v9 }
 0x15f   :  { %5972 = vmatprep.subr.bf16.mxu1 %v11711_v32  ;;  %v557_v38 = vld [vmem:[%s16177_s1 + $0xfe8] sm:$0xff] }
 0x160   :  { %v681_v17 = vld [vmem:[%s16177_s1 + $0x13c8] sm:$0xff]  ;;  %v11671_v24 = vcombine.high %v553_v15, %v557_v38  ;;  %v11670_v32 = vcombine.low %v553_v15, %v557_v38 }
 0x161   :  { %5932 = vmatpush1.bf16.msra.mxu0 %v11582_v41  ;;  %v685_v53 = vld [vmem:[%s16177_s1 + $0x13e8] sm:$0xff] }
 0x162   :  { %5973 = vmatpush1.bf16.msra.mxu1 %v11710_v43  ;;  %5933 = vmatprep.subr.bf16.mxu0 %v11575_v19  ;;  %v11799_v54 = vcombine.high %v681_v17, %v685_v53  ;;  %v545_v26 = vld [vmem:[%s16177_s1 + $0xf88] sm:$0xff]  ;;  %v11798_v33 = vcombine.low %v681_v17, %v685_v53 }
 0x163   :  { %5974 = vmatprep.subr.bf16.mxu1 %v11703_v45  ;;  %v549_v28 = vld [vmem:[%s16177_s1 + $0xfa8] sm:$0xff] }
 0x164   :  { %v673_v30 = vld [vmem:[%s16177_s1 + $0x1388] sm:$0xff]  ;;  %v11663_v34 = vcombine.high %v545_v26, %v549_v28  ;;  %v11662_v45 = vcombine.low %v545_v26, %v549_v28 }
 0x165   :  { %5934 = vmatpush1.bf16.msra.mxu0 %v11574_v52  ;;  %v677_v31 = vld [vmem:[%s16177_s1 + $0x13a8] sm:$0xff] }
 0x166   :  { %5975 = vmatpush1.bf16.msra.mxu1 %v11702_v55  ;;  %5935 = vmatprep.subr.bf16.mxu0 %v11567_v7  ;;  %v11791_v36 = vcombine.high %v673_v30, %v677_v31  ;;  %v541_v41 = vld [vmem:[%s16177_s1 + $0xf68] sm:$0xff]  ;;  %v11790_v46 = vcombine.low %v673_v30, %v677_v31 }
 0x167   :  { %5976 = vmatprep.subr.bf16.mxu1 %v11695_v56  ;;  %v665_v43 = vld [vmem:[%s16177_s1 + $0x1348] sm:$0xff]  ;;  %v11655_v48 = vcombine.high %v537_v37, %v541_v41  ;;  %v11654_v56 = vcombine.low %v537_v37, %v541_v41 }
 0x168   :  { %v669_v19 = vld [vmem:[%s16177_s1 + $0x1368] sm:$0xff] }
 0x169   :  { %5936 = vmatpush1.bf16.msra.mxu0 %v11566_v63  ;;  %v11783_v50 = vcombine.high %v665_v43, %v669_v19  ;;  %v529_v51 = vld [vmem:[%s16177_s1 + $0xf08] sm:$0xff]  ;;  %v11782_v57 = vcombine.low %v665_v43, %v669_v19 }
 0x16a   :  { %5977 = vmatpush1.bf16.msra.mxu1 %v11694_v0  ;;  %5937 = vmatprep.subr.bf16.mxu0 %v11559_v1  ;;  %v533_v52 = vld [vmem:[%s16177_s1 + $0xf28] sm:$0xff] }
 0x16b   :  { %5978 = vmatprep.subr.bf16.mxu1 %v11687_v2  ;;  %v657_v55 = vld [vmem:[%s16177_s1 + $0x1308] sm:$0xff]  ;;  %v11647_v60 = vcombine.high %v529_v51, %v533_v52  ;;  %v11646_v2 = vcombine.low %v529_v51, %v533_v52 }
 0x16c   :  { %v661_v7 = vld [vmem:[%s16177_s1 + $0x1328] sm:$0xff] }
 0x16d   :  { %5938 = vmatpush1.bf16.msra.mxu0 %v11558_v10  ;;  %v11775_v61 = vcombine.high %v657_v55, %v661_v7  ;;  %v521_v62 = vld [vmem:[%s16177_s1 + $0xec8] sm:$0xff]  ;;  %v11774_v3 = vcombine.low %v657_v55, %v661_v7 }
 0x16e   :  { %5979 = vmatpush1.bf16.msra.mxu1 %v11686_v11  ;;  %5939 = vmatprep.subr.bf16.mxu0 %v11551_v13  ;;  %v525_v63 = vld [vmem:[%s16177_s1 + $0xee8] sm:$0xff] }
 0x16f   :  { %5980 = vmatprep.subr.bf16.mxu1 %v11679_v42  ;;  %v649_v0 = vld [vmem:[%s16177_s1 + $0x12c8] sm:$0xff]  ;;  %v11639_v5 = vcombine.high %v521_v62, %v525_v63  ;;  %v11638_v42 = vcombine.low %v521_v62, %v525_v63 }
 0x170   :  { %v653_v1 = vld [vmem:[%s16177_s1 + $0x12e8] sm:$0xff] }
 0x171   :  { %5940 = vmatpush1.bf16.msra.mxu0 %v11550_v22  ;;  %v11767_v6 = vcombine.high %v649_v0, %v653_v1  ;;  %v513_v9 = vld [vmem:[%s16177_s1 + $0xe88] sm:$0xff]  ;;  %v11766_v15 = vcombine.low %v649_v0, %v653_v1 }
 0x172   :  { %5981 = vmatpush1.bf16.msra.mxu1 %v11678_v18  ;;  %5941 = vmatprep.subr.bf16.mxu0 %v11671_v24  ;;  %v517_v10 = vld [vmem:[%s16177_s1 + $0xea8] sm:$0xff] }
 0x173   :  { %5982 = vmatprep.subr.bf16.mxu1 %v11799_v54  ;;  %v641_v11 = vld [vmem:[%s16177_s1 + $0x1288] sm:$0xff]  ;;  %v11631_v38 = vcombine.high %v513_v9, %v517_v10  ;;  %v11630_v54 = vcombine.low %v513_v9, %v517_v10 }
 0x174   :  { %v645_v13 = vld [vmem:[%s16177_s1 + $0x12a8] sm:$0xff] }
 0x175   :  { %5942 = vmatpush2.bf16.msra.mxu0 %v11670_v32  ;;  %v11759_v17 = vcombine.high %v641_v11, %v645_v13  ;;  %v505_v53 = vld [vmem:[%s16177_s1 + $0xe48] sm:$0xff]  ;;  %v11758_v26 = vcombine.low %v641_v11, %v645_v13 }
 0x176   :  { %5983 = vmatpush2.bf16.msra.mxu1 %v11798_v33  ;;  %5943 = vmatprep.subr.bf16.mxu0 %v11663_v34  ;;  %v509_v22 = vld [vmem:[%s16177_s1 + $0xe68] sm:$0xff] }
 0x177   :  { %5984 = vmatprep.subr.bf16.mxu1 %v11791_v36  ;;  %v633_v18 = vld [vmem:[%s16177_s1 + $0x1248] sm:$0xff]  ;;  %v11623_v28 = vcombine.high %v505_v53, %v509_v22  ;;  %v11622_v36 = vcombine.low %v505_v53, %v509_v22 }
 0x178   :  { %v637_v24 = vld [vmem:[%s16177_s1 + $0x1268] sm:$0xff] }
 0x179   :  { %5944 = vmatpush2.bf16.msra.mxu0 %v11662_v45  ;;  %v11751_v30 = vcombine.high %v633_v18, %v637_v24  ;;  %v497_v31 = vld [vmem:[%s16177_s1 + $0xe08] sm:$0xff]  ;;  %v11750_v37 = vcombine.low %v633_v18, %v637_v24 }
 0x17a   :  { %5985 = vmatpush2.bf16.msra.mxu1 %v11790_v46  ;;  %5945 = vmatprep.subr.bf16.mxu0 %v11655_v48  ;;  %v501_v32 = vld [vmem:[%s16177_s1 + $0xe28] sm:$0xff] }
 0x17b   :  { %5986 = vmatprep.subr.bf16.mxu1 %v11783_v50  ;;  %v625_v33 = vld [vmem:[%s16177_s1 + $0x1208] sm:$0xff]  ;;  %v11615_v41 = vcombine.high %v497_v31, %v501_v32  ;;  %v11614_v50 = vcombine.low %v497_v31, %v501_v32 }
 0x17c   :  { %v629_v34 = vld [vmem:[%s16177_s1 + $0x1228] sm:$0xff] }
 0x17d   :  { %5946 = vmatpush2.bf16.msra.mxu0 %v11654_v56  ;;  %v11743_v43 = vcombine.high %v625_v33, %v629_v34  ;;  %v745_v19 = vld [vmem:[%s16177_s1 + $0x15c8] sm:$0xff]  ;;  %v11742_v51 = vcombine.low %v625_v33, %v629_v34 }
 0x17e   :  { %5987 = vmatpush2.bf16.msra.mxu1 %v11782_v57  ;;  %5947 = vmatprep.subr.bf16.mxu0 %v11647_v60  ;;  %v749_v45 = vld [vmem:[%s16177_s1 + $0x15e8] sm:$0xff] }
 0x17f   :  { %5988 = vmatprep.subr.bf16.mxu1 %v11775_v61  ;;  %v873_v46 = vld [vmem:[%s16177_s1 + $0x19c8] sm:$0xff]  ;;  %v11863_v52 = vcombine.high %v745_v19, %v749_v45  ;;  %v11862_v61 = vcombine.low %v745_v19, %v749_v45 }
 0x180   :  { %v877_v48 = vld [vmem:[%s16177_s1 + $0x19e8] sm:$0xff] }
 0x181   :  { %5948 = vmatpush2.bf16.msra.mxu0 %v11646_v2  ;;  %v11991_v55 = vcombine.high %v873_v46, %v877_v48  ;;  %v737_v7 = vld [vmem:[%s16177_s1 + $0x1588] sm:$0xff]  ;;  %v11990_v62 = vcombine.low %v873_v46, %v877_v48 }
 0x182   :  { %5989 = vmatpush2.bf16.msra.mxu1 %v11774_v3  ;;  %5949 = vmatprep.subr.bf16.mxu0 %v11639_v5  ;;  %v741_v56 = vld [vmem:[%s16177_s1 + $0x15a8] sm:$0xff] }
 0x183   :  { %5990 = vmatprep.subr.bf16.mxu1 %v11767_v6  ;;  %v865_v57 = vld [vmem:[%s16177_s1 + $0x1988] sm:$0xff]  ;;  %v11855_v63 = vcombine.high %v737_v7, %v741_v56  ;;  %v11854_v11 = vcombine.low %v737_v7, %v741_v56 }
 0x184   :  { %v869_v60 = vld [vmem:[%s16177_s1 + $0x19a8] sm:$0xff] }
 0x185   :  { %5950 = vmatpush2.bf16.msra.mxu0 %v11638_v42  ;;  %v11983_v0 = vcombine.high %v865_v57, %v869_v60  ;;  %v729_v1 = vld [vmem:[%s16177_s1 + $0x1548] sm:$0xff]  ;;  %v11982_v42 = vcombine.low %v865_v57, %v869_v60 }
 0x186   :  { %5991 = vmatpush2.bf16.msra.mxu1 %v11766_v15  ;;  %5951 = vmatprep.subr.bf16.mxu0 %v11631_v38  ;;  %v733_v2 = vld [vmem:[%s16177_s1 + $0x1568] sm:$0xff] }
 0x187   :  { %5992 = vmatprep.subr.bf16.mxu1 %v11759_v17  ;;  %v857_v5 = vld [vmem:[%s16177_s1 + $0x1948] sm:$0xff]  ;;  %v11847_v15 = vcombine.high %v729_v1, %v733_v2 }
 0x188   :  { %v861_v6 = vld [vmem:[%s16177_s1 + $0x1968] sm:$0xff] }
 0x189   :  { %5952 = vmatpush2.bf16.msra.mxu0 %v11630_v54  ;;  %v11975_v22 = vcombine.high %v857_v5, %v861_v6  ;;  %v725_v18 = vld [vmem:[%s16177_s1 + $0x1528] sm:$0xff]  ;;  %v11974_v32 = vcombine.low %v857_v5, %v861_v6 }
 0x18a   :  { %5993 = vmatpush2.bf16.msra.mxu1 %v11758_v26  ;;  %5953 = vmatprep.subr.bf16.mxu0 %v11623_v28  ;;  %v849_v54 = vld [vmem:[%s16177_s1 + $0x1908] sm:$0xff] }
 0x18b   :  { %5994 = vmatprep.subr.bf16.mxu1 %v11751_v30  ;;  %v11846_v30 = vcombine.low %v729_v1, %v733_v2  ;;  %v845_v19 = vld [vmem:[%s16177_s1 + $0x18e8] sm:$0xff] }
 0x18c   :  { %v837_v7 = vld [vmem:[%s16177_s1 + $0x18a8] sm:$0xff] }
 0x18d   :  { %5954 = vmatpush2.bf16.msra.mxu0 %v11622_v36  ;;  %v829_v1 = vld [vmem:[%s16177_s1 + $0x1868] sm:$0xff] }
 0x18e   :  { %5995 = vmatpush2.bf16.msra.mxu1 %v11750_v37  ;;  %5955 = vmatprep.subr.bf16.mxu0 %v11615_v41  ;;  %v713_v37 = vld [vmem:[%s16177_s1 + $0x14c8] sm:$0xff] }
 0x18f   :  { %5996 = vmatprep.subr.bf16.mxu1 %v11743_v43  ;;  %v717_v41 = vld [vmem:[%s16177_s1 + $0x14e8] sm:$0xff] }
 0x190   :  { %v841_v43 = vld [vmem:[%s16177_s1 + $0x18c8] sm:$0xff]  ;;  %v11831_v48 = vcombine.high %v713_v37, %v717_v41  ;;  %v11830_v56 = vcombine.low %v713_v37, %v717_v41 }
 0x191   :  { %5956 = vmatpush2.bf16.msra.mxu0 %v11614_v50  ;;  %v11959_v50 = vcombine.high %v841_v43, %v845_v19  ;;  %v11958_v57 = vcombine.low %v841_v43, %v845_v19  ;;  %v793_v19 = vld [vmem:[%s16177_s1 + $0x1748] sm:$0xff] }
 0x192   :  { %5997 = vmatpush2.bf16.msra.mxu1 %v11742_v51  ;;  %6007 = vmatprep.subr.bf16.mxu0 %v11863_v52  ;;  %v705_v51 = vld [vmem:[%s16177_s1 + $0x1488] sm:$0xff] }
 0x193   :  { %6048 = vmatprep.subr.bf16.mxu1 %v11991_v55  ;;  %v709_v52 = vld [vmem:[%s16177_s1 + $0x14a8] sm:$0xff] }
 0x194   :  { %v5713_v3 = vpop.f32.mrf.mxu0  ;;  %5958 = vmatmul.mubr.bf16.vlgmr.msra.gmra.mxu0 %v13347_v40  ;;  %v833_v55 = vld [vmem:[%s16177_s1 + $0x1888] sm:$0xff]  ;;  %v11823_v60 = vcombine.high %v705_v51, %v709_v52  ;;  %v11822_v2 = vcombine.low %v705_v51, %v709_v52 }
 0x195   :  { %v5714_v9 = vadd.f32 %v5713_v3, %v14001_v12  ;;  %v5754_v10 = vpop.f32.mrf.mxu1  ;;  %5999 = vmatmul.mubr.bf16.vlgmr.msra.gmra.mxu1 %v13554_v4  ;;  %6008 = vmatpush1.bf16.msra.mxu0 %v11862_v61  ;;  %v721_v12 = vld [vmem:[%s16177_s1 + $0x1508] sm:$0xff]  ;;  %v11951_v61 = vcombine.high %v833_v55, %v837_v7  ;;  %v11950_v3 = vcombine.low %v833_v55, %v837_v7 }
 0x196   :  { %6049 = vmatpush1.bf16.msra.mxu1 %v11990_v62  ;;  %v5715_v13 = vpop.f32.mrf.mxu0  ;;  %6009 = vmatprep.subr.bf16.mxu0 %v11855_v63  ;;  %v11839_v33 = vcombine.high %v721_v12, %v725_v18  ;;  %v11838_v45 = vcombine.low %v721_v12, %v725_v18  ;;  %v697_v62 = vld [vmem:[%s16177_s1 + $0x1448] sm:$0xff] }
 0x197   :  { %v14203_v38 = vadd.f32 %v5754_v10, %v5714_v9  ;;  %v5716_v17 = vadd.f32 %v5715_v13, %v14018_v23  ;;  %v5756_v53 = vpop.f32.mrf.mxu1  ;;  %6050 = vmatprep.subr.bf16.mxu1 %v11983_v0  ;;  %6039 = vmatprep.mubr.bf16.mxu0 %v13373_v49  ;;  %v853_v23 = vld [vmem:[%s16177_s1 + $0x1928] sm:$0xff] }
 0x198   :  { %v5717_v24 = vpop.f32.mrf.mxu0  ;;  %6080 = vmatprep.mubr.bf16.mxu1 %v13579_v14  ;;  %v11967_v36 = vcombine.high %v849_v54, %v853_v23  ;;  %v11966_v46 = vcombine.low %v849_v54, %v853_v23  ;;  %v701_v63 = vld [vmem:[%s16177_s1 + $0x1468] sm:$0xff] }
 0x199   :  { %v14220_v26 = vadd.f32 %v5756_v53, %v5716_v17  ;;  %v5758_v28 = vpop.f32.mrf.mxu1  ;;  %6010 = vmatpush1.bf16.msra.mxu0 %v11854_v11  ;;  %v825_v0 = vld [vmem:[%s16177_s1 + $0x1848] sm:$0xff]  ;;  %v11815_v5 = vcombine.high %v697_v62, %v701_v63 }
 0x19a   :  { %6051 = vmatpush1.bf16.msra.mxu1 %v11982_v42  ;;  %v5718_v31 = vpop.f32.mrf.mxu0  ;;  %6011 = vmatprep.subr.bf16.mxu0 %v11847_v15  ;;  %v11943_v6 = vcombine.high %v825_v0, %v829_v1  ;;  %v689_v9 = vld [vmem:[%s16177_s1 + $0x1408] sm:$0xff]  ;;  %v11814_v42 = vcombine.low %v697_v62, %v701_v63  ;;  %v11942_v15 = vcombine.low %v825_v0, %v829_v1 }
 0x19b   :  { %v5759_v34 = vpop.f32.mrf.mxu1  ;;  %6052 = vmatprep.subr.bf16.mxu1 %v11975_v22  ;;  %v693_v10 = vld [vmem:[%s16177_s1 + $0x1428] sm:$0xff] }
 0x19c   :  { %v817_v11 = vld [vmem:[%s16177_s1 + $0x1808] sm:$0xff]  ;;  %v11807_v17 = vcombine.high %v689_v9, %v693_v10  ;;  %v11806_v54 = vcombine.low %v689_v9, %v693_v10 }
 0x19d   :  { %6012 = vmatpush1.bf16.msra.mxu0 %v11846_v30  ;;  %v821_v13 = vld [vmem:[%s16177_s1 + $0x1828] sm:$0xff] }
 0x19e   :  { %6053 = vmatpush1.bf16.msra.mxu1 %v11974_v32  ;;  %6013 = vmatprep.subr.bf16.mxu0 %v11839_v33  ;;  %v11935_v53 = vcombine.high %v817_v11, %v821_v13  ;;  %v809_v22 = vld [vmem:[%s16177_s1 + $0x17c8] sm:$0xff]  ;;  %v11934_v23 = vcombine.low %v817_v11, %v821_v13 }
 0x19f   :  { %6054 = vmatprep.subr.bf16.mxu1 %v11967_v36  ;;  %v813_v12 = vld [vmem:[%s16177_s1 + $0x17e8] sm:$0xff] }
 0x1a0   :  { %v937_v18 = vld [vmem:[%s16177_s1 + $0x1bc8] sm:$0xff]  ;;  %v11927_v28 = vcombine.high %v809_v22, %v813_v12  ;;  %v11926_v36 = vcombine.low %v809_v22, %v813_v12 }
 0x1a1   :  { %6014 = vmatpush1.bf16.msra.mxu0 %v11838_v45  ;;  %v941_v24 = vld [vmem:[%s16177_s1 + $0x1be8] sm:$0xff] }
 0x1a2   :  { %6055 = vmatpush1.bf16.msra.mxu1 %v11966_v46  ;;  %6015 = vmatprep.subr.bf16.mxu0 %v11831_v48  ;;  %v12055_v30 = vcombine.high %v937_v18, %v941_v24  ;;  %v801_v31 = vld [vmem:[%s16177_s1 + $0x1788] sm:$0xff]  ;;  %v12054_v37 = vcombine.low %v937_v18, %v941_v24 }
 0x1a3   :  { %6056 = vmatprep.subr.bf16.mxu1 %v11959_v50  ;;  %v805_v32 = vld [vmem:[%s16177_s1 + $0x17a8] sm:$0xff] }
 0x1a4   :  { %v929_v33 = vld [vmem:[%s16177_s1 + $0x1b88] sm:$0xff]  ;;  %v11919_v41 = vcombine.high %v801_v31, %v805_v32  ;;  %v11918_v50 = vcombine.low %v801_v31, %v805_v32 }
 0x1a5   :  { %6016 = vmatpush1.bf16.msra.mxu0 %v11830_v56  ;;  %v933_v34 = vld [vmem:[%s16177_s1 + $0x1ba8] sm:$0xff] }
 0x1a6   :  { %6057 = vmatpush1.bf16.msra.mxu1 %v11958_v57  ;;  %6017 = vmatprep.subr.bf16.mxu0 %v11823_v60  ;;  %v12047_v43 = vcombine.high %v929_v33, %v933_v34  ;;  %v797_v45 = vld [vmem:[%s16177_s1 + $0x1768] sm:$0xff]  ;;  %v12046_v51 = vcombine.low %v929_v33, %v933_v34 }
 0x1a7   :  { %6058 = vmatprep.subr.bf16.mxu1 %v11951_v61  ;;  %v921_v46 = vld [vmem:[%s16177_s1 + $0x1b48] sm:$0xff]  ;;  %v11911_v52 = vcombine.high %v793_v19, %v797_v45  ;;  %v11910_v61 = vcombine.low %v793_v19, %v797_v45 }
 0x1a8   :  { %v925_v48 = vld [vmem:[%s16177_s1 + $0x1b68] sm:$0xff] }
 0x1a9   :  { %6018 = vmatpush1.bf16.msra.mxu0 %v11822_v2  ;;  %v12039_v55 = vcombine.high %v921_v46, %v925_v48  ;;  %v785_v7 = vld [vmem:[%s16177_s1 + $0x1708] sm:$0xff]  ;;  %v12038_v62 = vcombine.low %v921_v46, %v925_v48  ;;  %v106_v48 = vld [vmem:[%s16177_s1 + $0x1d0] sm:$0xff] }
 0x1aa   :  { %6059 = vmatpush1.bf16.msra.mxu1 %v11950_v3  ;;  %6019 = vmatprep.subr.bf16.mxu0 %v11815_v5  ;;  %v789_v56 = vld [vmem:[%s16177_s1 + $0x1728] sm:$0xff] }
 0x1ab   :  { %6060 = vmatprep.subr.bf16.mxu1 %v11943_v6  ;;  %v913_v57 = vld [vmem:[%s16177_s1 + $0x1b08] sm:$0xff]  ;;  %v11903_v63 = vcombine.high %v785_v7, %v789_v56  ;;  %v11902_v6 = vcombine.low %v785_v7, %v789_v56 }
 0x1ac   :  { %v917_v60 = vld [vmem:[%s16177_s1 + $0x1b28] sm:$0xff] }
 0x1ad   :  { %6020 = vmatpush1.bf16.msra.mxu0 %v11814_v42  ;;  %v12031_v0 = vcombine.high %v913_v57, %v917_v60  ;;  %v777_v1 = vld [vmem:[%s16177_s1 + $0x16c8] sm:$0xff]  ;;  %v12030_v9 = vcombine.low %v913_v57, %v917_v60  ;;  %v98_v60 = vld [vmem:[%s16177_s1 + $0x190] sm:$0xff] }
 0x1ae   :  { %6061 = vmatpush1.bf16.msra.mxu1 %v11942_v15  ;;  %6021 = vmatprep.subr.bf16.mxu0 %v11807_v17  ;;  %v781_v2 = vld [vmem:[%s16177_s1 + $0x16e8] sm:$0xff] }
 0x1af   :  { %6062 = vmatprep.subr.bf16.mxu1 %v11935_v53  ;;  %v905_v3 = vld [vmem:[%s16177_s1 + $0x1ac8] sm:$0xff]  ;;  %v11895_v10 = vcombine.high %v777_v1, %v781_v2  ;;  %v11894_v53 = vcombine.low %v777_v1, %v781_v2 }
 0x1b0   :  { %v909_v5 = vld [vmem:[%s16177_s1 + $0x1ae8] sm:$0xff] }
 0x1b1   :  { %6022 = vmatpush1.bf16.msra.mxu0 %v11806_v54  ;;  %v12023_v11 = vcombine.high %v905_v3, %v909_v5  ;;  %v769_v13 = vld [vmem:[%s16177_s1 + $0x1688] sm:$0xff]  ;;  %v12022_v22 = vcombine.low %v905_v3, %v909_v5  ;;  %v90_v5 = vld [vmem:[%s16177_s1 + $0x150] sm:$0xff] }
 0x1b2   :  { %6063 = vmatpush1.bf16.msra.mxu1 %v11934_v23  ;;  %6023 = vmatprep.subr.bf16.mxu0 %v11927_v28  ;;  %v773_v42 = vld [vmem:[%s16177_s1 + $0x16a8] sm:$0xff] }
 0x1b3   :  { %6064 = vmatprep.subr.bf16.mxu1 %v12055_v30  ;;  %v897_v15 = vld [vmem:[%s16177_s1 + $0x1a88] sm:$0xff]  ;;  %v11887_v12 = vcombine.high %v769_v13, %v773_v42  ;;  %v11886_v30 = vcombine.low %v769_v13, %v773_v42 }
 0x1b4   :  { %v901_v17 = vld [vmem:[%s16177_s1 + $0x1aa8] sm:$0xff] }
 0x1b5   :  { %6024 = vmatpush2.bf16.msra.mxu0 %v11926_v36  ;;  %v12015_v18 = vcombine.high %v897_v15, %v901_v17  ;;  %v761_v24 = vld [vmem:[%s16177_s1 + $0x1648] sm:$0xff]  ;;  %v12014_v31 = vcombine.low %v897_v15, %v901_v17 }
 0x1b6   :  { %6065 = vmatpush2.bf16.msra.mxu1 %v12054_v37  ;;  %6025 = vmatprep.subr.bf16.mxu0 %v11919_v41  ;;  %v765_v54 = vld [vmem:[%s16177_s1 + $0x1668] sm:$0xff] }
 0x1b7   :  { %6066 = vmatprep.subr.bf16.mxu1 %v12047_v43  ;;  %v889_v23 = vld [vmem:[%s16177_s1 + $0x1a48] sm:$0xff]  ;;  %v11879_v32 = vcombine.high %v761_v24, %v765_v54  ;;  %v11878_v43 = vcombine.low %v761_v24, %v765_v54  ;;  %v86_v54 = vld [vmem:[%s16177_s1 + $0x130] sm:$0xff] }
 0x1b8   :  { %v893_v28 = vld [vmem:[%s16177_s1 + $0x1a68] sm:$0xff] }
 0x1b9   :  { %6026 = vmatpush2.bf16.msra.mxu0 %v11918_v50  ;;  %v12007_v33 = vcombine.high %v889_v23, %v893_v28  ;;  %v753_v34 = vld [vmem:[%s16177_s1 + $0x1608] sm:$0xff]  ;;  %v12006_v19 = vcombine.low %v889_v23, %v893_v28  ;;  %v110_v50 = vld [vmem:[%s16177_s1 + $0x1f0] sm:$0xff] }
 0x1ba   :  { %6067 = vmatpush2.bf16.msra.mxu1 %v12046_v51  ;;  %6027 = vmatprep.subr.bf16.mxu0 %v11911_v52  ;;  %v757_v36 = vld [vmem:[%s16177_s1 + $0x1628] sm:$0xff]  ;;  %v234_v51 = vld [vmem:[%s16177_s1 + $0x5d0] sm:$0xff]  ;;  %v11225_v56 = vcombine.high %v106_v48, %v110_v50 }
 0x1bb   :  { %6068 = vmatprep.subr.bf16.mxu1 %v12039_v55  ;;  %v881_v37 = vld [vmem:[%s16177_s1 + $0x1a08] sm:$0xff]  ;;  %v11871_v45 = vcombine.high %v753_v34, %v757_v36  ;;  %v238_v52 = vld [vmem:[%s16177_s1 + $0x5f0] sm:$0xff]  ;;  %v11870_v55 = vcombine.low %v753_v34, %v757_v36 }
 0x1bc   :  { %v885_v41 = vld [vmem:[%s16177_s1 + $0x1a28] sm:$0xff]  ;;  %v11353_v57 = vcombine.high %v234_v51, %v238_v52  ;;  %v11352_v1 = vcombine.low %v234_v51, %v238_v52  ;;  %v214_v28 = vld [vmem:[%s16177_s1 + $0x530] sm:$0xff] }
 0x1bd   :  { %6028 = vmatpush2.bf16.msra.mxu0 %v11910_v61  ;;  %v11999_v46 = vcombine.high %v881_v37, %v885_v41  ;;  %v11998_v7 = vcombine.low %v881_v37, %v885_v41  ;;  %v102_v61 = vld [vmem:[%s16177_s1 + $0x1b0] sm:$0xff] }
 0x1be   :  { %6069 = vmatpush2.bf16.msra.mxu1 %v12038_v62  ;;  %6029 = vmatprep.subr.bf16.mxu0 %v11903_v63  ;;  %v226_v62 = vld [vmem:[%s16177_s1 + $0x590] sm:$0xff]  ;;  %v11217_v2 = vcombine.high %v98_v60, %v102_v61  ;;  %v11216_v15 = vcombine.low %v98_v60, %v102_v61 }
 0x1bf   :  { %6070 = vmatprep.subr.bf16.mxu1 %v12031_v0  ;;  %v230_v63 = vld [vmem:[%s16177_s1 + $0x5b0] sm:$0xff]  ;;  %v11224_v0 = vcombine.low %v106_v48, %v110_v50 }
 0x1c0   :  { %v11345_v3 = vcombine.high %v226_v62, %v230_v63  ;;  %v74_v41 = vld [vmem:[%s16177_s1 + $0xd0] sm:$0xff] }
 0x1c1   :  { %6030 = vmatpush2.bf16.msra.mxu0 %v11902_v6  ;;  %v94_v6 = vld [vmem:[%s16177_s1 + $0x170] sm:$0xff] }
 0x1c2   :  { %6071 = vmatpush2.bf16.msra.mxu1 %v12030_v9  ;;  %6031 = vmatprep.subr.bf16.mxu0 %v11895_v10  ;;  %v218_v10 = vld [vmem:[%s16177_s1 + $0x550] sm:$0xff] }
 0x1c3   :  { %6072 = vmatprep.subr.bf16.mxu1 %v12023_v11  ;;  %v222_v11 = vld [vmem:[%s16177_s1 + $0x570] sm:$0xff] }
 0x1c4   :  { %v11337_v24 = vcombine.high %v218_v10, %v222_v11  ;;  %v66_v52 = vld [vmem:[%s16177_s1 + $0x90] sm:$0xff] }
 0x1c5   :  { %6032 = vmatpush2.bf16.msra.mxu0 %v11894_v53  ;;  %v11344_v53 = vcombine.low %v226_v62, %v230_v63  ;;  %v58_v63 = vld [vmem:[%s16177_s1 + $0x50] sm:$0xff] }
 0x1c6   :  { %6073 = vmatpush2.bf16.msra.mxu1 %v12022_v22  ;;  %6033 = vmatprep.subr.bf16.mxu0 %v11887_v12  ;;  %v11209_v22 = vcombine.high %v90_v5, %v94_v6 }
 0x1c7   :  { %6074 = vmatprep.subr.bf16.mxu1 %v12015_v18 }
 0x1c9   :  { %6034 = vmatpush2.bf16.msra.mxu0 %v11886_v30 }
 0x1ca   :  { %6075 = vmatpush2.bf16.msra.mxu1 %v12014_v31  ;;  %6035 = vmatprep.subr.bf16.mxu0 %v11879_v32  ;;  %v11208_v31 = vcombine.low %v90_v5, %v94_v6 }
 0x1cb   :  { %6076 = vmatprep.subr.bf16.mxu1 %v12007_v33  ;;  %v11336_v33 = vcombine.low %v218_v10, %v222_v11  ;;  %v50_v10 = vld [vmem:[%s16177_s1 + $0x10] sm:$0xff] }
 0x1cc   :  { %v54_v11 = vld [vmem:[%s16177_s1 + $0x30] sm:$0xff] }
 0x1cd   :  { %6036 = vmatpush2.bf16.msra.mxu0 %v11878_v43  ;;  %v78_v43 = vld [vmem:[%s16177_s1 + $0xf0] sm:$0xff] }
 0x1ce   :  { %6077 = vmatpush2.bf16.msra.mxu1 %v12006_v19  ;;  %6037 = vmatprep.subr.bf16.mxu0 %v11871_v45  ;;  %v202_v19 = vld [vmem:[%s16177_s1 + $0x4d0] sm:$0xff]  ;;  %v11193_v50 = vcombine.high %v74_v41, %v78_v43 }
 0x1cf   :  { %6078 = vmatprep.subr.bf16.mxu1 %v11999_v46  ;;  %v206_v45 = vld [vmem:[%s16177_s1 + $0x4f0] sm:$0xff] }
 0x1d0   :  { %v11321_v51 = vcombine.high %v202_v19, %v206_v45  ;;  %v11320_v60 = vcombine.low %v202_v19, %v206_v45 }
 0x1d1   :  { %6038 = vmatpush2.bf16.msra.mxu0 %v11870_v55  ;;  %v70_v55 = vld [vmem:[%s16177_s1 + $0xb0] sm:$0xff] }
 0x1d2   :  { %6079 = vmatpush2.bf16.msra.mxu1 %v11998_v7  ;;  %6089 = vmatprep.subr.bf16.mxu0 %v11225_v56  ;;  %v194_v7 = vld [vmem:[%s16177_s1 + $0x490] sm:$0xff]  ;;  %v11185_v61 = vcombine.high %v66_v52, %v70_v55 }
 0x1d3   :  { %6130 = vmatprep.subr.bf16.mxu1 %v11353_v57  ;;  %v198_v56 = vld [vmem:[%s16177_s1 + $0x4b0] sm:$0xff]  ;;  %v11192_v57 = vcombine.low %v74_v41, %v78_v43 }
 0x1d4   :  { %v5795_v9 = vpop.f32.mrf.mxu0  ;;  %6040 = vmatmul.mubr.bf16.vlgmr.msra.gmra.mxu0 %v13569_v8  ;;  %v11313_v62 = vcombine.high %v194_v7, %v198_v56  ;;  %v11312_v5 = vcombine.low %v194_v7, %v198_v56  ;;  %v294_v41 = vld [vmem:[%s16177_s1 + $0x7b0] sm:$0xff] }
 0x1d5   :  { %v14404_v13 = vadd.f32 %v5795_v9, %v14203_v38  ;;  %v14406_v42 = vpop.f32.mrf.mxu1  ;;  %6081 = vmatmul.mubr.bf16.vlgmr.msra.gmra.mxu1 %v13774_v21  ;;  %6090 = vmatpush1.bf16.msra.mxu0 %v11224_v0  ;;  %v82_v38 = vld [vmem:[%s16177_s1 + $0x110] sm:$0xff] }
 0x1d6   :  { %6131 = vmatpush1.bf16.msra.mxu1 %v11352_v1  ;;  %v5797_v17 = vpop.f32.mrf.mxu0  ;;  %6091 = vmatprep.subr.bf16.mxu0 %v11217_v2  ;;  %v11201_v34 = vcombine.high %v82_v38, %v86_v54  ;;  %v11200_v46 = vcombine.low %v82_v38, %v86_v54  ;;  %v62_v0 = vld [vmem:[%s16177_s1 + $0x70] sm:$0xff] }
 0x1d7   :  { %v14410_v12 = vadd.f32 %v5797_v17, %v14220_v26  ;;  %v14412_v18 = vpop.f32.mrf.mxu1  ;;  %6132 = vmatprep.subr.bf16.mxu1 %v11345_v3  ;;  %6121 = vmatprep.mubr.bf16.mxu0 %v12980_v58  ;;  %v210_v26 = vld [vmem:[%s16177_s1 + $0x510] sm:$0xff]  ;;  %v11184_v3 = vcombine.low %v66_v52, %v70_v55  ;;  %v11177_v6 = vcombine.high %v58_v63, %v62_v0 }
 0x1d8   :  { %v5799_v23 = vpop.f32.mrf.mxu0  ;;  %6162 = vmatprep.mubr.bf16.mxu1 %v12984_v59  ;;  %v11329_v37 = vcombine.high %v210_v26, %v214_v28  ;;  %v11328_v48 = vcombine.low %v210_v26, %v214_v28  ;;  %v186_v1 = vld [vmem:[%s16177_s1 + $0x450] sm:$0xff] }
 0x1d9   :  { %v5840_v30 = vpop.f32.mrf.mxu1  ;;  %6092 = vmatpush1.bf16.msra.mxu0 %v11216_v15  ;;  %v190_v2 = vld [vmem:[%s16177_s1 + $0x470] sm:$0xff] }
 0x1da   :  { %6133 = vmatpush1.bf16.msra.mxu1 %v11344_v53  ;;  %v5800_v32 = vpop.f32.mrf.mxu0  ;;  %6093 = vmatprep.subr.bf16.mxu0 %v11209_v22  ;;  %v11305_v9 = vcombine.high %v186_v1, %v190_v2  ;;  %v178_v15 = vld [vmem:[%s16177_s1 + $0x410] sm:$0xff]  ;;  %v11176_v53 = vcombine.low %v58_v63, %v62_v0  ;;  %v11304_v22 = vcombine.low %v186_v1, %v190_v2 }
 0x1db   :  { %v5841_v36 = vpop.f32.mrf.mxu1  ;;  %6134 = vmatprep.subr.bf16.mxu1 %v11337_v24  ;;  %v182_v17 = vld [vmem:[%s16177_s1 + $0x430] sm:$0xff]  ;;  %v11169_v24 = vcombine.high %v50_v10, %v54_v11  ;;  %v11168_v30 = vcombine.low %v50_v10, %v54_v11 }
 0x1dc   :  { %v11297_v38 = vcombine.high %v178_v15, %v182_v17  ;;  %v170_v54 = vld [vmem:[%s16177_s1 + $0x3d0] sm:$0xff] }
 0x1dd   :  { %6094 = vmatpush1.bf16.msra.mxu0 %v11208_v31  ;;  %v174_v23 = vld [vmem:[%s16177_s1 + $0x3f0] sm:$0xff]  ;;  %v11296_v31 = vcombine.low %v178_v15, %v182_v17 }
 0x1de   :  { %6135 = vmatpush1.bf16.msra.mxu1 %v11336_v33  ;;  %6095 = vmatprep.subr.bf16.mxu0 %v11201_v34  ;;  %v298_v26 = vld [vmem:[%s16177_s1 + $0x7d0] sm:$0xff]  ;;  %v11289_v32 = vcombine.high %v170_v54, %v174_v23  ;;  %v11288_v43 = vcombine.low %v170_v54, %v174_v23 }
 0x1df   :  { %6136 = vmatprep.subr.bf16.mxu1 %v11329_v37  ;;  %v302_v28 = vld [vmem:[%s16177_s1 + $0x7f0] sm:$0xff] }
 0x1e0   :  { %v11417_v33 = vcombine.high %v298_v26, %v302_v28  ;;  %v162_v34 = vld [vmem:[%s16177_s1 + $0x390] sm:$0xff]  ;;  %v11416_v19 = vcombine.low %v298_v26, %v302_v28 }
 0x1e1   :  { %6096 = vmatpush1.bf16.msra.mxu0 %v11200_v46  ;;  %v166_v36 = vld [vmem:[%s16177_s1 + $0x3b0] sm:$0xff] }
 0x1e2   :  { %6137 = vmatpush1.bf16.msra.mxu1 %v11328_v48  ;;  %6097 = vmatprep.subr.bf16.mxu0 %v11193_v50  ;;  %v290_v37 = vld [vmem:[%s16177_s1 + $0x790] sm:$0xff]  ;;  %v11281_v45 = vcombine.high %v162_v34, %v166_v36  ;;  %v11280_v55 = vcombine.low %v162_v34, %v166_v36 }
 0x1e3   :  { %6138 = vmatprep.subr.bf16.mxu1 %v11321_v51  ;;  %v11409_v46 = vcombine.high %v290_v37, %v294_v41  ;;  %v154_v48 = vld [vmem:[%s16177_s1 + $0x350] sm:$0xff]  ;;  %v11408_v7 = vcombine.low %v290_v37, %v294_v41 }
 0x1e4   :  { %v158_v50 = vld [vmem:[%s16177_s1 + $0x370] sm:$0xff] }
 0x1e5   :  { %6098 = vmatpush1.bf16.msra.mxu0 %v11192_v57  ;;  %v282_v51 = vld [vmem:[%s16177_s1 + $0x750] sm:$0xff]  ;;  %v11273_v56 = vcombine.high %v154_v48, %v158_v50  ;;  %v11272_v0 = vcombine.low %v154_v48, %v158_v50 }
 0x1e6   :  { %6139 = vmatpush1.bf16.msra.mxu1 %v11320_v60  ;;  %6099 = vmatprep.subr.bf16.mxu0 %v11185_v61  ;;  %v286_v52 = vld [vmem:[%s16177_s1 + $0x770] sm:$0xff] }
 0x1e7   :  { %6140 = vmatprep.subr.bf16.mxu1 %v11313_v62  ;;  %v11401_v57 = vcombine.high %v282_v51, %v286_v52  ;;  %v146_v60 = vld [vmem:[%s16177_s1 + $0x310] sm:$0xff]  ;;  %v11400_v1 = vcombine.low %v282_v51, %v286_v52 }
 0x1e8   :  { %v150_v61 = vld [vmem:[%s16177_s1 + $0x330] sm:$0xff] }
 0x1e9   :  { %6100 = vmatpush1.bf16.msra.mxu0 %v11184_v3  ;;  %v274_v62 = vld [vmem:[%s16177_s1 + $0x710] sm:$0xff]  ;;  %v11265_v2 = vcombine.high %v146_v60, %v150_v61  ;;  %v11264_v11 = vcombine.low %v146_v60, %v150_v61 }
 0x1ea   :  { %6141 = vmatpush1.bf16.msra.mxu1 %v11312_v5  ;;  %6101 = vmatprep.subr.bf16.mxu0 %v11177_v6  ;;  %v278_v63 = vld [vmem:[%s16177_s1 + $0x730] sm:$0xff] }
 0x1eb   :  { %6142 = vmatprep.subr.bf16.mxu1 %v11305_v9  ;;  %v11393_v3 = vcombine.high %v274_v62, %v278_v63  ;;  %v138_v5 = vld [vmem:[%s16177_s1 + $0x2d0] sm:$0xff]  ;;  %v11392_v15 = vcombine.low %v274_v62, %v278_v63  ;;  %v960_v62 = vsub.s32 3, %v13747_v25 }
 0x1ec   :  { %v142_v6 = vld [vmem:[%s16177_s1 + $0x2f0] sm:$0xff] }
 0x1ed   :  { %6102 = vmatpush1.bf16.msra.mxu0 %v11176_v53  ;;  %v266_v9 = vld [vmem:[%s16177_s1 + $0x6d0] sm:$0xff]  ;;  %v11257_v17 = vcombine.high %v138_v5, %v142_v6  ;;  %v11256_v23 = vcombine.low %v138_v5, %v142_v6 }
 0x1ee   :  { %6143 = vmatpush1.bf16.msra.mxu1 %v11304_v22  ;;  %6103 = vmatprep.subr.bf16.mxu0 %v11169_v24  ;;  %v270_v10 = vld [vmem:[%s16177_s1 + $0x6f0] sm:$0xff] }
 0x1ef   :  { %6144 = vmatprep.subr.bf16.mxu1 %v11297_v38  ;;  %v11385_v53 = vcombine.high %v266_v9, %v270_v10  ;;  %v130_v22 = vld [vmem:[%s16177_s1 + $0x290] sm:$0xff]  ;;  %v11384_v26 = vcombine.low %v266_v9, %v270_v10 }
 0x1f0   :  { %v134_v24 = vld [vmem:[%s16177_s1 + $0x2b0] sm:$0xff] }
 0x1f1   :  { %6104 = vmatpush1.bf16.msra.mxu0 %v11168_v30  ;;  %v258_v38 = vld [vmem:[%s16177_s1 + $0x690] sm:$0xff]  ;;  %v11249_v28 = vcombine.high %v130_v22, %v134_v24  ;;  %v11248_v36 = vcombine.low %v130_v22, %v134_v24 }
 0x1f2   :  { %6145 = vmatpush1.bf16.msra.mxu1 %v11296_v31  ;;  %6105 = vmatprep.subr.bf16.mxu0 %v11289_v32  ;;  %v262_v54 = vld [vmem:[%s16177_s1 + $0x6b0] sm:$0xff] }
 0x1f3   :  { %6146 = vmatprep.subr.bf16.mxu1 %v11417_v33  ;;  %v11377_v30 = vcombine.high %v258_v38, %v262_v54  ;;  %v122_v31 = vld [vmem:[%s16177_s1 + $0x250] sm:$0xff]  ;;  %v11376_v37 = vcombine.low %v258_v38, %v262_v54 }
 0x1f4   :  { %v126_v32 = vld [vmem:[%s16177_s1 + $0x270] sm:$0xff] }
 0x1f5   :  { %6106 = vmatpush2.bf16.msra.mxu0 %v11288_v43  ;;  %v250_v33 = vld [vmem:[%s16177_s1 + $0x650] sm:$0xff]  ;;  %v11241_v41 = vcombine.high %v122_v31, %v126_v32  ;;  %v11240_v50 = vcombine.low %v122_v31, %v126_v32 }
 0x1f6   :  { %6147 = vmatpush2.bf16.msra.mxu1 %v11416_v19  ;;  %6107 = vmatprep.subr.bf16.mxu0 %v11281_v45  ;;  %v254_v34 = vld [vmem:[%s16177_s1 + $0x670] sm:$0xff] }
 0x1f7   :  { %6148 = vmatprep.subr.bf16.mxu1 %v11409_v46  ;;  %v11369_v43 = vcombine.high %v250_v33, %v254_v34  ;;  %v114_v19 = vld [vmem:[%s16177_s1 + $0x210] sm:$0xff]  ;;  %v11368_v51 = vcombine.low %v250_v33, %v254_v34 }
 0x1f8   :  { %v118_v45 = vld [vmem:[%s16177_s1 + $0x230] sm:$0xff] }
 0x1f9   :  { %6108 = vmatpush2.bf16.msra.mxu0 %v11280_v55  ;;  %v242_v46 = vld [vmem:[%s16177_s1 + $0x610] sm:$0xff]  ;;  %v11233_v52 = vcombine.high %v114_v19, %v118_v45  ;;  %v956_v55 = vsub.s32 2, %v13747_v25  ;;  %v11232_v63 = vcombine.low %v114_v19, %v118_v45 }
 0x1fa   :  { %6149 = vmatpush2.bf16.msra.mxu1 %v11408_v7  ;;  %6109 = vmatprep.subr.bf16.mxu0 %v11273_v56  ;;  %v246_v48 = vld [vmem:[%s16177_s1 + $0x630] sm:$0xff] }
 0x1fb   :  { %6150 = vmatprep.subr.bf16.mxu1 %v11401_v57  ;;  %v11361_v7 = vcombine.high %v242_v46, %v246_v48  ;;  %v362_v56 = vld [vmem:[%s16177_s1 + $0x9d0] sm:$0xff] }
 0x1fc   :  { %v366_v57 = vld [vmem:[%s16177_s1 + $0x9f0] sm:$0xff] }
 0x1fd   :  { %6110 = vmatpush2.bf16.msra.mxu0 %v11272_v0  ;;  %v490_v60 = vld [vmem:[%s16177_s1 + $0xdd0] sm:$0xff]  ;;  %v11360_v0 = vcombine.low %v242_v46, %v246_v48 }
 0x1fe   :  { %6151 = vmatpush2.bf16.msra.mxu1 %v11400_v1  ;;  %6111 = vmatprep.subr.bf16.mxu0 %v11265_v2  ;;  %v494_v61 = vld [vmem:[%s16177_s1 + $0xdf0] sm:$0xff]  ;;  %v11481_v1 = vcombine.high %v362_v56, %v366_v57  ;;  %v12806_v2 = vld [vmem:[%s16178_s2] sm:$0xff] }
 0x1ff   :  { %6152 = vmatprep.subr.bf16.mxu1 %v11393_v3  ;;  %v957_v3 = vrot.slane %v12806_v2, %v956_v55  ;;  %v11609_v5 = vcombine.high %v490_v60, %v494_v61  ;;  %v354_v6 = vld [vmem:[%s16177_s1 + $0x990] sm:$0xff] }
 0x200   :  { %v358_v9 = vld [vmem:[%s16177_s1 + $0x9b0] sm:$0xff] }
 0x201   :  { %6112 = vmatpush2.bf16.msra.mxu0 %v11264_v11  ;;  %v482_v10 = vld [vmem:[%s16177_s1 + $0xd90] sm:$0xff]  ;;  %v11473_v22 = vcombine.high %v354_v6, %v358_v9  ;;  %v5837_v24 = vadd.f32 %v14406_v42, %v957_v3  ;;  %v11472_v33 = vcombine.low %v354_v6, %v358_v9 }
 0x202   :  { %6153 = vmatpush2.bf16.msra.mxu1 %v11392_v15  ;;  %6113 = vmatprep.subr.bf16.mxu0 %v11257_v17  ;;  %v486_v11 = vld [vmem:[%s16177_s1 + $0xdb0] sm:$0xff]  ;;  %v961_v15 = vrot.slane %v12806_v2, %v960_v62  ;;  %v11480_v17 = vcombine.low %v362_v56, %v366_v57 }
 0x203   :  { %6154 = vmatprep.subr.bf16.mxu1 %v11385_v53  ;;  %v11608_v53 = vcombine.low %v490_v60, %v494_v61  ;;  %v11601_v38 = vcombine.high %v482_v10, %v486_v11  ;;  %v346_v54 = vld [vmem:[%s16177_s1 + $0x950] sm:$0xff] }
 0x204   :  { %v478_v42 = vld [vmem:[%s16177_s1 + $0xd70] sm:$0xff] }
 0x205   :  { %6114 = vmatpush2.bf16.msra.mxu0 %v11256_v23  ;;  %v350_v23 = vld [vmem:[%s16177_s1 + $0x970] sm:$0xff] }
 0x206   :  { %6155 = vmatpush2.bf16.msra.mxu1 %v11384_v26  ;;  %6115 = vmatprep.subr.bf16.mxu0 %v11249_v28  ;;  %v474_v28 = vld [vmem:[%s16177_s1 + $0xd50] sm:$0xff]  ;;  %v11464_v56 = vcombine.low %v346_v54, %v350_v23 }
 0x207   :  { %6156 = vmatprep.subr.bf16.mxu1 %v11377_v30  ;;  %v5839_v30 = vadd.f32 %v14412_v18, %v961_v15  ;;  %v11593_v45 = vcombine.high %v474_v28, %v478_v42  ;;  %v338_v18 = vld [vmem:[%s16177_s1 + $0x910] sm:$0xff]  ;;  %v11592_v60 = vcombine.low %v474_v28, %v478_v42 }
 0x208   :  { %v342_v46 = vld [vmem:[%s16177_s1 + $0x930] sm:$0xff] }
 0x209   :  { %6116 = vmatpush2.bf16.msra.mxu0 %v11248_v36  ;;  %v11600_v36 = vcombine.low %v482_v10, %v486_v11  ;;  %v11457_v61 = vcombine.high %v338_v18, %v342_v46  ;;  %v334_v2 = vld [vmem:[%s16177_s1 + $0x8f0] sm:$0xff]  ;;  %v11456_v6 = vcombine.low %v338_v18, %v342_v46 }
 0x20a   :  { %6157 = vmatpush2.bf16.msra.mxu1 %v11376_v37  ;;  %6117 = vmatprep.subr.bf16.mxu0 %v11241_v41  ;;  %v11465_v37 = vcombine.high %v346_v54, %v350_v23  ;;  %v458_v3 = vld [vmem:[%s16177_s1 + $0xcd0] sm:$0xff] }
 0x20b   :  { %6158 = vmatprep.subr.bf16.mxu1 %v11369_v43  ;;  %v322_v15 = vld [vmem:[%s16177_s1 + $0x890] sm:$0xff] }
 0x20c   :  { %v318_v28 = vld [vmem:[%s16177_s1 + $0x870] sm:$0xff] }
 0x20d   :  { %6118 = vmatpush2.bf16.msra.mxu0 %v11240_v50  ;;  %v466_v50 = vld [vmem:[%s16177_s1 + $0xd10] sm:$0xff] }
 0x20e   :  { %6159 = vmatpush2.bf16.msra.mxu1 %v11368_v51  ;;  %6119 = vmatprep.subr.bf16.mxu0 %v11233_v52  ;;  %v470_v51 = vld [vmem:[%s16177_s1 + $0xd30] sm:$0xff] }
 0x20f   :  { %6160 = vmatprep.subr.bf16.mxu1 %v11361_v7  ;;  %v11584_v9 = vcombine.low %v466_v50, %v470_v51  ;;  %v442_v42 = vld [vmem:[%s16177_s1 + $0xc50] sm:$0xff] }
 0x211   :  { %6120 = vmatpush2.bf16.msra.mxu0 %v11232_v63 }
 0x212   :  { %6161 = vmatpush2.bf16.msra.mxu1 %v11360_v0  ;;  %6171 = vmatprep.subr.bf16.mxu0 %v11481_v1  ;;  %v11585_v0 = vcombine.high %v466_v50, %v470_v51  ;;  %v330_v1 = vld [vmem:[%s16177_s1 + $0x8d0] sm:$0xff] }
 0x213   :  { %6212 = vmatprep.subr.bf16.mxu1 %v11609_v5  ;;  %v462_v5 = vld [vmem:[%s16177_s1 + $0xcf0] sm:$0xff]  ;;  %v11449_v10 = vcombine.high %v330_v1, %v334_v2 }
 0x214   :  { %v5877_v26 = vpop.f32.mrf.mxu0  ;;  %6122 = vmatmul.mubr.bf16.vlgmr.msra.gmra.mxu0 %v13110_v16  ;;  %v11577_v11 = vcombine.high %v458_v3, %v462_v5  ;;  %v426_v50 = vld [vmem:[%s16177_s1 + $0xbd0] sm:$0xff] }
 0x215   :  { %v5878_v31 = vadd.f32 %v5877_v26, %v5837_v24  ;;  %v5918_v32 = vpop.f32.mrf.mxu1  ;;  %6163 = vmatmul.mubr.bf16.vlgmr.msra.gmra.mxu1 %v13125_v20  ;;  %6172 = vmatpush1.bf16.msra.mxu0 %v11480_v17  ;;  %v326_v17 = vld [vmem:[%s16177_s1 + $0x8b0] sm:$0xff]  ;;  %v11448_v24 = vcombine.low %v330_v1, %v334_v2 }
 0x216   :  { %6213 = vmatpush1.bf16.msra.mxu1 %v11608_v53  ;;  %v5879_v34 = vpop.f32.mrf.mxu0  ;;  %6173 = vmatprep.subr.bf16.mxu0 %v11473_v22  ;;  %v450_v53 = vld [vmem:[%s16177_s1 + $0xc90] sm:$0xff]  ;;  %v11441_v54 = vcombine.high %v322_v15, %v326_v17 }
 0x217   :  { %v14621_v41 = vadd.f32 %v5918_v32, %v5878_v31  ;;  %v5880_v43 = vadd.f32 %v5879_v34, %v5839_v30  ;;  %v5920_v19 = vpop.f32.mrf.mxu1  ;;  %6214 = vmatprep.subr.bf16.mxu1 %v11601_v38  ;;  %6203 = vmatprep.mubr.bf16.mxu0 %v13143_v27  ;;  %v454_v22 = vld [vmem:[%s16177_s1 + $0xcb0] sm:$0xff]  ;;  %v11576_v38 = vcombine.low %v458_v3, %v462_v5 }
 0x218   :  { %v5881_v48 = vpop.f32.mrf.mxu0  ;;  %6244 = vmatprep.mubr.bf16.mxu1 %v13151_v29  ;;  %v11569_v23 = vcombine.high %v450_v53, %v454_v22  ;;  %v314_v26 = vld [vmem:[%s16177_s1 + $0x850] sm:$0xff]  ;;  %v11440_v31 = vcombine.low %v322_v15, %v326_v17  ;;  %v11568_v32 = vcombine.low %v450_v53, %v454_v22 }
 0x219   :  { %v14637_v52 = vadd.f32 %v5920_v19, %v5880_v43  ;;  %v5922_v7 = vpop.f32.mrf.mxu1  ;;  %6174 = vmatpush1.bf16.msra.mxu0 %v11472_v33  ;;  %v446_v30 = vld [vmem:[%s16177_s1 + $0xc70] sm:$0xff]  ;;  %v11433_v33 = vcombine.high %v314_v26, %v318_v28 }
 0x21a   :  { %6215 = vmatpush1.bf16.msra.mxu1 %v11600_v36  ;;  %v5882_v57 = vpop.f32.mrf.mxu0  ;;  %6175 = vmatprep.subr.bf16.mxu0 %v11465_v37  ;;  %v11561_v34 = vcombine.high %v442_v42, %v446_v30  ;;  %v306_v36 = vld [vmem:[%s16177_s1 + $0x810] sm:$0xff]  ;;  %v11560_v18 = vcombine.low %v442_v42, %v446_v30 }
 0x21b   :  { %v5923_v63 = vpop.f32.mrf.mxu1  ;;  %6216 = vmatprep.subr.bf16.mxu1 %v11593_v45  ;;  %v310_v37 = vld [vmem:[%s16177_s1 + $0x830] sm:$0xff]  ;;  %v11432_v45 = vcombine.low %v314_v26, %v318_v28 }
 0x21c   :  { %v434_v43 = vld [vmem:[%s16177_s1 + $0xc10] sm:$0xff]  ;;  %v11425_v46 = vcombine.high %v306_v36, %v310_v37  ;;  %v11424_v57 = vcombine.low %v306_v36, %v310_v37 }
 0x21d   :  { %6176 = vmatpush1.bf16.msra.mxu0 %v11464_v56  ;;  %v438_v19 = vld [vmem:[%s16177_s1 + $0xc30] sm:$0xff] }
 0x21e   :  { %6217 = vmatpush1.bf16.msra.mxu1 %v11592_v60  ;;  %6177 = vmatprep.subr.bf16.mxu0 %v11457_v61  ;;  %v11553_v48 = vcombine.high %v434_v43, %v438_v19  ;;  %v430_v51 = vld [vmem:[%s16177_s1 + $0xbf0] sm:$0xff]  ;;  %v11552_v60 = vcombine.low %v434_v43, %v438_v19 }
 0x21f   :  { %6218 = vmatprep.subr.bf16.mxu1 %v11585_v0  ;;  %v554_v7 = vld [vmem:[%s16177_s1 + $0xfd0] sm:$0xff]  ;;  %v11545_v61 = vcombine.high %v426_v50, %v430_v51  ;;  %v11544_v5 = vcombine.low %v426_v50, %v430_v51 }
 0x220   :  { %v558_v56 = vld [vmem:[%s16177_s1 + $0xff0] sm:$0xff] }
 0x221   :  { %6178 = vmatpush1.bf16.msra.mxu0 %v11456_v6  ;;  %v11673_v63 = vcombine.high %v554_v7, %v558_v56  ;;  %v418_v0 = vld [vmem:[%s16177_s1 + $0xb90] sm:$0xff]  ;;  %v11672_v6 = vcombine.low %v554_v7, %v558_v56 }
 0x222   :  { %6219 = vmatpush1.bf16.msra.mxu1 %v11584_v9  ;;  %6179 = vmatprep.subr.bf16.mxu0 %v11449_v10  ;;  %v422_v1 = vld [vmem:[%s16177_s1 + $0xbb0] sm:$0xff] }
 0x223   :  { %6220 = vmatprep.subr.bf16.mxu1 %v11577_v11  ;;  %v546_v2 = vld [vmem:[%s16177_s1 + $0xf90] sm:$0xff]  ;;  %v11537_v9 = vcombine.high %v418_v0, %v422_v1  ;;  %v11536_v22 = vcombine.low %v418_v0, %v422_v1 }
 0x224   :  { %v550_v3 = vld [vmem:[%s16177_s1 + $0xfb0] sm:$0xff] }
 0x225   :  { %6180 = vmatpush1.bf16.msra.mxu0 %v11448_v24  ;;  %v11665_v10 = vcombine.high %v546_v2, %v550_v3  ;;  %v410_v11 = vld [vmem:[%s16177_s1 + $0xb50] sm:$0xff]  ;;  %v11664_v24 = vcombine.low %v546_v2, %v550_v3 }
 0x226   :  { %6221 = vmatpush1.bf16.msra.mxu1 %v11576_v38  ;;  %6181 = vmatprep.subr.bf16.mxu0 %v11441_v54  ;;  %v414_v15 = vld [vmem:[%s16177_s1 + $0xb70] sm:$0xff] }
 0x227   :  { %6222 = vmatprep.subr.bf16.mxu1 %v11569_v23  ;;  %v538_v17 = vld [vmem:[%s16177_s1 + $0xf50] sm:$0xff]  ;;  %v11529_v38 = vcombine.high %v410_v11, %v414_v15  ;;  %v11528_v30 = vcombine.low %v410_v11, %v414_v15 }
 0x228   :  { %v542_v53 = vld [vmem:[%s16177_s1 + $0xf70] sm:$0xff] }
 0x229   :  { %6182 = vmatpush1.bf16.msra.mxu0 %v11440_v31  ;;  %v11657_v54 = vcombine.high %v538_v17, %v542_v53  ;;  %v402_v23 = vld [vmem:[%s16177_s1 + $0xb10] sm:$0xff]  ;;  %v11656_v31 = vcombine.low %v538_v17, %v542_v53 }
 0x22a   :  { %6223 = vmatpush1.bf16.msra.mxu1 %v11568_v32  ;;  %6183 = vmatprep.subr.bf16.mxu0 %v11433_v33  ;;  %v406_v26 = vld [vmem:[%s16177_s1 + $0xb30] sm:$0xff] }
 0x22b   :  { %6224 = vmatprep.subr.bf16.mxu1 %v11561_v34  ;;  %v530_v28 = vld [vmem:[%s16177_s1 + $0xf10] sm:$0xff]  ;;  %v11521_v32 = vcombine.high %v402_v23, %v406_v26  ;;  %v11520_v19 = vcombine.low %v402_v23, %v406_v26 }
 0x22c   :  { %v534_v42 = vld [vmem:[%s16177_s1 + $0xf30] sm:$0xff] }
 0x22d   :  { %6184 = vmatpush1.bf16.msra.mxu0 %v11432_v45  ;;  %v11649_v33 = vcombine.high %v530_v28, %v534_v42  ;;  %v394_v34 = vld [vmem:[%s16177_s1 + $0xad0] sm:$0xff]  ;;  %v11648_v45 = vcombine.low %v530_v28, %v534_v42 }
 0x22e   :  { %6225 = vmatpush1.bf16.msra.mxu1 %v11560_v18  ;;  %6185 = vmatprep.subr.bf16.mxu0 %v11425_v46  ;;  %v398_v36 = vld [vmem:[%s16177_s1 + $0xaf0] sm:$0xff] }
 0x22f   :  { %6226 = vmatprep.subr.bf16.mxu1 %v11553_v48  ;;  %v522_v37 = vld [vmem:[%s16177_s1 + $0xed0] sm:$0xff]  ;;  %v11513_v18 = vcombine.high %v394_v34, %v398_v36  ;;  %v11512_v56 = vcombine.low %v394_v34, %v398_v36 }
 0x230   :  { %v526_v43 = vld [vmem:[%s16177_s1 + $0xef0] sm:$0xff] }
 0x231   :  { %6186 = vmatpush1.bf16.msra.mxu0 %v11424_v57  ;;  %v11641_v46 = vcombine.high %v522_v37, %v526_v43  ;;  %v386_v48 = vld [vmem:[%s16177_s1 + $0xa90] sm:$0xff]  ;;  %v11640_v57 = vcombine.low %v522_v37, %v526_v43 }
 0x232   :  { %6227 = vmatpush1.bf16.msra.mxu1 %v11552_v60  ;;  %6187 = vmatprep.subr.bf16.mxu0 %v11545_v61  ;;  %v390_v50 = vld [vmem:[%s16177_s1 + $0xab0] sm:$0xff] }
 0x233   :  { %6228 = vmatprep.subr.bf16.mxu1 %v11673_v63  ;;  %v514_v51 = vld [vmem:[%s16177_s1 + $0xe90] sm:$0xff]  ;;  %v11505_v60 = vcombine.high %v386_v48, %v390_v50  ;;  %v11504_v3 = vcombine.low %v386_v48, %v390_v50 }
 0x234   :  { %v518_v7 = vld [vmem:[%s16177_s1 + $0xeb0] sm:$0xff] }
 0x235   :  { %6188 = vmatpush2.bf16.msra.mxu0 %v11544_v5  ;;  %v11633_v61 = vcombine.high %v514_v51, %v518_v7  ;;  %v378_v63 = vld [vmem:[%s16177_s1 + $0xa50] sm:$0xff]  ;;  %v11632_v5 = vcombine.low %v514_v51, %v518_v7 }
 0x236   :  { %6229 = vmatpush2.bf16.msra.mxu1 %v11672_v6  ;;  %6189 = vmatprep.subr.bf16.mxu0 %v11537_v9  ;;  %v382_v0 = vld [vmem:[%s16177_s1 + $0xa70] sm:$0xff] }
 0x237   :  { %6230 = vmatprep.subr.bf16.mxu1 %v11665_v10  ;;  %v506_v1 = vld [vmem:[%s16177_s1 + $0xe50] sm:$0xff]  ;;  %v11497_v6 = vcombine.high %v378_v63, %v382_v0  ;;  %v11496_v53 = vcombine.low %v378_v63, %v382_v0 }
 0x238   :  { %v510_v2 = vld [vmem:[%s16177_s1 + $0xe70] sm:$0xff] }
 0x239   :  { %6190 = vmatpush2.bf16.msra.mxu0 %v11536_v22  ;;  %v11625_v9 = vcombine.high %v506_v1, %v510_v2  ;;  %v370_v10 = vld [vmem:[%s16177_s1 + $0xa10] sm:$0xff]  ;;  %v11624_v22 = vcombine.low %v506_v1, %v510_v2 }
 0x23a   :  { %6231 = vmatpush2.bf16.msra.mxu1 %v11664_v24  ;;  %6191 = vmatprep.subr.bf16.mxu0 %v11529_v38  ;;  %v374_v11 = vld [vmem:[%s16177_s1 + $0xa30] sm:$0xff] }
 0x23b   :  { %6232 = vmatprep.subr.bf16.mxu1 %v11657_v54  ;;  %v498_v15 = vld [vmem:[%s16177_s1 + $0xe10] sm:$0xff]  ;;  %v11489_v24 = vcombine.high %v370_v10, %v374_v11  ;;  %v11488_v42 = vcombine.low %v370_v10, %v374_v11 }
 0x23c   :  { %v502_v17 = vld [vmem:[%s16177_s1 + $0xe30] sm:$0xff] }
 0x23d   :  { %6192 = vmatpush2.bf16.msra.mxu0 %v11528_v30  ;;  %v11617_v38 = vcombine.high %v498_v15, %v502_v17  ;;  %v618_v54 = vld [vmem:[%s16177_s1 + $0x11d0] sm:$0xff]  ;;  %v11616_v30 = vcombine.low %v498_v15, %v502_v17 }
 0x23e   :  { %6233 = vmatpush2.bf16.msra.mxu1 %v11656_v31  ;;  %6193 = vmatprep.subr.bf16.mxu0 %v11521_v32  ;;  %v622_v23 = vld [vmem:[%s16177_s1 + $0x11f0] sm:$0xff] }
 0x23f   :  { %6234 = vmatprep.subr.bf16.mxu1 %v11649_v33  ;;  %v746_v26 = vld [vmem:[%s16177_s1 + $0x15d0] sm:$0xff]  ;;  %v11737_v31 = vcombine.high %v618_v54, %v622_v23  ;;  %v11736_v43 = vcombine.low %v618_v54, %v622_v23 }
 0x240   :  { %v750_v28 = vld [vmem:[%s16177_s1 + $0x15f0] sm:$0xff] }
 0x241   :  { %6194 = vmatpush2.bf16.msra.mxu0 %v11520_v19  ;;  %v11865_v32 = vcombine.high %v746_v26, %v750_v28  ;;  %v610_v33 = vld [vmem:[%s16177_s1 + $0x1190] sm:$0xff]  ;;  %v11864_v19 = vcombine.low %v746_v26, %v750_v28 }
 0x242   :  { %6235 = vmatpush2.bf16.msra.mxu1 %v11648_v45  ;;  %6195 = vmatprep.subr.bf16.mxu0 %v11513_v18  ;;  %v614_v34 = vld [vmem:[%s16177_s1 + $0x11b0] sm:$0xff] }
 0x243   :  { %6236 = vmatprep.subr.bf16.mxu1 %v11641_v46  ;;  %v738_v36 = vld [vmem:[%s16177_s1 + $0x1590] sm:$0xff]  ;;  %v11729_v45 = vcombine.high %v610_v33, %v614_v34 }
 0x244   :  { %v742_v37 = vld [vmem:[%s16177_s1 + $0x15b0] sm:$0xff] }
 0x245   :  { %6196 = vmatpush2.bf16.msra.mxu0 %v11512_v56  ;;  %v11857_v18 = vcombine.high %v738_v36, %v742_v37  ;;  %v602_v46 = vld [vmem:[%s16177_s1 + $0x1150] sm:$0xff]  ;;  %v11856_v63 = vcombine.low %v738_v36, %v742_v37 }
 0x246   :  { %6237 = vmatpush2.bf16.msra.mxu1 %v11640_v57  ;;  %6197 = vmatprep.subr.bf16.mxu0 %v11505_v60  ;;  %v606_v48 = vld [vmem:[%s16177_s1 + $0x1170] sm:$0xff]  ;;  %v11728_v60 = vcombine.low %v610_v33, %v614_v34 }
 0x247   :  { %6238 = vmatprep.subr.bf16.mxu1 %v11633_v61  ;;  %v730_v51 = vld [vmem:[%s16177_s1 + $0x1550] sm:$0xff]  ;;  %v11721_v0 = vcombine.high %v602_v46, %v606_v48  ;;  %v11720_v17 = vcombine.low %v602_v46, %v606_v48 }
 0x248   :  { %v734_v7 = vld [vmem:[%s16177_s1 + $0x1570] sm:$0xff] }
 0x249   :  { %6198 = vmatpush2.bf16.msra.mxu0 %v11504_v3  ;;  %v722_v10 = vld [vmem:[%s16177_s1 + $0x1510] sm:$0xff] }
 0x24a   :  { %6239 = vmatpush2.bf16.msra.mxu1 %v11632_v5  ;;  %6199 = vmatprep.subr.bf16.mxu0 %v11497_v6  ;;  %v11849_v5 = vcombine.high %v730_v51, %v734_v7  ;;  %v598_v6 = vld [vmem:[%s16177_s1 + $0x1130] sm:$0xff] }
 0x24b   :  { %6240 = vmatprep.subr.bf16.mxu1 %v11625_v9  ;;  %v586_v23 = vld [vmem:[%s16177_s1 + $0x10d0] sm:$0xff] }
 0x24c   :  { %v590_v26 = vld [vmem:[%s16177_s1 + $0x10f0] sm:$0xff] }
 0x24d   :  { %6200 = vmatpush2.bf16.msra.mxu0 %v11496_v53  ;;  %v714_v28 = vld [vmem:[%s16177_s1 + $0x14d0] sm:$0xff] }
 0x24e   :  { %6241 = vmatpush2.bf16.msra.mxu1 %v11624_v22  ;;  %6201 = vmatprep.subr.bf16.mxu0 %v11489_v24  ;;  %v11848_v22 = vcombine.low %v730_v51, %v734_v7  ;;  %v578_v34 = vld [vmem:[%s16177_s1 + $0x1090] sm:$0xff] }
 0x24f   :  { %6242 = vmatprep.subr.bf16.mxu1 %v11617_v38  ;;  %v582_v36 = vld [vmem:[%s16177_s1 + $0x10b0] sm:$0xff] }
 0x250   :  { %v706_v37 = vld [vmem:[%s16177_s1 + $0x1490] sm:$0xff] }
 0x251   :  { %6202 = vmatpush2.bf16.msra.mxu0 %v11488_v42  ;;  %v718_v42 = vld [vmem:[%s16177_s1 + $0x14f0] sm:$0xff] }
 0x252   :  { %6243 = vmatpush2.bf16.msra.mxu1 %v11616_v30  ;;  %6253 = vmatprep.subr.bf16.mxu0 %v11737_v31  ;;  %v11833_v33 = vcombine.high %v714_v28, %v718_v42  ;;  %v570_v48 = vld [vmem:[%s16177_s1 + $0x1050] sm:$0xff] }
 0x253   :  { %6294 = vmatprep.subr.bf16.mxu1 %v11865_v32  ;;  %v11705_v32 = vcombine.high %v586_v23, %v590_v26  ;;  %v698_v51 = vld [vmem:[%s16177_s1 + $0x1450] sm:$0xff] }
 0x254   :  { %v5959_v50 = vpop.f32.mrf.mxu0  ;;  %6204 = vmatmul.mubr.bf16.vlgmr.msra.gmra.mxu0 %v13343_v39  ;;  %v702_v7 = vld [vmem:[%s16177_s1 + $0x1470] sm:$0xff] }
 0x255   :  { %v5960_v56 = vadd.f32 %v5959_v50, %v14621_v41  ;;  %v6000_v57 = vpop.f32.mrf.mxu1  ;;  %6245 = vmatmul.mubr.bf16.vlgmr.msra.gmra.mxu1 %v13347_v40  ;;  %6254 = vmatpush1.bf16.msra.mxu0 %v11736_v43  ;;  %v594_v41 = vld [vmem:[%s16177_s1 + $0x1110] sm:$0xff] }
 0x256   :  { %6295 = vmatpush1.bf16.msra.mxu1 %v11864_v19  ;;  %v5961_v61 = vpop.f32.mrf.mxu0  ;;  %6255 = vmatprep.subr.bf16.mxu0 %v11729_v45  ;;  %v11713_v24 = vcombine.high %v594_v41, %v598_v6  ;;  %v11712_v30 = vcombine.low %v594_v41, %v598_v6  ;;  %v710_v43 = vld [vmem:[%s16177_s1 + $0x14b0] sm:$0xff]  ;;  %v11704_v19 = vcombine.low %v586_v23, %v590_v26 }
 0x257   :  { %v14822_v1 = vadd.f32 %v6000_v57, %v5960_v56  ;;  %v5962_v2 = vadd.f32 %v5961_v61, %v14637_v52  ;;  %v6002_v3 = vpop.f32.mrf.mxu1  ;;  %6296 = vmatprep.subr.bf16.mxu1 %v11857_v18  ;;  %6285 = vmatprep.mubr.bf16.mxu0 %v13365_v47  ;;  %v726_v52 = vld [vmem:[%s16177_s1 + $0x1530] sm:$0xff]  ;;  %v11832_v45 = vcombine.low %v714_v28, %v718_v42 }
 0x258   :  { %v5963_v9 = vpop.f32.mrf.mxu0  ;;  %6326 = vmatprep.mubr.bf16.mxu1 %v13373_v49  ;;  %v11841_v54 = vcombine.high %v722_v10, %v726_v52  ;;  %v11840_v31 = vcombine.low %v722_v10, %v726_v52  ;;  %v11697_v18 = vcombine.high %v578_v34, %v582_v36  ;;  %v11825_v46 = vcombine.high %v706_v37, %v710_v43  ;;  %v574_v50 = vld [vmem:[%s16177_s1 + $0x1070] sm:$0xff] }
 0x259   :  { %v14839_v11 = vadd.f32 %v6002_v3, %v5962_v2  ;;  %v6004_v15 = vpop.f32.mrf.mxu1  ;;  %6256 = vmatpush1.bf16.msra.mxu0 %v11728_v60  ;;  %v11696_v56 = vcombine.low %v578_v34, %v582_v36  ;;  %v11824_v57 = vcombine.low %v706_v37, %v710_v43  ;;  %v11689_v60 = vcombine.high %v570_v48, %v574_v50  ;;  %v690_v2 = vld [vmem:[%s16177_s1 + $0x1410] sm:$0xff] }
 0x25a   :  { %6297 = vmatpush1.bf16.msra.mxu1 %v11856_v63  ;;  %v5964_v53 = vpop.f32.mrf.mxu0  ;;  %6257 = vmatprep.subr.bf16.mxu0 %v11721_v0  ;;  %v11817_v61 = vcombine.high %v698_v51, %v702_v7  ;;  %v562_v63 = vld [vmem:[%s16177_s1 + $0x1010] sm:$0xff]  ;;  %v11816_v41 = vcombine.low %v698_v51, %v702_v7 }
 0x25b   :  { %v6005_v38 = vpop.f32.mrf.mxu1  ;;  %6298 = vmatprep.subr.bf16.mxu1 %v11849_v5  ;;  %v566_v0 = vld [vmem:[%s16177_s1 + $0x1030] sm:$0xff]  ;;  %v11688_v5 = vcombine.low %v570_v48, %v574_v50 }
 0x25c   :  { %v694_v3 = vld [vmem:[%s16177_s1 + $0x1430] sm:$0xff]  ;;  %v11681_v6 = vcombine.high %v562_v63, %v566_v0  ;;  %v11680_v53 = vcombine.low %v562_v63, %v566_v0 }
 0x25d   :  { %6258 = vmatpush1.bf16.msra.mxu0 %v11720_v17  ;;  %v11809_v9 = vcombine.high %v690_v2, %v694_v3  ;;  %v682_v10 = vld [vmem:[%s16177_s1 + $0x13d0] sm:$0xff] }
 0x25e   :  { %6299 = vmatpush1.bf16.msra.mxu1 %v11848_v22  ;;  %6259 = vmatprep.subr.bf16.mxu0 %v11713_v24  ;;  %v686_v52 = vld [vmem:[%s16177_s1 + $0x13f0] sm:$0xff]  ;;  %v11808_v22 = vcombine.low %v690_v2, %v694_v3 }
 0x25f   :  { %6300 = vmatprep.subr.bf16.mxu1 %v11841_v54  ;;  %v810_v15 = vld [vmem:[%s16177_s1 + $0x17d0] sm:$0xff]  ;;  %v11801_v24 = vcombine.high %v682_v10, %v686_v52  ;;  %v11800_v42 = vcombine.low %v682_v10, %v686_v52 }
 0x260   :  { %v814_v17 = vld [vmem:[%s16177_s1 + $0x17f0] sm:$0xff] }
 0x261   :  { %6260 = vmatpush1.bf16.msra.mxu0 %v11712_v30  ;;  %v11929_v38 = vcombine.high %v810_v15, %v814_v17  ;;  %v674_v54 = vld [vmem:[%s16177_s1 + $0x1390] sm:$0xff]  ;;  %v11928_v30 = vcombine.low %v810_v15, %v814_v17 }
 0x262   :  { %6301 = vmatpush1.bf16.msra.mxu1 %v11840_v31  ;;  %6261 = vmatprep.subr.bf16.mxu0 %v11705_v32  ;;  %v678_v23 = vld [vmem:[%s16177_s1 + $0x13b0] sm:$0xff] }
 0x263   :  { %6302 = vmatprep.subr.bf16.mxu1 %v11833_v33  ;;  %v802_v26 = vld [vmem:[%s16177_s1 + $0x1790] sm:$0xff]  ;;  %v11793_v31 = vcombine.high %v674_v54, %v678_v23  ;;  %v11792_v43 = vcombine.low %v674_v54, %v678_v23 }
 0x264   :  { %v806_v28 = vld [vmem:[%s16177_s1 + $0x17b0] sm:$0xff] }
 0x265   :  { %6262 = vmatpush1.bf16.msra.mxu0 %v11704_v19  ;;  %v11921_v32 = vcombine.high %v802_v26, %v806_v28  ;;  %v666_v33 = vld [vmem:[%s16177_s1 + $0x1350] sm:$0xff]  ;;  %v11920_v19 = vcombine.low %v802_v26, %v806_v28 }
 0x266   :  { %6303 = vmatpush1.bf16.msra.mxu1 %v11832_v45  ;;  %6263 = vmatprep.subr.bf16.mxu0 %v11697_v18  ;;  %v670_v34 = vld [vmem:[%s16177_s1 + $0x1370] sm:$0xff] }
 0x267   :  { %6304 = vmatprep.subr.bf16.mxu1 %v11825_v46  ;;  %v794_v36 = vld [vmem:[%s16177_s1 + $0x1750] sm:$0xff]  ;;  %v11785_v45 = vcombine.high %v666_v33, %v670_v34  ;;  %v11784_v7 = vcombine.low %v666_v33, %v670_v34 }
 0x268   :  { %v798_v37 = vld [vmem:[%s16177_s1 + $0x1770] sm:$0xff] }
 0x269   :  { %6264 = vmatpush1.bf16.msra.mxu0 %v11696_v56  ;;  %v11913_v18 = vcombine.high %v794_v36, %v798_v37  ;;  %v658_v46 = vld [vmem:[%s16177_s1 + $0x1310] sm:$0xff]  ;;  %v11912_v56 = vcombine.low %v794_v36, %v798_v37 }
 0x26a   :  { %6305 = vmatpush1.bf16.msra.mxu1 %v11824_v57  ;;  %6265 = vmatprep.subr.bf16.mxu0 %v11689_v60  ;;  %v662_v48 = vld [vmem:[%s16177_s1 + $0x1330] sm:$0xff] }
 0x26b   :  { %6306 = vmatprep.subr.bf16.mxu1 %v11817_v61  ;;  %v786_v50 = vld [vmem:[%s16177_s1 + $0x1710] sm:$0xff]  ;;  %v11777_v57 = vcombine.high %v658_v46, %v662_v48  ;;  %v11776_v3 = vcombine.low %v658_v46, %v662_v48  ;;  %v107_v48 = vld [vmem:[%s16177_s1 + $0x1d8] sm:$0xff] }
 0x26c   :  { %v790_v51 = vld [vmem:[%s16177_s1 + $0x1730] sm:$0xff] }
 0x26d   :  { %6266 = vmatpush1.bf16.msra.mxu0 %v11688_v5  ;;  %v11905_v60 = vcombine.high %v786_v50, %v790_v51  ;;  %v650_v61 = vld [vmem:[%s16177_s1 + $0x12d0] sm:$0xff]  ;;  %v11904_v5 = vcombine.low %v786_v50, %v790_v51  ;;  %v111_v50 = vld [vmem:[%s16177_s1 + $0x1f8] sm:$0xff] }
 0x26e   :  { %6307 = vmatpush1.bf16.msra.mxu1 %v11816_v41  ;;  %6267 = vmatprep.subr.bf16.mxu0 %v11681_v6  ;;  %v654_v63 = vld [vmem:[%s16177_s1 + $0x12f0] sm:$0xff] }
 0x26f   :  { %6308 = vmatprep.subr.bf16.mxu1 %v11809_v9  ;;  %v778_v0 = vld [vmem:[%s16177_s1 + $0x16d0] sm:$0xff]  ;;  %v11769_v41 = vcombine.high %v650_v61, %v654_v63  ;;  %v11768_v17 = vcombine.low %v650_v61, %v654_v63  ;;  %v99_v63 = vld [vmem:[%s16177_s1 + $0x198] sm:$0xff] }
 0x270   :  { %v782_v2 = vld [vmem:[%s16177_s1 + $0x16f0] sm:$0xff] }
 0x271   :  { %6268 = vmatpush1.bf16.msra.mxu0 %v11680_v53  ;;  %v11897_v6 = vcombine.high %v778_v0, %v782_v2  ;;  %v642_v9 = vld [vmem:[%s16177_s1 + $0x1290] sm:$0xff]  ;;  %v11896_v53 = vcombine.low %v778_v0, %v782_v2  ;;  %v103_v0 = vld [vmem:[%s16177_s1 + $0x1b8] sm:$0xff] }
 0x272   :  { %6309 = vmatpush1.bf16.msra.mxu1 %v11808_v22  ;;  %6269 = vmatprep.subr.bf16.mxu0 %v11801_v24  ;;  %v646_v10 = vld [vmem:[%s16177_s1 + $0x12b0] sm:$0xff] }
 0x273   :  { %6310 = vmatprep.subr.bf16.mxu1 %v11929_v38  ;;  %v770_v52 = vld [vmem:[%s16177_s1 + $0x1690] sm:$0xff]  ;;  %v11761_v22 = vcombine.high %v642_v9, %v646_v10  ;;  %v11760_v28 = vcombine.low %v642_v9, %v646_v10 }
 0x274   :  { %v774_v15 = vld [vmem:[%s16177_s1 + $0x16b0] sm:$0xff] }
 0x275   :  { %6270 = vmatpush2.bf16.msra.mxu0 %v11800_v42  ;;  %v11889_v24 = vcombine.high %v770_v52, %v774_v15  ;;  %v634_v38 = vld [vmem:[%s16177_s1 + $0x1250] sm:$0xff]  ;;  %v11888_v42 = vcombine.low %v770_v52, %v774_v15  ;;  %v91_v52 = vld [vmem:[%s16177_s1 + $0x158] sm:$0xff] }
 0x276   :  { %6311 = vmatpush2.bf16.msra.mxu1 %v11928_v30  ;;  %6271 = vmatprep.subr.bf16.mxu0 %v11793_v31  ;;  %v638_v54 = vld [vmem:[%s16177_s1 + $0x1270] sm:$0xff]  ;;  %v95_v15 = vld [vmem:[%s16177_s1 + $0x178] sm:$0xff] }
 0x277   :  { %6312 = vmatprep.subr.bf16.mxu1 %v11921_v32  ;;  %v762_v23 = vld [vmem:[%s16177_s1 + $0x1650] sm:$0xff]  ;;  %v11753_v30 = vcombine.high %v634_v38, %v638_v54  ;;  %v11752_v37 = vcombine.low %v634_v38, %v638_v54  ;;  %v11218_v38 = vcombine.low %v99_v63, %v103_v0 }
 0x278   :  { %v766_v26 = vld [vmem:[%s16177_s1 + $0x1670] sm:$0xff] }
 0x279   :  { %6272 = vmatpush2.bf16.msra.mxu0 %v11792_v43  ;;  %v11881_v31 = vcombine.high %v762_v23, %v766_v26  ;;  %v626_v32 = vld [vmem:[%s16177_s1 + $0x1210] sm:$0xff]  ;;  %v11880_v43 = vcombine.low %v762_v23, %v766_v26 }
 0x27a   :  { %6313 = vmatpush2.bf16.msra.mxu1 %v11920_v19  ;;  %6273 = vmatprep.subr.bf16.mxu0 %v11785_v45  ;;  %v630_v33 = vld [vmem:[%s16177_s1 + $0x1230] sm:$0xff] }
 0x27b   :  { %6314 = vmatprep.subr.bf16.mxu1 %v11913_v18  ;;  %v754_v34 = vld [vmem:[%s16177_s1 + $0x1610] sm:$0xff]  ;;  %v11745_v19 = vcombine.high %v626_v32, %v630_v33  ;;  %v11744_v51 = vcombine.low %v626_v32, %v630_v33  ;;  %v83_v32 = vld [vmem:[%s16177_s1 + $0x118] sm:$0xff] }
 0x27c   :  { %v758_v36 = vld [vmem:[%s16177_s1 + $0x1630] sm:$0xff] }
 0x27d   :  { %6274 = vmatpush2.bf16.msra.mxu0 %v11784_v7  ;;  %v11873_v45 = vcombine.high %v754_v34, %v758_v36  ;;  %v874_v18 = vld [vmem:[%s16177_s1 + $0x19d0] sm:$0xff]  ;;  %v11872_v7 = vcombine.low %v754_v34, %v758_v36 }
 0x27e   :  { %6315 = vmatpush2.bf16.msra.mxu1 %v11912_v56  ;;  %6275 = vmatprep.subr.bf16.mxu0 %v11777_v57  ;;  %v878_v46 = vld [vmem:[%s16177_s1 + $0x19f0] sm:$0xff]  ;;  %v11227_v57 = vcombine.high %v107_v48, %v111_v50 }
 0x27f   :  { %6316 = vmatprep.subr.bf16.mxu1 %v11905_v60  ;;  %v11993_v56 = vcombine.high %v874_v18, %v878_v46  ;;  %v866_v60 = vld [vmem:[%s16177_s1 + $0x1990] sm:$0xff]  ;;  %v11992_v2 = vcombine.low %v874_v18, %v878_v46 }
 0x280   :  { %v870_v61 = vld [vmem:[%s16177_s1 + $0x19b0] sm:$0xff] }
 0x281   :  { %6276 = vmatpush2.bf16.msra.mxu0 %v11776_v3  ;;  %v11226_v3 = vcombine.low %v107_v48, %v111_v50  ;;  %v862_v9 = vld [vmem:[%s16177_s1 + $0x1970] sm:$0xff]  ;;  %v75_v48 = vld [vmem:[%s16177_s1 + $0xd8] sm:$0xff] }
 0x282   :  { %6317 = vmatpush2.bf16.msra.mxu1 %v11904_v5  ;;  %6277 = vmatprep.subr.bf16.mxu0 %v11769_v41  ;;  %v11985_v5 = vcombine.high %v866_v60, %v870_v61  ;;  %v11219_v41 = vcombine.high %v99_v63, %v103_v0  ;;  %v842_v46 = vld [vmem:[%s16177_s1 + $0x18d0] sm:$0xff]  ;;  %v79_v50 = vld [vmem:[%s16177_s1 + $0xf8] sm:$0xff] }
 0x283   :  { %6318 = vmatprep.subr.bf16.mxu1 %v11897_v6  ;;  %v858_v6 = vld [vmem:[%s16177_s1 + $0x1950] sm:$0xff]  ;;  %v67_v63 = vld [vmem:[%s16177_s1 + $0x98] sm:$0xff] }
 0x284   :  { %v11977_v54 = vcombine.high %v858_v6, %v862_v9  ;;  %v11976_v36 = vcombine.low %v858_v6, %v862_v9  ;;  %v71_v0 = vld [vmem:[%s16177_s1 + $0xb8] sm:$0xff]  ;;  %v826_v6 = vld [vmem:[%s16177_s1 + $0x1850] sm:$0xff] }
 0x285   :  { %6278 = vmatpush2.bf16.msra.mxu0 %v11768_v17  ;;  %v830_v9 = vld [vmem:[%s16177_s1 + $0x1870] sm:$0xff] }
 0x286   :  { %6319 = vmatpush2.bf16.msra.mxu1 %v11896_v53  ;;  %6279 = vmatprep.subr.bf16.mxu0 %v11761_v22  ;;  %v11984_v22 = vcombine.low %v866_v60, %v870_v61  ;;  %v834_v60 = vld [vmem:[%s16177_s1 + $0x1890] sm:$0xff] }
 0x287   :  { %6320 = vmatprep.subr.bf16.mxu1 %v11889_v24  ;;  %v838_v61 = vld [vmem:[%s16177_s1 + $0x18b0] sm:$0xff] }
 0x289   :  { %6280 = vmatpush2.bf16.msra.mxu0 %v11760_v28 }
 0x28a   :  { %6321 = vmatpush2.bf16.msra.mxu1 %v11888_v42  ;;  %6281 = vmatprep.subr.bf16.mxu0 %v11753_v30  ;;  %v11211_v42 = vcombine.high %v91_v52, %v95_v15  ;;  %v854_v30 = vld [vmem:[%s16177_s1 + $0x1930] sm:$0xff] }
 0x28b   :  { %6322 = vmatprep.subr.bf16.mxu1 %v11881_v31 }
 0x28d   :  { %6282 = vmatpush2.bf16.msra.mxu0 %v11752_v37 }
 0x28e   :  { %6323 = vmatpush2.bf16.msra.mxu1 %v11880_v43  ;;  %6283 = vmatprep.subr.bf16.mxu0 %v11745_v19  ;;  %v11210_v43 = vcombine.low %v91_v52, %v95_v15  ;;  %v63_v52 = vld [vmem:[%s16177_s1 + $0x78] sm:$0xff]  ;;  %v11952_v15 = vcombine.low %v834_v60, %v838_v61 }
 0x28f   :  { %6324 = vmatprep.subr.bf16.mxu1 %v11873_v45 }
 0x291   :  { %6284 = vmatpush2.bf16.msra.mxu0 %v11744_v51 }
 0x292   :  { %6325 = vmatpush2.bf16.msra.mxu1 %v11872_v7  ;;  %6335 = vmatprep.subr.bf16.mxu0 %v11993_v56 }
 0x293   :  { %6376 = vmatprep.subr.bf16.mxu1 %v11227_v57  ;;  %v11195_v57 = vcombine.high %v75_v48, %v79_v50 }
 0x294   :  { %v6041_v10 = vpop.f32.mrf.mxu0  ;;  %6286 = vmatmul.mubr.bf16.vlgmr.msra.gmra.mxu0 %v13554_v4 }
 0x295   :  { %v6042_v17 = vadd.f32 %v6041_v10, %v14822_v1  ;;  %v6082_v53 = vpop.f32.mrf.mxu1  ;;  %6327 = vmatmul.mubr.bf16.vlgmr.msra.gmra.mxu1 %v13569_v8  ;;  %6336 = vmatpush1.bf16.msra.mxu0 %v11992_v2  ;;  %v850_v1 = vld [vmem:[%s16177_s1 + $0x1910] sm:$0xff]  ;;  %v59_v10 = vld [vmem:[%s16177_s1 + $0x58] sm:$0xff] }
 0x296   :  { %6377 = vmatpush1.bf16.msra.mxu1 %v11226_v3  ;;  %v6043_v24 = vpop.f32.mrf.mxu0  ;;  %6337 = vmatprep.subr.bf16.mxu0 %v11985_v5  ;;  %v11969_v19 = vcombine.high %v850_v1, %v854_v30  ;;  %v11968_v51 = vcombine.low %v850_v1, %v854_v30  ;;  %v11194_v3 = vcombine.low %v75_v48, %v79_v50 }
 0x297   :  { %v15024_v23 = vadd.f32 %v6082_v53, %v6042_v17  ;;  %v6044_v26 = vadd.f32 %v6043_v24, %v14839_v11  ;;  %v6084_v28 = vpop.f32.mrf.mxu1  ;;  %6378 = vmatprep.subr.bf16.mxu1 %v11219_v41  ;;  %6367 = vmatprep.mubr.bf16.mxu0 %v13579_v14  ;;  %v87_v11 = vld [vmem:[%s16177_s1 + $0x138] sm:$0xff]  ;;  %v11953_v5 = vcombine.high %v834_v60, %v838_v61  ;;  %v818_v24 = vld [vmem:[%s16177_s1 + $0x1810] sm:$0xff] }
 0x298   :  { %v6045_v31 = vpop.f32.mrf.mxu0  ;;  %6408 = vmatprep.mubr.bf16.mxu1 %v12980_v58  ;;  %v11203_v18 = vcombine.high %v83_v32, %v87_v11  ;;  %v846_v58 = vld [vmem:[%s16177_s1 + $0x18f0] sm:$0xff]  ;;  %v11202_v7 = vcombine.low %v83_v32, %v87_v11  ;;  %v11187_v41 = vcombine.high %v67_v63, %v71_v0  ;;  %v11186_v17 = vcombine.low %v67_v63, %v71_v0  ;;  %v171_v11 = vld [vmem:[%s16177_s1 + $0x3d8] sm:$0xff] }
 0x299   :  { %v15041_v33 = vadd.f32 %v6084_v28, %v6044_v26  ;;  %v6086_v34 = vpop.f32.mrf.mxu1  ;;  %6338 = vmatpush1.bf16.msra.mxu0 %v11984_v22  ;;  %v11961_v56 = vcombine.high %v842_v46, %v846_v58  ;;  %v11960_v2 = vcombine.low %v842_v46, %v846_v58  ;;  %v11945_v53 = vcombine.high %v826_v6, %v830_v9  ;;  %v55_v26 = vld [vmem:[%s16177_s1 + $0x38] sm:$0xff]  ;;  %v938_v31 = vld [vmem:[%s16177_s1 + $0x1bd0] sm:$0xff] }
 0x29a   :  { %6379 = vmatpush1.bf16.msra.mxu1 %v11218_v38  ;;  %v6046_v37 = vpop.f32.mrf.mxu0  ;;  %6339 = vmatprep.subr.bf16.mxu0 %v11977_v54  ;;  %v11179_v22 = vcombine.high %v59_v10, %v63_v52  ;;  %v822_v38 = vld [vmem:[%s16177_s1 + $0x1830] sm:$0xff]  ;;  %v51_v54 = vld [vmem:[%s16177_s1 + $0x18] sm:$0xff]  ;;  %v11944_v28 = vcombine.low %v826_v6, %v830_v9 }
 0x29b   :  { %v6087_v45 = vpop.f32.mrf.mxu1  ;;  %6380 = vmatprep.subr.bf16.mxu1 %v11211_v42  ;;  %v11178_v42 = vcombine.low %v59_v10, %v63_v52  ;;  %v11937_v1 = vcombine.high %v818_v24, %v822_v38  ;;  %v11171_v30 = vcombine.high %v51_v54, %v55_v26  ;;  %v942_v32 = vld [vmem:[%s16177_s1 + $0x1bf0] sm:$0xff]  ;;  %v175_v34 = vld [vmem:[%s16177_s1 + $0x3f8] sm:$0xff]  ;;  %v11170_v37 = vcombine.low %v51_v54, %v55_v26 }
 0x29c   :  { %v930_v45 = vld [vmem:[%s16177_s1 + $0x1b90] sm:$0xff]  ;;  %v163_v46 = vld [vmem:[%s16177_s1 + $0x398] sm:$0xff]  ;;  %v12056_v48 = vcombine.low %v938_v31, %v942_v32  ;;  %v11290_v50 = vcombine.low %v171_v11, %v175_v34 }
 0x29d   :  { %6340 = vmatpush1.bf16.msra.mxu0 %v11976_v36  ;;  %v11936_v36 = vcombine.low %v818_v24, %v822_v38  ;;  %v167_v58 = vld [vmem:[%s16177_s1 + $0x3b8] sm:$0xff] }
 0x29e   :  { %6381 = vmatpush1.bf16.msra.mxu1 %v11210_v43  ;;  %6341 = vmatprep.subr.bf16.mxu0 %v11969_v19  ;;  %v12057_v43 = vcombine.high %v938_v31, %v942_v32  ;;  %v11291_v19 = vcombine.high %v171_v11, %v175_v34  ;;  %v155_v60 = vld [vmem:[%s16177_s1 + $0x358] sm:$0xff]  ;;  %v11282_v0 = vcombine.low %v163_v46, %v167_v58 }
 0x29f   :  { %6382 = vmatprep.subr.bf16.mxu1 %v11203_v18  ;;  %v934_v18 = vld [vmem:[%s16177_s1 + $0x1bb0] sm:$0xff]  ;;  %v159_v61 = vld [vmem:[%s16177_s1 + $0x378] sm:$0xff] }
 0x2a0   :  { %v12048_v63 = vcombine.low %v930_v45, %v934_v18  ;;  %v147_v6 = vld [vmem:[%s16177_s1 + $0x318] sm:$0xff]  ;;  %v11274_v52 = vcombine.low %v155_v60, %v159_v61 }
 0x2a1   :  { %6342 = vmatpush1.bf16.msra.mxu0 %v11968_v51  ;;  %v12049_v51 = vcombine.high %v930_v45, %v934_v18  ;;  %v151_v9 = vld [vmem:[%s16177_s1 + $0x338] sm:$0xff] }
 0x2a2   :  { %6383 = vmatpush1.bf16.msra.mxu1 %v11202_v7  ;;  %6343 = vmatprep.subr.bf16.mxu0 %v11961_v56  ;;  %v11283_v7 = vcombine.high %v163_v46, %v167_v58  ;;  %v922_v56 = vld [vmem:[%s16177_s1 + $0x1b50] sm:$0xff]  ;;  %v139_v24 = vld [vmem:[%s16177_s1 + $0x2d8] sm:$0xff]  ;;  %v11266_v26 = vcombine.low %v147_v6, %v151_v9 }
 0x2a3   :  { %6384 = vmatprep.subr.bf16.mxu1 %v11195_v57  ;;  %v926_v57 = vld [vmem:[%s16177_s1 + $0x1b70] sm:$0xff]  ;;  %v143_v38 = vld [vmem:[%s16177_s1 + $0x2f8] sm:$0xff] }
 0x2a4   :  { %v12040_v10 = vcombine.low %v922_v56, %v926_v57  ;;  %v131_v31 = vld [vmem:[%s16177_s1 + $0x298] sm:$0xff]  ;;  %v11258_v34 = vcombine.low %v139_v24, %v143_v38 }
 0x2a5   :  { %6344 = vmatpush1.bf16.msra.mxu0 %v11960_v2  ;;  %v12041_v2 = vcombine.high %v922_v56, %v926_v57  ;;  %v135_v32 = vld [vmem:[%s16177_s1 + $0x2b8] sm:$0xff] }
 0x2a6   :  { %6385 = vmatpush1.bf16.msra.mxu1 %v11194_v3  ;;  %6345 = vmatprep.subr.bf16.mxu0 %v11953_v5  ;;  %v11275_v3 = vcombine.high %v155_v60, %v159_v61  ;;  %v914_v5 = vld [vmem:[%s16177_s1 + $0x1b10] sm:$0xff]  ;;  %v123_v45 = vld [vmem:[%s16177_s1 + $0x258] sm:$0xff]  ;;  %v11250_v58 = vcombine.low %v131_v31, %v135_v32 }
 0x2a7   :  { %6386 = vmatprep.subr.bf16.mxu1 %v11187_v41  ;;  %v918_v41 = vld [vmem:[%s16177_s1 + $0x1b30] sm:$0xff]  ;;  %v127_v18 = vld [vmem:[%s16177_s1 + $0x278] sm:$0xff] }
 0x2a8   :  { %v12032_v54 = vcombine.low %v914_v5, %v918_v41  ;;  %v115_v56 = vld [vmem:[%s16177_s1 + $0x218] sm:$0xff]  ;;  %v11242_v61 = vcombine.low %v123_v45, %v127_v18 }
 0x2a9   :  { %6346 = vmatpush1.bf16.msra.mxu0 %v11952_v15  ;;  %v12033_v15 = vcombine.high %v914_v5, %v918_v41  ;;  %v119_v57 = vld [vmem:[%s16177_s1 + $0x238] sm:$0xff] }
 0x2aa   :  { %6387 = vmatpush1.bf16.msra.mxu1 %v11186_v17  ;;  %6347 = vmatprep.subr.bf16.mxu0 %v11945_v53  ;;  %v11267_v17 = vcombine.high %v147_v6, %v151_v9  ;;  %v906_v53 = vld [vmem:[%s16177_s1 + $0x1ad0] sm:$0xff]  ;;  %v363_v5 = vld [vmem:[%s16177_s1 + $0x9d8] sm:$0xff]  ;;  %v964_v9 = vsub.s32 4, %v13747_v25 }
 0x2ab   :  { %6388 = vmatprep.subr.bf16.mxu1 %v11179_v22  ;;  %v910_v22 = vld [vmem:[%s16177_s1 + $0x1af0] sm:$0xff]  ;;  %v367_v41 = vld [vmem:[%s16177_s1 + $0x9f8] sm:$0xff] }
 0x2ac   :  { %v12024_v11 = vcombine.low %v906_v53, %v910_v22 }
 0x2ad   :  { %6348 = vmatpush1.bf16.msra.mxu0 %v11944_v28  ;;  %v12025_v28 = vcombine.high %v906_v53, %v910_v22  ;;  %v227_v53 = vld [vmem:[%s16177_s1 + $0x598] sm:$0xff] }
 0x2ae   :  { %6389 = vmatpush1.bf16.msra.mxu1 %v11178_v42  ;;  %6349 = vmatprep.subr.bf16.mxu0 %v11937_v1  ;;  %v11259_v42 = vcombine.high %v139_v24, %v143_v38  ;;  %v898_v1 = vld [vmem:[%s16177_s1 + $0x1a90] sm:$0xff]  ;;  %v231_v22 = vld [vmem:[%s16177_s1 + $0x5b8] sm:$0xff] }
 0x2af   :  { %6390 = vmatprep.subr.bf16.mxu1 %v11171_v30  ;;  %v902_v30 = vld [vmem:[%s16177_s1 + $0x1ab0] sm:$0xff]  ;;  %v355_v24 = vld [vmem:[%s16177_s1 + $0x998] sm:$0xff] }
 0x2b0   :  { %v12016_v46 = vcombine.low %v898_v1, %v902_v30  ;;  %v359_v38 = vld [vmem:[%s16177_s1 + $0x9b8] sm:$0xff] }
 0x2b1   :  { %6350 = vmatpush1.bf16.msra.mxu0 %v11936_v36  ;;  %v12017_v36 = vcombine.high %v898_v1, %v902_v30  ;;  %v11347_v1 = vcombine.high %v227_v53, %v231_v22 }
 0x2b2   :  { %6391 = vmatpush1.bf16.msra.mxu1 %v11170_v37  ;;  %6351 = vmatprep.subr.bf16.mxu0 %v12057_v43  ;;  %v11251_v37 = vcombine.high %v131_v31, %v135_v32  ;;  %v890_v43 = vld [vmem:[%s16177_s1 + $0x1a50] sm:$0xff]  ;;  %v11475_v31 = vcombine.high %v355_v24, %v359_v38  ;;  %v219_v32 = vld [vmem:[%s16177_s1 + $0x558] sm:$0xff] }
 0x2b3   :  { %6392 = vmatprep.subr.bf16.mxu1 %v11291_v19  ;;  %v894_v19 = vld [vmem:[%s16177_s1 + $0x1a70] sm:$0xff] }
 0x2b4   :  { %v12008_v60 = vcombine.low %v890_v43, %v894_v19 }
 0x2b5   :  { %6352 = vmatpush2.bf16.msra.mxu0 %v12056_v48  ;;  %v12009_v48 = vcombine.high %v890_v43, %v894_v19 }
 0x2b6   :  { %6393 = vmatpush2.bf16.msra.mxu1 %v11290_v50  ;;  %6353 = vmatprep.subr.bf16.mxu0 %v12049_v51  ;;  %v11243_v50 = vcombine.high %v123_v45, %v127_v18  ;;  %v882_v51 = vld [vmem:[%s16177_s1 + $0x1a10] sm:$0xff]  ;;  %v11346_v45 = vcombine.low %v227_v53, %v231_v22 }
 0x2b7   :  { %6394 = vmatprep.subr.bf16.mxu1 %v11283_v7  ;;  %v886_v7 = vld [vmem:[%s16177_s1 + $0x1a30] sm:$0xff] }
 0x2b8   :  { %v12000_v6 = vcombine.low %v882_v51, %v886_v7 }
 0x2b9   :  { %6354 = vmatpush2.bf16.msra.mxu0 %v12048_v63  ;;  %v12001_v63 = vcombine.high %v882_v51, %v886_v7 }
 0x2ba   :  { %6395 = vmatpush2.bf16.msra.mxu1 %v11282_v0  ;;  %6355 = vmatprep.subr.bf16.mxu0 %v12041_v2  ;;  %v11235_v0 = vcombine.high %v115_v56, %v119_v57  ;;  %v235_v2 = vld [vmem:[%s16177_s1 + $0x5d8] sm:$0xff] }
 0x2bb   :  { %6396 = vmatprep.subr.bf16.mxu1 %v11275_v3  ;;  %v239_v3 = vld [vmem:[%s16177_s1 + $0x5f8] sm:$0xff] }
 0x2bd   :  { %6356 = vmatpush2.bf16.msra.mxu0 %v12040_v10  ;;  %v11234_v10 = vcombine.low %v115_v56, %v119_v57  ;;  %v211_v56 = vld [vmem:[%s16177_s1 + $0x518] sm:$0xff] }
 0x2be   :  { %6397 = vmatpush2.bf16.msra.mxu1 %v11274_v52  ;;  %6357 = vmatprep.subr.bf16.mxu0 %v12033_v15  ;;  %v11355_v52 = vcombine.high %v235_v2, %v239_v3  ;;  %v11483_v15 = vcombine.high %v363_v5, %v367_v41 }
 0x2bf   :  { %6398 = vmatprep.subr.bf16.mxu1 %v11267_v17  ;;  %v968_v17 = vsub.s32 5, %v13747_v25 }
 0x2c1   :  { %6358 = vmatpush2.bf16.msra.mxu0 %v12032_v54  ;;  %v12807_v54 = vld [vmem:[%s16178_s2] sm:$0xff] }
 0x2c2   :  { %6399 = vmatpush2.bf16.msra.mxu1 %v11266_v26  ;;  %6359 = vmatprep.subr.bf16.mxu0 %v12025_v28  ;;  %v965_v26 = vrot.slane %v12807_v54, %v964_v9  ;;  %v11354_v28 = vcombine.low %v235_v2, %v239_v3  ;;  %v969_v30 = vrot.slane %v12807_v54, %v968_v17  ;;  %v195_v54 = vld [vmem:[%s16177_s1 + $0x498] sm:$0xff] }
 0x2c3   :  { %6400 = vmatprep.subr.bf16.mxu1 %v11259_v42  ;;  %v11482_v42 = vcombine.low %v363_v5, %v367_v41 }
 0x2c5   :  { %6360 = vmatpush2.bf16.msra.mxu0 %v12024_v11  ;;  %v223_v11 = vld [vmem:[%s16177_s1 + $0x578] sm:$0xff] }
 0x2c6   :  { %6401 = vmatpush2.bf16.msra.mxu1 %v11258_v34  ;;  %6361 = vmatprep.subr.bf16.mxu0 %v12017_v36  ;;  %v347_v36 = vld [vmem:[%s16177_s1 + $0x958] sm:$0xff]  ;;  %v11338_v2 = vcombine.low %v219_v32, %v223_v11 }
 0x2c7   :  { %6402 = vmatprep.subr.bf16.mxu1 %v11251_v37  ;;  %v351_v37 = vld [vmem:[%s16177_s1 + $0x978] sm:$0xff] }
 0x2c8   :  { %v11467_v7 = vcombine.high %v347_v36, %v351_v37 }
 0x2c9   :  { %6362 = vmatpush2.bf16.msra.mxu0 %v12016_v46  ;;  %v11474_v46 = vcombine.low %v355_v24, %v359_v38 }
 0x2ca   :  { %6403 = vmatpush2.bf16.msra.mxu1 %v11250_v58  ;;  %6363 = vmatprep.subr.bf16.mxu0 %v12009_v48  ;;  %v11339_v58 = vcombine.high %v219_v32, %v223_v11  ;;  %v187_v11 = vld [vmem:[%s16177_s1 + $0x458] sm:$0xff] }
 0x2cb   :  { %6404 = vmatprep.subr.bf16.mxu1 %v11243_v50 }
 0x2cd   :  { %6364 = vmatpush2.bf16.msra.mxu0 %v12008_v60  ;;  %v339_v60 = vld [vmem:[%s16177_s1 + $0x918] sm:$0xff] }
 0x2ce   :  { %6405 = vmatpush2.bf16.msra.mxu1 %v11242_v61  ;;  %6365 = vmatprep.subr.bf16.mxu0 %v12001_v63  ;;  %v343_v61 = vld [vmem:[%s16177_s1 + $0x938] sm:$0xff] }
 0x2cf   :  { %6406 = vmatprep.subr.bf16.mxu1 %v11235_v0  ;;  %v11458_v22 = vcombine.low %v339_v60, %v343_v61 }
 0x2d1   :  { %6366 = vmatpush2.bf16.msra.mxu0 %v12000_v6  ;;  %v11459_v6 = vcombine.high %v339_v60, %v343_v61  ;;  %v299_v60 = vld [vmem:[%s16177_s1 + $0x7d8] sm:$0xff] }
 0x2d2   :  { %6407 = vmatpush2.bf16.msra.mxu1 %v11234_v10  ;;  %6417 = vmatprep.subr.bf16.mxu0 %v11355_v52  ;;  %v203_v10 = vld [vmem:[%s16177_s1 + $0x4d8] sm:$0xff] }
 0x2d3   :  { %6458 = vmatprep.subr.bf16.mxu1 %v11483_v15  ;;  %v331_v52 = vld [vmem:[%s16177_s1 + $0x8d8] sm:$0xff] }
 0x2d4   :  { %v6123_v34 = vpop.f32.mrf.mxu0  ;;  %6368 = vmatmul.mubr.bf16.vlgmr.msra.gmra.mxu0 %v13774_v21  ;;  %v335_v15 = vld [vmem:[%s16177_s1 + $0x8f8] sm:$0xff] }
 0x2d5   :  { %v6124_v43 = vadd.f32 %v6123_v34, %v965_v26  ;;  %v6164_v19 = vpop.f32.mrf.mxu1  ;;  %6409 = vmatmul.mubr.bf16.vlgmr.msra.gmra.mxu1 %v13110_v16  ;;  %6418 = vmatpush1.bf16.msra.mxu0 %v11354_v28  ;;  %v215_v16 = vld [vmem:[%s16177_s1 + $0x538] sm:$0xff]  ;;  %v11451_v38 = vcombine.high %v331_v52, %v335_v15 }
 0x2d6   :  { %6459 = vmatpush1.bf16.msra.mxu1 %v11482_v42  ;;  %v6125_v18 = vpop.f32.mrf.mxu0  ;;  %6419 = vmatprep.subr.bf16.mxu0 %v11347_v1  ;;  %v11331_v5 = vcombine.high %v211_v56, %v215_v16  ;;  %v11330_v53 = vcombine.low %v211_v56, %v215_v16  ;;  %v199_v26 = vld [vmem:[%s16177_s1 + $0x4b8] sm:$0xff] }
 0x2d7   :  { %v15234_v48 = vadd.f32 %v6164_v19, %v6124_v43  ;;  %v6126_v50 = vadd.f32 %v6125_v18, %v969_v30  ;;  %v6166_v51 = vpop.f32.mrf.mxu1  ;;  %6460 = vmatprep.subr.bf16.mxu1 %v11475_v31  ;;  %6449 = vmatprep.mubr.bf16.mxu0 %v12984_v59  ;;  %v11466_v59 = vcombine.low %v347_v36, %v351_v37  ;;  %v323_v28 = vld [vmem:[%s16177_s1 + $0x898] sm:$0xff] }
 0x2d8   :  { %v6127_v57 = vpop.f32.mrf.mxu0  ;;  %6490 = vmatprep.mubr.bf16.mxu1 %v13143_v27  ;;  %v207_v27 = vld [vmem:[%s16177_s1 + $0x4f8] sm:$0xff]  ;;  %v11450_v30 = vcombine.low %v331_v52, %v335_v15  ;;  %v11315_v31 = vcombine.high %v195_v54, %v199_v26  ;;  %v11314_v43 = vcombine.low %v195_v54, %v199_v26 }
 0x2d9   :  { %v15250_v63 = vadd.f32 %v6166_v51, %v6126_v50  ;;  %v6168_v0 = vpop.f32.mrf.mxu1  ;;  %6420 = vmatpush1.bf16.msra.mxu0 %v11346_v45  ;;  %v11323_v24 = vcombine.high %v203_v10, %v207_v27  ;;  %v327_v42 = vld [vmem:[%s16177_s1 + $0x8b8] sm:$0xff]  ;;  %v11322_v1 = vcombine.low %v203_v10, %v207_v27 }
 0x2da   :  { %6461 = vmatpush1.bf16.msra.mxu1 %v11474_v46  ;;  %v6128_v3 = vpop.f32.mrf.mxu0  ;;  %6421 = vmatprep.subr.bf16.mxu0 %v11339_v58  ;;  %v11443_v32 = vcombine.high %v323_v28, %v327_v42  ;;  %v191_v34 = vld [vmem:[%s16177_s1 + $0x478] sm:$0xff]  ;;  %v11442_v19 = vcombine.low %v323_v28, %v327_v42 }
 0x2db   :  { %v6169_v41 = vpop.f32.mrf.mxu1  ;;  %6462 = vmatprep.subr.bf16.mxu1 %v11467_v7  ;;  %v315_v36 = vld [vmem:[%s16177_s1 + $0x858] sm:$0xff]  ;;  %v11307_v45 = vcombine.high %v187_v11, %v191_v34  ;;  %v11306_v7 = vcombine.low %v187_v11, %v191_v34 }
 0x2dc   :  { %v319_v37 = vld [vmem:[%s16177_s1 + $0x878] sm:$0xff] }
 0x2dd   :  { %6422 = vmatpush1.bf16.msra.mxu0 %v11338_v2  ;;  %v11435_v18 = vcombine.high %v315_v36, %v319_v37  ;;  %v179_v46 = vld [vmem:[%s16177_s1 + $0x418] sm:$0xff]  ;;  %v11434_v56 = vcombine.low %v315_v36, %v319_v37 }
 0x2de   :  { %6463 = vmatpush1.bf16.msra.mxu1 %v11466_v59  ;;  %6423 = vmatprep.subr.bf16.mxu0 %v11331_v5  ;;  %v183_v58 = vld [vmem:[%s16177_s1 + $0x438] sm:$0xff] }
 0x2df   :  { %6464 = vmatprep.subr.bf16.mxu1 %v11459_v6  ;;  %v307_v50 = vld [vmem:[%s16177_s1 + $0x818] sm:$0xff]  ;;  %v11299_v16 = vcombine.high %v179_v46, %v183_v58  ;;  %v11298_v3 = vcombine.low %v179_v46, %v183_v58 }
 0x2e0   :  { %v311_v51 = vld [vmem:[%s16177_s1 + $0x838] sm:$0xff] }
 0x2e1   :  { %6424 = vmatpush1.bf16.msra.mxu0 %v11330_v53  ;;  %v11427_v57 = vcombine.high %v307_v50, %v311_v51  ;;  %v303_v61 = vld [vmem:[%s16177_s1 + $0x7f8] sm:$0xff]  ;;  %v11426_v59 = vcombine.low %v307_v50, %v311_v51 }
 0x2e2   :  { %6465 = vmatpush1.bf16.msra.mxu1 %v11458_v22  ;;  %6425 = vmatprep.subr.bf16.mxu0 %v11323_v24  ;;  %v427_v0 = vld [vmem:[%s16177_s1 + $0xbd8] sm:$0xff]  ;;  %v11419_v5 = vcombine.high %v299_v60, %v303_v61  ;;  %v11418_v15 = vcombine.low %v299_v60, %v303_v61 }
 0x2e3   :  { %6466 = vmatprep.subr.bf16.mxu1 %v11451_v38  ;;  %v431_v2 = vld [vmem:[%s16177_s1 + $0xbf8] sm:$0xff] }
 0x2e4   :  { %v11547_v41 = vcombine.high %v427_v0, %v431_v2  ;;  %v291_v6 = vld [vmem:[%s16177_s1 + $0x798] sm:$0xff]  ;;  %v11546_v53 = vcombine.low %v427_v0, %v431_v2 }
 0x2e5   :  { %6426 = vmatpush1.bf16.msra.mxu0 %v11322_v1  ;;  %v295_v10 = vld [vmem:[%s16177_s1 + $0x7b8] sm:$0xff] }
 0x2e6   :  { %6467 = vmatpush1.bf16.msra.mxu1 %v11450_v30  ;;  %6427 = vmatprep.subr.bf16.mxu0 %v11315_v31  ;;  %v419_v27 = vld [vmem:[%s16177_s1 + $0xb98] sm:$0xff]  ;;  %v11411_v22 = vcombine.high %v291_v6, %v295_v10  ;;  %v11410_v42 = vcombine.low %v291_v6, %v295_v10 }
 0x2e7   :  { %6468 = vmatprep.subr.bf16.mxu1 %v11443_v32  ;;  %v423_v52 = vld [vmem:[%s16177_s1 + $0xbb8] sm:$0xff] }
 0x2e8   :  { %v11539_v24 = vcombine.high %v419_v27, %v423_v52  ;;  %v283_v38 = vld [vmem:[%s16177_s1 + $0x758] sm:$0xff]  ;;  %v11538_v1 = vcombine.low %v419_v27, %v423_v52 }
 0x2e9   :  { %6428 = vmatpush1.bf16.msra.mxu0 %v11314_v43  ;;  %v287_v54 = vld [vmem:[%s16177_s1 + $0x778] sm:$0xff] }
 0x2ea   :  { %6469 = vmatpush1.bf16.msra.mxu1 %v11442_v19  ;;  %6429 = vmatprep.subr.bf16.mxu0 %v11307_v45  ;;  %v411_v26 = vld [vmem:[%s16177_s1 + $0xb58] sm:$0xff]  ;;  %v11403_v30 = vcombine.high %v283_v38, %v287_v54  ;;  %v11402_v37 = vcombine.low %v283_v38, %v287_v54 }
 0x2eb   :  { %6470 = vmatprep.subr.bf16.mxu1 %v11435_v18  ;;  %v415_v28 = vld [vmem:[%s16177_s1 + $0xb78] sm:$0xff] }
 0x2ec   :  { %v11531_v31 = vcombine.high %v411_v26, %v415_v28  ;;  %v275_v32 = vld [vmem:[%s16177_s1 + $0x718] sm:$0xff]  ;;  %v11530_v43 = vcombine.low %v411_v26, %v415_v28 }
 0x2ed   :  { %6430 = vmatpush1.bf16.msra.mxu0 %v11306_v7  ;;  %v279_v11 = vld [vmem:[%s16177_s1 + $0x738] sm:$0xff] }
 0x2ee   :  { %6471 = vmatpush1.bf16.msra.mxu1 %v11434_v56  ;;  %6431 = vmatprep.subr.bf16.mxu0 %v11299_v16  ;;  %v403_v34 = vld [vmem:[%s16177_s1 + $0xb18] sm:$0xff]  ;;  %v11395_v19 = vcombine.high %v275_v32, %v279_v11  ;;  %v11394_v51 = vcombine.low %v275_v32, %v279_v11 }
 0x2ef   :  { %6472 = vmatprep.subr.bf16.mxu1 %v11427_v57  ;;  %v407_v36 = vld [vmem:[%s16177_s1 + $0xb38] sm:$0xff] }
 0x2f0   :  { %v11523_v45 = vcombine.high %v403_v34, %v407_v36  ;;  %v267_v18 = vld [vmem:[%s16177_s1 + $0x6d8] sm:$0xff]  ;;  %v11522_v7 = vcombine.low %v403_v34, %v407_v36 }
 0x2f1   :  { %6432 = vmatpush1.bf16.msra.mxu0 %v11298_v3  ;;  %v271_v46 = vld [vmem:[%s16177_s1 + $0x6f8] sm:$0xff] }
 0x2f2   :  { %6473 = vmatpush1.bf16.msra.mxu1 %v11426_v59  ;;  %6433 = vmatprep.subr.bf16.mxu0 %v11419_v5  ;;  %v395_v58 = vld [vmem:[%s16177_s1 + $0xad8] sm:$0xff]  ;;  %v11387_v56 = vcombine.high %v267_v18, %v271_v46  ;;  %v11386_v2 = vcombine.low %v267_v18, %v271_v46 }
 0x2f3   :  { %6474 = vmatprep.subr.bf16.mxu1 %v11547_v41  ;;  %v399_v50 = vld [vmem:[%s16177_s1 + $0xaf8] sm:$0xff] }
 0x2f4   :  { %v11515_v16 = vcombine.high %v395_v58, %v399_v50  ;;  %v259_v57 = vld [vmem:[%s16177_s1 + $0x698] sm:$0xff]  ;;  %v11514_v3 = vcombine.low %v395_v58, %v399_v50 }
 0x2f5   :  { %6434 = vmatpush2.bf16.msra.mxu0 %v11418_v15  ;;  %v263_v60 = vld [vmem:[%s16177_s1 + $0x6b8] sm:$0xff] }
 0x2f6   :  { %6475 = vmatpush2.bf16.msra.mxu1 %v11546_v53  ;;  %6435 = vmatprep.subr.bf16.mxu0 %v11411_v22  ;;  %v387_v61 = vld [vmem:[%s16177_s1 + $0xa98] sm:$0xff]  ;;  %v11379_v59 = vcombine.high %v259_v57, %v263_v60  ;;  %v11378_v52 = vcombine.low %v259_v57, %v263_v60 }
 0x2f7   :  { %6476 = vmatprep.subr.bf16.mxu1 %v11539_v24  ;;  %v391_v0 = vld [vmem:[%s16177_s1 + $0xab8] sm:$0xff] }
 0x2f8   :  { %v11507_v5 = vcombine.high %v387_v61, %v391_v0  ;;  %v251_v41 = vld [vmem:[%s16177_s1 + $0x658] sm:$0xff]  ;;  %v11506_v15 = vcombine.low %v387_v61, %v391_v0 }
 0x2f9   :  { %6436 = vmatpush2.bf16.msra.mxu0 %v11410_v42  ;;  %v255_v6 = vld [vmem:[%s16177_s1 + $0x678] sm:$0xff] }
 0x2fa   :  { %6477 = vmatpush2.bf16.msra.mxu1 %v11538_v1  ;;  %6437 = vmatprep.subr.bf16.mxu0 %v11403_v30  ;;  %v379_v10 = vld [vmem:[%s16177_s1 + $0xa58] sm:$0xff]  ;;  %v11371_v53 = vcombine.high %v251_v41, %v255_v6  ;;  %v11370_v28 = vcombine.low %v251_v41, %v255_v6 }
 0x2fb   :  { %6478 = vmatprep.subr.bf16.mxu1 %v11531_v31  ;;  %v383_v27 = vld [vmem:[%s16177_s1 + $0xa78] sm:$0xff] }
 0x2fc   :  { %v11499_v22 = vcombine.high %v379_v10, %v383_v27  ;;  %v243_v24 = vld [vmem:[%s16177_s1 + $0x618] sm:$0xff]  ;;  %v11498_v42 = vcombine.low %v379_v10, %v383_v27 }
 0x2fd   :  { %6438 = vmatpush2.bf16.msra.mxu0 %v11402_v37  ;;  %v247_v38 = vld [vmem:[%s16177_s1 + $0x638] sm:$0xff] }
 0x2fe   :  { %6479 = vmatpush2.bf16.msra.mxu1 %v11530_v43  ;;  %6439 = vmatprep.subr.bf16.mxu0 %v11395_v19  ;;  %v371_v54 = vld [vmem:[%s16177_s1 + $0xa18] sm:$0xff]  ;;  %v11363_v1 = vcombine.high %v243_v24, %v247_v38  ;;  %v11362_v36 = vcombine.low %v243_v24, %v247_v38 }
 0x2ff   :  { %6480 = vmatprep.subr.bf16.mxu1 %v11523_v45  ;;  %v375_v26 = vld [vmem:[%s16177_s1 + $0xa38] sm:$0xff] }
 0x300   :  { %v11491_v30 = vcombine.high %v371_v54, %v375_v26  ;;  %v491_v31 = vld [vmem:[%s16177_s1 + $0xdd8] sm:$0xff]  ;;  %v11490_v37 = vcombine.low %v371_v54, %v375_v26 }
 0x301   :  { %6440 = vmatpush2.bf16.msra.mxu0 %v11394_v51  ;;  %v495_v32 = vld [vmem:[%s16177_s1 + $0xdf8] sm:$0xff] }
 0x302   :  { %6481 = vmatpush2.bf16.msra.mxu1 %v11522_v7  ;;  %6441 = vmatprep.subr.bf16.mxu0 %v11387_v56  ;;  %v619_v11 = vld [vmem:[%s16177_s1 + $0x11d8] sm:$0xff]  ;;  %v11611_v43 = vcombine.high %v491_v31, %v495_v32  ;;  %v11610_v50 = vcombine.low %v491_v31, %v495_v32 }
 0x303   :  { %6482 = vmatprep.subr.bf16.mxu1 %v11515_v16  ;;  %v623_v34 = vld [vmem:[%s16177_s1 + $0x11f8] sm:$0xff] }
 0x304   :  { %v11739_v19 = vcombine.high %v619_v11, %v623_v34  ;;  %v483_v45 = vld [vmem:[%s16177_s1 + $0xd98] sm:$0xff]  ;;  %v11738_v51 = vcombine.low %v619_v11, %v623_v34 }
 0x305   :  { %6442 = vmatpush2.bf16.msra.mxu0 %v11386_v2  ;;  %v487_v18 = vld [vmem:[%s16177_s1 + $0xdb8] sm:$0xff] }
 0x306   :  { %6483 = vmatpush2.bf16.msra.mxu1 %v11514_v3  ;;  %6443 = vmatprep.subr.bf16.mxu0 %v11379_v59  ;;  %v611_v46 = vld [vmem:[%s16177_s1 + $0x1198] sm:$0xff]  ;;  %v11603_v7 = vcombine.high %v483_v45, %v487_v18  ;;  %v11602_v59 = vcombine.low %v483_v45, %v487_v18 }
 0x307   :  { %6484 = vmatprep.subr.bf16.mxu1 %v11507_v5  ;;  %v615_v58 = vld [vmem:[%s16177_s1 + $0x11b8] sm:$0xff] }
 0x308   :  { %v11731_v56 = vcombine.high %v611_v46, %v615_v58  ;;  %v475_v16 = vld [vmem:[%s16177_s1 + $0xd58] sm:$0xff]  ;;  %v11730_v41 = vcombine.low %v611_v46, %v615_v58 }
 0x309   :  { %6444 = vmatpush2.bf16.msra.mxu0 %v11378_v52  ;;  %v479_v57 = vld [vmem:[%s16177_s1 + $0xd78] sm:$0xff] }
 0x30a   :  { %6485 = vmatpush2.bf16.msra.mxu1 %v11506_v15  ;;  %6445 = vmatprep.subr.bf16.mxu0 %v11371_v53  ;;  %v603_v61 = vld [vmem:[%s16177_s1 + $0x1158] sm:$0xff]  ;;  %v11594_v38 = vcombine.low %v475_v16, %v479_v57 }
 0x30b   :  { %6486 = vmatprep.subr.bf16.mxu1 %v11499_v22  ;;  %v607_v0 = vld [vmem:[%s16177_s1 + $0x1178] sm:$0xff] }
 0x30c   :  { %v11723_v52 = vcombine.high %v603_v61, %v607_v0  ;;  %v595_v53 = vld [vmem:[%s16177_s1 + $0x1118] sm:$0xff] }
 0x30d   :  { %6446 = vmatpush2.bf16.msra.mxu0 %v11370_v28  ;;  %v591_v31 = vld [vmem:[%s16177_s1 + $0x10f8] sm:$0xff] }
 0x30e   :  { %6487 = vmatpush2.bf16.msra.mxu1 %v11498_v42  ;;  %6447 = vmatprep.subr.bf16.mxu0 %v11363_v1  ;;  %v459_v1 = vld [vmem:[%s16177_s1 + $0xcd8] sm:$0xff] }
 0x30f   :  { %6488 = vmatprep.subr.bf16.mxu1 %v11491_v30  ;;  %v587_v30 = vld [vmem:[%s16177_s1 + $0x10d8] sm:$0xff] }
 0x310   :  { %v583_v45 = vld [vmem:[%s16177_s1 + $0x10b8] sm:$0xff]  ;;  %v11706_v46 = vcombine.low %v587_v30, %v591_v31 }
 0x311   :  { %6448 = vmatpush2.bf16.msra.mxu0 %v11362_v36  ;;  %v11707_v36 = vcombine.high %v587_v30, %v591_v31  ;;  %v539_v31 = vld [vmem:[%s16177_s1 + $0xf58] sm:$0xff] }
 0x312   :  { %6489 = vmatpush2.bf16.msra.mxu1 %v11490_v37  ;;  %6499 = vmatprep.subr.bf16.mxu0 %v11611_v43  ;;  %v451_v37 = vld [vmem:[%s16177_s1 + $0xc98] sm:$0xff] }
 0x313   :  { %6540 = vmatprep.subr.bf16.mxu1 %v11739_v19  ;;  %v455_v43 = vld [vmem:[%s16177_s1 + $0xcb8] sm:$0xff] }
 0x314   :  { %v6205_v60 = vpop.f32.mrf.mxu0  ;;  %6450 = vmatmul.mubr.bf16.vlgmr.msra.gmra.mxu0 %v13125_v20  ;;  %v11595_v20 = vcombine.high %v475_v16, %v479_v57  ;;  %v579_v19 = vld [vmem:[%s16177_s1 + $0x1098] sm:$0xff]  ;;  %v11571_v58 = vcombine.high %v451_v37, %v455_v43  ;;  %v11570_v57 = vcombine.low %v451_v37, %v455_v43 }
 0x315   :  { %v6206_v2 = vadd.f32 %v6205_v60, %v15234_v48  ;;  %v6246_v3 = vpop.f32.mrf.mxu1  ;;  %6491 = vmatmul.mubr.bf16.vlgmr.msra.gmra.mxu1 %v13343_v39  ;;  %6500 = vmatpush1.bf16.msra.mxu0 %v11610_v50  ;;  %v467_v48 = vld [vmem:[%s16177_s1 + $0xd18] sm:$0xff]  ;;  %v11699_v50 = vcombine.high %v579_v19, %v583_v45  ;;  %v11698_v60 = vcombine.low %v579_v19, %v583_v45 }
 0x316   :  { %6541 = vmatpush1.bf16.msra.mxu1 %v11738_v51  ;;  %v6207_v5 = vpop.f32.mrf.mxu0  ;;  %6501 = vmatprep.subr.bf16.mxu0 %v11603_v7  ;;  %v471_v39 = vld [vmem:[%s16177_s1 + $0xd38] sm:$0xff] }
 0x317   :  { %v15435_v6 = vadd.f32 %v6246_v3, %v6206_v2  ;;  %v6208_v10 = vadd.f32 %v6207_v5, %v15250_v63  ;;  %v6248_v27 = vpop.f32.mrf.mxu1  ;;  %6542 = vmatprep.subr.bf16.mxu1 %v11731_v56  ;;  %6531 = vmatprep.mubr.bf16.mxu0 %v13151_v29  ;;  %v599_v63 = vld [vmem:[%s16177_s1 + $0x1138] sm:$0xff]  ;;  %v11722_v29 = vcombine.low %v603_v61, %v607_v0 }
 0x318   :  { %v6209_v15 = vpop.f32.mrf.mxu0  ;;  %6572 = vmatprep.mubr.bf16.mxu1 %v13365_v47  ;;  %v11587_v26 = vcombine.high %v467_v48, %v471_v39  ;;  %v11715_v42 = vcombine.high %v595_v53, %v599_v63  ;;  %v463_v47 = vld [vmem:[%s16177_s1 + $0xcf8] sm:$0xff]  ;;  %v11586_v32 = vcombine.low %v467_v48, %v471_v39  ;;  %v11714_v11 = vcombine.low %v595_v53, %v599_v63 }
 0x319   :  { %v15452_v22 = vadd.f32 %v6248_v27, %v6208_v10  ;;  %v6250_v24 = vpop.f32.mrf.mxu1  ;;  %6502 = vmatpush1.bf16.msra.mxu0 %v11602_v59  ;;  %v11579_v34 = vcombine.high %v459_v1, %v463_v47  ;;  %v11578_v18 = vcombine.low %v459_v1, %v463_v47  ;;  %v443_v51 = vld [vmem:[%s16177_s1 + $0xc58] sm:$0xff] }
 0x31a   :  { %6543 = vmatpush1.bf16.msra.mxu1 %v11730_v41  ;;  %v6210_v54 = vpop.f32.mrf.mxu0  ;;  %6503 = vmatprep.subr.bf16.mxu0 %v11595_v20  ;;  %v447_v7 = vld [vmem:[%s16177_s1 + $0xc78] sm:$0xff] }
 0x31b   :  { %v6251_v28 = vpop.f32.mrf.mxu1  ;;  %6544 = vmatprep.subr.bf16.mxu1 %v11723_v52  ;;  %v571_v56 = vld [vmem:[%s16177_s1 + $0x1058] sm:$0xff]  ;;  %v11563_v61 = vcombine.high %v443_v51, %v447_v7  ;;  %v11562_v41 = vcombine.low %v443_v51, %v447_v7 }
 0x31c   :  { %v575_v16 = vld [vmem:[%s16177_s1 + $0x1078] sm:$0xff] }
 0x31d   :  { %6504 = vmatpush1.bf16.msra.mxu0 %v11594_v38  ;;  %v11691_v0 = vcombine.high %v571_v56, %v575_v16  ;;  %v435_v2 = vld [vmem:[%s16177_s1 + $0xc18] sm:$0xff]  ;;  %v11690_v20 = vcombine.low %v571_v56, %v575_v16 }
 0x31e   :  { %6545 = vmatpush1.bf16.msra.mxu1 %v11722_v29  ;;  %6505 = vmatprep.subr.bf16.mxu0 %v11587_v26  ;;  %v439_v3 = vld [vmem:[%s16177_s1 + $0xc38] sm:$0xff] }
 0x31f   :  { %6546 = vmatprep.subr.bf16.mxu1 %v11715_v42  ;;  %v563_v59 = vld [vmem:[%s16177_s1 + $0x1018] sm:$0xff]  ;;  %v11555_v10 = vcombine.high %v435_v2, %v439_v3  ;;  %v11554_v53 = vcombine.low %v435_v2, %v439_v3 }
 0x320   :  { %v567_v5 = vld [vmem:[%s16177_s1 + $0x1038] sm:$0xff] }
 0x321   :  { %6506 = vmatpush1.bf16.msra.mxu0 %v11586_v32  ;;  %v11683_v27 = vcombine.high %v563_v59, %v567_v5  ;;  %v555_v52 = vld [vmem:[%s16177_s1 + $0xfd8] sm:$0xff]  ;;  %v11682_v63 = vcombine.low %v563_v59, %v567_v5 }
 0x322   :  { %6547 = vmatpush1.bf16.msra.mxu1 %v11714_v11  ;;  %6507 = vmatprep.subr.bf16.mxu0 %v11579_v34  ;;  %v559_v48 = vld [vmem:[%s16177_s1 + $0xff8] sm:$0xff] }
 0x323   :  { %6548 = vmatprep.subr.bf16.mxu1 %v11707_v36  ;;  %v683_v39 = vld [vmem:[%s16177_s1 + $0x13d8] sm:$0xff]  ;;  %v11675_v24 = vcombine.high %v555_v52, %v559_v48  ;;  %v11674_v42 = vcombine.low %v555_v52, %v559_v48 }
 0x324   :  { %v687_v15 = vld [vmem:[%s16177_s1 + $0x13f8] sm:$0xff] }
 0x325   :  { %6508 = vmatpush1.bf16.msra.mxu0 %v11578_v18  ;;  %v11803_v38 = vcombine.high %v683_v39, %v687_v15  ;;  %v547_v54 = vld [vmem:[%s16177_s1 + $0xf98] sm:$0xff]  ;;  %v11802_v1 = vcombine.low %v683_v39, %v687_v15 }
 0x326   :  { %6549 = vmatpush1.bf16.msra.mxu1 %v11706_v46  ;;  %6509 = vmatprep.subr.bf16.mxu0 %v11571_v58  ;;  %v551_v29 = vld [vmem:[%s16177_s1 + $0xfb8] sm:$0xff] }
 0x327   :  { %6550 = vmatprep.subr.bf16.mxu1 %v11699_v50  ;;  %v675_v26 = vld [vmem:[%s16177_s1 + $0x1398] sm:$0xff]  ;;  %v11667_v47 = vcombine.high %v547_v54, %v551_v29  ;;  %v11666_v36 = vcombine.low %v547_v54, %v551_v29 }
 0x328   :  { %v679_v28 = vld [vmem:[%s16177_s1 + $0x13b8] sm:$0xff] }
 0x329   :  { %6510 = vmatpush1.bf16.msra.mxu0 %v11570_v57  ;;  %v11795_v30 = vcombine.high %v675_v26, %v679_v28  ;;  %v543_v32 = vld [vmem:[%s16177_s1 + $0xf78] sm:$0xff]  ;;  %v11794_v37 = vcombine.low %v675_v26, %v679_v28 }
 0x32a   :  { %6551 = vmatpush1.bf16.msra.mxu1 %v11698_v60  ;;  %6511 = vmatprep.subr.bf16.mxu0 %v11563_v61  ;;  %v667_v11 = vld [vmem:[%s16177_s1 + $0x1358] sm:$0xff]  ;;  %v11659_v43 = vcombine.high %v539_v31, %v543_v32  ;;  %v11658_v50 = vcombine.low %v539_v31, %v543_v32 }
 0x32b   :  { %6552 = vmatprep.subr.bf16.mxu1 %v11691_v0  ;;  %v671_v34 = vld [vmem:[%s16177_s1 + $0x1378] sm:$0xff] }
 0x32c   :  { %v11787_v19 = vcombine.high %v667_v11, %v671_v34  ;;  %v531_v45 = vld [vmem:[%s16177_s1 + $0xf18] sm:$0xff]  ;;  %v11786_v51 = vcombine.low %v667_v11, %v671_v34 }
 0x32d   :  { %6512 = vmatpush1.bf16.msra.mxu0 %v11562_v41  ;;  %v535_v18 = vld [vmem:[%s16177_s1 + $0xf38] sm:$0xff] }
 0x32e   :  { %6553 = vmatpush1.bf16.msra.mxu1 %v11690_v20  ;;  %6513 = vmatprep.subr.bf16.mxu0 %v11555_v10  ;;  %v659_v46 = vld [vmem:[%s16177_s1 + $0x1318] sm:$0xff]  ;;  %v11651_v7 = vcombine.high %v531_v45, %v535_v18  ;;  %v11650_v0 = vcombine.low %v531_v45, %v535_v18 }
 0x32f   :  { %6554 = vmatprep.subr.bf16.mxu1 %v11683_v27  ;;  %v663_v58 = vld [vmem:[%s16177_s1 + $0x1338] sm:$0xff] }
 0x330   :  { %v11779_v56 = vcombine.high %v659_v46, %v663_v58  ;;  %v523_v16 = vld [vmem:[%s16177_s1 + $0xed8] sm:$0xff]  ;;  %v11778_v2 = vcombine.low %v659_v46, %v663_v58 }
 0x331   :  { %6514 = vmatpush1.bf16.msra.mxu0 %v11554_v53  ;;  %v527_v57 = vld [vmem:[%s16177_s1 + $0xef8] sm:$0xff] }
 0x332   :  { %6555 = vmatpush1.bf16.msra.mxu1 %v11682_v63  ;;  %6515 = vmatprep.subr.bf16.mxu0 %v11675_v24  ;;  %v651_v60 = vld [vmem:[%s16177_s1 + $0x12d8] sm:$0xff]  ;;  %v11643_v3 = vcombine.high %v523_v16, %v527_v57  ;;  %v11642_v27 = vcombine.low %v523_v16, %v527_v57 }
 0x333   :  { %6556 = vmatprep.subr.bf16.mxu1 %v11803_v38  ;;  %v655_v61 = vld [vmem:[%s16177_s1 + $0x12f8] sm:$0xff] }
 0x334   :  { %v11771_v59 = vcombine.high %v651_v60, %v655_v61  ;;  %v515_v5 = vld [vmem:[%s16177_s1 + $0xe98] sm:$0xff]  ;;  %v11770_v52 = vcombine.low %v651_v60, %v655_v61 }
 0x335   :  { %6516 = vmatpush2.bf16.msra.mxu0 %v11674_v42  ;;  %v519_v41 = vld [vmem:[%s16177_s1 + $0xeb8] sm:$0xff] }
 0x336   :  { %6557 = vmatpush2.bf16.msra.mxu1 %v11802_v1  ;;  %6517 = vmatprep.subr.bf16.mxu0 %v11667_v47  ;;  %v643_v20 = vld [vmem:[%s16177_s1 + $0x1298] sm:$0xff]  ;;  %v11635_v48 = vcombine.high %v515_v5, %v519_v41  ;;  %v11634_v38 = vcombine.low %v515_v5, %v519_v41 }
 0x337   :  { %6558 = vmatprep.subr.bf16.mxu1 %v11795_v30  ;;  %v647_v10 = vld [vmem:[%s16177_s1 + $0x12b8] sm:$0xff] }
 0x338   :  { %v11763_v39 = vcombine.high %v643_v20, %v647_v10  ;;  %v507_v15 = vld [vmem:[%s16177_s1 + $0xe58] sm:$0xff]  ;;  %v11762_v54 = vcombine.low %v643_v20, %v647_v10 }
 0x339   :  { %6518 = vmatpush2.bf16.msra.mxu0 %v11666_v36  ;;  %v511_v53 = vld [vmem:[%s16177_s1 + $0xe78] sm:$0xff] }
 0x33a   :  { %6559 = vmatpush2.bf16.msra.mxu1 %v11794_v37  ;;  %6519 = vmatprep.subr.bf16.mxu0 %v11659_v43  ;;  %v635_v63 = vld [vmem:[%s16177_s1 + $0x1258] sm:$0xff]  ;;  %v11627_v29 = vcombine.high %v507_v15, %v511_v53  ;;  %v11626_v30 = vcombine.low %v507_v15, %v511_v53 }
 0x33b   :  { %6560 = vmatprep.subr.bf16.mxu1 %v11787_v19  ;;  %v639_v24 = vld [vmem:[%s16177_s1 + $0x1278] sm:$0xff] }
 0x33c   :  { %v11755_v26 = vcombine.high %v635_v63, %v639_v24  ;;  %v499_v28 = vld [vmem:[%s16177_s1 + $0xe18] sm:$0xff]  ;;  %v11754_v31 = vcombine.low %v635_v63, %v639_v24 }
 0x33d   :  { %6520 = vmatpush2.bf16.msra.mxu0 %v11658_v50  ;;  %v503_v42 = vld [vmem:[%s16177_s1 + $0xe38] sm:$0xff] }
 0x33e   :  { %6561 = vmatpush2.bf16.msra.mxu1 %v11786_v51  ;;  %6521 = vmatprep.subr.bf16.mxu0 %v11651_v7  ;;  %v627_v1 = vld [vmem:[%s16177_s1 + $0x1218] sm:$0xff]  ;;  %v11619_v32 = vcombine.high %v499_v28, %v503_v42  ;;  %v11618_v19 = vcombine.low %v499_v28, %v503_v42 }
 0x33f   :  { %6562 = vmatprep.subr.bf16.mxu1 %v11779_v56  ;;  %v631_v47 = vld [vmem:[%s16177_s1 + $0x1238] sm:$0xff] }
 0x340   :  { %v11747_v11 = vcombine.high %v627_v1, %v631_v47  ;;  %v747_v34 = vld [vmem:[%s16177_s1 + $0x15d8] sm:$0xff]  ;;  %v11746_v45 = vcombine.low %v627_v1, %v631_v47 }
 0x341   :  { %6522 = vmatpush2.bf16.msra.mxu0 %v11650_v0  ;;  %v751_v36 = vld [vmem:[%s16177_s1 + $0x15f8] sm:$0xff] }
 0x342   :  { %6563 = vmatpush2.bf16.msra.mxu1 %v11778_v2  ;;  %6523 = vmatprep.subr.bf16.mxu0 %v11643_v3  ;;  %v875_v37 = vld [vmem:[%s16177_s1 + $0x19d8] sm:$0xff]  ;;  %v11867_v18 = vcombine.high %v747_v34, %v751_v36  ;;  %v11866_v56 = vcombine.low %v747_v34, %v751_v36 }
 0x343   :  { %6564 = vmatprep.subr.bf16.mxu1 %v11771_v59  ;;  %v879_v43 = vld [vmem:[%s16177_s1 + $0x19f8] sm:$0xff] }
 0x344   :  { %v11995_v46 = vcombine.high %v875_v37, %v879_v43  ;;  %v739_v58 = vld [vmem:[%s16177_s1 + $0x1598] sm:$0xff]  ;;  %v11994_v16 = vcombine.low %v875_v37, %v879_v43 }
 0x345   :  { %6524 = vmatpush2.bf16.msra.mxu0 %v11642_v27  ;;  %v743_v50 = vld [vmem:[%s16177_s1 + $0x15b8] sm:$0xff] }
 0x346   :  { %6565 = vmatpush2.bf16.msra.mxu1 %v11770_v52  ;;  %6525 = vmatprep.subr.bf16.mxu0 %v11635_v48  ;;  %v867_v51 = vld [vmem:[%s16177_s1 + $0x1998] sm:$0xff]  ;;  %v11859_v57 = vcombine.high %v739_v58, %v743_v50  ;;  %v11858_v20 = vcombine.low %v739_v58, %v743_v50 }
 0x347   :  { %6566 = vmatprep.subr.bf16.mxu1 %v11763_v39  ;;  %v871_v7 = vld [vmem:[%s16177_s1 + $0x19b8] sm:$0xff] }
 0x348   :  { %v11987_v60 = vcombine.high %v867_v51, %v871_v7  ;;  %v731_v61 = vld [vmem:[%s16177_s1 + $0x1558] sm:$0xff]  ;;  %v11986_v27 = vcombine.low %v867_v51, %v871_v7 }
 0x349   :  { %6526 = vmatpush2.bf16.msra.mxu0 %v11634_v38  ;;  %v735_v0 = vld [vmem:[%s16177_s1 + $0x1578] sm:$0xff] }
 0x34a   :  { %6567 = vmatpush2.bf16.msra.mxu1 %v11762_v54  ;;  %6527 = vmatprep.subr.bf16.mxu0 %v11627_v29  ;;  %v859_v3 = vld [vmem:[%s16177_s1 + $0x1958] sm:$0xff]  ;;  %v11850_v54 = vcombine.low %v731_v61, %v735_v0 }
 0x34b   :  { %6568 = vmatprep.subr.bf16.mxu1 %v11755_v26  ;;  %v863_v59 = vld [vmem:[%s16177_s1 + $0x1978] sm:$0xff] }
 0x34c   :  { %v11979_v15 = vcombine.high %v859_v3, %v863_v59  ;;  %v851_v63 = vld [vmem:[%s16177_s1 + $0x1918] sm:$0xff] }
 0x34d   :  { %6528 = vmatpush2.bf16.msra.mxu0 %v11626_v30  ;;  %v715_v1 = vld [vmem:[%s16177_s1 + $0x14d8] sm:$0xff] }
 0x34e   :  { %6569 = vmatpush2.bf16.msra.mxu1 %v11754_v31  ;;  %6529 = vmatprep.subr.bf16.mxu0 %v11619_v32  ;;  %v843_v47 = vld [vmem:[%s16177_s1 + $0x18d8] sm:$0xff] }
 0x34f   :  { %6570 = vmatprep.subr.bf16.mxu1 %v11747_v11  ;;  %v847_v30 = vld [vmem:[%s16177_s1 + $0x18f8] sm:$0xff] }
 0x350   :  { %v11963_v34 = vcombine.high %v843_v47, %v847_v30  ;;  %v707_v36 = vld [vmem:[%s16177_s1 + $0x1498] sm:$0xff] }
 0x351   :  { %6530 = vmatpush2.bf16.msra.mxu0 %v11618_v19  ;;  %v711_v37 = vld [vmem:[%s16177_s1 + $0x14b8] sm:$0xff] }
 0x352   :  { %6571 = vmatpush2.bf16.msra.mxu1 %v11746_v45  ;;  %6581 = vmatprep.subr.bf16.mxu0 %v11867_v18  ;;  %v835_v43 = vld [vmem:[%s16177_s1 + $0x1898] sm:$0xff]  ;;  %v11962_v18 = vcombine.low %v843_v47, %v847_v30 }
 0x353   :  { %6622 = vmatprep.subr.bf16.mxu1 %v11995_v46  ;;  %v839_v19 = vld [vmem:[%s16177_s1 + $0x18b8] sm:$0xff]  ;;  %v11827_v46 = vcombine.high %v707_v36, %v711_v37 }
 0x354   :  { %v6287_v2 = vpop.f32.mrf.mxu0  ;;  %6532 = vmatmul.mubr.bf16.vlgmr.msra.gmra.mxu0 %v13347_v40  ;;  %v11851_v40 = vcombine.high %v731_v61, %v735_v0  ;;  %v11955_v58 = vcombine.high %v835_v43, %v839_v19  ;;  %v699_v50 = vld [vmem:[%s16177_s1 + $0x1458] sm:$0xff] }
 0x355   :  { %v6288_v5 = vadd.f32 %v6287_v2, %v15435_v6  ;;  %v6328_v41 = vpop.f32.mrf.mxu1  ;;  %6573 = vmatmul.mubr.bf16.vlgmr.msra.gmra.mxu1 %v13554_v4  ;;  %6582 = vmatpush1.bf16.msra.mxu0 %v11866_v56  ;;  %v723_v6 = vld [vmem:[%s16177_s1 + $0x1518] sm:$0xff] }
 0x356   :  { %6623 = vmatpush1.bf16.msra.mxu1 %v11994_v16  ;;  %v6289_v10 = vpop.f32.mrf.mxu0  ;;  %6583 = vmatprep.subr.bf16.mxu0 %v11859_v57  ;;  %v727_v4 = vld [vmem:[%s16177_s1 + $0x1538] sm:$0xff]  ;;  %v11826_v16 = vcombine.low %v707_v36, %v711_v37  ;;  %v11954_v57 = vcombine.low %v835_v43, %v839_v19 }
 0x357   :  { %v15637_v52 = vadd.f32 %v6328_v41, %v6288_v5  ;;  %v6290_v48 = vadd.f32 %v6289_v10, %v15452_v22  ;;  %v6330_v39 = vpop.f32.mrf.mxu1  ;;  %6624 = vmatprep.subr.bf16.mxu1 %v11987_v60  ;;  %6613 = vmatprep.mubr.bf16.mxu0 %v13373_v49  ;;  %v855_v22 = vld [vmem:[%s16177_s1 + $0x1938] sm:$0xff]  ;;  %v11978_v49 = vcombine.low %v859_v3, %v863_v59 }
 0x358   :  { %v6291_v53 = vpop.f32.mrf.mxu0  ;;  %6654 = vmatprep.mubr.bf16.mxu1 %v13579_v14  ;;  %v11843_v26 = vcombine.high %v723_v6, %v727_v4  ;;  %v11971_v42 = vcombine.high %v851_v63, %v855_v22  ;;  %v719_v14 = vld [vmem:[%s16177_s1 + $0x14f8] sm:$0xff]  ;;  %v11842_v31 = vcombine.low %v723_v6, %v727_v4  ;;  %v11970_v32 = vcombine.low %v851_v63, %v855_v22 }
 0x359   :  { %v15654_v24 = vadd.f32 %v6330_v39, %v6290_v48  ;;  %v6332_v38 = vpop.f32.mrf.mxu1  ;;  %6584 = vmatpush1.bf16.msra.mxu0 %v11858_v20  ;;  %v11835_v11 = vcombine.high %v715_v1, %v719_v14  ;;  %v11834_v45 = vcombine.low %v715_v1, %v719_v14  ;;  %v703_v51 = vld [vmem:[%s16177_s1 + $0x1478] sm:$0xff] }
 0x35a   :  { %6625 = vmatpush1.bf16.msra.mxu1 %v11986_v27  ;;  %v6292_v29 = vpop.f32.mrf.mxu0  ;;  %6585 = vmatprep.subr.bf16.mxu0 %v11851_v40  ;;  %v827_v7 = vld [vmem:[%s16177_s1 + $0x1858] sm:$0xff]  ;;  %v11819_v60 = vcombine.high %v699_v50, %v703_v51  ;;  %v11818_v5 = vcombine.low %v699_v50, %v703_v51 }
 0x35b   :  { %v6333_v28 = vpop.f32.mrf.mxu1  ;;  %6626 = vmatprep.subr.bf16.mxu1 %v11979_v15  ;;  %v831_v56 = vld [vmem:[%s16177_s1 + $0x1878] sm:$0xff] }
 0x35c   :  { %v11947_v61 = vcombine.high %v827_v7, %v831_v56  ;;  %v691_v0 = vld [vmem:[%s16177_s1 + $0x1418] sm:$0xff]  ;;  %v11946_v41 = vcombine.low %v827_v7, %v831_v56 }
 0x35d   :  { %6586 = vmatpush1.bf16.msra.mxu0 %v11850_v54  ;;  %v695_v2 = vld [vmem:[%s16177_s1 + $0x1438] sm:$0xff] }
 0x35e   :  { %6627 = vmatpush1.bf16.msra.mxu1 %v11978_v49  ;;  %6587 = vmatprep.subr.bf16.mxu0 %v11843_v26  ;;  %v819_v3 = vld [vmem:[%s16177_s1 + $0x1818] sm:$0xff]  ;;  %v11811_v20 = vcombine.high %v691_v0, %v695_v2  ;;  %v11810_v15 = vcombine.low %v691_v0, %v695_v2 }
 0x35f   :  { %6628 = vmatprep.subr.bf16.mxu1 %v11971_v42  ;;  %v823_v59 = vld [vmem:[%s16177_s1 + $0x1838] sm:$0xff] }
 0x360   :  { %v11939_v10 = vcombine.high %v819_v3, %v823_v59  ;;  %v811_v27 = vld [vmem:[%s16177_s1 + $0x17d8] sm:$0xff]  ;;  %v11938_v6 = vcombine.low %v819_v3, %v823_v59 }
 0x361   :  { %6588 = vmatpush1.bf16.msra.mxu0 %v11842_v31  ;;  %v815_v40 = vld [vmem:[%s16177_s1 + $0x17f8] sm:$0xff] }
 0x362   :  { %6629 = vmatpush1.bf16.msra.mxu1 %v11970_v32  ;;  %6589 = vmatprep.subr.bf16.mxu0 %v11835_v11  ;;  %v939_v48 = vld [vmem:[%s16177_s1 + $0x1bd8] sm:$0xff]  ;;  %v11931_v4 = vcombine.high %v811_v27, %v815_v40  ;;  %v11930_v29 = vcombine.low %v811_v27, %v815_v40 }
 0x363   :  { %6630 = vmatprep.subr.bf16.mxu1 %v11963_v34  ;;  %v943_v39 = vld [vmem:[%s16177_s1 + $0x1bf8] sm:$0xff] }
 0x364   :  { %v12059_v53 = vcombine.high %v939_v48, %v943_v39  ;;  %v803_v63 = vld [vmem:[%s16177_s1 + $0x1798] sm:$0xff]  ;;  %v12058_v49 = vcombine.low %v939_v48, %v943_v39 }
 0x365   :  { %6590 = vmatpush1.bf16.msra.mxu0 %v11834_v45  ;;  %v807_v22 = vld [vmem:[%s16177_s1 + $0x17b8] sm:$0xff] }
 0x366   :  { %6631 = vmatpush1.bf16.msra.mxu1 %v11962_v18  ;;  %6591 = vmatprep.subr.bf16.mxu0 %v11827_v46  ;;  %v931_v38 = vld [vmem:[%s16177_s1 + $0x1b98] sm:$0xff]  ;;  %v11923_v26 = vcombine.high %v803_v63, %v807_v22  ;;  %v11922_v30 = vcombine.low %v803_v63, %v807_v22 }
 0x367   :  { %6632 = vmatprep.subr.bf16.mxu1 %v11955_v58  ;;  %v935_v54 = vld [vmem:[%s16177_s1 + $0x1bb8] sm:$0xff] }
 0x368   :  { %v12051_v28 = vcombine.high %v931_v38, %v935_v54  ;;  %v795_v42 = vld [vmem:[%s16177_s1 + $0x1758] sm:$0xff]  ;;  %v12050_v31 = vcombine.low %v931_v38, %v935_v54 }
 0x369   :  { %6592 = vmatpush1.bf16.msra.mxu0 %v11826_v16  ;;  %v799_v1 = vld [vmem:[%s16177_s1 + $0x1778] sm:$0xff] }
 0x36a   :  { %6633 = vmatpush1.bf16.msra.mxu1 %v11954_v57  ;;  %6593 = vmatprep.subr.bf16.mxu0 %v11819_v60  ;;  %v923_v14 = vld [vmem:[%s16177_s1 + $0x1b58] sm:$0xff]  ;;  %v11915_v32 = vcombine.high %v795_v42, %v799_v1  ;;  %v11914_v19 = vcombine.low %v795_v42, %v799_v1  ;;  %v6739_v42 = vld [vmem:[#allocation2 + $0x1e0] sm:$0xff] }
 0x36b   :  { %6634 = vmatprep.subr.bf16.mxu1 %v11947_v61  ;;  %v927_v47 = vld [vmem:[%s16177_s1 + $0x1b78] sm:$0xff]  ;;  %v6863_v1 = vld [vmem:[#allocation2 + $0x5c0] sm:$0xff] }
 0x36c   :  { %v12043_v11 = vcombine.high %v923_v14, %v927_v47  ;;  %v787_v34 = vld [vmem:[%s16177_s1 + $0x1718] sm:$0xff]  ;;  %v12042_v45 = vcombine.low %v923_v14, %v927_v47  ;;  %v6867_v14 = vld [vmem:[#allocation2 + $0x5e0] sm:$0xff] }
 0x36d   :  { %6594 = vmatpush1.bf16.msra.mxu0 %v11818_v5  ;;  %v791_v36 = vld [vmem:[%s16177_s1 + $0x1738] sm:$0xff] }
 0x36e   :  { %6635 = vmatpush1.bf16.msra.mxu1 %v11946_v41  ;;  %6595 = vmatprep.subr.bf16.mxu0 %v11811_v20  ;;  %v915_v37 = vld [vmem:[%s16177_s1 + $0x1b18] sm:$0xff]  ;;  %v11907_v18 = vcombine.high %v787_v34, %v791_v36  ;;  %v11906_v56 = vcombine.low %v787_v34, %v791_v36  ;;  %v6727_v34 = vld [vmem:[#allocation2 + $0x180] sm:$0xff] }
 0x36f   :  { %6636 = vmatprep.subr.bf16.mxu1 %v11939_v10  ;;  %v919_v43 = vld [vmem:[%s16177_s1 + $0x1b38] sm:$0xff]  ;;  %v6731_v36 = vld [vmem:[#allocation2 + $0x1a0] sm:$0xff] }
 0x370   :  { %v12035_v46 = vcombine.high %v915_v37, %v919_v43  ;;  %v779_v58 = vld [vmem:[%s16177_s1 + $0x16d8] sm:$0xff]  ;;  %v12034_v16 = vcombine.low %v915_v37, %v919_v43  ;;  %v6666_v37 = vmax.f32 %v15041_v33, 0.0 }
 0x371   :  { %6596 = vmatpush1.bf16.msra.mxu0 %v11810_v15  ;;  %v783_v50 = vld [vmem:[%s16177_s1 + $0x16f8] sm:$0xff] }
 0x372   :  { %6637 = vmatpush1.bf16.msra.mxu1 %v11938_v6  ;;  %6597 = vmatprep.subr.bf16.mxu0 %v11931_v4  ;;  %v907_v51 = vld [vmem:[%s16177_s1 + $0x1ad8] sm:$0xff]  ;;  %v11899_v57 = vcombine.high %v779_v58, %v783_v50  ;;  %v11898_v59 = vcombine.low %v779_v58, %v783_v50  ;;  %v6719_v58 = vld [vmem:[#allocation2 + $0x140] sm:$0xff]  ;;  %v15805_v33 = vpack.c.bf16 %v6666_v37, %v6666_v37 }
 0x373   :  { %6638 = vmatprep.subr.bf16.mxu1 %v12059_v53  ;;  %v911_v7 = vld [vmem:[%s16177_s1 + $0x1af8] sm:$0xff]  ;;  %v6723_v50 = vld [vmem:[#allocation2 + $0x160] sm:$0xff] }
 0x374   :  { %v12027_v60 = vcombine.high %v907_v51, %v911_v7  ;;  %v771_v61 = vld [vmem:[%s16177_s1 + $0x1698] sm:$0xff]  ;;  %v12026_v5 = vcombine.low %v907_v51, %v911_v7 }
 0x375   :  { %6598 = vmatpush2.bf16.msra.mxu0 %v11930_v29  ;;  %v775_v0 = vld [vmem:[%s16177_s1 + $0x16b8] sm:$0xff] }
 0x376   :  { %6639 = vmatpush2.bf16.msra.mxu1 %v12058_v49  ;;  %6599 = vmatprep.subr.bf16.mxu0 %v11923_v26  ;;  %v899_v2 = vld [vmem:[%s16177_s1 + $0x1a98] sm:$0xff]  ;;  %v11891_v41 = vcombine.high %v771_v61, %v775_v0  ;;  %v11890_v39 = vcombine.low %v771_v61, %v775_v0  ;;  %v12108_v61 = vcombine.low %v6727_v34, %v6731_v36 }
 0x377   :  { %6640 = vmatprep.subr.bf16.mxu1 %v12051_v28  ;;  %v903_v3 = vld [vmem:[%s16177_s1 + $0x1ab8] sm:$0xff]  ;;  %v6735_v28 = vld [vmem:[#allocation2 + $0x1c0] sm:$0xff] }
 0x378   :  { %v12019_v20 = vcombine.high %v899_v2, %v903_v3  ;;  %v763_v10 = vld [vmem:[%s16177_s1 + $0x1658] sm:$0xff]  ;;  %v12018_v15 = vcombine.low %v899_v2, %v903_v3  ;;  %v12116_v43 = vcombine.low %v6735_v28, %v6739_v42  ;;  %v12101_v2 = vcombine.high %v6719_v58, %v6723_v50 }
 0x379   :  { %6600 = vmatpush2.bf16.msra.mxu0 %v11922_v30  ;;  %v767_v27 = vld [vmem:[%s16177_s1 + $0x1678] sm:$0xff] }
 0x37a   :  { %6641 = vmatpush2.bf16.msra.mxu1 %v12050_v31  ;;  %6601 = vmatprep.subr.bf16.mxu0 %v11915_v32  ;;  %v891_v40 = vld [vmem:[%s16177_s1 + $0x1a58] sm:$0xff]  ;;  %v11883_v6 = vcombine.high %v763_v10, %v767_v27  ;;  %v11882_v54 = vcombine.low %v763_v10, %v767_v27  ;;  %v12117_v31 = vcombine.high %v6735_v28, %v6739_v42  ;;  %v6699_v28 = vld [vmem:[#allocation2 + $0xa0] sm:$0xff] }
 0x37b   :  { %6642 = vmatprep.subr.bf16.mxu1 %v12043_v11  ;;  %v895_v48 = vld [vmem:[%s16177_s1 + $0x1a78] sm:$0xff]  ;;  %v12245_v32 = vcombine.high %v6863_v1, %v6867_v14  ;;  %v6664_v11 = vmax.f32 %v14410_v12, 0.0  ;;  %v12100_v27 = vcombine.low %v6719_v58, %v6723_v50  ;;  %v6823_v42 = vld [vmem:[#allocation2 + $0x480] sm:$0xff] }
 0x37c   :  { %v12011_v4 = vcombine.high %v891_v40, %v895_v48  ;;  %v755_v53 = vld [vmem:[%s16177_s1 + $0x1618] sm:$0xff]  ;;  %v12010_v29 = vcombine.low %v891_v40, %v895_v48  ;;  %v6807_v58 = vld [vmem:[#allocation2 + $0x400] sm:$0xff] }
 0x37d   :  { %6602 = vmatpush2.bf16.msra.mxu0 %v11914_v19  ;;  %v759_v63 = vld [vmem:[%s16177_s1 + $0x1638] sm:$0xff]  ;;  %v6855_v19 = vld [vmem:[#allocation2 + $0x580] sm:$0xff]  ;;  %v15802_v51 = vpack.c.bf16 %v6664_v11, %v6664_v11 }
 0x37e   :  { %6643 = vmatpush2.bf16.msra.mxu1 %v12042_v45  ;;  %6603 = vmatprep.subr.bf16.mxu0 %v11907_v18  ;;  %v883_v22 = vld [vmem:[%s16177_s1 + $0x1a18] sm:$0xff]  ;;  %v11875_v49 = vcombine.high %v755_v53, %v759_v63  ;;  %v11874_v47 = vcombine.low %v755_v53, %v759_v63  ;;  %v6859_v45 = vld [vmem:[#allocation2 + $0x5a0] sm:$0xff]  ;;  %v12244_v18 = vcombine.low %v6863_v1, %v6867_v14 }
 0x37f   :  { %6644 = vmatprep.subr.bf16.mxu1 %v12035_v46  ;;  %v887_v38 = vld [vmem:[%s16177_s1 + $0x1a38] sm:$0xff]  ;;  %v12109_v46 = vcombine.high %v6727_v34, %v6731_v36  ;;  %v12237_v12 = vcombine.high %v6855_v19, %v6859_v45  ;;  %v6707_v53 = vld [vmem:[#allocation2 + $0xe0] sm:$0xff] }
 0x380   :  { %v12003_v26 = vcombine.high %v883_v22, %v887_v38  ;;  %v12002_v30 = vcombine.low %v883_v22, %v887_v38  ;;  %v6831_v63 = vld [vmem:[#allocation2 + $0x4c0] sm:$0xff] }
 0x381   :  { %6604 = vmatpush2.bf16.msra.mxu0 %v11906_v56  ;;  %v6847_v56 = vld [vmem:[#allocation2 + $0x540] sm:$0xff] }
 0x382   :  { %6645 = vmatpush2.bf16.msra.mxu1 %v12034_v16  ;;  %6605 = vmatprep.subr.bf16.mxu0 %v11899_v57  ;;  %v6851_v16 = vld [vmem:[#allocation2 + $0x560] sm:$0xff] }
 0x383   :  { %6646 = vmatprep.subr.bf16.mxu1 %v12027_v60  ;;  %v12228_v48 = vcombine.low %v6847_v56, %v6851_v16  ;;  %v6835_v22 = vld [vmem:[#allocation2 + $0x4e0] sm:$0xff] }
 0x384   :  { %v6827_v1 = vld [vmem:[#allocation2 + $0x4a0] sm:$0xff] }
 0x385   :  { %6606 = vmatpush2.bf16.msra.mxu0 %v11898_v59  ;;  %v6711_v59 = vld [vmem:[#allocation2 + $0x100] sm:$0xff] }
 0x386   :  { %6647 = vmatpush2.bf16.msra.mxu1 %v12026_v5  ;;  %6607 = vmatprep.subr.bf16.mxu0 %v11891_v41  ;;  %v6715_v5 = vld [vmem:[#allocation2 + $0x120] sm:$0xff] }
 0x387   :  { %6648 = vmatprep.subr.bf16.mxu1 %v12019_v20  ;;  %v6843_v20 = vld [vmem:[#allocation2 + $0x520] sm:$0xff]  ;;  %v12092_v38 = vcombine.low %v6711_v59, %v6715_v5 }
 0x388   :  { %v6691_v11 = vld [vmem:[#allocation2 + $0x60] sm:$0xff] }
 0x389   :  { %6608 = vmatpush2.bf16.msra.mxu0 %v11890_v39  ;;  %v12093_v39 = vcombine.high %v6711_v59, %v6715_v5  ;;  %v6815_v34 = vld [vmem:[#allocation2 + $0x440] sm:$0xff] }
 0x38a   :  { %6649 = vmatpush2.bf16.msra.mxu1 %v12018_v15  ;;  %6609 = vmatprep.subr.bf16.mxu0 %v11883_v6  ;;  %v6819_v36 = vld [vmem:[#allocation2 + $0x460] sm:$0xff] }
 0x38b   :  { %6650 = vmatprep.subr.bf16.mxu1 %v12011_v4  ;;  %v6703_v4 = vld [vmem:[#allocation2 + $0xc0] sm:$0xff] }
 0x38c   :  { %v12084_v14 = vcombine.low %v6703_v4, %v6707_v53  ;;  %v6811_v50 = vld [vmem:[#allocation2 + $0x420] sm:$0xff] }
 0x38d   :  { %6610 = vmatpush2.bf16.msra.mxu0 %v11882_v54  ;;  %v12188_v5 = vcombine.low %v6807_v58, %v6811_v50 }
 0x38e   :  { %6651 = vmatpush2.bf16.msra.mxu1 %v12010_v29  ;;  %6611 = vmatprep.subr.bf16.mxu0 %v11875_v49  ;;  %v12085_v29 = vcombine.high %v6703_v4, %v6707_v53  ;;  %v12213_v49 = vcombine.high %v6831_v63, %v6835_v22  ;;  %v6783_v4 = vld [vmem:[#allocation2 + $0x340] sm:$0xff] }
 0x38f   :  { %6652 = vmatprep.subr.bf16.mxu1 %v12003_v26  ;;  %v6695_v26 = vld [vmem:[#allocation2 + $0x80] sm:$0xff] }
 0x390   :  { %v12076_v37 = vcombine.low %v6695_v26, %v6699_v28  ;;  %v6787_v53 = vld [vmem:[#allocation2 + $0x360] sm:$0xff] }
 0x391   :  { %6612 = vmatpush2.bf16.msra.mxu0 %v11874_v47  ;;  %v12212_v47 = vcombine.low %v6831_v63, %v6835_v22  ;;  %v6911_v63 = vld [vmem:[#allocation2 + $0x740] sm:$0xff] }
 0x392   :  { %6653 = vmatpush2.bf16.msra.mxu1 %v12002_v30  ;;  %9793 = vmatprep.subr.bf16.mxu0 %v12117_v31  ;;  %v12077_v30 = vcombine.high %v6695_v26, %v6699_v28  ;;  %v12205_v31 = vcombine.high %v6823_v42, %v6827_v1  ;;  %v6915_v22 = vld [vmem:[#allocation2 + $0x760] sm:$0xff] }
 0x393   :  { %9834 = vmatprep.subr.bf16.mxu1 %v12245_v32  ;;  %v6687_v32 = vld [vmem:[#allocation2 + $0x40] sm:$0xff] }
 0x394   :  { %v6369_v7 = vpop.f32.mrf.mxu0  ;;  %6614 = vmatmul.mubr.bf16.vlgmr.msra.gmra.mxu0 %v13569_v8  ;;  %v12236_v8 = vcombine.low %v6855_v19, %v6859_v45  ;;  %v12069_v19 = vcombine.high %v6687_v32, %v6691_v11  ;;  %v12197_v45 = vcombine.high %v6815_v34, %v6819_v36  ;;  %v6775_v26 = vld [vmem:[#allocation2 + $0x300] sm:$0xff] }
 0x395   :  { %v15808_v57 = vadd.f32 %v6369_v7, %v15637_v52  ;;  %v15810_v60 = vpop.f32.mrf.mxu1  ;;  %6655 = vmatmul.mubr.bf16.vlgmr.msra.gmra.mxu1 %v13774_v21  ;;  %9794 = vmatpush1.bf16.msra.mxu0 %v12116_v43  ;;  %v12229_v52 = vcombine.high %v6847_v56, %v6851_v16  ;;  %v6839_v21 = vld [vmem:[#allocation2 + $0x500] sm:$0xff]  ;;  %v12204_v43 = vcombine.low %v6823_v42, %v6827_v1 }
 0x396   :  { %9825 = vmatprep.mubr.bf16.mxu0 %v15802_v51  ;;  %9835 = vmatpush1.bf16.msra.mxu1 %v12244_v18  ;;  %v15814_v0 = vpop.f32.mrf.mxu0  ;;  %v12221_v6 = vcombine.high %v6839_v21, %v6843_v20  ;;  %v12220_v54 = vcombine.low %v6839_v21, %v6843_v20  ;;  %v6679_v18 = vld [vmem:[#allocation2] sm:$0xff]  ;;  %v12068_v7 = vcombine.low %v6687_v32, %v6691_v11 }
 0x397   :  { %9866 = vmatprep.mubr.bf16.mxu1 %v15805_v33  ;;  %v15817_v3 = vpop.f32.mrf.mxu1  ;;  %9795 = vmatprep.subr.bf16.mxu0 %v12109_v46  ;;  %v6683_v46 = vld [vmem:[#allocation2 + $0x20] sm:$0xff]  ;;  %v12189_v16 = vcombine.high %v6807_v58, %v6811_v50 }
 0x398   :  { %v6373_v41 = vpop.f32.mrf.mxu0  ;;  %9836 = vmatprep.subr.bf16.mxu1 %v12237_v12  ;;  %v12196_v12 = vcombine.low %v6815_v34, %v6819_v36  ;;  %v12061_v56 = vcombine.high %v6679_v18, %v6683_v46  ;;  %v12060_v59 = vcombine.low %v6679_v18, %v6683_v46  ;;  %v6791_v20 = vld [vmem:[#allocation2 + $0x380] sm:$0xff] }
 0x399   :  { %v6414_v10 = vpop.f32.mrf.mxu1  ;;  %9796 = vmatpush1.bf16.msra.mxu0 %v12108_v61  ;;  %v6799_v61 = vld [vmem:[#allocation2 + $0x3c0] sm:$0xff] }
 0x39a   :  { %9837 = vmatpush1.bf16.msra.mxu1 %v12236_v8  ;;  %v6374_v40 = vpop.f32.mrf.mxu0  ;;  %9797 = vmatprep.subr.bf16.mxu0 %v12101_v2  ;;  %v6803_v8 = vld [vmem:[#allocation2 + $0x3e0] sm:$0xff] }
 0x39b   :  { %v6415_v15 = vpop.f32.mrf.mxu1  ;;  %9838 = vmatprep.subr.bf16.mxu1 %v12229_v52  ;;  %v6927_v2 = vld [vmem:[#allocation2 + $0x7c0] sm:$0xff]  ;;  %v12181_v41 = vcombine.high %v6799_v61, %v6803_v8 }
 0x39c   :  { %v6931_v52 = vld [vmem:[#allocation2 + $0x7e0] sm:$0xff] }
 0x39d   :  { %9798 = vmatpush1.bf16.msra.mxu0 %v12100_v27  ;;  %v12309_v21 = vcombine.high %v6927_v2, %v6931_v52  ;;  %v6795_v10 = vld [vmem:[#allocation2 + $0x3a0] sm:$0xff] }
 0x39e   :  { %9839 = vmatpush1.bf16.msra.mxu1 %v12228_v48  ;;  %9799 = vmatprep.subr.bf16.mxu0 %v12093_v39  ;;  %v6919_v27 = vld [vmem:[#allocation2 + $0x780] sm:$0xff]  ;;  %v12180_v48 = vcombine.low %v6799_v61, %v6803_v8  ;;  %v12308_v39 = vcombine.low %v6927_v2, %v6931_v52  ;;  %v12173_v15 = vcombine.high %v6791_v20, %v6795_v10 }
 0x39f   :  { %9840 = vmatprep.subr.bf16.mxu1 %v12221_v6  ;;  %v6923_v40 = vld [vmem:[#allocation2 + $0x7a0] sm:$0xff] }
 0x3a0   :  { %v12301_v6 = vcombine.high %v6919_v27, %v6923_v40  ;;  %v6779_v28 = vld [vmem:[#allocation2 + $0x320] sm:$0xff] }
 0x3a1   :  { %9800 = vmatpush1.bf16.msra.mxu0 %v12092_v38  ;;  %v12172_v38 = vcombine.low %v6791_v20, %v6795_v10  ;;  %v6903_v42 = vld [vmem:[#allocation2 + $0x700] sm:$0xff] }
 0x3a2   :  { %9841 = vmatpush1.bf16.msra.mxu1 %v12220_v54  ;;  %9801 = vmatprep.subr.bf16.mxu0 %v12085_v29  ;;  %v12300_v54 = vcombine.low %v6919_v27, %v6923_v40  ;;  %v12165_v29 = vcombine.high %v6783_v4, %v6787_v53  ;;  %v6907_v1 = vld [vmem:[#allocation2 + $0x720] sm:$0xff] }
 0x3a3   :  { %9842 = vmatprep.subr.bf16.mxu1 %v12213_v49  ;;  %v12293_v49 = vcombine.high %v6911_v63, %v6915_v22  ;;  %v6767_v32 = vld [vmem:[#allocation2 + $0x2c0] sm:$0xff] }
 0x3a4   :  { %v6771_v11 = vld [vmem:[#allocation2 + $0x2e0] sm:$0xff] }
 0x3a5   :  { %9802 = vmatpush1.bf16.msra.mxu0 %v12084_v14  ;;  %v12164_v14 = vcombine.low %v6783_v4, %v6787_v53  ;;  %v6895_v34 = vld [vmem:[#allocation2 + $0x6c0] sm:$0xff] }
 0x3a6   :  { %9843 = vmatpush1.bf16.msra.mxu1 %v12212_v47  ;;  %9803 = vmatprep.subr.bf16.mxu0 %v12077_v30  ;;  %v12292_v47 = vcombine.low %v6911_v63, %v6915_v22  ;;  %v12157_v30 = vcombine.high %v6775_v26, %v6779_v28  ;;  %v6899_v36 = vld [vmem:[#allocation2 + $0x6e0] sm:$0xff]  ;;  %v6372_v22 = vadd.f32 %v15814_v0, %v15654_v24 }
 0x3a7   :  { %9844 = vmatprep.subr.bf16.mxu1 %v12205_v31  ;;  %v12285_v31 = vcombine.high %v6903_v42, %v6907_v1  ;;  %v6759_v18 = vld [vmem:[#allocation2 + $0x280] sm:$0xff] }
 0x3a8   :  { %v6763_v46 = vld [vmem:[#allocation2 + $0x2a0] sm:$0xff] }
 0x3a9   :  { %9804 = vmatpush1.bf16.msra.mxu0 %v12076_v37  ;;  %v12156_v37 = vcombine.low %v6775_v26, %v6779_v28  ;;  %v6887_v58 = vld [vmem:[#allocation2 + $0x680] sm:$0xff]  ;;  %v6663_v26 = vmax.f32 %v14404_v13, 0.0 }
 0x3aa   :  { %9845 = vmatpush1.bf16.msra.mxu1 %v12204_v43  ;;  %9805 = vmatprep.subr.bf16.mxu0 %v12069_v19  ;;  %v12284_v43 = vcombine.low %v6903_v42, %v6907_v1  ;;  %v12149_v19 = vcombine.high %v6767_v32, %v6771_v11  ;;  %v6891_v50 = vld [vmem:[#allocation2 + $0x6a0] sm:$0xff]  ;;  %v6665_v1 = vmax.f32 %v15024_v23, 0.0 }
 0x3ab   :  { %9846 = vmatprep.subr.bf16.mxu1 %v12197_v45  ;;  %v12277_v45 = vcombine.high %v6895_v34, %v6899_v36  ;;  %v6751_v61 = vld [vmem:[#allocation2 + $0x240] sm:$0xff]  ;;  %v15832_v23 = vpack.c.bf16 %v6663_v26, %v6663_v26 }
 0x3ac   :  { %v6755_v8 = vld [vmem:[#allocation2 + $0x260] sm:$0xff] }
 0x3ad   :  { %9806 = vmatpush1.bf16.msra.mxu0 %v12068_v7  ;;  %v12148_v7 = vcombine.low %v6767_v32, %v6771_v11  ;;  %v6879_v2 = vld [vmem:[#allocation2 + $0x640] sm:$0xff] }
 0x3ae   :  { %9847 = vmatpush1.bf16.msra.mxu1 %v12196_v12  ;;  %9807 = vmatprep.subr.bf16.mxu0 %v12061_v56  ;;  %v12276_v12 = vcombine.low %v6895_v34, %v6899_v36  ;;  %v12141_v56 = vcombine.high %v6759_v18, %v6763_v46  ;;  %v6883_v52 = vld [vmem:[#allocation2 + $0x660] sm:$0xff] }
 0x3af   :  { %9848 = vmatprep.subr.bf16.mxu1 %v12189_v16  ;;  %v12269_v16 = vcombine.high %v6887_v58, %v6891_v50  ;;  %v6743_v20 = vld [vmem:[#allocation2 + $0x200] sm:$0xff] }
 0x3b0   :  { %v6747_v10 = vld [vmem:[#allocation2 + $0x220] sm:$0xff] }
 0x3b1   :  { %9808 = vmatpush1.bf16.msra.mxu0 %v12060_v59  ;;  %v12140_v59 = vcombine.low %v6759_v18, %v6763_v46  ;;  %v6871_v27 = vld [vmem:[#allocation2 + $0x600] sm:$0xff] }
 0x3b2   :  { %9849 = vmatpush1.bf16.msra.mxu1 %v12188_v5  ;;  %9809 = vmatprep.subr.bf16.mxu0 %v12181_v41  ;;  %v12268_v5 = vcombine.low %v6887_v58, %v6891_v50  ;;  %v12133_v41 = vcombine.high %v6751_v61, %v6755_v8  ;;  %v6875_v40 = vld [vmem:[#allocation2 + $0x620] sm:$0xff] }
 0x3b3   :  { %9850 = vmatprep.subr.bf16.mxu1 %v12309_v21  ;;  %v12261_v21 = vcombine.high %v6879_v2, %v6883_v52  ;;  %v12253_v4 = vcombine.high %v6871_v27, %v6875_v40  ;;  %v6991_v53 = vld [vmem:[#allocation2 + $0x9c0] sm:$0xff]  ;;  %v12252_v28 = vcombine.low %v6871_v27, %v6875_v40 }
 0x3b4   :  { %v6995_v63 = vld [vmem:[#allocation2 + $0x9e0] sm:$0xff] }
 0x3b5   :  { %9810 = vmatpush2.bf16.msra.mxu0 %v12180_v48  ;;  %v12132_v48 = vcombine.low %v6751_v61, %v6755_v8  ;;  %v12373_v42 = vcombine.high %v6991_v53, %v6995_v63  ;;  %v6983_v0 = vld [vmem:[#allocation2 + $0x980] sm:$0xff]  ;;  %v12372_v32 = vcombine.low %v6991_v53, %v6995_v63 }
 0x3b6   :  { %9851 = vmatpush2.bf16.msra.mxu1 %v12308_v39  ;;  %9811 = vmatprep.subr.bf16.mxu0 %v12173_v15  ;;  %v12260_v39 = vcombine.low %v6879_v2, %v6883_v52  ;;  %v12125_v15 = vcombine.high %v6743_v20, %v6747_v10  ;;  %v7111_v11 = vld [vmem:[#allocation2 + $0xd80] sm:$0xff] }
 0x3b7   :  { %9852 = vmatprep.subr.bf16.mxu1 %v12301_v6  ;;  %v972_v6 = vsub.s32 6, %v13747_v25  ;;  %v7115_v34 = vld [vmem:[#allocation2 + $0xda0] sm:$0xff] }
 0x3b8   :  { %v12493_v50 = vcombine.high %v7111_v11, %v7115_v34  ;;  %v7103_v61 = vld [vmem:[#allocation2 + $0xd40] sm:$0xff] }
 0x3b9   :  { %9812 = vmatpush2.bf16.msra.mxu0 %v12172_v38  ;;  %v7119_v38 = vld [vmem:[#allocation2 + $0xdc0] sm:$0xff] }
 0x3ba   :  { %9853 = vmatpush2.bf16.msra.mxu1 %v12300_v54  ;;  %9813 = vmatprep.subr.bf16.mxu0 %v12165_v29  ;;  %v7123_v54 = vld [vmem:[#allocation2 + $0xde0] sm:$0xff]  ;;  %v976_v29 = vsub.s32 7, %v13747_v25 }
 0x3bb   :  { %9854 = vmatprep.subr.bf16.mxu1 %v12293_v49  ;;  %v12124_v49 = vcombine.low %v6743_v20, %v6747_v10  ;;  %v12500_v18 = vcombine.low %v7119_v38, %v7123_v54 }
 0x3bd   :  { %9814 = vmatpush2.bf16.msra.mxu0 %v12164_v14  ;;  %v12808_v14 = vld [vmem:[%s16178_s2] sm:$0xff] }
 0x3be   :  { %9855 = vmatpush2.bf16.msra.mxu1 %v12292_v47  ;;  %9815 = vmatprep.subr.bf16.mxu0 %v12157_v30  ;;  %v973_v24 = vrot.slane %v12808_v14, %v972_v6  ;;  %v6987_v47 = vld [vmem:[#allocation2 + $0x9a0] sm:$0xff]  ;;  %v12501_v30 = vcombine.high %v7119_v38, %v7123_v54  ;;  %v977_v13 = vrot.slane %v12808_v14, %v976_v29  ;;  %v15847_v14 = vld [vmem:[#allocation2 + $0x5c8] sm:$0xff] }
 0x3bf   :  { %9856 = vmatprep.subr.bf16.mxu1 %v12285_v31  ;;  %v6668_v31 = vmax.f32 %v6372_v22, 0.0  ;;  %v12365_v36 = vcombine.high %v6983_v0, %v6987_v47  ;;  %v6959_v22 = vld [vmem:[#allocation2 + $0x8c0] sm:$0xff] }
 0x3c0   :  { %v6963_v38 = vld [vmem:[#allocation2 + $0x8e0] sm:$0xff] }
 0x3c1   :  { %9816 = vmatpush2.bf16.msra.mxu0 %v12156_v37  ;;  %v15834_v37 = vpack.c.bf16 %v6665_v1, %v6665_v1  ;;  %v15837_v46 = vpack.c.bf16 %v6668_v31, %v6668_v31  ;;  %v12341_v1 = vcombine.high %v6959_v22, %v6963_v38 }
 0x3c2   :  { %9857 = vmatpush2.bf16.msra.mxu1 %v12284_v43  ;;  %9817 = vmatprep.subr.bf16.mxu0 %v12149_v19  ;;  %v6411_v43 = vadd.f32 %v15810_v60, %v973_v24  ;;  %v6975_v19 = vld [vmem:[#allocation2 + $0x940] sm:$0xff]  ;;  %v15849_v24 = vld [vmem:[#allocation2 + $0x5e8] sm:$0xff] }
 0x3c3   :  { %9858 = vmatprep.subr.bf16.mxu1 %v12277_v45  ;;  %v6979_v45 = vld [vmem:[#allocation2 + $0x960] sm:$0xff]  ;;  %v12246_v31 = vcombine.low %v15847_v14, %v15849_v24 }
 0x3c4   :  { %v7107_v60 = vld [vmem:[#allocation2 + $0xd60] sm:$0xff]  ;;  %v12357_v2 = vcombine.high %v6975_v19, %v6979_v45 }
 0x3c5   :  { %9818 = vmatpush2.bf16.msra.mxu0 %v12148_v7  ;;  %v6413_v7 = vadd.f32 %v15817_v3, %v977_v13  ;;  %v12492_v3 = vcombine.low %v7111_v11, %v7115_v34  ;;  %v12485_v10 = vcombine.high %v7103_v61, %v7107_v60  ;;  %v12484_v54 = vcombine.low %v7103_v61, %v7107_v60  ;;  %v7079_v11 = vld [vmem:[#allocation2 + $0xc80] sm:$0xff] }
 0x3c6   :  { %9859 = vmatpush2.bf16.msra.mxu1 %v12276_v12  ;;  %9819 = vmatprep.subr.bf16.mxu0 %v12141_v56  ;;  %v7083_v34 = vld [vmem:[#allocation2 + $0xca0] sm:$0xff] }
 0x3c7   :  { %9860 = vmatprep.subr.bf16.mxu1 %v12269_v16  ;;  %v12364_v16 = vcombine.low %v6983_v0, %v6987_v47  ;;  %v6951_v0 = vld [vmem:[#allocation2 + $0x880] sm:$0xff]  ;;  %v12460_v61 = vcombine.low %v7079_v11, %v7083_v34 }
 0x3c8   :  { %v6955_v47 = vld [vmem:[#allocation2 + $0x8a0] sm:$0xff] }
 0x3c9   :  { %9820 = vmatpush2.bf16.msra.mxu0 %v12140_v59 }
 0x3ca   :  { %9861 = vmatpush2.bf16.msra.mxu1 %v12268_v5  ;;  %9821 = vmatprep.subr.bf16.mxu0 %v12133_v41  ;;  %v6967_v41 = vld [vmem:[#allocation2 + $0x900] sm:$0xff] }
 0x3cb   :  { %9862 = vmatprep.subr.bf16.mxu1 %v12261_v21  ;;  %v6971_v21 = vld [vmem:[#allocation2 + $0x920] sm:$0xff] }
 0x3cc   :  { %v12349_v53 = vcombine.high %v6967_v41, %v6971_v21  ;;  %v12348_v26 = vcombine.low %v6967_v41, %v6971_v21  ;;  %v7055_v41 = vld [vmem:[#allocation2 + $0xbc0] sm:$0xff] }
 0x3cd   :  { %9822 = vmatpush2.bf16.msra.mxu0 %v12132_v48  ;;  %v12356_v48 = vcombine.low %v6975_v19, %v6979_v45  ;;  %v6947_v19 = vld [vmem:[#allocation2 + $0x860] sm:$0xff] }
 0x3ce   :  { %9863 = vmatpush2.bf16.msra.mxu1 %v12260_v39  ;;  %9823 = vmatprep.subr.bf16.mxu0 %v12125_v15  ;;  %v7095_v39 = vld [vmem:[#allocation2 + $0xd00] sm:$0xff] }
 0x3cf   :  { %9864 = vmatprep.subr.bf16.mxu1 %v12253_v4  ;;  %v7099_v15 = vld [vmem:[#allocation2 + $0xd20] sm:$0xff] }
 0x3d0   :  { %v7059_v21 = vld [vmem:[#allocation2 + $0xbe0] sm:$0xff] }
 0x3d1   :  { %9824 = vmatpush2.bf16.msra.mxu0 %v12124_v49  ;;  %v12477_v49 = vcombine.high %v7095_v39, %v7099_v15 }
 0x3d2   :  { %9865 = vmatpush2.bf16.msra.mxu1 %v12252_v28  ;;  %9875 = vmatprep.subr.bf16.mxu0 %v12373_v42  ;;  %v7087_v28 = vld [vmem:[#allocation2 + $0xcc0] sm:$0xff] }
 0x3d3   :  { %9916 = vmatprep.subr.bf16.mxu1 %v12501_v30  ;;  %v7091_v42 = vld [vmem:[#allocation2 + $0xce0] sm:$0xff]  ;;  %v12476_v30 = vcombine.low %v7095_v39, %v7099_v15  ;;  %v12437_v39 = vcombine.high %v7055_v41, %v7059_v21 }
 0x3d4   :  { %v6451_v58 = vpop.f32.mrf.mxu0  ;;  %9826 = vmatmul.mubr.bf16.vlgmr.msra.gmra.mxu0 %v15832_v23  ;;  %v12469_v13 = vcombine.high %v7087_v28, %v7091_v42  ;;  %v12468_v45 = vcombine.low %v7087_v28, %v7091_v42  ;;  %v7047_v15 = vld [vmem:[#allocation2 + $0xb80] sm:$0xff] }
 0x3d5   :  { %v6452_v12 = vadd.f32 %v6451_v58, %v6411_v43  ;;  %v6492_v56 = vpop.f32.mrf.mxu1  ;;  %9867 = vmatmul.mubr.bf16.vlgmr.msra.gmra.mxu1 %v15834_v37  ;;  %9876 = vmatpush1.bf16.msra.mxu0 %v12372_v32  ;;  %v12340_v32 = vcombine.low %v6959_v22, %v6963_v38  ;;  %v6943_v43 = vld [vmem:[#allocation2 + $0x840] sm:$0xff]  ;;  %v12332_v58 = vcombine.low %v6951_v0, %v6955_v47 }
 0x3d6   :  { %9907 = vmatprep.mubr.bf16.mxu0 %v15837_v46  ;;  %v6453_v8 = vpop.f32.mrf.mxu0  ;;  %9877 = vmatprep.subr.bf16.mxu0 %v12365_v36  ;;  %v12333_v36 = vcombine.high %v6951_v0, %v6955_v47  ;;  %v12436_v22 = vcombine.low %v7055_v41, %v7059_v21  ;;  %v7175_v38 = vld [vmem:[#allocation2 + $0xf80] sm:$0xff] }
 0x3d7   :  { %v15843_v52 = vadd.f32 %v6492_v56, %v6452_v12  ;;  %v6454_v59 = vadd.f32 %v6453_v8, %v6413_v7  ;;  %v6494_v5 = vpop.f32.mrf.mxu1  ;;  %9917 = vmatpush1.bf16.msra.mxu1 %v12500_v18  ;;  %v12461_v18 = vcombine.high %v7079_v11, %v7083_v34  ;;  %v7075_v7 = vld [vmem:[#allocation2 + $0xc60] sm:$0xff]  ;;  %v12325_v12 = vcombine.high %v6943_v43, %v6947_v19 }
 0x3d8   :  { %v6455_v20 = vpop.f32.mrf.mxu0  ;;  %9918 = vmatprep.subr.bf16.mxu1 %v12493_v50  ;;  %v7071_v50 = vld [vmem:[#allocation2 + $0xc40] sm:$0xff]  ;;  %v12324_v8 = vcombine.low %v6943_v43, %v6947_v19 }
 0x3d9   :  { %v15845_v27 = vadd.f32 %v6494_v5, %v6454_v59  ;;  %v6496_v40 = vpop.f32.mrf.mxu1  ;;  %9878 = vmatpush1.bf16.msra.mxu0 %v12364_v16  ;;  %v6935_v56 = vld [vmem:[#allocation2 + $0x800] sm:$0xff]  ;;  %v12453_v60 = vcombine.high %v7071_v50, %v7075_v7 }
 0x3da   :  { %v6456_v4 = vpop.f32.mrf.mxu0  ;;  %9879 = vmatprep.subr.bf16.mxu0 %v12357_v2  ;;  %v6939_v16 = vld [vmem:[#allocation2 + $0x820] sm:$0xff] }
 0x3db   :  { %v6497_v63 = vpop.f32.mrf.mxu1  ;;  %9919 = vmatpush1.bf16.msra.mxu1 %v12492_v3  ;;  %v7063_v2 = vld [vmem:[#allocation2 + $0xc00] sm:$0xff]  ;;  %v12317_v5 = vcombine.high %v6935_v56, %v6939_v16  ;;  %v12452_v3 = vcombine.low %v7071_v50, %v7075_v7 }
 0x3dc   :  { %9920 = vmatprep.subr.bf16.mxu1 %v12485_v10  ;;  %v7067_v59 = vld [vmem:[#allocation2 + $0xc20] sm:$0xff]  ;;  %v12316_v10 = vcombine.low %v6935_v56, %v6939_v16 }
 0x3dd   :  { %9880 = vmatpush1.bf16.msra.mxu0 %v12356_v48  ;;  %v12445_v20 = vcombine.high %v7063_v2, %v7067_v59  ;;  %v7183_v40 = vld [vmem:[#allocation2 + $0xfc0] sm:$0xff] }
 0x3de   :  { %9881 = vmatprep.subr.bf16.mxu0 %v12349_v53  ;;  %v7187_v48 = vld [vmem:[#allocation2 + $0xfe0] sm:$0xff]  ;;  %v12444_v53 = vcombine.low %v7063_v2, %v7067_v59 }
 0x3df   :  { %9921 = vmatpush1.bf16.msra.mxu1 %v12484_v54  ;;  %v7051_v4 = vld [vmem:[#allocation2 + $0xba0] sm:$0xff]  ;;  %v12565_v63 = vcombine.high %v7183_v40, %v7187_v48  ;;  %v12564_v42 = vcombine.low %v7183_v40, %v7187_v48 }
 0x3e0   :  { %9922 = vmatprep.subr.bf16.mxu1 %v12477_v49  ;;  %v7179_v54 = vld [vmem:[#allocation2 + $0xfa0] sm:$0xff]  ;;  %v12429_v49 = vcombine.high %v7047_v15, %v7051_v4  ;;  %v12428_v0 = vcombine.low %v7047_v15, %v7051_v4 }
 0x3e1   :  { %9882 = vmatpush1.bf16.msra.mxu0 %v12348_v26  ;;  %v7039_v26 = vld [vmem:[#allocation2 + $0xb40] sm:$0xff]  ;;  %v12556_v34 = vcombine.low %v7175_v38, %v7179_v54 }
 0x3e2   :  { %9883 = vmatprep.subr.bf16.mxu0 %v12341_v1  ;;  %v7043_v28 = vld [vmem:[#allocation2 + $0xb60] sm:$0xff]  ;;  %v12557_v1 = vcombine.high %v7175_v38, %v7179_v54 }
 0x3e3   :  { %9923 = vmatpush1.bf16.msra.mxu1 %v12476_v30  ;;  %v7167_v47 = vld [vmem:[#allocation2 + $0xf40] sm:$0xff]  ;;  %v12420_v43 = vcombine.low %v7039_v26, %v7043_v28 }
 0x3e4   :  { %9924 = vmatprep.subr.bf16.mxu1 %v12469_v13  ;;  %v7171_v30 = vld [vmem:[#allocation2 + $0xf60] sm:$0xff]  ;;  %v12421_v13 = vcombine.high %v7039_v26, %v7043_v28 }
 0x3e5   :  { %9884 = vmatpush1.bf16.msra.mxu0 %v12340_v32  ;;  %v7031_v32 = vld [vmem:[#allocation2 + $0xb00] sm:$0xff]  ;;  %v12548_v7 = vcombine.low %v7167_v47, %v7171_v30 }
 0x3e6   :  { %9885 = vmatprep.subr.bf16.mxu0 %v12333_v36  ;;  %v7035_v11 = vld [vmem:[#allocation2 + $0xb20] sm:$0xff]  ;;  %v12549_v36 = vcombine.high %v7167_v47, %v7171_v30  ;;  %v6740_v47 = vld [vmem:[#allocation2 + $0x1e8] sm:$0xff] }
 0x3e7   :  { %9925 = vmatpush1.bf16.msra.mxu1 %v12468_v45  ;;  %v7159_v19 = vld [vmem:[#allocation2 + $0xf00] sm:$0xff]  ;;  %v12412_v56 = vcombine.low %v7031_v32, %v7035_v11 }
 0x3e8   :  { %9926 = vmatprep.subr.bf16.mxu1 %v12461_v18  ;;  %v7163_v45 = vld [vmem:[#allocation2 + $0xf20] sm:$0xff]  ;;  %v12413_v18 = vcombine.high %v7031_v32, %v7035_v11  ;;  %v6667_v11 = vmax.f32 %v15808_v57, 0.0 }
 0x3e9   :  { %9886 = vmatpush1.bf16.msra.mxu0 %v12332_v58  ;;  %v7023_v58 = vld [vmem:[#allocation2 + $0xac0] sm:$0xff]  ;;  %v12540_v59 = vcombine.low %v7159_v19, %v7163_v45 }
 0x3ea   :  { %9887 = vmatprep.subr.bf16.mxu0 %v12325_v12  ;;  %v7027_v50 = vld [vmem:[#allocation2 + $0xae0] sm:$0xff]  ;;  %v12541_v12 = vcombine.high %v7159_v19, %v7163_v45  ;;  %v12247_v45 = vcombine.high %v15847_v14, %v15849_v24 }
 0x3eb   :  { %9927 = vmatpush1.bf16.msra.mxu1 %v12460_v61  ;;  %v7151_v16 = vld [vmem:[#allocation2 + $0xec0] sm:$0xff]  ;;  %v12404_v41 = vcombine.low %v7023_v58, %v7027_v50 }
 0x3ec   :  { %9928 = vmatprep.subr.bf16.mxu1 %v12453_v60  ;;  %v7155_v61 = vld [vmem:[#allocation2 + $0xee0] sm:$0xff]  ;;  %v12405_v60 = vcombine.high %v7023_v58, %v7027_v50  ;;  %v15856_v58 = vpack.c.bf16 %v6667_v11, %v6667_v11 }
 0x3ed   :  { %9888 = vmatpush1.bf16.msra.mxu0 %v12324_v8  ;;  %v7015_v8 = vld [vmem:[#allocation2 + $0xa80] sm:$0xff]  ;;  %v12532_v48 = vcombine.low %v7151_v16, %v7155_v61 }
 0x3ee   :  { %9889 = vmatprep.subr.bf16.mxu0 %v12317_v5  ;;  %v7019_v2 = vld [vmem:[#allocation2 + $0xaa0] sm:$0xff]  ;;  %v12533_v5 = vcombine.high %v7151_v16, %v7155_v61 }
 0x3ef   :  { %9929 = vmatpush1.bf16.msra.mxu1 %v12452_v3  ;;  %v7143_v21 = vld [vmem:[#allocation2 + $0xe80] sm:$0xff]  ;;  %v12396_v15 = vcombine.low %v7015_v8, %v7019_v2 }
 0x3f0   :  { %9930 = vmatprep.subr.bf16.mxu1 %v12445_v20  ;;  %v7147_v3 = vld [vmem:[#allocation2 + $0xea0] sm:$0xff]  ;;  %v12397_v20 = vcombine.high %v7015_v8, %v7019_v2 }
 0x3f1   :  { %9890 = vmatpush1.bf16.msra.mxu0 %v12316_v10  ;;  %v7007_v10 = vld [vmem:[#allocation2 + $0xa40] sm:$0xff]  ;;  %v12524_v54 = vcombine.low %v7143_v21, %v7147_v3 }
 0x3f2   :  { %9891 = vmatprep.subr.bf16.mxu0 %v12437_v39  ;;  %v7011_v40 = vld [vmem:[#allocation2 + $0xa60] sm:$0xff]  ;;  %v12525_v39 = vcombine.high %v7143_v21, %v7147_v3 }
 0x3f3   :  { %9931 = vmatpush1.bf16.msra.mxu1 %v12444_v53  ;;  %v7135_v4 = vld [vmem:[#allocation2 + $0xe40] sm:$0xff]  ;;  %v12388_v26 = vcombine.low %v7007_v10, %v7011_v40 }
 0x3f4   :  { %9932 = vmatprep.subr.bf16.mxu1 %v12565_v63  ;;  %v7139_v53 = vld [vmem:[#allocation2 + $0xe60] sm:$0xff]  ;;  %v12389_v63 = vcombine.high %v7007_v10, %v7011_v40 }
 0x3f5   :  { %9892 = vmatpush2.bf16.msra.mxu0 %v12436_v22  ;;  %v6999_v22 = vld [vmem:[#allocation2 + $0xa00] sm:$0xff]  ;;  %v12516_v30 = vcombine.low %v7135_v4, %v7139_v53 }
 0x3f6   :  { %9893 = vmatprep.subr.bf16.mxu0 %v12429_v49  ;;  %v7003_v38 = vld [vmem:[#allocation2 + $0xa20] sm:$0xff]  ;;  %v12517_v49 = vcombine.high %v7135_v4, %v7139_v53  ;;  %v6696_v53 = vld [vmem:[#allocation2 + $0x88] sm:$0xff] }
 0x3f7   :  { %9933 = vmatpush2.bf16.msra.mxu1 %v12564_v42  ;;  %v7127_v28 = vld [vmem:[#allocation2 + $0xe00] sm:$0xff]  ;;  %v12380_v32 = vcombine.low %v6999_v22, %v7003_v38 }
 0x3f8   :  { %9934 = vmatprep.subr.bf16.mxu1 %v12557_v1  ;;  %v7131_v42 = vld [vmem:[#allocation2 + $0xe20] sm:$0xff]  ;;  %v12381_v1 = vcombine.high %v6999_v22, %v7003_v38 }
 0x3f9   :  { %9894 = vmatpush2.bf16.msra.mxu0 %v12428_v0  ;;  %v6736_v0 = vld [vmem:[#allocation2 + $0x1c8] sm:$0xff]  ;;  %v12508_v19 = vcombine.low %v7127_v28, %v7131_v42 }
 0x3fa   :  { %9895 = vmatprep.subr.bf16.mxu0 %v12421_v13  ;;  %v12509_v13 = vcombine.high %v7127_v28, %v7131_v42  ;;  %v6680_v42 = vld [vmem:[#allocation2 + $0x8] sm:$0xff] }
 0x3fb   :  { %9935 = vmatpush2.bf16.msra.mxu1 %v12556_v34  ;;  %v12119_v34 = vcombine.high %v6736_v0, %v6740_v47 }
 0x3fc   :  { %9936 = vmatprep.subr.bf16.mxu1 %v12549_v36  ;;  %v6728_v36 = vld [vmem:[#allocation2 + $0x188] sm:$0xff] }
 0x3fd   :  { %9896 = vmatpush2.bf16.msra.mxu0 %v12420_v43  ;;  %v6732_v43 = vld [vmem:[#allocation2 + $0x1a8] sm:$0xff] }
 0x3fe   :  { %9897 = vmatprep.subr.bf16.mxu0 %v12413_v18  ;;  %v12118_v18 = vcombine.low %v6736_v0, %v6740_v47  ;;  %v12111_v50 = vcombine.high %v6728_v36, %v6732_v43  ;;  %v12110_v61 = vcombine.low %v6728_v36, %v6732_v43  ;;  %v6796_v36 = vld [vmem:[#allocation2 + $0x3a8] sm:$0xff] }
 0x3ff   :  { %9937 = vmatpush2.bf16.msra.mxu1 %v12548_v7  ;;  %v6720_v7 = vld [vmem:[#allocation2 + $0x148] sm:$0xff] }
 0x400   :  { %9938 = vmatprep.subr.bf16.mxu1 %v12541_v12  ;;  %v6724_v12 = vld [vmem:[#allocation2 + $0x168] sm:$0xff] }
 0x401   :  { %9898 = vmatpush2.bf16.msra.mxu0 %v12412_v56  ;;  %v12103_v8 = vcombine.high %v6720_v7, %v6724_v12 }
 0x402   :  { %9899 = vmatprep.subr.bf16.mxu0 %v12405_v60 }
 0x403   :  { %9939 = vmatpush2.bf16.msra.mxu1 %v12540_v59 }
 0x404   :  { %9940 = vmatprep.subr.bf16.mxu1 %v12533_v5  ;;  %v6712_v5 = vld [vmem:[#allocation2 + $0x108] sm:$0xff] }
 0x405   :  { %9900 = vmatpush2.bf16.msra.mxu0 %v12404_v41  ;;  %v6716_v41 = vld [vmem:[#allocation2 + $0x128] sm:$0xff] }
 0x406   :  { %9901 = vmatprep.subr.bf16.mxu0 %v12397_v20  ;;  %v12102_v20 = vcombine.low %v6720_v7, %v6724_v12  ;;  %v12095_v10 = vcombine.high %v6712_v5, %v6716_v41  ;;  %v6776_v12 = vld [vmem:[#allocation2 + $0x308] sm:$0xff] }
 0x407   :  { %9941 = vmatpush2.bf16.msra.mxu1 %v12532_v48  ;;  %v6704_v48 = vld [vmem:[#allocation2 + $0xc8] sm:$0xff] }
 0x408   :  { %9942 = vmatprep.subr.bf16.mxu1 %v12525_v39  ;;  %v6708_v39 = vld [vmem:[#allocation2 + $0xe8] sm:$0xff] }
 0x409   :  { %9902 = vmatpush2.bf16.msra.mxu0 %v12396_v15  ;;  %v12094_v15 = vcombine.low %v6712_v5, %v6716_v41  ;;  %v12087_v4 = vcombine.high %v6704_v48, %v6708_v39  ;;  %v12086_v22 = vcombine.low %v6704_v48, %v6708_v39 }
 0x40a   :  { %9903 = vmatprep.subr.bf16.mxu0 %v12389_v63  ;;  %v6700_v63 = vld [vmem:[#allocation2 + $0xa8] sm:$0xff] }
 0x40b   :  { %9943 = vmatpush2.bf16.msra.mxu1 %v12524_v54  ;;  %v12079_v38 = vcombine.high %v6696_v53, %v6700_v63  ;;  %v6688_v54 = vld [vmem:[#allocation2 + $0x48] sm:$0xff] }
 0x40c   :  { %9944 = vmatprep.subr.bf16.mxu1 %v12517_v49  ;;  %v6692_v49 = vld [vmem:[#allocation2 + $0x68] sm:$0xff] }
 0x40d   :  { %9904 = vmatpush2.bf16.msra.mxu0 %v12388_v26  ;;  %v12078_v26 = vcombine.low %v6696_v53, %v6700_v63  ;;  %v12071_v28 = vcombine.high %v6688_v54, %v6692_v49  ;;  %v12070_v0 = vcombine.low %v6688_v54, %v6692_v49 }
 0x40e   :  { %9905 = vmatprep.subr.bf16.mxu0 %v12381_v1  ;;  %v6684_v1 = vld [vmem:[#allocation2 + $0x28] sm:$0xff] }
 0x40f   :  { %9945 = vmatpush2.bf16.msra.mxu1 %v12516_v30  ;;  %v12063_v47 = vcombine.high %v6680_v42, %v6684_v1  ;;  %v6800_v30 = vld [vmem:[#allocation2 + $0x3c8] sm:$0xff] }
 0x410   :  { %9946 = vmatprep.subr.bf16.mxu1 %v12509_v13  ;;  %v6804_v13 = vld [vmem:[#allocation2 + $0x3e8] sm:$0xff] }
 0x411   :  { %9906 = vmatpush2.bf16.msra.mxu0 %v12380_v32  ;;  %v12062_v32 = vcombine.low %v6680_v42, %v6684_v1  ;;  %v12183_v11 = vcombine.high %v6800_v30, %v6804_v13  ;;  %v12182_v43 = vcombine.low %v6800_v30, %v6804_v13  ;;  %v6980_v30 = vld [vmem:[#allocation2 + $0x968] sm:$0xff] }
 0x412   :  { %9957 = vmatprep.subr.bf16.mxu0 %v12119_v34  ;;  %v6792_v34 = vld [vmem:[#allocation2 + $0x388] sm:$0xff] }
 0x413   :  { %9947 = vmatpush2.bf16.msra.mxu1 %v12508_v19  ;;  %v12175_v19 = vcombine.high %v6792_v34, %v6796_v36 }
 0x414   :  { %v6533_v57 = vpop.f32.mrf.mxu0  ;;  %9908 = vmatmul.mubr.bf16.vlgmr.msra.gmra.mxu0 %v15856_v58  ;;  %9998 = vmatprep.subr.bf16.mxu1 %v12247_v45  ;;  %v6784_v45 = vld [vmem:[#allocation2 + $0x348] sm:$0xff] }
 0x415   :  { %v6534_v56 = vadd.f32 %v6533_v57, %v15843_v52  ;;  %v6574_v16 = vpop.f32.mrf.mxu1  ;;  %9958 = vmatpush1.bf16.msra.mxu0 %v12118_v18  ;;  %9989 = vmatprep.mubr.bf16.mxu0 %v15802_v51  ;;  %v6788_v18 = vld [vmem:[#allocation2 + $0x368] sm:$0xff] }
 0x416   :  { %v15861_v60 = vpop.f32.mrf.mxu0  ;;  %9959 = vmatprep.subr.bf16.mxu0 %v12111_v50  ;;  %v12174_v50 = vcombine.low %v6792_v34, %v6796_v36  ;;  %v12167_v7 = vcombine.high %v6784_v45, %v6788_v18  ;;  %v6780_v57 = vld [vmem:[#allocation2 + $0x328] sm:$0xff] }
 0x417   :  { %v15863_v2 = vadd.f32 %v6574_v16, %v6534_v56  ;;  %v15865_v59 = vpop.f32.mrf.mxu1  ;;  %v12166_v56 = vcombine.low %v6784_v45, %v6788_v18  ;;  %v12159_v16 = vcombine.high %v6776_v12, %v6780_v57  ;;  %v12158_v5 = vcombine.low %v6776_v12, %v6780_v57  ;;  %v6968_v18 = vld [vmem:[#allocation2 + $0x908] sm:$0xff] }
 0x418   :  { %v6537_v21 = vpop.f32.mrf.mxu0  ;;  %v6536_v42 = vadd.f32 %v15861_v60, %v15845_v27 }
 0x419   :  { %v6578_v3 = vpop.f32.mrf.mxu1  ;;  %9960 = vmatpush1.bf16.msra.mxu0 %v12110_v61  ;;  %v6768_v61 = vld [vmem:[#allocation2 + $0x2c8] sm:$0xff] }
 0x41a   :  { %v6538_v52 = vpop.f32.mrf.mxu0  ;;  %9961 = vmatprep.subr.bf16.mxu0 %v12103_v8  ;;  %v6772_v8 = vld [vmem:[#allocation2 + $0x2e8] sm:$0xff] }
 0x41b   :  { %v6579_v40 = vpop.f32.mrf.mxu1  ;;  %v12151_v41 = vcombine.high %v6768_v61, %v6772_v8  ;;  %v6760_v21 = vld [vmem:[#allocation2 + $0x288] sm:$0xff] }
 0x41c   :  { %v6764_v3 = vld [vmem:[#allocation2 + $0x2a8] sm:$0xff] }
 0x41d   :  { %9962 = vmatpush1.bf16.msra.mxu0 %v12102_v20  ;;  %v12150_v20 = vcombine.low %v6768_v61, %v6772_v8  ;;  %v12143_v52 = vcombine.high %v6760_v21, %v6764_v3  ;;  %v6756_v40 = vld [vmem:[#allocation2 + $0x268] sm:$0xff]  ;;  %v12142_v48 = vcombine.low %v6760_v21, %v6764_v3 }
 0x41e   :  { %9963 = vmatprep.subr.bf16.mxu0 %v12095_v10  ;;  %v6752_v10 = vld [vmem:[#allocation2 + $0x248] sm:$0xff] }
 0x41f   :  { %v12135_v39 = vcombine.high %v6752_v10, %v6756_v40  ;;  %v12134_v53 = vcombine.low %v6752_v10, %v6756_v40  ;;  %v6960_v21 = vld [vmem:[#allocation2 + $0x8c8] sm:$0xff] }
 0x420   :  { %v6964_v3 = vld [vmem:[#allocation2 + $0x8e8] sm:$0xff] }
 0x421   :  { %9964 = vmatpush1.bf16.msra.mxu0 %v12094_v15  ;;  %v6744_v15 = vld [vmem:[#allocation2 + $0x208] sm:$0xff] }
 0x422   :  { %9965 = vmatprep.subr.bf16.mxu0 %v12087_v4  ;;  %v6748_v4 = vld [vmem:[#allocation2 + $0x228] sm:$0xff] }
 0x423   :  { %v12127_v63 = vcombine.high %v6744_v15, %v6748_v4  ;;  %v12126_v54 = vcombine.low %v6744_v15, %v6748_v4  ;;  %v6852_v15 = vld [vmem:[#allocation2 + $0x568] sm:$0xff] }
 0x424   :  { %v6952_v4 = vld [vmem:[#allocation2 + $0x888] sm:$0xff] }
 0x425   :  { %9966 = vmatpush1.bf16.msra.mxu0 %v12086_v22  ;;  %v6992_v22 = vld [vmem:[#allocation2 + $0x9c8] sm:$0xff] }
 0x426   :  { %9967 = vmatprep.subr.bf16.mxu0 %v12079_v38  ;;  %v6996_v38 = vld [vmem:[#allocation2 + $0x9e8] sm:$0xff] }
 0x427   :  { %v12375_v49 = vcombine.high %v6992_v22, %v6996_v38  ;;  %v12374_v1 = vcombine.low %v6992_v22, %v6996_v38  ;;  %v12342_v22 = vcombine.low %v6960_v21, %v6964_v3 }
 0x429   :  { %9968 = vmatpush1.bf16.msra.mxu0 %v12078_v26  ;;  %v6984_v26 = vld [vmem:[#allocation2 + $0x988] sm:$0xff] }
 0x42a   :  { %9969 = vmatprep.subr.bf16.mxu0 %v12071_v28  ;;  %v6988_v28 = vld [vmem:[#allocation2 + $0x9a8] sm:$0xff] }
 0x42b   :  { %v12366_v36 = vcombine.low %v6984_v26, %v6988_v28 }
 0x42d   :  { %9970 = vmatpush1.bf16.msra.mxu0 %v12070_v0  ;;  %v12367_v0 = vcombine.high %v6984_v26, %v6988_v28  ;;  %v6844_v26 = vld [vmem:[#allocation2 + $0x528] sm:$0xff] }
 0x42e   :  { %9971 = vmatprep.subr.bf16.mxu0 %v12063_v47  ;;  %v6976_v47 = vld [vmem:[#allocation2 + $0x948] sm:$0xff] }
 0x42f   :  { %v12359_v27 = vcombine.high %v6976_v47, %v6980_v30  ;;  %v6944_v28 = vld [vmem:[#allocation2 + $0x848] sm:$0xff] }
 0x431   :  { %9972 = vmatpush1.bf16.msra.mxu0 %v12062_v32  ;;  %v6577_v32 = vadd.f32 %v15865_v59, %v6536_v42  ;;  %v12358_v59 = vcombine.low %v6976_v47, %v6980_v30  ;;  %v6948_v42 = vld [vmem:[#allocation2 + $0x868] sm:$0xff] }
 0x432   :  { %9973 = vmatprep.subr.bf16.mxu0 %v12183_v11  ;;  %v12327_v24 = vcombine.high %v6944_v28, %v6948_v42  ;;  %v6836_v47 = vld [vmem:[#allocation2 + $0x4e8] sm:$0xff] }
 0x433   :  { %v6936_v30 = vld [vmem:[#allocation2 + $0x808] sm:$0xff] }
 0x435   :  { %9974 = vmatpush2.bf16.msra.mxu0 %v12182_v43 }
 0x436   :  { %9975 = vmatprep.subr.bf16.mxu0 %v12175_v19 }
 0x439   :  { %9976 = vmatpush2.bf16.msra.mxu0 %v12174_v50  ;;  %v6972_v50 = vld [vmem:[#allocation2 + $0x928] sm:$0xff] }
 0x43a   :  { %9977 = vmatprep.subr.bf16.mxu0 %v12167_v7  ;;  %v12350_v10 = vcombine.low %v6968_v18, %v6972_v50 }
 0x43d   :  { %9978 = vmatpush2.bf16.msra.mxu0 %v12166_v56 }
 0x43e   :  { %9979 = vmatprep.subr.bf16.mxu0 %v12159_v16  ;;  %v12351_v16 = vcombine.high %v6968_v18, %v6972_v50 }
 0x441   :  { %9980 = vmatpush2.bf16.msra.mxu0 %v12158_v5  ;;  %v6856_v5 = vld [vmem:[#allocation2 + $0x588] sm:$0xff] }
 0x442   :  { %9981 = vmatprep.subr.bf16.mxu0 %v12151_v41  ;;  %v6860_v41 = vld [vmem:[#allocation2 + $0x5a8] sm:$0xff] }
 0x443   :  { %v12239_v40 = vcombine.high %v6856_v5, %v6860_v41 }
 0x445   :  { %9982 = vmatpush2.bf16.msra.mxu0 %v12150_v20 }
 0x446   :  { %9983 = vmatprep.subr.bf16.mxu0 %v12143_v52 }
 0x449   :  { %9984 = vmatpush2.bf16.msra.mxu0 %v12142_v48  ;;  %v12343_v48 = vcombine.high %v6960_v21, %v6964_v3  ;;  %v7040_v21 = vld [vmem:[#allocation2 + $0xb48] sm:$0xff] }
 0x44a   :  { %9985 = vmatprep.subr.bf16.mxu0 %v12135_v39  ;;  %v6848_v39 = vld [vmem:[#allocation2 + $0x548] sm:$0xff] }
 0x44b   :  { %v12231_v38 = vcombine.high %v6848_v39, %v6852_v15  ;;  %v7044_v3 = vld [vmem:[#allocation2 + $0xb68] sm:$0xff] }
 0x44d   :  { %9986 = vmatpush2.bf16.msra.mxu0 %v12134_v53  ;;  %v6956_v53 = vld [vmem:[#allocation2 + $0x8a8] sm:$0xff] }
 0x44e   :  { %9987 = vmatprep.subr.bf16.mxu0 %v12127_v63  ;;  %v12238_v63 = vcombine.low %v6856_v5, %v6860_v41  ;;  %v6808_v5 = vld [vmem:[#allocation2 + $0x408] sm:$0xff] }
 0x44f   :  { %v6812_v41 = vld [vmem:[#allocation2 + $0x428] sm:$0xff] }
 0x451   :  { %9988 = vmatpush2.bf16.msra.mxu0 %v12126_v54  ;;  %v12335_v54 = vcombine.high %v6952_v4, %v6956_v53 }
 0x452   :  { %10039 = vmatprep.subr.bf16.mxu0 %v12375_v49  ;;  %v6840_v49 = vld [vmem:[#allocation2 + $0x508] sm:$0xff] }
 0x453   :  { %v12223_v14 = vcombine.high %v6840_v49, %v6844_v26 }
 0x454   :  { %v6615_v13 = vpop.f32.mrf.mxu0  ;;  %9990 = vmatmul.mubr.bf16.vlgmr.msra.gmra.mxu0 %v15832_v23 }
 0x455   :  { %v6616_v11 = vadd.f32 %v6615_v13, %v15863_v2  ;;  %v6656_v34 = vpop.f32.mrf.mxu1  ;;  %10040 = vmatpush1.bf16.msra.mxu0 %v12374_v1  ;;  %10071 = vmatprep.mubr.bf16.mxu0 %v15837_v46  ;;  %v12230_v1 = vcombine.low %v6848_v39, %v6852_v15  ;;  %v6940_v13 = vld [vmem:[#allocation2 + $0x828] sm:$0xff]  ;;  %v12423_v39 = vcombine.high %v7040_v21, %v7044_v3 }
 0x456   :  { %v6617_v43 = vpop.f32.mrf.mxu0  ;;  %10041 = vmatprep.subr.bf16.mxu0 %v12367_v0  ;;  %v12334_v0 = vcombine.low %v6952_v4, %v6956_v53  ;;  %v12318_v18 = vcombine.low %v6936_v30, %v6940_v13  ;;  %v6928_v15 = vld [vmem:[#allocation2 + $0x7c8] sm:$0xff] }
 0x457   :  { %v6657_v60 = vadd.f32 %v6656_v34, %v6616_v11  ;;  %v6618_v19 = vadd.f32 %v6617_v43, %v6577_v32  ;;  %v6658_v45 = vpop.f32.mrf.mxu1  ;;  %v12222_v32 = vcombine.low %v6840_v49, %v6844_v26  ;;  %v12326_v11 = vcombine.low %v6944_v28, %v6948_v42  ;;  %v6824_v43 = vld [vmem:[#allocation2 + $0x488] sm:$0xff] }
 0x458   :  { %v6619_v7 = vpop.f32.mrf.mxu0  ;;  %v6932_v4 = vld [vmem:[#allocation2 + $0x7e8] sm:$0xff] }
 0x459   :  { %v6659_v12 = vadd.f32 %v6658_v45, %v6618_v19  ;;  %v6660_v57 = vpop.f32.mrf.mxu1  ;;  %10042 = vmatpush1.bf16.msra.mxu0 %v12366_v36  ;;  %v6669_v56 = vmax.f32 %v6657_v60, 0.0  ;;  %v12319_v36 = vcombine.high %v6936_v30, %v6940_v13  ;;  %v7056_v60 = vld [vmem:[#allocation2 + $0xbc8] sm:$0xff] }
 0x45a   :  { %v6620_v2 = vpop.f32.mrf.mxu0  ;;  %10043 = vmatprep.subr.bf16.mxu0 %v12359_v27  ;;  %v6828_v27 = vld [vmem:[#allocation2 + $0x4a8] sm:$0xff] }
 0x45b   :  { %v6670_v61 = vmax.f32 %v6659_v12, 0.0  ;;  %v6661_v8 = vpop.f32.mrf.mxu1  ;;  %v15875_v52 = vpack.c.bf16 %v6669_v56, %v6669_v56  ;;  %v7060_v19 = vld [vmem:[#allocation2 + $0xbe8] sm:$0xff]  ;;  %v12207_v50 = vcombine.high %v6824_v43, %v6828_v27  ;;  %v12206_v2 = vcombine.low %v6824_v43, %v6828_v27 }
 0x45c   :  { %v12439_v7 = vcombine.high %v7056_v60, %v7060_v19  ;;  %v6816_v12 = vld [vmem:[#allocation2 + $0x448] sm:$0xff] }
 0x45d   :  { %v15873_v20 = vpack.c.bf16 %v6670_v61, %v6670_v61  ;;  %10044 = vmatpush1.bf16.msra.mxu0 %v12358_v59  ;;  %v6820_v57 = vld [vmem:[#allocation2 + $0x468] sm:$0xff] }
 0x45e   :  { %10045 = vmatprep.subr.bf16.mxu0 %v12351_v16  ;;  %v7048_v59 = vld [vmem:[#allocation2 + $0xb88] sm:$0xff]  ;;  %v12438_v16 = vcombine.low %v7056_v60, %v7060_v19  ;;  %v12199_v61 = vcombine.high %v6816_v12, %v6820_v57 }
 0x45f   :  { %9948 = vmatprep.mubr.bf16.mxu1 %v15873_v20  ;;  %v7052_v56 = vld [vmem:[#allocation2 + $0xba8] sm:$0xff] }
 0x460   :  { %9949 = vmatmul.mubr.bf16.vlgmr.msra.gmra.mxu1 %v15875_v52  ;;  %v12431_v8 = vcombine.high %v7048_v59, %v7052_v56  ;;  %v7032_v53 = vld [vmem:[#allocation2 + $0xb08] sm:$0xff] }
 0x461   :  { %9999 = vmatpush1.bf16.msra.mxu1 %v12246_v31  ;;  %10030 = vmatprep.mubr.bf16.mxu1 %v15805_v33  ;;  %v6832_v31 = vld [vmem:[#allocation2 + $0x4c8] sm:$0xff] }
 0x462   :  { %10046 = vmatpush1.bf16.msra.mxu0 %v12350_v10  ;;  %10000 = vmatprep.subr.bf16.mxu1 %v12239_v40  ;;  %v12215_v34 = vcombine.high %v6832_v31, %v6836_v47  ;;  %v12214_v45 = vcombine.low %v6832_v31, %v6836_v47  ;;  %v12198_v10 = vcombine.low %v6816_v12, %v6820_v57  ;;  %v6920_v26 = vld [vmem:[#allocation2 + $0x788] sm:$0xff] }
 0x463   :  { %10047 = vmatprep.subr.bf16.mxu0 %v12343_v48  ;;  %v12430_v40 = vcombine.low %v7048_v59, %v7052_v56  ;;  %v12191_v48 = vcombine.high %v6808_v5, %v6812_v41  ;;  %v6924_v28 = vld [vmem:[#allocation2 + $0x7a8] sm:$0xff] }
 0x464   :  { %v7024_v42 = vld [vmem:[#allocation2 + $0xac8] sm:$0xff] }
 0x465   :  { %10001 = vmatpush1.bf16.msra.mxu1 %v12238_v63  ;;  %v7036_v63 = vld [vmem:[#allocation2 + $0xb28] sm:$0xff] }
 0x466   :  { %10048 = vmatpush1.bf16.msra.mxu0 %v12342_v22  ;;  %10002 = vmatprep.subr.bf16.mxu1 %v12231_v38  ;;  %v12190_v22 = vcombine.low %v6808_v5, %v6812_v41  ;;  %v12422_v38 = vcombine.low %v7040_v21, %v7044_v3  ;;  %v12415_v49 = vcombine.high %v7032_v53, %v7036_v63  ;;  %v6912_v47 = vld [vmem:[#allocation2 + $0x748] sm:$0xff]  ;;  %v6737_v3 = vld [vmem:[#allocation2 + $0x1d0] sm:$0xff] }
 0x467   :  { %10049 = vmatprep.subr.bf16.mxu0 %v12335_v54  ;;  %v12311_v54 = vcombine.high %v6928_v15, %v6932_v4  ;;  %v6916_v30 = vld [vmem:[#allocation2 + $0x768] sm:$0xff] }
 0x468   :  { %v7016_v13 = vld [vmem:[#allocation2 + $0xa88] sm:$0xff] }
 0x469   :  { %10003 = vmatpush1.bf16.msra.mxu1 %v12230_v1  ;;  %v7028_v1 = vld [vmem:[#allocation2 + $0xae8] sm:$0xff] }
 0x46a   :  { %10050 = vmatpush1.bf16.msra.mxu0 %v12334_v0  ;;  %10004 = vmatprep.subr.bf16.mxu1 %v12223_v14  ;;  %v12310_v0 = vcombine.low %v6928_v15, %v6932_v4  ;;  %v12414_v14 = vcombine.low %v7032_v53, %v7036_v63  ;;  %v12407_v31 = vcombine.high %v7024_v42, %v7028_v1  ;;  %v6904_v27 = vld [vmem:[#allocation2 + $0x708] sm:$0xff]  ;;  %v7191_v15 = vld [vmem:[%s16180_s4] sm:$0xff] }
 0x46b   :  { %10051 = vmatprep.subr.bf16.mxu0 %v12327_v24  ;;  %v12303_v24 = vcombine.high %v6920_v26, %v6924_v28  ;;  %v6908_v60 = vld [vmem:[#allocation2 + $0x728] sm:$0xff] }
 0x46c   :  { %v7008_v19 = vld [vmem:[#allocation2 + $0xa48] sm:$0xff] }
 0x46d   :  { %10005 = vmatpush1.bf16.msra.mxu1 %v12222_v32  ;;  %v7020_v32 = vld [vmem:[#allocation2 + $0xaa8] sm:$0xff] }
 0x46e   :  { %10052 = vmatpush1.bf16.msra.mxu0 %v12326_v11  ;;  %10006 = vmatprep.subr.bf16.mxu1 %v12215_v34  ;;  %v12302_v11 = vcombine.low %v6920_v26, %v6924_v28  ;;  %v12406_v34 = vcombine.low %v7024_v42, %v7028_v1  ;;  %v12399_v43 = vcombine.high %v7016_v13, %v7020_v32  ;;  %v6896_v57 = vld [vmem:[#allocation2 + $0x6c8] sm:$0xff] }
 0x46f   :  { %10053 = vmatprep.subr.bf16.mxu0 %v12319_v36  ;;  %v12295_v36 = vcombine.high %v6912_v47, %v6916_v30  ;;  %v6900_v59 = vld [vmem:[#allocation2 + $0x6e8] sm:$0xff]  ;;  %v7200_v28 = vrot.slane %v7191_v15, %v952_v44 }
 0x470   :  { %v7000_v56 = vld [vmem:[#allocation2 + $0xa08] sm:$0xff] }
 0x471   :  { %10007 = vmatpush1.bf16.msra.mxu1 %v12214_v45  ;;  %v7012_v45 = vld [vmem:[#allocation2 + $0xa68] sm:$0xff] }
 0x472   :  { %10054 = vmatpush1.bf16.msra.mxu0 %v12318_v18  ;;  %10008 = vmatprep.subr.bf16.mxu1 %v12207_v50  ;;  %v12294_v18 = vcombine.low %v6912_v47, %v6916_v30  ;;  %v12398_v50 = vcombine.low %v7016_v13, %v7020_v32  ;;  %v12391_v12 = vcombine.high %v7008_v19, %v7012_v45  ;;  %v6888_v41 = vld [vmem:[#allocation2 + $0x688] sm:$0xff]  ;;  %v6725_v47 = vld [vmem:[#allocation2 + $0x170] sm:$0xff] }
 0x473   :  { %10055 = vmatprep.subr.bf16.mxu0 %v12439_v7  ;;  %v12287_v7 = vcombine.high %v6904_v27, %v6908_v60  ;;  %v6892_v21 = vld [vmem:[#allocation2 + $0x6a8] sm:$0xff] }
 0x474   :  { %v6880_v53 = vld [vmem:[#allocation2 + $0x648] sm:$0xff] }
 0x475   :  { %10009 = vmatpush1.bf16.msra.mxu1 %v12206_v2  ;;  %v7004_v2 = vld [vmem:[#allocation2 + $0xa28] sm:$0xff] }
 0x476   :  { %10056 = vmatpush2.bf16.msra.mxu0 %v12438_v16  ;;  %10010 = vmatprep.subr.bf16.mxu1 %v12199_v61  ;;  %v12286_v16 = vcombine.low %v6904_v27, %v6908_v60  ;;  %v12390_v61 = vcombine.low %v7008_v19, %v7012_v45  ;;  %v12383_v5 = vcombine.high %v7000_v56, %v7004_v2  ;;  %v6884_v63 = vld [vmem:[#allocation2 + $0x668] sm:$0xff] }
 0x477   :  { %10057 = vmatprep.subr.bf16.mxu0 %v12431_v8  ;;  %v12279_v8 = vcombine.high %v6896_v57, %v6900_v59  ;;  %v12263_v42 = vcombine.high %v6880_v53, %v6884_v63  ;;  %v7120_v60 = vld [vmem:[#allocation2 + $0xdc8] sm:$0xff] }
 0x478   :  { %v7124_v19 = vld [vmem:[#allocation2 + $0xde8] sm:$0xff] }
 0x479   :  { %10011 = vmatpush1.bf16.msra.mxu1 %v12198_v10  ;;  %v6741_v10 = vld [vmem:[#allocation2 + $0x1f0] sm:$0xff] }
 0x47a   :  { %10058 = vmatpush2.bf16.msra.mxu0 %v12430_v40  ;;  %10012 = vmatprep.subr.bf16.mxu1 %v12191_v48  ;;  %v12278_v40 = vcombine.low %v6896_v57, %v6900_v59  ;;  %v12382_v48 = vcombine.low %v7000_v56, %v7004_v2  ;;  %v12121_v4 = vcombine.high %v6737_v3, %v6741_v10 }
 0x47b   :  { %10059 = vmatprep.subr.bf16.mxu0 %v12423_v39  ;;  %v12271_v39 = vcombine.high %v6888_v41, %v6892_v21  ;;  %v12120_v26 = vcombine.low %v6737_v3, %v6741_v10  ;;  %v12503_v2 = vcombine.high %v7120_v60, %v7124_v19  ;;  %v12502_v3 = vcombine.low %v7120_v60, %v7124_v19  ;;  %v6805_v60 = vld [vmem:[#allocation2 + $0x3f0] sm:$0xff] }
 0x47d   :  { %10013 = vmatpush1.bf16.msra.mxu1 %v12190_v22  ;;  %v6729_v22 = vld [vmem:[#allocation2 + $0x190] sm:$0xff] }
 0x47e   :  { %10060 = vmatpush2.bf16.msra.mxu0 %v12422_v38  ;;  %10014 = vmatprep.subr.bf16.mxu1 %v12311_v54  ;;  %v6733_v38 = vld [vmem:[#allocation2 + $0x1b0] sm:$0xff]  ;;  %v12270_v54 = vcombine.low %v6888_v41, %v6892_v21 }
 0x47f   :  { %10061 = vmatprep.subr.bf16.mxu0 %v12415_v49  ;;  %v7196_v49 = vrot.slane %v7191_v15, %v948_v35  ;;  %v12113_v1 = vcombine.high %v6729_v22, %v6733_v38  ;;  %v12262_v35 = vcombine.low %v6880_v53, %v6884_v63  ;;  %v6705_v41 = vld [vmem:[#allocation2 + $0xd0] sm:$0xff]  ;;  %v7108_v15 = vld [vmem:[#allocation2 + $0xd68] sm:$0xff] }
 0x480   :  { %v6709_v21 = vld [vmem:[#allocation2 + $0xf0] sm:$0xff] }
 0x481   :  { %10015 = vmatpush2.bf16.msra.mxu1 %v12310_v0  ;;  %v6872_v0 = vld [vmem:[#allocation2 + $0x608] sm:$0xff]  ;;  %v6701_v53 = vld [vmem:[#allocation2 + $0xb0] sm:$0xff] }
 0x482   :  { %10062 = vmatpush2.bf16.msra.mxu0 %v12414_v14  ;;  %10016 = vmatprep.subr.bf16.mxu1 %v12303_v24  ;;  %v6876_v14 = vld [vmem:[#allocation2 + $0x628] sm:$0xff] }
 0x483   :  { %10063 = vmatprep.subr.bf16.mxu0 %v12407_v31  ;;  %v6721_v31 = vld [vmem:[#allocation2 + $0x150] sm:$0xff]  ;;  %v12254_v57 = vcombine.low %v6872_v0, %v6876_v14 }
 0x484   :  { %v12105_v27 = vcombine.high %v6721_v31, %v6725_v47  ;;  %v12104_v56 = vcombine.low %v6721_v31, %v6725_v47  ;;  %v7088_v31 = vld [vmem:[#allocation2 + $0xcc8] sm:$0xff] }
 0x485   :  { %10017 = vmatpush2.bf16.msra.mxu1 %v12302_v11  ;;  %v12112_v11 = vcombine.low %v6729_v22, %v6733_v38  ;;  %v12088_v22 = vcombine.low %v6705_v41, %v6709_v21  ;;  %v7092_v47 = vld [vmem:[#allocation2 + $0xce8] sm:$0xff] }
 0x486   :  { %10064 = vmatpush2.bf16.msra.mxu0 %v12406_v34  ;;  %10018 = vmatprep.subr.bf16.mxu1 %v12295_v36  ;;  %v12255_v34 = vcombine.high %v6872_v0, %v6876_v14  ;;  %v12470_v19 = vcombine.low %v7088_v31, %v7092_v47 }
 0x487   :  { %10065 = vmatprep.subr.bf16.mxu0 %v12399_v43 }
 0x489   :  { %10019 = vmatpush2.bf16.msra.mxu1 %v12294_v18  ;;  %v6713_v18 = vld [vmem:[#allocation2 + $0x110] sm:$0xff] }
 0x48a   :  { %10066 = vmatpush2.bf16.msra.mxu0 %v12398_v50  ;;  %10020 = vmatprep.subr.bf16.mxu1 %v12287_v7  ;;  %v6717_v50 = vld [vmem:[#allocation2 + $0x130] sm:$0xff] }
 0x48b   :  { %10067 = vmatprep.subr.bf16.mxu0 %v12391_v12  ;;  %v12096_v10 = vcombine.low %v6713_v18, %v6717_v50 }
 0x48d   :  { %10021 = vmatpush2.bf16.msra.mxu1 %v12286_v16 }
 0x48e   :  { %10068 = vmatpush2.bf16.msra.mxu0 %v12390_v61  ;;  %10022 = vmatprep.subr.bf16.mxu1 %v12279_v8  ;;  %v12097_v61 = vcombine.high %v6713_v18, %v6717_v50  ;;  %v7112_v8 = vld [vmem:[#allocation2 + $0xd88] sm:$0xff] }
 0x48f   :  { %10069 = vmatprep.subr.bf16.mxu0 %v12383_v5  ;;  %v7116_v5 = vld [vmem:[#allocation2 + $0xda8] sm:$0xff] }
 0x490   :  { %v12494_v63 = vcombine.low %v7112_v8, %v7116_v5 }
 0x491   :  { %10023 = vmatpush2.bf16.msra.mxu1 %v12278_v40  ;;  %v12495_v40 = vcombine.high %v7112_v8, %v7116_v5  ;;  %v7064_v5 = vld [vmem:[#allocation2 + $0xc08] sm:$0xff] }
 0x492   :  { %10070 = vmatpush2.bf16.msra.mxu0 %v12382_v48  ;;  %10024 = vmatprep.subr.bf16.mxu1 %v12271_v39  ;;  %v12089_v48 = vcombine.high %v6705_v41, %v6709_v21  ;;  %v7104_v39 = vld [vmem:[#allocation2 + $0xd48] sm:$0xff]  ;;  %v6785_v21 = vld [vmem:[#allocation2 + $0x350] sm:$0xff] }
 0x493   :  { %10121 = vmatprep.subr.bf16.mxu0 %v12121_v4  ;;  %v6697_v4 = vld [vmem:[#allocation2 + $0x90] sm:$0xff]  ;;  %v12487_v38 = vcombine.high %v7104_v39, %v7108_v15  ;;  %v7068_v41 = vld [vmem:[#allocation2 + $0xc28] sm:$0xff] }
 0x494   :  { %v9827_v24 = vpop.f32.mrf.mxu0  ;;  %v12080_v0 = vcombine.low %v6697_v4, %v6701_v53 }
 0x495   :  { %v9828_v30 = vadd.f32 %v9827_v24, %v7196_v49  ;;  %v9868_v13 = vpop.f32.mrf.mxu1  ;;  %10025 = vmatpush2.bf16.msra.mxu1 %v12270_v54  ;;  %10072 = vmatmul.mubr.bf16.vlgmr.msra.gmra.mxu0 %v15856_v58  ;;  %v12081_v54 = vcombine.high %v6697_v4, %v6701_v53  ;;  %v7096_v49 = vld [vmem:[#allocation2 + $0xd08] sm:$0xff]  ;;  %v6777_v53 = vld [vmem:[#allocation2 + $0x310] sm:$0xff] }
 0x496   :  { %10122 = vmatpush1.bf16.msra.mxu0 %v12120_v26  ;;  %10153 = vmatprep.mubr.bf16.mxu0 %v15802_v51  ;;  %v9829_v32 = vpop.f32.mrf.mxu0  ;;  %v7100_v26 = vld [vmem:[#allocation2 + $0xd28] sm:$0xff] }
 0x497   :  { %v15892_v44 = vadd.f32 %v9868_v13, %v9828_v30  ;;  %v9830_v36 = vadd.f32 %v9829_v32, %v7200_v28  ;;  %v9870_v43 = vpop.f32.mrf.mxu1  ;;  %10026 = vmatprep.subr.bf16.mxu1 %v12263_v42  ;;  %10123 = vmatprep.subr.bf16.mxu0 %v12113_v1  ;;  %v6689_v28 = vld [vmem:[#allocation2 + $0x50] sm:$0xff]  ;;  %v12486_v1 = vcombine.low %v7104_v39, %v7108_v15  ;;  %v7184_v15 = vld [vmem:[#allocation2 + $0xfc8] sm:$0xff] }
 0x498   :  { %v9831_v45 = vpop.f32.mrf.mxu0  ;;  %v6693_v42 = vld [vmem:[#allocation2 + $0x70] sm:$0xff]  ;;  %v12479_v14 = vcombine.high %v7096_v49, %v7100_v26  ;;  %v7188_v4 = vld [vmem:[#allocation2 + $0xfe8] sm:$0xff] }
 0x499   :  { %v15894_v7 = vadd.f32 %v9870_v43, %v9830_v36  ;;  %v9872_v12 = vpop.f32.mrf.mxu1  ;;  %10027 = vmatpush2.bf16.msra.mxu1 %v12262_v35  ;;  %v12073_v24 = vcombine.high %v6689_v28, %v6693_v42  ;;  %v6681_v30 = vld [vmem:[#allocation2 + $0x10] sm:$0xff]  ;;  %v12478_v35 = vcombine.low %v7096_v49, %v7100_v26  ;;  %v12072_v32 = vcombine.low %v6689_v28, %v6693_v42  ;;  %v7080_v36 = vld [vmem:[#allocation2 + $0xc88] sm:$0xff] }
 0x49a   :  { %10124 = vmatpush1.bf16.msra.mxu0 %v12112_v11  ;;  %v9832_v59 = vpop.f32.mrf.mxu0  ;;  %10028 = vmatprep.subr.bf16.mxu1 %v12255_v34  ;;  %v6685_v13 = vld [vmem:[#allocation2 + $0x30] sm:$0xff]  ;;  %v12471_v11 = vcombine.high %v7088_v31, %v7092_v47  ;;  %v7084_v43 = vld [vmem:[#allocation2 + $0xca8] sm:$0xff] }
 0x49b   :  { %v9873_v16 = vpop.f32.mrf.mxu1  ;;  %10125 = vmatprep.subr.bf16.mxu0 %v12105_v27  ;;  %v12065_v34 = vcombine.high %v6681_v30, %v6685_v13  ;;  %v6801_v27 = vld [vmem:[#allocation2 + $0x3d0] sm:$0xff]  ;;  %v12064_v45 = vcombine.low %v6681_v30, %v6685_v13  ;;  %v12463_v18 = vcombine.high %v7080_v36, %v7084_v43  ;;  %v7072_v12 = vld [vmem:[#allocation2 + $0xc48] sm:$0xff] }
 0x49c   :  { %v12185_v50 = vcombine.high %v6801_v27, %v6805_v60  ;;  %v6793_v59 = vld [vmem:[#allocation2 + $0x390] sm:$0xff]  ;;  %v12184_v16 = vcombine.low %v6801_v27, %v6805_v60  ;;  %v7176_v26 = vld [vmem:[#allocation2 + $0xf88] sm:$0xff] }
 0x49d   :  { %10029 = vmatpush2.bf16.msra.mxu1 %v12254_v57  ;;  %v7076_v57 = vld [vmem:[#allocation2 + $0xc68] sm:$0xff]  ;;  %v6769_v42 = vld [vmem:[#allocation2 + $0x2d0] sm:$0xff] }
 0x49e   :  { %10126 = vmatpush1.bf16.msra.mxu0 %v12104_v56  ;;  %10080 = vmatprep.subr.bf16.mxu1 %v12503_v2  ;;  %v6797_v56 = vld [vmem:[#allocation2 + $0x3b0] sm:$0xff]  ;;  %v12462_v2 = vcombine.low %v7080_v36, %v7084_v43  ;;  %v7180_v28 = vld [vmem:[#allocation2 + $0xfa8] sm:$0xff] }
 0x49f   :  { %10127 = vmatprep.subr.bf16.mxu0 %v12097_v61  ;;  %v12455_v61 = vcombine.high %v7072_v12, %v7076_v57  ;;  %v12177_v8 = vcombine.high %v6793_v59, %v6797_v56  ;;  %v7168_v47 = vld [vmem:[#allocation2 + $0xf48] sm:$0xff]  ;;  %v6761_v13 = vld [vmem:[#allocation2 + $0x290] sm:$0xff] }
 0x4a0   :  { %10031 = vmatmul.mubr.bf16.vlgmr.msra.gmra.mxu1 %v15834_v37  ;;  %v7172_v30 = vld [vmem:[#allocation2 + $0xf68] sm:$0xff]  ;;  %v6753_v60 = vld [vmem:[#allocation2 + $0x250] sm:$0xff] }
 0x4a1   :  { %10081 = vmatpush1.bf16.msra.mxu1 %v12502_v3  ;;  %10112 = vmatprep.mubr.bf16.mxu1 %v15873_v20  ;;  %v6789_v3 = vld [vmem:[#allocation2 + $0x370] sm:$0xff]  ;;  %v7160_v43 = vld [vmem:[#allocation2 + $0xf08] sm:$0xff] }
 0x4a2   :  { %10128 = vmatpush1.bf16.msra.mxu0 %v12096_v10  ;;  %10082 = vmatprep.subr.bf16.mxu1 %v12495_v40  ;;  %v12454_v10 = vcombine.low %v7072_v12, %v7076_v57  ;;  %v12176_v40 = vcombine.low %v6793_v59, %v6797_v56  ;;  %v12169_v39 = vcombine.high %v6785_v21, %v6789_v3  ;;  %v7164_v27 = vld [vmem:[#allocation2 + $0xf28] sm:$0xff]  ;;  %v6745_v56 = vld [vmem:[#allocation2 + $0x210] sm:$0xff] }
 0x4a3   :  { %10129 = vmatprep.subr.bf16.mxu0 %v12089_v48  ;;  %v12447_v48 = vcombine.high %v7064_v5, %v7068_v41  ;;  %v7152_v57 = vld [vmem:[#allocation2 + $0xec8] sm:$0xff] }
 0x4a4   :  { %v7156_v59 = vld [vmem:[#allocation2 + $0xee8] sm:$0xff] }
 0x4a5   :  { %10083 = vmatpush1.bf16.msra.mxu1 %v12494_v63  ;;  %v6781_v63 = vld [vmem:[#allocation2 + $0x330] sm:$0xff] }
 0x4a6   :  { %10130 = vmatpush1.bf16.msra.mxu0 %v12088_v22  ;;  %10084 = vmatprep.subr.bf16.mxu1 %v12487_v38  ;;  %v12446_v22 = vcombine.low %v7064_v5, %v7068_v41  ;;  %v12168_v38 = vcombine.low %v6785_v21, %v6789_v3  ;;  %v12161_v49 = vcombine.high %v6777_v53, %v6781_v63  ;;  %v7144_v41 = vld [vmem:[#allocation2 + $0xe88] sm:$0xff]  ;;  %v6993_v3 = vld [vmem:[#allocation2 + $0x9d0] sm:$0xff] }
 0x4a7   :  { %10131 = vmatprep.subr.bf16.mxu0 %v12081_v54  ;;  %v12567_v54 = vcombine.high %v7184_v15, %v7188_v4  ;;  %v7148_v21 = vld [vmem:[#allocation2 + $0xea8] sm:$0xff] }
 0x4a9   :  { %10085 = vmatpush1.bf16.msra.mxu1 %v12486_v1  ;;  %v6773_v1 = vld [vmem:[#allocation2 + $0x2f0] sm:$0xff] }
 0x4aa   :  { %10132 = vmatpush1.bf16.msra.mxu0 %v12080_v0  ;;  %10086 = vmatprep.subr.bf16.mxu1 %v12479_v14  ;;  %v12566_v0 = vcombine.low %v7184_v15, %v7188_v4  ;;  %v12160_v14 = vcombine.low %v6777_v53, %v6781_v63  ;;  %v12153_v31 = vcombine.high %v6769_v42, %v6773_v1  ;;  %v7136_v4 = vld [vmem:[#allocation2 + $0xe48] sm:$0xff]  ;;  %v6985_v63 = vld [vmem:[#allocation2 + $0x990] sm:$0xff] }
 0x4ab   :  { %10133 = vmatprep.subr.bf16.mxu0 %v12073_v24  ;;  %v12559_v24 = vcombine.high %v7176_v26, %v7180_v28  ;;  %v7140_v53 = vld [vmem:[#allocation2 + $0xe68] sm:$0xff] }
 0x4ad   :  { %10087 = vmatpush1.bf16.msra.mxu1 %v12478_v35  ;;  %v6765_v35 = vld [vmem:[#allocation2 + $0x2b0] sm:$0xff] }
 0x4ae   :  { %10134 = vmatpush1.bf16.msra.mxu0 %v12072_v32  ;;  %10088 = vmatprep.subr.bf16.mxu1 %v12471_v11  ;;  %v12558_v32 = vcombine.low %v7176_v26, %v7180_v28  ;;  %v12152_v11 = vcombine.low %v6769_v42, %v6773_v1  ;;  %v12145_v36 = vcombine.high %v6761_v13, %v6765_v35  ;;  %v7128_v28 = vld [vmem:[#allocation2 + $0xe08] sm:$0xff] }
 0x4af   :  { %10135 = vmatprep.subr.bf16.mxu0 %v12065_v34  ;;  %v12551_v34 = vcombine.high %v7168_v47, %v7172_v30  ;;  %v7132_v42 = vld [vmem:[#allocation2 + $0xe28] sm:$0xff] }
 0x4b1   :  { %10089 = vmatpush1.bf16.msra.mxu1 %v12470_v19  ;;  %v6757_v19 = vld [vmem:[#allocation2 + $0x270] sm:$0xff] }
 0x4b2   :  { %10136 = vmatpush1.bf16.msra.mxu0 %v12064_v45  ;;  %10090 = vmatprep.subr.bf16.mxu1 %v12463_v18  ;;  %v12550_v45 = vcombine.low %v7168_v47, %v7172_v30  ;;  %v12144_v18 = vcombine.low %v6761_v13, %v6765_v35  ;;  %v12137_v12 = vcombine.high %v6753_v60, %v6757_v19 }
 0x4b3   :  { %10137 = vmatprep.subr.bf16.mxu0 %v12185_v50  ;;  %v12543_v50 = vcombine.high %v7160_v43, %v7164_v27  ;;  %v12511_v13 = vcombine.high %v7128_v28, %v7132_v42 }
 0x4b5   :  { %10091 = vmatpush1.bf16.msra.mxu1 %v12462_v2  ;;  %v6749_v2 = vld [vmem:[#allocation2 + $0x230] sm:$0xff] }
 0x4b6   :  { %10138 = vmatpush2.bf16.msra.mxu0 %v12184_v16  ;;  %10092 = vmatprep.subr.bf16.mxu1 %v12455_v61  ;;  %v12542_v16 = vcombine.low %v7160_v43, %v7164_v27  ;;  %v12136_v61 = vcombine.low %v6753_v60, %v6757_v19  ;;  %v12129_v5 = vcombine.high %v6745_v56, %v6749_v2  ;;  %v6973_v43 = vld [vmem:[#allocation2 + $0x930] sm:$0xff] }
 0x4b7   :  { %10139 = vmatprep.subr.bf16.mxu0 %v12177_v8  ;;  %v12535_v8 = vcombine.high %v7152_v57, %v7156_v59  ;;  %v12510_v27 = vcombine.low %v7128_v28, %v7132_v42  ;;  %v6941_v28 = vld [vmem:[#allocation2 + $0x830] sm:$0xff] }
 0x4b9   :  { %10093 = vmatpush1.bf16.msra.mxu1 %v12454_v10  ;;  %v6997_v10 = vld [vmem:[#allocation2 + $0x9f0] sm:$0xff] }
 0x4ba   :  { %10140 = vmatpush2.bf16.msra.mxu0 %v12176_v40  ;;  %10094 = vmatprep.subr.bf16.mxu1 %v12447_v48  ;;  %v12534_v40 = vcombine.low %v7152_v57, %v7156_v59  ;;  %v12128_v48 = vcombine.low %v6745_v56, %v6749_v2  ;;  %v12377_v15 = vcombine.high %v6993_v3, %v6997_v10  ;;  %v6965_v57 = vld [vmem:[#allocation2 + $0x8f0] sm:$0xff] }
 0x4bb   :  { %10141 = vmatprep.subr.bf16.mxu0 %v12169_v39  ;;  %v12527_v39 = vcombine.high %v7144_v41, %v7148_v21 }
 0x4bd   :  { %10095 = vmatpush1.bf16.msra.mxu1 %v12446_v22  ;;  %v6989_v22 = vld [vmem:[#allocation2 + $0x9b0] sm:$0xff] }
 0x4be   :  { %10142 = vmatpush2.bf16.msra.mxu0 %v12168_v38  ;;  %10096 = vmatprep.subr.bf16.mxu1 %v12567_v54  ;;  %v12526_v38 = vcombine.low %v7144_v41, %v7148_v21  ;;  %v12376_v54 = vcombine.low %v6993_v3, %v6997_v10  ;;  %v12369_v26 = vcombine.high %v6985_v63, %v6989_v22  ;;  %v6957_v41 = vld [vmem:[#allocation2 + $0x8b0] sm:$0xff] }
 0x4bf   :  { %10143 = vmatprep.subr.bf16.mxu0 %v12161_v49  ;;  %v12519_v49 = vcombine.high %v7136_v4, %v7140_v53  ;;  %v12368_v30 = vcombine.low %v6985_v63, %v6989_v22 }
 0x4c1   :  { %10097 = vmatpush2.bf16.msra.mxu1 %v12566_v0  ;;  %v6977_v0 = vld [vmem:[#allocation2 + $0x950] sm:$0xff] }
 0x4c2   :  { %10144 = vmatpush2.bf16.msra.mxu0 %v12160_v14  ;;  %10098 = vmatprep.subr.bf16.mxu1 %v12559_v24  ;;  %v6981_v14 = vld [vmem:[#allocation2 + $0x970] sm:$0xff] }
 0x4c3   :  { %10145 = vmatprep.subr.bf16.mxu0 %v12153_v31  ;;  %v12518_v31 = vcombine.low %v7136_v4, %v7140_v53  ;;  %v12360_v19 = vcombine.low %v6977_v0, %v6981_v14  ;;  %v6949_v4 = vld [vmem:[#allocation2 + $0x870] sm:$0xff] }
 0x4c5   :  { %10099 = vmatpush2.bf16.msra.mxu1 %v12558_v32  ;;  %v12361_v32 = vcombine.high %v6977_v0, %v6981_v14 }
 0x4c6   :  { %10146 = vmatpush2.bf16.msra.mxu0 %v12152_v11  ;;  %10100 = vmatprep.subr.bf16.mxu1 %v12551_v34  ;;  %v6865_v11 = vld [vmem:[#allocation2 + $0x5d0] sm:$0xff] }
 0x4c7   :  { %10147 = vmatprep.subr.bf16.mxu0 %v12145_v36  ;;  %v6869_v34 = vld [vmem:[#allocation2 + $0x5f0] sm:$0xff] }
 0x4c8   :  { %v6969_v36 = vld [vmem:[#allocation2 + $0x910] sm:$0xff]  ;;  %v12248_v59 = vcombine.low %v6865_v11, %v6869_v34 }
 0x4c9   :  { %10101 = vmatpush2.bf16.msra.mxu1 %v12550_v45  ;;  %v12249_v45 = vcombine.high %v6865_v11, %v6869_v34  ;;  %v12352_v56 = vcombine.low %v6969_v36, %v6973_v43 }
 0x4ca   :  { %10148 = vmatpush2.bf16.msra.mxu0 %v12144_v18  ;;  %10102 = vmatprep.subr.bf16.mxu1 %v12543_v50  ;;  %v12353_v18 = vcombine.high %v6969_v36, %v6973_v43  ;;  %v6857_v50 = vld [vmem:[#allocation2 + $0x590] sm:$0xff] }
 0x4cb   :  { %10149 = vmatprep.subr.bf16.mxu0 %v12137_v12  ;;  %v6961_v12 = vld [vmem:[#allocation2 + $0x8d0] sm:$0xff] }
 0x4cc   :  { %v12344_v3 = vcombine.low %v6961_v12, %v6965_v57  ;;  %v6817_v36 = vld [vmem:[#allocation2 + $0x450] sm:$0xff] }
 0x4cd   :  { %10103 = vmatpush2.bf16.msra.mxu1 %v12542_v16  ;;  %v12345_v16 = vcombine.high %v6961_v12, %v6965_v57  ;;  %v6821_v43 = vld [vmem:[#allocation2 + $0x470] sm:$0xff] }
 0x4ce   :  { %10150 = vmatpush2.bf16.msra.mxu0 %v12136_v61  ;;  %10104 = vmatprep.subr.bf16.mxu1 %v12535_v8  ;;  %v6849_v61 = vld [vmem:[#allocation2 + $0x550] sm:$0xff] }
 0x4cf   :  { %10151 = vmatprep.subr.bf16.mxu0 %v12129_v5  ;;  %v6853_v8 = vld [vmem:[#allocation2 + $0x570] sm:$0xff] }
 0x4d0   :  { %v6953_v5 = vld [vmem:[#allocation2 + $0x890] sm:$0xff]  ;;  %v12233_v10 = vcombine.high %v6849_v61, %v6853_v8  ;;  %v12232_v53 = vcombine.low %v6849_v61, %v6853_v8 }
 0x4d1   :  { %10105 = vmatpush2.bf16.msra.mxu1 %v12534_v40  ;;  %v12337_v40 = vcombine.high %v6953_v5, %v6957_v41  ;;  %v12336_v63 = vcombine.low %v6953_v5, %v6957_v41  ;;  %v6813_v12 = vld [vmem:[#allocation2 + $0x430] sm:$0xff] }
 0x4d2   :  { %10152 = vmatpush2.bf16.msra.mxu0 %v12128_v48  ;;  %10106 = vmatprep.subr.bf16.mxu1 %v12527_v39  ;;  %v6841_v48 = vld [vmem:[#allocation2 + $0x510] sm:$0xff] }
 0x4d3   :  { %10203 = vmatprep.subr.bf16.mxu0 %v12377_v15  ;;  %v6845_v39 = vld [vmem:[#allocation2 + $0x530] sm:$0xff] }
 0x4d4   :  { %v9909_v1 = vpop.f32.mrf.mxu0  ;;  %v6945_v15 = vld [vmem:[#allocation2 + $0x850] sm:$0xff]  ;;  %v12225_v22 = vcombine.high %v6841_v48, %v6845_v39  ;;  %v12224_v42 = vcombine.low %v6841_v48, %v6845_v39 }
 0x4d5   :  { %v15899_v24 = vadd.f32 %v9909_v1, %v15892_v44  ;;  %10107 = vmatpush2.bf16.msra.mxu1 %v12526_v38  ;;  %10154 = vmatmul.mubr.bf16.vlgmr.msra.gmra.mxu0 %v15832_v23  ;;  %v12329_v38 = vcombine.high %v6945_v15, %v6949_v4  ;;  %v12328_v1 = vcombine.low %v6945_v15, %v6949_v4  ;;  %v7041_v57 = vld [vmem:[#allocation2 + $0xb50] sm:$0xff] }
 0x4d6   :  { %10204 = vmatpush1.bf16.msra.mxu0 %v12376_v54  ;;  %10235 = vmatprep.mubr.bf16.mxu0 %v15837_v46  ;;  %v9911_v47 = vpop.f32.mrf.mxu0  ;;  %v6833_v54 = vld [vmem:[#allocation2 + $0x4d0] sm:$0xff] }
 0x4d7   :  { %v15904_v35 = vadd.f32 %v9911_v47, %v15894_v7  ;;  %10108 = vmatprep.subr.bf16.mxu1 %v12519_v49  ;;  %10205 = vmatprep.subr.bf16.mxu0 %v12369_v26  ;;  %v6861_v7 = vld [vmem:[#allocation2 + $0x5b0] sm:$0xff] }
 0x4d8   :  { %v9913_v44 = vpop.f32.mrf.mxu0  ;;  %v12241_v2 = vcombine.high %v6857_v50, %v6861_v7  ;;  %v12240_v21 = vcombine.low %v6857_v50, %v6861_v7  ;;  %v6837_v49 = vld [vmem:[#allocation2 + $0x4f0] sm:$0xff] }
 0x4d9   :  { %10109 = vmatpush2.bf16.msra.mxu1 %v12518_v31  ;;  %v6937_v26 = vld [vmem:[#allocation2 + $0x810] sm:$0xff]  ;;  %v12217_v0 = vcombine.high %v6833_v54, %v6837_v49 }
 0x4da   :  { %10206 = vmatpush1.bf16.msra.mxu0 %v12368_v30  ;;  %v9914_v60 = vpop.f32.mrf.mxu0  ;;  %10110 = vmatprep.subr.bf16.mxu1 %v12511_v13  ;;  %v12321_v14 = vcombine.high %v6937_v26, %v6941_v28  ;;  %v6825_v31 = vld [vmem:[#allocation2 + $0x490] sm:$0xff]  ;;  %v12320_v11 = vcombine.low %v6937_v26, %v6941_v28 }
 0x4db   :  { %10207 = vmatprep.subr.bf16.mxu0 %v12361_v32  ;;  %v6829_v47 = vld [vmem:[#allocation2 + $0x4b0] sm:$0xff]  ;;  %v12216_v32 = vcombine.low %v6833_v54, %v6837_v49 }
 0x4dc   :  { %v7057_v30 = vld [vmem:[#allocation2 + $0xbd0] sm:$0xff]  ;;  %v12209_v34 = vcombine.high %v6825_v31, %v6829_v47 }
 0x4dd   :  { %10111 = vmatpush2.bf16.msra.mxu1 %v12510_v27  ;;  %v7061_v13 = vld [vmem:[#allocation2 + $0xbf0] sm:$0xff] }
 0x4de   :  { %10208 = vmatpush1.bf16.msra.mxu0 %v12360_v19  ;;  %10162 = vmatprep.subr.bf16.mxu1 %v12249_v45  ;;  %v12441_v44 = vcombine.high %v7057_v30, %v7061_v13  ;;  %v7049_v27 = vld [vmem:[#allocation2 + $0xb90] sm:$0xff]  ;;  %v12208_v19 = vcombine.low %v6825_v31, %v6829_v47  ;;  %v12440_v45 = vcombine.low %v7057_v30, %v7061_v13 }
 0x4df   :  { %10209 = vmatprep.subr.bf16.mxu0 %v12353_v18  ;;  %v7053_v60 = vld [vmem:[#allocation2 + $0xbb0] sm:$0xff]  ;;  %v12201_v18 = vcombine.high %v6817_v36, %v6821_v43 }
 0x4e0   :  { %10113 = vmatmul.mubr.bf16.vlgmr.msra.gmra.mxu1 %v15875_v52  ;;  %v12433_v50 = vcombine.high %v7049_v27, %v7053_v60  ;;  %v6809_v7 = vld [vmem:[#allocation2 + $0x410] sm:$0xff] }
 0x4e1   :  { %10163 = vmatpush1.bf16.msra.mxu1 %v12248_v59  ;;  %10194 = vmatprep.mubr.bf16.mxu1 %v15805_v33  ;;  %v7045_v59 = vld [vmem:[#allocation2 + $0xb70] sm:$0xff] }
 0x4e2   :  { %10210 = vmatpush1.bf16.msra.mxu0 %v12352_v56  ;;  %10164 = vmatprep.subr.bf16.mxu1 %v12241_v2  ;;  %v12200_v56 = vcombine.low %v6817_v36, %v6821_v43  ;;  %v12432_v2 = vcombine.low %v7049_v27, %v7053_v60  ;;  %v12425_v61 = vcombine.high %v7041_v57, %v7045_v59  ;;  %v6929_v8 = vld [vmem:[#allocation2 + $0x7d0] sm:$0xff] }
 0x4e3   :  { %10211 = vmatprep.subr.bf16.mxu0 %v12345_v16  ;;  %v12193_v16 = vcombine.high %v6809_v7, %v6813_v12  ;;  %v6933_v5 = vld [vmem:[#allocation2 + $0x7f0] sm:$0xff] }
 0x4e4   :  { %v7033_v41 = vld [vmem:[#allocation2 + $0xb10] sm:$0xff] }
 0x4e5   :  { %10165 = vmatpush1.bf16.msra.mxu1 %v12240_v21  ;;  %v7037_v21 = vld [vmem:[#allocation2 + $0xb30] sm:$0xff] }
 0x4e6   :  { %10212 = vmatpush1.bf16.msra.mxu0 %v12344_v3  ;;  %10166 = vmatprep.subr.bf16.mxu1 %v12233_v10  ;;  %v12192_v3 = vcombine.low %v6809_v7, %v6813_v12  ;;  %v12424_v10 = vcombine.low %v7041_v57, %v7045_v59  ;;  %v12417_v48 = vcombine.high %v7033_v41, %v7037_v21  ;;  %v6921_v39 = vld [vmem:[#allocation2 + $0x790] sm:$0xff]  ;;  %v6738_v59 = vld [vmem:[#allocation2 + $0x1d8] sm:$0xff] }
 0x4e7   :  { %10213 = vmatprep.subr.bf16.mxu0 %v12337_v40  ;;  %v12313_v40 = vcombine.high %v6929_v8, %v6933_v5  ;;  %v6925_v15 = vld [vmem:[#allocation2 + $0x7b0] sm:$0xff] }
 0x4e8   :  { %v7025_v4 = vld [vmem:[#allocation2 + $0xad0] sm:$0xff] }
 0x4e9   :  { %10167 = vmatpush1.bf16.msra.mxu1 %v12232_v53  ;;  %v7029_v53 = vld [vmem:[#allocation2 + $0xaf0] sm:$0xff] }
 0x4ea   :  { %10214 = vmatpush1.bf16.msra.mxu0 %v12336_v63  ;;  %10168 = vmatprep.subr.bf16.mxu1 %v12225_v22  ;;  %v12312_v63 = vcombine.low %v6929_v8, %v6933_v5  ;;  %v12416_v22 = vcombine.low %v7033_v41, %v7037_v21  ;;  %v12409_v54 = vcombine.high %v7025_v4, %v7029_v53  ;;  %v6913_v49 = vld [vmem:[#allocation2 + $0x750] sm:$0xff]  ;;  %v6730_v21 = vld [vmem:[#allocation2 + $0x198] sm:$0xff] }
 0x4eb   :  { %10215 = vmatprep.subr.bf16.mxu0 %v12329_v38  ;;  %v12305_v38 = vcombine.high %v6921_v39, %v6925_v15  ;;  %v6917_v26 = vld [vmem:[#allocation2 + $0x770] sm:$0xff] }
 0x4ec   :  { %v7017_v28 = vld [vmem:[#allocation2 + $0xa90] sm:$0xff] }
 0x4ed   :  { %10169 = vmatpush1.bf16.msra.mxu1 %v12224_v42  ;;  %v7021_v42 = vld [vmem:[#allocation2 + $0xab0] sm:$0xff] }
 0x4ee   :  { %10216 = vmatpush1.bf16.msra.mxu0 %v12328_v1  ;;  %10170 = vmatprep.subr.bf16.mxu1 %v12217_v0  ;;  %v12304_v1 = vcombine.low %v6921_v39, %v6925_v15  ;;  %v12408_v0 = vcombine.low %v7025_v4, %v7029_v53  ;;  %v12401_v31 = vcombine.high %v7017_v28, %v7021_v42  ;;  %v6905_v47 = vld [vmem:[#allocation2 + $0x710] sm:$0xff] }
 0x4ef   :  { %10217 = vmatprep.subr.bf16.mxu0 %v12321_v14  ;;  %v12297_v14 = vcombine.high %v6913_v49, %v6917_v26  ;;  %v6909_v30 = vld [vmem:[#allocation2 + $0x730] sm:$0xff] }
 0x4f0   :  { %v7009_v13 = vld [vmem:[#allocation2 + $0xa50] sm:$0xff] }
 0x4f1   :  { %10171 = vmatpush1.bf16.msra.mxu1 %v12216_v32  ;;  %v7013_v32 = vld [vmem:[#allocation2 + $0xa70] sm:$0xff] }
 0x4f2   :  { %10218 = vmatpush1.bf16.msra.mxu0 %v12320_v11  ;;  %10172 = vmatprep.subr.bf16.mxu1 %v12209_v34  ;;  %v12296_v11 = vcombine.low %v6913_v49, %v6917_v26  ;;  %v12400_v34 = vcombine.low %v7017_v28, %v7021_v42  ;;  %v12393_v36 = vcombine.high %v7009_v13, %v7013_v32  ;;  %v6897_v43 = vld [vmem:[#allocation2 + $0x6d0] sm:$0xff] }
 0x4f3   :  { %10219 = vmatprep.subr.bf16.mxu0 %v12441_v44  ;;  %v12289_v44 = vcombine.high %v6905_v47, %v6909_v30  ;;  %v6901_v27 = vld [vmem:[#allocation2 + $0x6f0] sm:$0xff] }
 0x4f4   :  { %v7001_v60 = vld [vmem:[#allocation2 + $0xa10] sm:$0xff] }
 0x4f5   :  { %10173 = vmatpush1.bf16.msra.mxu1 %v12208_v19  ;;  %v7005_v19 = vld [vmem:[#allocation2 + $0xa30] sm:$0xff] }
 0x4f6   :  { %10220 = vmatpush2.bf16.msra.mxu0 %v12440_v45  ;;  %10174 = vmatprep.subr.bf16.mxu1 %v12201_v18  ;;  %v12288_v45 = vcombine.low %v6905_v47, %v6909_v30  ;;  %v12392_v18 = vcombine.low %v7009_v13, %v7013_v32  ;;  %v12385_v7 = vcombine.high %v7001_v60, %v7005_v19  ;;  %v6889_v12 = vld [vmem:[#allocation2 + $0x690] sm:$0xff] }
 0x4f7   :  { %10221 = vmatprep.subr.bf16.mxu0 %v12433_v50  ;;  %v12281_v50 = vcombine.high %v6897_v43, %v6901_v27  ;;  %v6893_v57 = vld [vmem:[#allocation2 + $0x6b0] sm:$0xff] }
 0x4f8   :  { %v6881_v5 = vld [vmem:[#allocation2 + $0x650] sm:$0xff] }
 0x4f9   :  { %10175 = vmatpush1.bf16.msra.mxu1 %v12200_v56  ;;  %v6742_v56 = vld [vmem:[#allocation2 + $0x1f8] sm:$0xff]  ;;  %v6885_v41 = vld [vmem:[#allocation2 + $0x670] sm:$0xff] }
 0x4fa   :  { %10222 = vmatpush2.bf16.msra.mxu0 %v12432_v2  ;;  %10176 = vmatprep.subr.bf16.mxu1 %v12193_v16  ;;  %v12280_v2 = vcombine.low %v6897_v43, %v6901_v27  ;;  %v12384_v16 = vcombine.low %v7001_v60, %v7005_v19  ;;  %v12123_v8 = vcombine.high %v6738_v59, %v6742_v56  ;;  %v6873_v15 = vld [vmem:[#allocation2 + $0x610] sm:$0xff] }
 0x4fb   :  { %10223 = vmatprep.subr.bf16.mxu0 %v12425_v61  ;;  %v12273_v61 = vcombine.high %v6889_v12, %v6893_v57  ;;  %v6877_v4 = vld [vmem:[#allocation2 + $0x630] sm:$0xff] }
 0x4fc   :  { %v12257_v26 = vcombine.high %v6873_v15, %v6877_v4  ;;  %v7121_v42 = vld [vmem:[#allocation2 + $0xdd0] sm:$0xff]  ;;  %v12256_v47 = vcombine.low %v6873_v15, %v6877_v4 }
 0x4fd   :  { %10177 = vmatpush1.bf16.msra.mxu1 %v12192_v3  ;;  %v6734_v3 = vld [vmem:[#allocation2 + $0x1b8] sm:$0xff]  ;;  %v7089_v4 = vld [vmem:[#allocation2 + $0xcd0] sm:$0xff] }
 0x4fe   :  { %10224 = vmatpush2.bf16.msra.mxu0 %v12424_v10  ;;  %10178 = vmatprep.subr.bf16.mxu1 %v12313_v40  ;;  %v12272_v10 = vcombine.low %v6889_v12, %v6893_v57  ;;  %v12122_v40 = vcombine.low %v6738_v59, %v6742_v56  ;;  %v12115_v39 = vcombine.high %v6730_v21, %v6734_v3  ;;  %v6702_v12 = vld [vmem:[#allocation2 + $0xb8] sm:$0xff] }
 0x4ff   :  { %10225 = vmatprep.subr.bf16.mxu0 %v12417_v48  ;;  %v12265_v48 = vcombine.high %v6881_v5, %v6885_v41  ;;  %v12114_v49 = vcombine.low %v6730_v21, %v6734_v3  ;;  %v6690_v3 = vld [vmem:[#allocation2 + $0x58] sm:$0xff] }
 0x501   :  { %10179 = vmatpush2.bf16.msra.mxu1 %v12312_v63  ;;  %v6722_v63 = vld [vmem:[#allocation2 + $0x158] sm:$0xff] }
 0x502   :  { %10226 = vmatpush2.bf16.msra.mxu0 %v12416_v22  ;;  %10180 = vmatprep.subr.bf16.mxu1 %v12305_v38  ;;  %v6726_v22 = vld [vmem:[#allocation2 + $0x178] sm:$0xff]  ;;  %v12264_v38 = vcombine.low %v6881_v5, %v6885_v41  ;;  %v7097_v5 = vld [vmem:[#allocation2 + $0xd10] sm:$0xff] }
 0x503   :  { %10227 = vmatprep.subr.bf16.mxu0 %v12409_v54  ;;  %v12107_v28 = vcombine.high %v6722_v63, %v6726_v22  ;;  %v12106_v13 = vcombine.low %v6722_v63, %v6726_v22  ;;  %v7101_v41 = vld [vmem:[#allocation2 + $0xd30] sm:$0xff]  ;;  %v6686_v22 = vld [vmem:[#allocation2 + $0x38] sm:$0xff] }
 0x504   :  { %v7093_v63 = vld [vmem:[#allocation2 + $0xcf0] sm:$0xff] }
 0x505   :  { %10181 = vmatpush2.bf16.msra.mxu1 %v12304_v1  ;;  %v7125_v1 = vld [vmem:[#allocation2 + $0xdf0] sm:$0xff] }
 0x506   :  { %10228 = vmatpush2.bf16.msra.mxu0 %v12408_v0  ;;  %10182 = vmatprep.subr.bf16.mxu1 %v12297_v14  ;;  %v6714_v14 = vld [vmem:[#allocation2 + $0x118] sm:$0xff]  ;;  %v12505_v32 = vcombine.high %v7121_v42, %v7125_v1  ;;  %v12504_v43 = vcombine.low %v7121_v42, %v7125_v1  ;;  %v7081_v42 = vld [vmem:[#allocation2 + $0xc90] sm:$0xff] }
 0x507   :  { %10229 = vmatprep.subr.bf16.mxu0 %v12401_v31  ;;  %v6718_v31 = vld [vmem:[#allocation2 + $0x138] sm:$0xff]  ;;  %v7085_v1 = vld [vmem:[#allocation2 + $0xcb0] sm:$0xff] }
 0x508   :  { %v12098_v27 = vcombine.low %v6714_v14, %v6718_v31 }
 0x509   :  { %10183 = vmatpush2.bf16.msra.mxu1 %v12296_v11  ;;  %v7113_v11 = vld [vmem:[#allocation2 + $0xd90] sm:$0xff] }
 0x50a   :  { %10230 = vmatpush2.bf16.msra.mxu0 %v12400_v34  ;;  %10184 = vmatprep.subr.bf16.mxu1 %v12289_v44  ;;  %v7117_v34 = vld [vmem:[#allocation2 + $0xdb0] sm:$0xff]  ;;  %v6706_v44 = vld [vmem:[#allocation2 + $0xd8] sm:$0xff] }
 0x50b   :  { %10231 = vmatprep.subr.bf16.mxu0 %v12393_v36  ;;  %v6710_v36 = vld [vmem:[#allocation2 + $0xf8] sm:$0xff]  ;;  %v12497_v60 = vcombine.high %v7113_v11, %v7117_v34  ;;  %v12496_v59 = vcombine.low %v7113_v11, %v7117_v34 }
 0x50c   :  { %v12091_v19 = vcombine.high %v6706_v44, %v6710_v36  ;;  %v6794_v11 = vld [vmem:[#allocation2 + $0x398] sm:$0xff] }
 0x50d   :  { %10185 = vmatpush2.bf16.msra.mxu1 %v12288_v45  ;;  %v7105_v45 = vld [vmem:[#allocation2 + $0xd50] sm:$0xff]  ;;  %v6798_v34 = vld [vmem:[#allocation2 + $0x3b8] sm:$0xff] }
 0x50e   :  { %10232 = vmatpush2.bf16.msra.mxu0 %v12392_v18  ;;  %10186 = vmatprep.subr.bf16.mxu1 %v12281_v50  ;;  %v7109_v18 = vld [vmem:[#allocation2 + $0xd70] sm:$0xff] }
 0x50f   :  { %10233 = vmatprep.subr.bf16.mxu0 %v12385_v7  ;;  %v6698_v7 = vld [vmem:[#allocation2 + $0x98] sm:$0xff] }
 0x511   :  { %10187 = vmatpush2.bf16.msra.mxu1 %v12280_v2  ;;  %v12090_v2 = vcombine.low %v6706_v44, %v6710_v36  ;;  %v12464_v44 = vcombine.low %v7081_v42, %v7085_v1 }
 0x512   :  { %10234 = vmatpush2.bf16.msra.mxu0 %v12384_v16  ;;  %10188 = vmatprep.subr.bf16.mxu1 %v12273_v61  ;;  %v12489_v16 = vcombine.high %v7105_v45, %v7109_v18 }
 0x513   :  { %10285 = vmatprep.subr.bf16.mxu0 %v12123_v8  ;;  %v12083_v8 = vcombine.high %v6698_v7, %v6702_v12 }
 0x514   :  { %v15908_v53 = vpop.f32.mrf.mxu0 }
 0x515   :  { %10189 = vmatpush2.bf16.msra.mxu1 %v12272_v10  ;;  %10236 = vmatmul.mubr.bf16.vlgmr.msra.gmra.mxu0 %v15856_v58  ;;  %v12488_v10 = vcombine.low %v7105_v45, %v7109_v18  ;;  %v6786_v45 = vld [vmem:[#allocation2 + $0x358] sm:$0xff] }
 0x516   :  { %10286 = vmatpush1.bf16.msra.mxu0 %v12122_v40  ;;  %10317 = vmatprep.mubr.bf16.mxu0 %v15802_v51  ;;  %v15912_v54 = vpop.f32.mrf.mxu0  ;;  %v12099_v51 = vcombine.high %v6714_v14, %v6718_v31  ;;  %v6806_v14 = vld [vmem:[#allocation2 + $0x3f8] sm:$0xff]  ;;  %v12472_v31 = vcombine.low %v7089_v4, %v7093_v63 }
 0x517   :  { %10190 = vmatprep.subr.bf16.mxu1 %v12265_v48  ;;  %10287 = vmatprep.subr.bf16.mxu0 %v12115_v39  ;;  %v12082_v48 = vcombine.low %v6698_v7, %v6702_v12  ;;  %v12481_v39 = vcombine.high %v7097_v5, %v7101_v41  ;;  %v6790_v18 = vld [vmem:[#allocation2 + $0x378] sm:$0xff]  ;;  %v12178_v7 = vcombine.low %v6794_v11, %v6798_v34 }
 0x518   :  { %v9995_v0 = vpop.f32.mrf.mxu0 }
 0x519   :  { %10191 = vmatpush2.bf16.msra.mxu1 %v12264_v38  ;;  %v12480_v38 = vcombine.low %v7097_v5, %v7101_v41  ;;  %v6802_v0 = vld [vmem:[#allocation2 + $0x3d8] sm:$0xff]  ;;  %v12170_v41 = vcombine.low %v6786_v45, %v6790_v18 }
 0x51a   :  { %10288 = vmatpush1.bf16.msra.mxu0 %v12114_v49  ;;  %v9996_v30 = vpop.f32.mrf.mxu0  ;;  %10192 = vmatprep.subr.bf16.mxu1 %v12257_v26  ;;  %v12473_v26 = vcombine.high %v7089_v4, %v7093_v63  ;;  %v12186_v36 = vcombine.low %v6802_v0, %v6806_v14 }
 0x51b   :  { %10289 = vmatprep.subr.bf16.mxu0 %v12107_v28  ;;  %v12465_v30 = vcombine.high %v7081_v42, %v7085_v1 }
 0x51d   :  { %10193 = vmatpush2.bf16.msra.mxu1 %v12256_v47 }
 0x51e   :  { %10290 = vmatpush1.bf16.msra.mxu0 %v12106_v13  ;;  %10244 = vmatprep.subr.bf16.mxu1 %v12505_v32  ;;  %v12187_v13 = vcombine.high %v6802_v0, %v6806_v14  ;;  %v7073_v32 = vld [vmem:[#allocation2 + $0xc50] sm:$0xff] }
 0x51f   :  { %10291 = vmatprep.subr.bf16.mxu0 %v12099_v51  ;;  %v7077_v51 = vld [vmem:[#allocation2 + $0xc70] sm:$0xff] }
 0x520   :  { %10195 = vmatmul.mubr.bf16.vlgmr.msra.gmra.mxu1 %v15834_v37  ;;  %v9950_v50 = vpop.f32.mrf.mxu1  ;;  %v7161_v0 = vld [vmem:[#allocation2 + $0xf10] sm:$0xff] }
 0x521   :  { %v15916_v57 = vadd.f32 %v9950_v50, %v15899_v24  ;;  %10245 = vmatpush1.bf16.msra.mxu1 %v12504_v43  ;;  %10276 = vmatprep.mubr.bf16.mxu1 %v15873_v20  ;;  %v6694_v24 = vld [vmem:[#allocation2 + $0x78] sm:$0xff]  ;;  %v12457_v43 = vcombine.high %v7073_v32, %v7077_v51  ;;  %v12456_v50 = vcombine.low %v7073_v32, %v7077_v51  ;;  %v7165_v14 = vld [vmem:[#allocation2 + $0xf30] sm:$0xff] }
 0x522   :  { %10292 = vmatpush1.bf16.msra.mxu0 %v12098_v27  ;;  %v9952_v56 = vpop.f32.mrf.mxu1  ;;  %10246 = vmatprep.subr.bf16.mxu1 %v12497_v60  ;;  %v12075_v15 = vcombine.high %v6690_v3, %v6694_v24  ;;  %v12074_v49 = vcombine.low %v6690_v3, %v6694_v24  ;;  %v12179_v27 = vcombine.high %v6794_v11, %v6798_v34  ;;  %v7065_v60 = vld [vmem:[#allocation2 + $0xc10] sm:$0xff] }
 0x523   :  { %v15920_v61 = vadd.f32 %v9952_v56, %v15904_v35  ;;  %10293 = vmatprep.subr.bf16.mxu0 %v12091_v19  ;;  %v6682_v35 = vld [vmem:[#allocation2 + $0x18] sm:$0xff]  ;;  %v7069_v19 = vld [vmem:[#allocation2 + $0xc30] sm:$0xff]  ;;  %v12545_v32 = vcombine.high %v7161_v0, %v7165_v14 }
 0x524   :  { %v9954_v21 = vpop.f32.mrf.mxu1  ;;  %v12067_v28 = vcombine.high %v6682_v35, %v6686_v22  ;;  %v12066_v47 = vcombine.low %v6682_v35, %v6686_v22  ;;  %v12449_v12 = vcombine.high %v7065_v60, %v7069_v19  ;;  %v7185_v56 = vld [vmem:[#allocation2 + $0xfd0] sm:$0xff]  ;;  %v12448_v5 = vcombine.low %v7065_v60, %v7069_v19 }
 0x525   :  { %10247 = vmatpush1.bf16.msra.mxu1 %v12496_v59  ;;  %v12171_v59 = vcombine.high %v6786_v45, %v6790_v18  ;;  %v7177_v24 = vld [vmem:[#allocation2 + $0xf90] sm:$0xff] }
 0x526   :  { %10294 = vmatpush1.bf16.msra.mxu0 %v12090_v2  ;;  %v9955_v40 = vpop.f32.mrf.mxu1  ;;  %10248 = vmatprep.subr.bf16.mxu1 %v12489_v16  ;;  %v7189_v2 = vld [vmem:[#allocation2 + $0xff0] sm:$0xff]  ;;  %v6778_v16 = vld [vmem:[#allocation2 + $0x318] sm:$0xff] }
 0x527   :  { %10295 = vmatprep.subr.bf16.mxu0 %v12083_v8  ;;  %v6782_v8 = vld [vmem:[#allocation2 + $0x338] sm:$0xff]  ;;  %v12569_v21 = vcombine.high %v7185_v56, %v7189_v2  ;;  %v7169_v35 = vld [vmem:[#allocation2 + $0xf50] sm:$0xff] }
 0x528   :  { %v12163_v3 = vcombine.high %v6778_v16, %v6782_v8  ;;  %v6770_v40 = vld [vmem:[#allocation2 + $0x2d8] sm:$0xff]  ;;  %v7173_v22 = vld [vmem:[#allocation2 + $0xf70] sm:$0xff] }
 0x529   :  { %10249 = vmatpush1.bf16.msra.mxu1 %v12488_v10  ;;  %v7181_v10 = vld [vmem:[#allocation2 + $0xfb0] sm:$0xff]  ;;  %v12553_v42 = vcombine.high %v7169_v35, %v7173_v22 }
 0x52a   :  { %10296 = vmatpush1.bf16.msra.mxu0 %v12082_v48  ;;  %10250 = vmatprep.subr.bf16.mxu1 %v12481_v39  ;;  %v6774_v48 = vld [vmem:[#allocation2 + $0x2f8] sm:$0xff]  ;;  %v12568_v39 = vcombine.low %v7185_v56, %v7189_v2  ;;  %v12561_v4 = vcombine.high %v7177_v24, %v7181_v10  ;;  %v7153_v11 = vld [vmem:[#allocation2 + $0xed0] sm:$0xff] }
 0x52b   :  { %10297 = vmatprep.subr.bf16.mxu0 %v12075_v15  ;;  %v12162_v15 = vcombine.low %v6778_v16, %v6782_v8  ;;  %v12155_v63 = vcombine.high %v6770_v40, %v6774_v48  ;;  %v7157_v34 = vld [vmem:[#allocation2 + $0xef0] sm:$0xff] }
 0x52c   :  { %v12537_v60 = vcombine.high %v7153_v11, %v7157_v34  ;;  %v7145_v45 = vld [vmem:[#allocation2 + $0xe90] sm:$0xff] }
 0x52d   :  { %10251 = vmatpush1.bf16.msra.mxu1 %v12480_v38  ;;  %v6762_v38 = vld [vmem:[#allocation2 + $0x298] sm:$0xff]  ;;  %v7149_v18 = vld [vmem:[#allocation2 + $0xeb0] sm:$0xff] }
 0x52e   :  { %10298 = vmatpush1.bf16.msra.mxu0 %v12074_v49  ;;  %10252 = vmatprep.subr.bf16.mxu1 %v12473_v26  ;;  %v6766_v49 = vld [vmem:[#allocation2 + $0x2b8] sm:$0xff]  ;;  %v12560_v26 = vcombine.low %v7177_v24, %v7181_v10  ;;  %v12529_v56 = vcombine.high %v7145_v45, %v7149_v18  ;;  %v7137_v16 = vld [vmem:[#allocation2 + $0xe50] sm:$0xff] }
 0x52f   :  { %10299 = vmatprep.subr.bf16.mxu0 %v12067_v28  ;;  %v12154_v28 = vcombine.low %v6770_v40, %v6774_v48  ;;  %v12147_v1 = vcombine.high %v6762_v38, %v6766_v49  ;;  %v7141_v8 = vld [vmem:[#allocation2 + $0xe70] sm:$0xff] }
 0x530   :  { %v12521_v24 = vcombine.high %v7137_v16, %v7141_v8  ;;  %v7129_v40 = vld [vmem:[#allocation2 + $0xe10] sm:$0xff] }
 0x531   :  { %10253 = vmatpush1.bf16.msra.mxu1 %v12472_v31  ;;  %v6754_v31 = vld [vmem:[#allocation2 + $0x258] sm:$0xff]  ;;  %v7133_v48 = vld [vmem:[#allocation2 + $0xe30] sm:$0xff] }
 0x532   :  { %10300 = vmatpush1.bf16.msra.mxu0 %v12066_v47  ;;  %10254 = vmatprep.subr.bf16.mxu1 %v12465_v30  ;;  %v6758_v47 = vld [vmem:[#allocation2 + $0x278] sm:$0xff]  ;;  %v12552_v30 = vcombine.low %v7169_v35, %v7173_v22  ;;  %v12513_v22 = vcombine.high %v7129_v40, %v7133_v48 }
 0x533   :  { %10301 = vmatprep.subr.bf16.mxu0 %v12187_v13  ;;  %v12146_v13 = vcombine.low %v6762_v38, %v6766_v49  ;;  %v12139_v51 = vcombine.high %v6754_v31, %v6758_v47 }
 0x535   :  { %10255 = vmatpush1.bf16.msra.mxu1 %v12464_v44  ;;  %v6746_v44 = vld [vmem:[#allocation2 + $0x218] sm:$0xff] }
 0x536   :  { %10302 = vmatpush2.bf16.msra.mxu0 %v12186_v36  ;;  %10256 = vmatprep.subr.bf16.mxu1 %v12457_v43  ;;  %v6750_v36 = vld [vmem:[#allocation2 + $0x238] sm:$0xff]  ;;  %v12544_v43 = vcombine.low %v7161_v0, %v7165_v14  ;;  %v12512_v14 = vcombine.low %v7129_v40, %v7133_v48 }
 0x537   :  { %10303 = vmatprep.subr.bf16.mxu0 %v12179_v27  ;;  %v12138_v27 = vcombine.low %v6754_v31, %v6758_v47  ;;  %v12131_v19 = vcombine.high %v6746_v44, %v6750_v36 }
 0x539   :  { %10257 = vmatpush1.bf16.msra.mxu1 %v12456_v50  ;;  %v6994_v50 = vld [vmem:[#allocation2 + $0x9d8] sm:$0xff] }
 0x53a   :  { %10304 = vmatpush2.bf16.msra.mxu0 %v12178_v7  ;;  %10258 = vmatprep.subr.bf16.mxu1 %v12449_v12  ;;  %v6998_v7 = vld [vmem:[#allocation2 + $0x9f8] sm:$0xff]  ;;  %v12536_v12 = vcombine.low %v7153_v11, %v7157_v34 }
 0x53b   :  { %10305 = vmatprep.subr.bf16.mxu0 %v12171_v59  ;;  %v12130_v59 = vcombine.low %v6746_v44, %v6750_v36  ;;  %v12379_v2 = vcombine.high %v6994_v50, %v6998_v7  ;;  %v6962_v11 = vld [vmem:[#allocation2 + $0x8d8] sm:$0xff] }
 0x53c   :  { %v6966_v34 = vld [vmem:[#allocation2 + $0x8f8] sm:$0xff] }
 0x53d   :  { %10259 = vmatpush1.bf16.msra.mxu1 %v12448_v5  ;;  %v6986_v5 = vld [vmem:[#allocation2 + $0x998] sm:$0xff] }
 0x53e   :  { %10306 = vmatpush2.bf16.msra.mxu0 %v12170_v41  ;;  %10260 = vmatprep.subr.bf16.mxu1 %v12569_v21  ;;  %v6990_v41 = vld [vmem:[#allocation2 + $0x9b8] sm:$0xff]  ;;  %v12528_v21 = vcombine.low %v7145_v45, %v7149_v18 }
 0x53f   :  { %10307 = vmatprep.subr.bf16.mxu0 %v12163_v3  ;;  %v12378_v3 = vcombine.low %v6994_v50, %v6998_v7  ;;  %v12371_v10 = vcombine.high %v6986_v5, %v6990_v41  ;;  %v12370_v35 = vcombine.low %v6986_v5, %v6990_v41  ;;  %v6854_v45 = vld [vmem:[#allocation2 + $0x578] sm:$0xff] }
 0x540   :  { %v6954_v50 = vld [vmem:[#allocation2 + $0x898] sm:$0xff] }
 0x541   :  { %10261 = vmatpush2.bf16.msra.mxu1 %v12568_v39  ;;  %v6978_v39 = vld [vmem:[#allocation2 + $0x958] sm:$0xff] }
 0x542   :  { %10308 = vmatpush2.bf16.msra.mxu0 %v12162_v15  ;;  %10262 = vmatprep.subr.bf16.mxu1 %v12561_v4  ;;  %v6982_v15 = vld [vmem:[#allocation2 + $0x978] sm:$0xff] }
 0x543   :  { %10309 = vmatprep.subr.bf16.mxu0 %v12155_v63  ;;  %v12520_v63 = vcombine.low %v7137_v16, %v7141_v8  ;;  %v12363_v49 = vcombine.high %v6978_v39, %v6982_v15  ;;  %v6958_v7 = vld [vmem:[#allocation2 + $0x8b8] sm:$0xff] }
 0x544   :  { %v12339_v8 = vcombine.high %v6954_v50, %v6958_v7  ;;  %v6842_v5 = vld [vmem:[#allocation2 + $0x518] sm:$0xff]  ;;  %v12338_v48 = vcombine.low %v6954_v50, %v6958_v7 }
 0x545   :  { %10263 = vmatpush2.bf16.msra.mxu1 %v12560_v26  ;;  %v6866_v26 = vld [vmem:[#allocation2 + $0x5d8] sm:$0xff] }
 0x546   :  { %10310 = vmatpush2.bf16.msra.mxu0 %v12154_v28  ;;  %10264 = vmatprep.subr.bf16.mxu1 %v12553_v42  ;;  %v6870_v28 = vld [vmem:[#allocation2 + $0x5f8] sm:$0xff] }
 0x547   :  { %10311 = vmatprep.subr.bf16.mxu0 %v12147_v1  ;;  %v6970_v42 = vld [vmem:[#allocation2 + $0x918] sm:$0xff]  ;;  %v12251_v31 = vcombine.high %v6866_v26, %v6870_v28  ;;  %v12250_v36 = vcombine.low %v6866_v26, %v6870_v28 }
 0x548   :  { %v6974_v1 = vld [vmem:[#allocation2 + $0x938] sm:$0xff] }
 0x549   :  { %10265 = vmatpush2.bf16.msra.mxu1 %v12552_v30  ;;  %v6846_v41 = vld [vmem:[#allocation2 + $0x538] sm:$0xff] }
 0x54a   :  { %10312 = vmatpush2.bf16.msra.mxu0 %v12146_v13  ;;  %10266 = vmatprep.subr.bf16.mxu1 %v12545_v32  ;;  %v12355_v13 = vcombine.high %v6970_v42, %v6974_v1  ;;  %v6858_v32 = vld [vmem:[#allocation2 + $0x598] sm:$0xff] }
 0x54b   :  { %10313 = vmatprep.subr.bf16.mxu0 %v12139_v51  ;;  %v6862_v51 = vld [vmem:[#allocation2 + $0x5b8] sm:$0xff] }
 0x54d   :  { %10267 = vmatpush2.bf16.msra.mxu1 %v12544_v43  ;;  %v12354_v43 = vcombine.low %v6970_v42, %v6974_v1  ;;  %v6826_v42 = vld [vmem:[#allocation2 + $0x498] sm:$0xff] }
 0x54e   :  { %10314 = vmatpush2.bf16.msra.mxu0 %v12138_v27  ;;  %10268 = vmatprep.subr.bf16.mxu1 %v12537_v60  ;;  %v12243_v27 = vcombine.high %v6858_v32, %v6862_v51  ;;  %v6830_v1 = vld [vmem:[#allocation2 + $0x4b8] sm:$0xff] }
 0x54f   :  { %10315 = vmatprep.subr.bf16.mxu0 %v12131_v19  ;;  %v6850_v19 = vld [vmem:[#allocation2 + $0x558] sm:$0xff] }
 0x551   :  { %10269 = vmatpush2.bf16.msra.mxu1 %v12536_v12 }
 0x552   :  { %10316 = vmatpush2.bf16.msra.mxu0 %v12130_v59  ;;  %10270 = vmatprep.subr.bf16.mxu1 %v12529_v56  ;;  %v12242_v59 = vcombine.low %v6858_v32, %v6862_v51  ;;  %v6822_v32 = vld [vmem:[#allocation2 + $0x478] sm:$0xff] }
 0x553   :  { %10367 = vmatprep.subr.bf16.mxu0 %v12379_v2  ;;  %v12235_v2 = vcombine.high %v6850_v19, %v6854_v45  ;;  %v7050_v51 = vld [vmem:[#allocation2 + $0xb98] sm:$0xff] }
 0x555   :  { %v15922_v4 = vpop.f32.mrf.mxu0  ;;  %10271 = vmatpush2.bf16.msra.mxu1 %v12528_v21  ;;  %10318 = vmatmul.mubr.bf16.vlgmr.msra.gmra.mxu0 %v15832_v23  ;;  %v12362_v23 = vcombine.low %v6978_v39, %v6982_v15  ;;  %v12227_v39 = vcombine.high %v6842_v5, %v6846_v41 }
 0x556   :  { %10368 = vmatpush1.bf16.msra.mxu0 %v12378_v3  ;;  %10399 = vmatprep.mubr.bf16.mxu0 %v15837_v46  ;;  %v15929_v46 = vld [vmem:[%s16180_s4] sm:$0xff] }
 0x557   :  { %v10075_v38 = vpop.f32.mrf.mxu0  ;;  %10272 = vmatprep.subr.bf16.mxu1 %v12521_v24  ;;  %10369 = vmatprep.subr.bf16.mxu0 %v12371_v10  ;;  %v7204_v47 = vrot.slane %v15929_v46, %v956_v55  ;;  %v7208_v44 = vrot.slane %v15929_v46, %v960_v62  ;;  %v12347_v55 = vcombine.high %v6962_v11, %v6966_v34  ;;  %v6950_v24 = vld [vmem:[#allocation2 + $0x878] sm:$0xff] }
 0x558   :  { %v12234_v10 = vcombine.low %v6850_v19, %v6854_v45  ;;  %v7046_v19 = vld [vmem:[#allocation2 + $0xb78] sm:$0xff] }
 0x559   :  { %v10077_v0 = vpop.f32.mrf.mxu0  ;;  %10273 = vmatpush2.bf16.msra.mxu1 %v12520_v63  ;;  %v9992_v60 = vadd.f32 %v15908_v53, %v7204_v47  ;;  %v9994_v12 = vadd.f32 %v15912_v54, %v7208_v44  ;;  %v12346_v53 = vcombine.low %v6962_v11, %v6966_v34  ;;  %v6946_v54 = vld [vmem:[#allocation2 + $0x858] sm:$0xff]  ;;  %v12211_v47 = vcombine.high %v6826_v42, %v6830_v1 }
 0x55a   :  { %10370 = vmatpush1.bf16.msra.mxu0 %v12370_v35  ;;  %10274 = vmatprep.subr.bf16.mxu1 %v12513_v22  ;;  %v12331_v15 = vcombine.high %v6946_v54, %v6950_v24  ;;  %v6834_v63 = vld [vmem:[#allocation2 + $0x4d8] sm:$0xff]  ;;  %v12330_v26 = vcombine.low %v6946_v54, %v6950_v24  ;;  %v12210_v34 = vcombine.low %v6826_v42, %v6830_v1 }
 0x55b   :  { %v10078_v30 = vpop.f32.mrf.mxu0  ;;  %10371 = vmatprep.subr.bf16.mxu0 %v12363_v49  ;;  %v6838_v35 = vld [vmem:[#allocation2 + $0x4f8] sm:$0xff] }
 0x55c   :  { %v6938_v22 = vld [vmem:[#allocation2 + $0x818] sm:$0xff]  ;;  %v12219_v28 = vcombine.high %v6834_v63, %v6838_v35 }
 0x55d   :  { %10275 = vmatpush2.bf16.msra.mxu1 %v12512_v14  ;;  %v6942_v49 = vld [vmem:[#allocation2 + $0x838] sm:$0xff] }
 0x55e   :  { %10372 = vmatpush1.bf16.msra.mxu0 %v12362_v23  ;;  %10326 = vmatprep.subr.bf16.mxu1 %v12251_v31  ;;  %v7058_v0 = vld [vmem:[#allocation2 + $0xbd8] sm:$0xff]  ;;  %v12218_v23 = vcombine.low %v6834_v63, %v6838_v35  ;;  %v12322_v31 = vcombine.low %v6938_v22, %v6942_v49 }
 0x55f   :  { %10373 = vmatprep.subr.bf16.mxu0 %v12355_v13  ;;  %v7062_v14 = vld [vmem:[#allocation2 + $0xbf8] sm:$0xff] }
 0x560   :  { %v10032_v18 = vpop.f32.mrf.mxu1  ;;  %10277 = vmatmul.mubr.bf16.vlgmr.msra.gmra.mxu1 %v15875_v52  ;;  %v12443_v30 = vcombine.high %v7058_v0, %v7062_v14  ;;  %v6818_v13 = vld [vmem:[#allocation2 + $0x458] sm:$0xff]  ;;  %v12442_v44 = vcombine.low %v7058_v0, %v7062_v14 }
 0x561   :  { %v10033_v62 = vadd.f32 %v10032_v18, %v9992_v60  ;;  %10327 = vmatpush1.bf16.msra.mxu1 %v12250_v36  ;;  %10358 = vmatprep.mubr.bf16.mxu1 %v15805_v33  ;;  %v7054_v11 = vld [vmem:[#allocation2 + $0xbb8] sm:$0xff]  ;;  %v12203_v36 = vcombine.high %v6818_v13, %v6822_v32  ;;  %v12202_v45 = vcombine.low %v6818_v13, %v6822_v32 }
 0x562   :  { %v10034_v56 = vpop.f32.mrf.mxu1  ;;  %10374 = vmatpush1.bf16.msra.mxu0 %v12354_v43  ;;  %10328 = vmatprep.subr.bf16.mxu1 %v12243_v27  ;;  %v12435_v43 = vcombine.high %v7050_v51, %v7054_v11  ;;  %v6810_v27 = vld [vmem:[#allocation2 + $0x418] sm:$0xff]  ;;  %v12434_v18 = vcombine.low %v7050_v51, %v7054_v11 }
 0x563   :  { %v10035_v16 = vadd.f32 %v10034_v56, %v9994_v12  ;;  %10375 = vmatprep.subr.bf16.mxu0 %v12347_v55  ;;  %v15942_v21 = vadd.f32 %v15922_v4, %v10033_v62  ;;  %v12226_v4 = vcombine.low %v6842_v5, %v6846_v41  ;;  %v6814_v60 = vld [vmem:[#allocation2 + $0x438] sm:$0xff] }
 0x564   :  { %v10036_v3 = vpop.f32.mrf.mxu1  ;;  %v7042_v55 = vld [vmem:[#allocation2 + $0xb58] sm:$0xff]  ;;  %v12195_v50 = vcombine.high %v6810_v27, %v6814_v60 }
 0x565   :  { %10329 = vmatpush1.bf16.msra.mxu1 %v12242_v59  ;;  %v15944_v33 = vadd.f32 %v10075_v38, %v10035_v16  ;;  %v12323_v38 = vcombine.high %v6938_v22, %v6942_v49  ;;  %v12427_v7 = vcombine.high %v7042_v55, %v7046_v19  ;;  %v6930_v12 = vld [vmem:[#allocation2 + $0x7d8] sm:$0xff] }
 0x566   :  { %v10037_v40 = vpop.f32.mrf.mxu1  ;;  %10376 = vmatpush1.bf16.msra.mxu0 %v12346_v53  ;;  %10330 = vmatprep.subr.bf16.mxu1 %v12235_v2  ;;  %v6934_v62 = vld [vmem:[#allocation2 + $0x7f8] sm:$0xff]  ;;  %v12194_v53 = vcombine.low %v6810_v27, %v6814_v60  ;;  %v12426_v2 = vcombine.low %v7042_v55, %v7046_v19 }
 0x567   :  { %10377 = vmatprep.subr.bf16.mxu0 %v12339_v8  ;;  %v7034_v59 = vld [vmem:[#allocation2 + $0xb18] sm:$0xff]  ;;  %v12315_v16 = vcombine.high %v6930_v12, %v6934_v62  ;;  %v12314_v24 = vcombine.low %v6930_v12, %v6934_v62 }
 0x568   :  { %v7038_v56 = vld [vmem:[#allocation2 + $0xb38] sm:$0xff] }
 0x569   :  { %10331 = vmatpush1.bf16.msra.mxu1 %v12234_v10  ;;  %v12419_v8 = vcombine.high %v7034_v59, %v7038_v56  ;;  %v6922_v5 = vld [vmem:[#allocation2 + $0x798] sm:$0xff]  ;;  %v12418_v10 = vcombine.low %v7034_v59, %v7038_v56  ;;  %v12744_v59 = vld [vmem:[%s16181_s5 + $0x70] sm:$0xff]  }
 0x56a   :  { %10378 = vmatpush1.bf16.msra.mxu0 %v12338_v48  ;;  %10332 = vmatprep.subr.bf16.mxu1 %v12227_v39  ;;  %v6926_v41 = vld [vmem:[#allocation2 + $0x7b8] sm:$0xff] }
 0x56b   :  { %10379 = vmatprep.subr.bf16.mxu0 %v12331_v15  ;;  %v7026_v3 = vld [vmem:[#allocation2 + $0xad8] sm:$0xff]  ;;  %v12307_v40 = vcombine.high %v6922_v5, %v6926_v41  ;;  %v12306_v22 = vcombine.low %v6922_v5, %v6926_v41 }
 0x56c   :  { %v7030_v54 = vld [vmem:[#allocation2 + $0xaf8] sm:$0xff] }
 0x56d   :  { %10333 = vmatpush1.bf16.msra.mxu1 %v12226_v4  ;;  %v12411_v48 = vcombine.high %v7026_v3, %v7030_v54  ;;  %v6914_v39 = vld [vmem:[#allocation2 + $0x758] sm:$0xff]  ;;  %v12410_v49 = vcombine.low %v7026_v3, %v7030_v54  ;;  %v12746_v3 = vld [vmem:[%s16181_s5 + $0x68] sm:$0xff]  }
 0x56e   :  { %10380 = vmatpush1.bf16.msra.mxu0 %v12330_v26  ;;  %10334 = vmatprep.subr.bf16.mxu1 %v12219_v28  ;;  %v6918_v15 = vld [vmem:[#allocation2 + $0x778] sm:$0xff] }
 0x56f   :  { %10381 = vmatprep.subr.bf16.mxu0 %v12323_v38  ;;  %v7018_v63 = vld [vmem:[#allocation2 + $0xa98] sm:$0xff]  ;;  %v12299_v4 = vcombine.high %v6914_v39, %v6918_v15  ;;  %v12298_v0 = vcombine.low %v6914_v39, %v6918_v15  ;;  %v12748_v15 = vld [vmem:[%s16181_s5 + $0x60] sm:$0xff]  }
 0x570   :  { %v7022_v35 = vld [vmem:[#allocation2 + $0xab8] sm:$0xff] }
 0x571   :  { %10335 = vmatpush1.bf16.msra.mxu1 %v12218_v23  ;;  %v12403_v26 = vcombine.high %v7018_v63, %v7022_v35  ;;  %v6906_v28 = vld [vmem:[#allocation2 + $0x718] sm:$0xff]  ;;  %v12402_v14 = vcombine.low %v7018_v63, %v7022_v35 }
 0x572   :  { %10382 = vmatpush1.bf16.msra.mxu0 %v12322_v31  ;;  %10336 = vmatprep.subr.bf16.mxu1 %v12211_v47  ;;  %v6910_v38 = vld [vmem:[#allocation2 + $0x738] sm:$0xff] }
 0x573   :  { %10383 = vmatprep.subr.bf16.mxu0 %v12443_v30  ;;  %v7010_v42 = vld [vmem:[#allocation2 + $0xa58] sm:$0xff]  ;;  %v12291_v23 = vcombine.high %v6906_v28, %v6910_v38  ;;  %v12290_v51 = vcombine.low %v6906_v28, %v6910_v38 }
 0x574   :  { %v7014_v1 = vld [vmem:[#allocation2 + $0xa78] sm:$0xff] }
 0x575   :  { %10337 = vmatpush1.bf16.msra.mxu1 %v12210_v34  ;;  %v12395_v31 = vcombine.high %v7010_v42, %v7014_v1  ;;  %v6898_v47 = vld [vmem:[#allocation2 + $0x6d8] sm:$0xff]  ;;  %v12394_v11 = vcombine.low %v7010_v42, %v7014_v1 }
 0x576   :  { %10384 = vmatpush2.bf16.msra.mxu0 %v12442_v44  ;;  %10338 = vmatprep.subr.bf16.mxu1 %v12203_v36  ;;  %v6902_v30 = vld [vmem:[#allocation2 + $0x6f8] sm:$0xff] }
 0x577   :  { %10385 = vmatprep.subr.bf16.mxu0 %v12435_v43  ;;  %v7002_v13 = vld [vmem:[#allocation2 + $0xa18] sm:$0xff]  ;;  %v12283_v34 = vcombine.high %v6898_v47, %v6902_v30  ;;  %v12282_v27 = vcombine.low %v6898_v47, %v6902_v30 }
 0x578   :  { %v7006_v32 = vld [vmem:[#allocation2 + $0xa38] sm:$0xff] }
 0x579   :  { %10339 = vmatpush1.bf16.msra.mxu1 %v12202_v45  ;;  %v12387_v44 = vcombine.high %v7002_v13, %v7006_v32  ;;  %v6890_v36 = vld [vmem:[#allocation2 + $0x698] sm:$0xff]  ;;  %v12386_v60 = vcombine.low %v7002_v13, %v7006_v32  ;;  %v10450_v45 = vmax.f32 %v15920_v61, 0.0  ;;  %v12753_v32 = vld [vmem:[%s16181_s5 + $0x10] sm:$0xff]  }
 0x57a   :  { %10386 = vmatpush2.bf16.msra.mxu0 %v12434_v18  ;;  %10340 = vmatprep.subr.bf16.mxu1 %v12195_v50  ;;  %v6894_v43 = vld [vmem:[#allocation2 + $0x6b8] sm:$0xff] }
 0x57b   :  { %10387 = vmatprep.subr.bf16.mxu0 %v12427_v7  ;;  %v12275_v55 = vcombine.high %v6890_v36, %v6894_v43  ;;  %v12742_v19 = vld [vmem:[%s16181_s5 + $0x78] sm:$0xff]   ;;  %v12274_v7 = vcombine.low %v6890_v36, %v6894_v43  ;;  %v12755_v43 = vld [vmem:[%s16181_s5 + $0x8] sm:$0xff]  }
 0x57c   :  { %v6882_v18 = vld [vmem:[#allocation2 + $0x658] sm:$0xff] }
 0x57d   :  { %10341 = vmatpush1.bf16.msra.mxu1 %v12194_v53  ;;  %v6886_v50 = vld [vmem:[#allocation2 + $0x678] sm:$0xff] }
 0x57e   :  { %10388 = vmatpush2.bf16.msra.mxu0 %v12426_v2  ;;  %10342 = vmatprep.subr.bf16.mxu1 %v12315_v16  ;;  %v12743_v12 = vld [vmem:[%s16181_s5 + $0x38] sm:$0xff]   ;;  %v12267_v62 = vcombine.high %v6882_v18, %v6886_v50  ;;  %v10458_v2 = vpack.c.bf16 %v10450_v45, %v10450_v45  ;;  %v12266_v16 = vcombine.low %v6882_v18, %v6886_v50  ;;  %v12757_v18 = vld [vmem:[%s16181_s5] sm:$0xff]  }
 0x57f   :  { %10389 = vmatprep.subr.bf16.mxu0 %v12419_v8  ;;  %v6874_v56 = vld [vmem:[#allocation2 + $0x618] sm:$0xff]  ;;  %v12745_v8 = vld [vmem:[%s16181_s5 + $0x30] sm:$0xff]  }
 0x580   :  { %v6878_v53 = vld [vmem:[#allocation2 + $0x638] sm:$0xff] }
 0x581   :  { %10343 = vmatpush2.bf16.msra.mxu1 %v12314_v24  ;;  %v12259_v5 = vcombine.high %v6874_v56, %v6878_v53  ;;  %v7122_v54 = vld [vmem:[#allocation2 + $0xdd8] sm:$0xff] }
 0x582   :  { %10390 = vmatpush2.bf16.msra.mxu0 %v12418_v10  ;;  %10344 = vmatprep.subr.bf16.mxu1 %v12307_v40  ;;  %v7126_v24 = vld [vmem:[#allocation2 + $0xdf8] sm:$0xff]  ;;  %v12747_v40 = vld [vmem:[%s16181_s5 + $0x28] sm:$0xff]  }
 0x583   :  { %10391 = vmatprep.subr.bf16.mxu0 %v12411_v48  ;;  %v12507_v48 = vcombine.high %v7122_v54, %v7126_v24  ;;  %v7114_v63 = vld [vmem:[#allocation2 + $0xd98] sm:$0xff] }
 0x584   :  { %v7118_v35 = vld [vmem:[#allocation2 + $0xdb8] sm:$0xff] }
 0x585   :  { %10345 = vmatpush2.bf16.msra.mxu1 %v12306_v22  ;;  %v12506_v22 = vcombine.low %v7122_v54, %v7126_v24  ;;  %v7106_v28 = vld [vmem:[#allocation2 + $0xd58] sm:$0xff]  ;;  %v12777_v24 = vld [vmem:[%s16181_s5 + $0x130] sm:$0xff]  }
 0x586   :  { %10392 = vmatpush2.bf16.msra.mxu0 %v12410_v49  ;;  %10346 = vmatprep.subr.bf16.mxu1 %v12299_v4  ;;  %v12749_v49 = vld [vmem:[%s16181_s5 + $0x20] sm:$0xff]   ;;  %v12499_v4 = vcombine.high %v7114_v63, %v7118_v35  ;;  %v7110_v38 = vld [vmem:[#allocation2 + $0xd78] sm:$0xff] }
 0x587   :  { %10393 = vmatprep.subr.bf16.mxu0 %v12403_v26  ;;  %v12750_v26 = vld [vmem:[%s16181_s5 + $0x58] sm:$0xff]  }
 0x588   :  { %v7102_v47 = vld [vmem:[#allocation2 + $0xd38] sm:$0xff] }
 0x589   :  { %10347 = vmatpush2.bf16.msra.mxu1 %v12298_v0  ;;  %v12498_v0 = vcombine.low %v7114_v63, %v7118_v35  ;;  %v7178_v63 = vld [vmem:[#allocation2 + $0xf98] sm:$0xff] }
 0x58a   :  { %10394 = vmatpush2.bf16.msra.mxu0 %v12402_v14  ;;  %10348 = vmatprep.subr.bf16.mxu1 %v12291_v23  ;;  %v12751_v23 = vld [vmem:[%s16181_s5 + $0x18] sm:$0xff]  }
 0x58b   :  { %10395 = vmatprep.subr.bf16.mxu0 %v12395_v31  ;;  %v12491_v31 = vcombine.high %v7106_v28, %v7110_v38  ;;  %v7182_v35 = vld [vmem:[#allocation2 + $0xfb8] sm:$0xff] }
 0x58d   :  { %10349 = vmatpush2.bf16.msra.mxu1 %v12290_v51 }
 0x58e   :  { %10396 = vmatpush2.bf16.msra.mxu0 %v12394_v11  ;;  %10350 = vmatprep.subr.bf16.mxu1 %v12283_v34  ;;  %v12754_v11 = vld [vmem:[%s16181_s5 + $0x48] sm:$0xff]   ;;  %v7090_v34 = vld [vmem:[#allocation2 + $0xcd8] sm:$0xff] }
 0x58f   :  { %10397 = vmatprep.subr.bf16.mxu0 %v12387_v44  ;;  %v7094_v44 = vld [vmem:[#allocation2 + $0xcf8] sm:$0xff] }
 0x590   :  { %v12474_v45 = vcombine.low %v7090_v34, %v7094_v44 }
 0x591   :  { %10351 = vmatpush2.bf16.msra.mxu1 %v12282_v27  ;;  %v12475_v27 = vcombine.high %v7090_v34, %v7094_v44 }
 0x592   :  { %10398 = vmatpush2.bf16.msra.mxu0 %v12386_v60  ;;  %10352 = vmatprep.subr.bf16.mxu1 %v12275_v55  ;;  %v12756_v60 = vld [vmem:[%s16181_s5 + $0x40] sm:$0xff]   ;;  %v7082_v55 = vld [vmem:[#allocation2 + $0xc98] sm:$0xff] }
 0x593   :  { %12637 = vmatprep.subr.bf16.mxu0 %v12742_v19  ;;  %v7086_v19 = vld [vmem:[#allocation2 + $0xcb8] sm:$0xff] }
 0x594   :  { %v12467_v50 = vcombine.high %v7082_v55, %v7086_v19 }
 0x595   :  { %v15956_v61 = vpop.f32.mrf.mxu0  ;;  %10353 = vmatpush2.bf16.msra.mxu1 %v12274_v7  ;;  %10400 = vmatmul.mubr.bf16.vlgmr.msra.gmra.mxu0 %v15856_v58  ;;  %v12258_v58 = vcombine.low %v6874_v56, %v6878_v53  ;;  %v10449_v7 = vmax.f32 %v15916_v57, 0.0  ;;  %v12466_v56 = vcombine.low %v7082_v55, %v7086_v19  ;;  %v12776_v57 = vld [vmem:[%s16181_s5 + $0x170] sm:$0xff]  }
 0x596   :  { %12638 = vmatpush3.bf16.msra.mxu0 %v12743_v12  ;;  %11016 = vmatprep.mubr.bf16.mxu0 %v10458_v2  ;;  %v7074_v12 = vld [vmem:[#allocation2 + $0xc58] sm:$0xff] }
 0x597   :  { %v15962_v41 = vpop.f32.mrf.mxu0  ;;  %10354 = vmatprep.subr.bf16.mxu1 %v12267_v62  ;;  %12639 = vmatprep.subr.bf16.mxu0 %v12744_v59  ;;  %v7078_v62 = vld [vmem:[#allocation2 + $0xc78] sm:$0xff] }
 0x598   :  { %v12774_v59 = vld [vmem:[%s16181_s5 + $0x178] sm:$0xff]   ;;  %v12459_v53 = vcombine.high %v7074_v12, %v7078_v62 }
 0x599   :  { %v10159_v10 = vpop.f32.mrf.mxu0  ;;  %10355 = vmatpush2.bf16.msra.mxu1 %v12266_v16  ;;  %v12775_v2 = vld [vmem:[%s16181_s5 + $0x138] sm:$0xff]   ;;  %v10457_v16 = vpack.c.bf16 %v10449_v7, %v10449_v7 }
 0x59a   :  { %12640 = vmatpush3.bf16.msra.mxu0 %v12745_v8  ;;  %10356 = vmatprep.subr.bf16.mxu1 %v12259_v5  ;;  %v7066_v8 = vld [vmem:[#allocation2 + $0xc18] sm:$0xff] }
 0x59b   :  { %v10160_v39 = vpop.f32.mrf.mxu0  ;;  %12641 = vmatprep.subr.bf16.mxu0 %v12746_v3  ;;  %v7070_v5 = vld [vmem:[#allocation2 + $0xc38] sm:$0xff]  ;;  %v12458_v3 = vcombine.low %v7074_v12, %v7078_v62 }
 0x59c   :  { %v12451_v54 = vcombine.high %v7066_v8, %v7070_v5  ;;  %v7186_v10 = vld [vmem:[#allocation2 + $0xfd8] sm:$0xff] }
 0x59d   :  { %10357 = vmatpush2.bf16.msra.mxu1 %v12258_v58  ;;  %v7190_v58 = vld [vmem:[#allocation2 + $0xff8] sm:$0xff] }
 0x59e   :  { %12642 = vmatpush3.bf16.msra.mxu0 %v12747_v40  ;;  %10408 = vmatprep.subr.bf16.mxu1 %v12507_v48  ;;  %v12778_v40 = vld [vmem:[%s16181_s5 + $0x168] sm:$0xff]   ;;  %v12450_v48 = vcombine.low %v7066_v8, %v7070_v5  ;;  %v12571_v39 = vcombine.high %v7186_v10, %v7190_v58  ;;  %v7130_v62 = vld [vmem:[#allocation2 + $0xe18] sm:$0xff] }
 0x59f   :  { %12643 = vmatprep.subr.bf16.mxu0 %v12748_v15  ;;  %v12779_v15 = vld [vmem:[%s16181_s5 + $0x128] sm:$0xff]  }
 0x5a0   :  { %v10114_v42 = vpop.f32.mrf.mxu1  ;;  %10359 = vmatmul.mubr.bf16.vlgmr.msra.gmra.mxu1 %v15834_v37  ;;  %v12752_v37 = vld [vmem:[%s16181_s5 + $0x50] sm:$0xff]  }
 0x5a1   :  { %v15981_v1 = vadd.f32 %v10114_v42, %v15942_v21  ;;  %10409 = vmatpush1.bf16.msra.mxu1 %v12506_v22  ;;  %10440 = vmatprep.mubr.bf16.mxu1 %v15873_v20  ;;  %v7098_v21 = vld [vmem:[#allocation2 + $0xd18] sm:$0xff]  ;;  %v12490_v20 = vcombine.low %v7106_v28, %v7110_v38  ;;  %v12780_v22 = vld [vmem:[%s16181_s5 + $0x160] sm:$0xff]  }
 0x5a2   :  { %v15984_v14 = vpop.f32.mrf.mxu1  ;;  %12644 = vmatpush3.bf16.msra.mxu0 %v12749_v49  ;;  %10410 = vmatprep.subr.bf16.mxu1 %v12499_v4  ;;  %v12483_v51 = vcombine.high %v7098_v21, %v7102_v47  ;;  %v12482_v36 = vcombine.low %v7098_v21, %v7102_v47  ;;  %v12570_v49 = vcombine.low %v7186_v10, %v7190_v58  ;;  %v7170_v28 = vld [vmem:[#allocation2 + $0xf58] sm:$0xff]  ;;  %v12784_v47 = vld [vmem:[%s16181_s5 + $0x150] sm:$0xff]  }
 0x5a3   :  { %12645 = vmatprep.subr.bf16.mxu0 %v12750_v26  ;;  %v12563_v4 = vcombine.high %v7178_v63, %v7182_v35  ;;  %v12781_v26 = vld [vmem:[%s16181_s5 + $0x120] sm:$0xff]   ;;  %v7174_v38 = vld [vmem:[#allocation2 + $0xf78] sm:$0xff]  ;;  %v7216_v58 = vrot.slane %v15929_v46, %v968_v17  ;;  %v12761_v17 = vld [vmem:[%s16181_s5 + $0xb0] sm:$0xff]  }
 0x5a4   :  { %v10118_v30 = vpop.f32.mrf.mxu1  ;;  %v12782_v42 = vld [vmem:[%s16181_s5 + $0x158] sm:$0xff]  }
 0x5a5   :  { %10411 = vmatpush1.bf16.msra.mxu1 %v12498_v0  ;;  %v12562_v0 = vcombine.low %v7178_v63, %v7182_v35  ;;  %v7166_v21 = vld [vmem:[#allocation2 + $0xf38] sm:$0xff]  ;;  %v12554_v30 = vcombine.low %v7170_v28, %v7174_v38  ;;  %v12762_v35 = vld [vmem:[%s16181_s5 + $0xe8] sm:$0xff]  }
 0x5a6   :  { %v10119_v13 = vpop.f32.mrf.mxu1  ;;  %12646 = vmatpush3.bf16.msra.mxu0 %v12751_v23  ;;  %10412 = vmatprep.subr.bf16.mxu1 %v12491_v31  ;;  %v12555_v23 = vcombine.high %v7170_v28, %v7174_v38  ;;  %v12783_v31 = vld [vmem:[%s16181_s5 + $0x118] sm:$0xff]   ;;  %v12765_v28 = vld [vmem:[%s16181_s5 + $0xa0] sm:$0xff]  }
 0x5a7   :  { %12647 = vmatprep.subr.bf16.mxu0 %v12752_v37  ;;  %v7162_v37 = vld [vmem:[#allocation2 + $0xf18] sm:$0xff]  ;;  %v12785_v13 = vld [vmem:[%s16181_s5 + $0x110] sm:$0xff]  }
 0x5a8   :  { %v12546_v34 = vcombine.low %v7162_v37, %v7166_v21  ;;  %v12766_v38 = vld [vmem:[%s16181_s5 + $0xd8] sm:$0xff]  }
 0x5a9   :  { %10413 = vmatpush1.bf16.msra.mxu1 %v12490_v20  ;;  %v12547_v20 = vcombine.high %v7162_v37, %v7166_v21  ;;  %v12771_v37 = vld [vmem:[%s16181_s5 + $0x88] sm:$0xff]   ;;  %v12772_v21 = vld [vmem:[%s16181_s5 + $0xc0] sm:$0xff]  }
 0x5aa   :  { %12648 = vmatpush3.bf16.msra.mxu0 %v12753_v32  ;;  %10414 = vmatprep.subr.bf16.mxu1 %v12483_v51  ;;  %v7154_v32 = vld [vmem:[#allocation2 + $0xed8] sm:$0xff] }
 0x5ab   :  { %12649 = vmatprep.subr.bf16.mxu0 %v12754_v11  ;;  %v7158_v51 = vld [vmem:[#allocation2 + $0xef8] sm:$0xff]  ;;  %v12786_v11 = vld [vmem:[%s16181_s5 + $0x148] sm:$0xff]  }
 0x5ac   :  { %v12539_v44 = vcombine.high %v7154_v32, %v7158_v51  ;;  %v12538_v55 = vcombine.low %v7154_v32, %v7158_v51  ;;  %v12792_v51 = vld [vmem:[%s16181_s5 + $0x1f0] sm:$0xff]  }
 0x5ad   :  { %10415 = vmatpush1.bf16.msra.mxu1 %v12482_v36  ;;  %v12787_v36 = vld [vmem:[%s16181_s5 + $0x108] sm:$0xff]  }
 0x5ae   :  { %12650 = vmatpush3.bf16.msra.mxu0 %v12755_v43  ;;  %10416 = vmatprep.subr.bf16.mxu1 %v12475_v27  ;;  %v7146_v43 = vld [vmem:[#allocation2 + $0xe98] sm:$0xff] }
 0x5af   :  { %12651 = vmatprep.subr.bf16.mxu0 %v12756_v60  ;;  %v7150_v27 = vld [vmem:[#allocation2 + $0xeb8] sm:$0xff]  ;;  %v12788_v60 = vld [vmem:[%s16181_s5 + $0x140] sm:$0xff]  }
 0x5b0   :  { %v12531_v19 = vcombine.high %v7146_v43, %v7150_v27  ;;  %v12530_v7 = vcombine.low %v7146_v43, %v7150_v27  ;;  %v12798_v43 = vld [vmem:[%s16181_s5 + $0x1d8] sm:$0xff]  }
 0x5b1   :  { %10417 = vmatpush1.bf16.msra.mxu1 %v12474_v45  ;;  %v12789_v45 = vld [vmem:[%s16181_s5 + $0x100] sm:$0xff]   ;;  %v12799_v27 = vld [vmem:[%s16181_s5 + $0x198] sm:$0xff]  }
 0x5b2   :  { %12652 = vmatpush3.bf16.msra.mxu0 %v12757_v18  ;;  %10418 = vmatprep.subr.bf16.mxu1 %v12467_v50  ;;  %v7138_v18 = vld [vmem:[#allocation2 + $0xe58] sm:$0xff] }
 0x5b3   :  { %12681 = vmatprep.subr.bf16.mxu0 %v12774_v59  ;;  %v7142_v50 = vld [vmem:[#allocation2 + $0xe78] sm:$0xff] }
 0x5b4   :  { %v12523_v12 = vcombine.high %v7138_v18, %v7142_v50  ;;  %v7134_v59 = vld [vmem:[#allocation2 + $0xe38] sm:$0xff] }
 0x5b5   :  { %10419 = vmatpush1.bf16.msra.mxu1 %v12466_v56  ;;  %11017 = vmatmul.mubr.bf16.vlgmr.msra.gmra.mxu0 %v10457_v16  ;;  %v10117_v16 = vadd.f32 %v15984_v14, %v15944_v33  ;;  %v12759_v33 = vld [vmem:[%s16181_s5 + $0xb8] sm:$0xff]   ;;  %v12760_v14 = vld [vmem:[%s16181_s5 + $0xf0] sm:$0xff]  }
 0x5b6   :  { %10420 = vmatprep.subr.bf16.mxu1 %v12459_v53  ;;  %12682 = vmatpush3.bf16.msra.mxu0 %v12775_v2  ;;  %v12522_v53 = vcombine.low %v7138_v18, %v7142_v50  ;;  %v12515_v2 = vcombine.high %v7130_v62, %v7134_v59 }
 0x5b7   :  { %12683 = vmatprep.subr.bf16.mxu0 %v12776_v57  ;;  %v12514_v57 = vcombine.low %v7130_v62, %v7134_v59  ;;  %v12802_v62 = vld [vmem:[%s16181_s5 + $0x1c8] sm:$0xff]  }
 0x5b9   :  { %10421 = vmatpush1.bf16.msra.mxu1 %v12458_v3  ;;  %v12758_v3 = vld [vmem:[%s16181_s5 + $0xf8] sm:$0xff]  }
 0x5ba   :  { %10422 = vmatprep.subr.bf16.mxu1 %v12451_v54  ;;  %12684 = vmatpush3.bf16.msra.mxu0 %v12777_v24  ;;  %v7212_v54 = vrot.slane %v15929_v46, %v964_v9  ;;  %v10452_v24 = vmax.f32 %v10117_v16, 0.0 }
 0x5bb   :  { %12685 = vmatprep.subr.bf16.mxu0 %v12778_v40 }
 0x5bc   :  { %v10156_v40 = vadd.f32 %v15956_v61, %v7212_v54 }
 0x5bd   :  { %10423 = vmatpush1.bf16.msra.mxu1 %v12450_v48  ;;  %v10460_v48 = vpack.c.bf16 %v10452_v24, %v10452_v24 }
 0x5be   :  { %10424 = vmatprep.subr.bf16.mxu1 %v12571_v39  ;;  %12686 = vmatpush3.bf16.msra.mxu0 %v12779_v15  ;;  %v10158_v39 = vadd.f32 %v15962_v41, %v7216_v58 }
 0x5bf   :  { %12687 = vmatprep.subr.bf16.mxu0 %v12780_v22 }
 0x5c1   :  { %10425 = vmatpush2.bf16.msra.mxu1 %v12570_v49 }
 0x5c2   :  { %10426 = vmatprep.subr.bf16.mxu1 %v12563_v4  ;;  %12688 = vmatpush3.bf16.msra.mxu0 %v12781_v26  ;;  %v12764_v26 = vld [vmem:[%s16181_s5 + $0xe0] sm:$0xff]  }
 0x5c3   :  { %12689 = vmatprep.subr.bf16.mxu0 %v12782_v42  ;;  %v12767_v42 = vld [vmem:[%s16181_s5 + $0x98] sm:$0xff]  }
 0x5c5   :  { %10427 = vmatpush2.bf16.msra.mxu1 %v12562_v0  ;;  %v12768_v0 = vld [vmem:[%s16181_s5 + $0xd0] sm:$0xff]  }
 0x5c6   :  { %10428 = vmatprep.subr.bf16.mxu1 %v12555_v23  ;;  %12690 = vmatpush3.bf16.msra.mxu0 %v12783_v31  ;;  %v12769_v23 = vld [vmem:[%s16181_s5 + $0x90] sm:$0xff]   ;;  %v12770_v31 = vld [vmem:[%s16181_s5 + $0xc8] sm:$0xff]  }
 0x5c7   :  { %12691 = vmatprep.subr.bf16.mxu0 %v12784_v47  ;;  %v12773_v47 = vld [vmem:[%s16181_s5 + $0x80] sm:$0xff]  }
 0x5c9   :  { %10429 = vmatpush2.bf16.msra.mxu1 %v12554_v30  ;;  %v10451_v30 = vmax.f32 %v15981_v1, 0.0  ;;  %v12793_v1 = vld [vmem:[%s16181_s5 + $0x1b0] sm:$0xff]  }
 0x5ca   :  { %10430 = vmatprep.subr.bf16.mxu1 %v12547_v20  ;;  %12692 = vmatpush3.bf16.msra.mxu0 %v12785_v13  ;;  %v12790_v20 = vld [vmem:[%s16181_s5 + $0x1f8] sm:$0xff]  }
 0x5cb   :  { %12693 = vmatprep.subr.bf16.mxu0 %v12786_v11  ;;  %v12791_v13 = vld [vmem:[%s16181_s5 + $0x1b8] sm:$0xff]   ;;  %v10459_v32 = vpack.c.bf16 %v10451_v30, %v10451_v30  ;;  %v12794_v11 = vld [vmem:[%s16181_s5 + $0x1e8] sm:$0xff]  }
 0x5cd   :  { %10431 = vmatpush2.bf16.msra.mxu1 %v12546_v34  ;;  %v12795_v34 = vld [vmem:[%s16181_s5 + $0x1a8] sm:$0xff]  }
 0x5ce   :  { %10432 = vmatprep.subr.bf16.mxu1 %v12539_v44  ;;  %12694 = vmatpush3.bf16.msra.mxu0 %v12787_v36  ;;  %v12796_v44 = vld [vmem:[%s16181_s5 + $0x1e0] sm:$0xff]  }
 0x5cf   :  { %12695 = vmatprep.subr.bf16.mxu0 %v12788_v60  ;;  %v12797_v36 = vld [vmem:[%s16181_s5 + $0x1a0] sm:$0xff]   ;;  %v12800_v60 = vld [vmem:[%s16181_s5 + $0x1d0] sm:$0xff]  }
 0x5d1   :  { %10433 = vmatpush2.bf16.msra.mxu1 %v12538_v55  ;;  %v12801_v55 = vld [vmem:[%s16181_s5 + $0x190] sm:$0xff]  }
 0x5d2   :  { %10434 = vmatprep.subr.bf16.mxu1 %v12531_v19  ;;  %12696 = vmatpush3.bf16.msra.mxu0 %v12789_v45 }
 0x5d5   :  { %v10237_v56 = vpop.f32.mrf.mxu0  ;;  %10435 = vmatpush2.bf16.msra.mxu1 %v12530_v7 }
 0x5d6   :  { %10436 = vmatprep.subr.bf16.mxu1 %v12523_v12 }
 0x5d7   :  { %v10239_v8 = vpop.f32.mrf.mxu0 }
 0x5d9   :  { %v10241_v5 = vpop.f32.mrf.mxu0  ;;  %10437 = vmatpush2.bf16.msra.mxu1 %v12522_v53 }
 0x5da   :  { %10438 = vmatprep.subr.bf16.mxu1 %v12515_v2  ;;  %v12804_v5 = vld [vmem:[%s16181_s5 + $0x1c0] sm:$0xff]  }
 0x5db   :  { %v10242_v10 = vpop.f32.mrf.mxu0 }
 0x5dd   :  { %10439 = vmatpush2.bf16.msra.mxu1 %v12514_v57 }
 0x5de   :  { %12659 = vmatprep.subr.bf16.mxu1 %v12758_v3  ;;  %v12805_v3 = vld [vmem:[%s16181_s5 + $0x180] sm:$0xff]  }
 0x5e0   :  { %v10196_v9 = vpop.f32.mrf.mxu1  ;;  %10441 = vmatmul.mubr.bf16.vlgmr.msra.gmra.mxu1 %v15875_v52  ;;  %v12763_v52 = vld [vmem:[%s16181_s5 + $0xa8] sm:$0xff]  }
 0x5e1   :  { %v10197_v15 = vadd.f32 %v10196_v9, %v10156_v40  ;;  %12660 = vmatpush3.bf16.msra.mxu1 %v12759_v33  ;;  %11056 = vmatprep.mubr.bf16.mxu1 %v10460_v48  ;;  %v7224_v48 = vrot.slane %v15929_v46, %v976_v29 }
 0x5e2   :  { %v10198_v63 = vpop.f32.mrf.mxu1  ;;  %12661 = vmatprep.subr.bf16.mxu1 %v12760_v14  ;;  %v7220_v14 = vrot.slane %v15929_v46, %v972_v6 }
 0x5e3   :  { %v10199_v61 = vadd.f32 %v10198_v63, %v10158_v39  ;;  %v10238_v22 = vadd.f32 %v10237_v56, %v10197_v15  ;;  %v12803_v56 = vld [vmem:[%s16181_s5 + $0x188] sm:$0xff]  }
 0x5e4   :  { %v10200_v49 = vpop.f32.mrf.mxu1 }
 0x5e5   :  { %12662 = vmatpush3.bf16.msra.mxu1 %v12761_v17  ;;  %v10240_v41 = vadd.f32 %v10239_v8, %v10199_v61 }
 0x5e6   :  { %v10201_v4 = vpop.f32.mrf.mxu1  ;;  %12663 = vmatprep.subr.bf16.mxu1 %v12762_v35 }
 0x5e9   :  { %12664 = vmatpush3.bf16.msra.mxu1 %v12763_v52 }
 0x5ea   :  { %12665 = vmatprep.subr.bf16.mxu1 %v12764_v26 }
 0x5ed   :  { %12666 = vmatpush3.bf16.msra.mxu1 %v12765_v28 }
 0x5ee   :  { %12667 = vmatprep.subr.bf16.mxu1 %v12766_v38 }
 0x5f1   :  { %12668 = vmatpush3.bf16.msra.mxu1 %v12767_v42 }
 0x5f2   :  { %12669 = vmatprep.subr.bf16.mxu1 %v12768_v0 }
 0x5f5   :  { %12670 = vmatpush3.bf16.msra.mxu1 %v12769_v23 }
 0x5f6   :  { %12671 = vmatprep.subr.bf16.mxu1 %v12770_v31 }
 0x5f9   :  { %12672 = vmatpush3.bf16.msra.mxu1 %v12771_v37 }
 0x5fa   :  { %12673 = vmatprep.subr.bf16.mxu1 %v12772_v21 }
 0x5fd   :  { %12674 = vmatpush3.bf16.msra.mxu1 %v12773_v47  ;;  %v12572_v47 = vld [vmem:[%s16182_s6] ss:$0 sm:$0xff] }
 0x5fe   :  { %12703 = vmatprep.subr.bf16.mxu1 %v12790_v20 }
 0x600   :  { %11057 = vmatmul.mubr.bf16.vlgmr.msra.gmra.mxu1 %v10459_v32 }
 0x601   :  { %12704 = vmatpush3.bf16.msra.mxu1 %v12791_v13 }
 0x602   :  { %12705 = vmatprep.subr.bf16.mxu1 %v12792_v51 }
 0x605   :  { %12706 = vmatpush3.bf16.msra.mxu1 %v12793_v1 }
 0x606   :  { %12707 = vmatprep.subr.bf16.mxu1 %v12794_v11 }
 0x609   :  { %12708 = vmatpush3.bf16.msra.mxu1 %v12795_v34 }
 0x60a   :  { %12709 = vmatprep.subr.bf16.mxu1 %v12796_v44 }
 0x60d   :  { %12710 = vmatpush3.bf16.msra.mxu1 %v12797_v36 }
 0x60e   :  { %12711 = vmatprep.subr.bf16.mxu1 %v12798_v43 }
 0x611   :  { %12712 = vmatpush3.bf16.msra.mxu1 %v12799_v27 }
 0x612   :  { %12713 = vmatprep.subr.bf16.mxu1 %v12800_v60 }
 0x615   :  { %v10319_v19 = vpop.f32.mrf.mxu0  ;;  %12714 = vmatpush3.bf16.msra.mxu1 %v12801_v55 }
 0x616   :  { %12715 = vmatprep.subr.bf16.mxu1 %v12802_v62  ;;  %v10320_v9 = vadd.f32 %v10319_v19, %v7220_v14 }
 0x617   :  { %v10321_v45 = vpop.f32.mrf.mxu0 }
 0x618   :  { %v10322_v15 = vadd.f32 %v10321_v45, %v7224_v48 }
 0x619   :  { %v10323_v18 = vpop.f32.mrf.mxu0  ;;  %12716 = vmatpush3.bf16.msra.mxu1 %v12803_v56 }
 0x61a   :  { %12717 = vmatprep.subr.bf16.mxu1 %v12804_v5 }
 0x61b   :  { %v10324_v50 = vpop.f32.mrf.mxu0 }
 0x61d   :  { %12718 = vmatpush3.bf16.msra.mxu1 %v12805_v3 }
 0x620   :  { %v10278_v7 = vpop.f32.mrf.mxu1 }
 0x621   :  { %v10279_v12 = vadd.f32 %v10278_v7, %v10238_v22 }
 0x622   :  { %v10280_v59 = vpop.f32.mrf.mxu1 }
 0x623   :  { %v10281_v53 = vadd.f32 %v10280_v59, %v10240_v41  ;;  %v10453_v2 = vmax.f32 %v10279_v12, 0.0 }
 0x624   :  { %v10282_v16 = vpop.f32.mrf.mxu1 }
 0x625   :  { %v10454_v8 = vmax.f32 %v10281_v53, 0.0  ;;  %v10461_v24 = vpack.c.bf16 %v10453_v2, %v10453_v2 }
 0x626   :  { %v10283_v57 = vpop.f32.mrf.mxu1 }
 0x627   :  { %v10462_v54 = vpack.c.bf16 %v10454_v8, %v10454_v8 }
 0x629   :  { %11096 = vmatprep.mubr.bf16.mxu0 %v10462_v54 }
 0x62a   :  { %11097 = vmatmul.mubr.bf16.vlgmr.msra.gmra.mxu0 %v10461_v24 }
 0x655   :  { %v10401_v10 = vpop.f32.mrf.mxu0 }
 0x657   :  { %v10403_v58 = vpop.f32.mrf.mxu0 }
 0x659   :  { %v10405_v33 = vpop.f32.mrf.mxu0 }
 0x65b   :  { %v10406_v40 = vpop.f32.mrf.mxu0 }
 0x660   :  { %v10360_v39 = vpop.f32.mrf.mxu1 }
 0x661   :  { %v10361_v17 = vadd.f32 %v10360_v39, %v10320_v9 }
 0x662   :  { %v10362_v63 = vpop.f32.mrf.mxu1 }
 0x663   :  { %v10363_v35 = vadd.f32 %v10362_v63, %v10322_v15  ;;  %v10402_v61 = vadd.f32 %v10401_v10, %v10361_v17 }
 0x664   :  { %v10364_v22 = vpop.f32.mrf.mxu1 }
 0x665   :  { %v10404_v49 = vadd.f32 %v10403_v58, %v10363_v35 }
 0x666   :  { %v10365_v52 = vpop.f32.mrf.mxu1 }
 0x675   :  { %v12653_v41 = vpop.f32.mrf.mxu0 }
 0x677   :  { %v12654_v4 = vpop.f32.mrf.mxu0 }
 0x678   :  { %v12655_v26 = vadd.f32 %v12654_v4, %v12653_v41 }
 0x679   :  { %v12656_v28 = vpop.f32.mrf.mxu0 }
 0x67a   :  { %v11019_v13 = vadd.f32 %v12655_v26, %v12572_v47 }
 0x67b   :  { %v12657_v6 = vpop.f32.mrf.mxu0 }
 0x6a0   :  { %v10442_v38 = vpop.f32.mrf.mxu1 }
 0x6a1   :  { %v10443_v42 = vadd.f32 %v10442_v38, %v10402_v61 }
 0x6a2   :  { %v10444_v25 = vpop.f32.mrf.mxu1 }
 0x6a3   :  { %v10445_v0 = vadd.f32 %v10444_v25, %v10404_v49  ;;  %v10455_v29 = vmax.f32 %v10443_v42, 0.0 }
 0x6a4   :  { %v10446_v46 = vpop.f32.mrf.mxu1 }
 0x6a5   :  { %v10456_v23 = vmax.f32 %v10445_v0, 0.0  ;;  %v10463_v21 = vpack.c.bf16 %v10455_v29, %v10455_v29 }
 0x6a6   :  { %v10447_v31 = vpop.f32.mrf.mxu1 }
 0x6a7   :  { %v10464_v37 = vpack.c.bf16 %v10456_v23, %v10456_v23 }
 0x6a9   :  { %11136 = vmatprep.mubr.bf16.mxu1 %v10464_v37 }
 0x6aa   :  { %11137 = vmatmul.mubr.bf16.vlgmr.msra.gmra.mxu1 %v10463_v21 }
 0x6c0   :  { %v12675_v30 = vpop.f32.mrf.mxu1 }
 0x6c2   :  { %v12676_v20 = vpop.f32.mrf.mxu1 }
 0x6c3   :  { %v12677_v32 = vadd.f32 %v12676_v20, %v12675_v30 }
 0x6c4   :  { %v12678_v51 = vpop.f32.mrf.mxu1 }
 0x6c5   :  { %v11059_v1 = vadd.f32 %v12677_v32, %v11019_v13 }
 0x6c6   :  { %v12679_v11 = vpop.f32.mrf.mxu1 }
 0x6ea   :  { %v12697_v34 = vpop.f32.mrf.mxu0 }
 0x6ec   :  { %v12698_v44 = vpop.f32.mrf.mxu0 }
 0x6ed   :  { %v12699_v36 = vadd.f32 %v12698_v44, %v12697_v34 }
 0x6ee   :  { %v12700_v43 = vpop.f32.mrf.mxu0 }
 0x6ef   :  { %v11099_v27 = vadd.f32 %v12699_v36, %v11059_v1 }
 0x6f0   :  { %v12701_v60 = vpop.f32.mrf.mxu0 }
 0x76a   :  { %v12719_v55 = vpop.f32.mrf.mxu1 }
 0x76c   :  { %v12720_v19 = vpop.f32.mrf.mxu1 }
 0x76d   :  { %v12721_v45 = vadd.f32 %v12720_v19, %v12719_v55 }
 0x76e   :  { %v12722_v18 = vpop.f32.mrf.mxu1 }
 0x76f   :  { %v11139_v50 = vadd.f32 %v12721_v45, %v11099_v27 }
 0x770   :  { %v12723_v7 = vpop.f32.mrf.mxu1 }
 0x771   :  { %11144 = vst [vmem:[%s16183_s7] sm:$0xff] %v11139_v50 }
 0x772   :  { %11149 = vsyncpa [#allocation3], 1 }

</bundles_post_ra>
